<compile_context>
chip_gen: v7x
topology: tpu7x:2x2x1
jax: 0.10.0
libtpu: 0.0.40
codegen_flags: <defaults>
</compile_context>

<pallas_src>
import numpy as np
import jax
import jax.numpy as jnp
from jax import lax
from jax.experimental import pallas as pl
from jax.experimental.pallas import tpu as pltpu


# ---------------------------------------------------------------------------
# Tap-weight builders (wrapper-side, tiny).
#
# Activations are stored as flat "superpixel" slabs: image rows in row-major
# order, each row split into superpixels of `g` adjacent columns; one
# superpixel is one slab row whose lanes are (column-in-superpixel, channel),
# i.e. lane = col * C + ch.  A 3x3 conv becomes a few per-row-offset tap
# matmuls between slabs shifted by {di*wp + dj} slab rows (wp = superpixels
# per image row, dj selects current / previous / next superpixel).
# ---------------------------------------------------------------------------

def _taps_stride2_grouped(w, go):
    """3x3 stride-(1,2) conv taps over `go`-output-column superpixels.

    w: (3, 3, Cin, Cout) HWIO.  Input superpixels hold gi = 2*go columns
    (K = 2*go*Cin lanes), output superpixels hold go columns (N = go*Cout).
    Returns (taps (6, K, N), meta) with meta[t] = (di, dj), dj in {0, -1}.
    """
    cin, cout = w.shape[2], w.shape[3]
    gi = 2 * go
    p0 = np.zeros((3, gi, go), np.float32)   # current superpixel
    pm = np.zeros((3, gi, go), np.float32)   # previous superpixel
    for c in range(go):
        for j in range(3):
            ic = 2 * c + j - 1
            if ic >= 0:
                p0[j, ic, c] = 1.0
            else:
                pm[j, gi + ic, c] = 1.0
    mats, meta = [], []
    for i in range(3):
        m0 = jnp.einsum("juc,jao->uaco", p0, w[i]).reshape(gi * cin, go * cout)
        mm = jnp.einsum("juc,jao->uaco", pm, w[i]).reshape(gi * cin, go * cout)
        mats.append(m0); meta.append((i - 1, 0))
        mats.append(mm); meta.append((i - 1, -1))
    return jnp.stack(mats), meta


def _taps_stride1_grouped(w, go):
    """3x3 stride-1 conv taps over `go`-column superpixels (gi == go)."""
    cin, cout = w.shape[2], w.shape[3]
    pp = np.zeros((3, go, go), np.float32)   # previous superpixel
    pc = np.zeros((3, go, go), np.float32)   # current superpixel
    pn = np.zeros((3, go, go), np.float32)   # next superpixel
    for c in range(go):
        for j in range(3):
            ic = c + j - 1
            if ic < 0:
                pp[j, go + ic, c] = 1.0
            elif ic >= go:
                pn[j, ic - go, c] = 1.0
            else:
                pc[j, ic, c] = 1.0
    mats, meta = [], []
    for i in range(3):
        for P, dj in ((pp, -1), (pc, 0), (pn, 1)):
            m = jnp.einsum("juc,jao->uaco", P, w[i]).reshape(go * cin, go * cout)
            mats.append(m); meta.append((i - 1, dj))
    return jnp.stack(mats), meta


# ---------------------------------------------------------------------------
# In-kernel fused conv (+ bias + ReLU [+ 2x2/2 max-pool]) layer
# ---------------------------------------------------------------------------

def _conv_layer(src, dst, w_ref, b_ref, *, wp, h, lead_in, lead_out, meta,
                pool=None, pool_scr=None):
    """One conv layer over VMEM superpixel slabs with zeroed halos.

    Processes one image row (wp superpixels) per fori_loop step so the f32
    accumulator ((wp, N) <= (80, 128) = 10 vregs) stays in registers.
    pool:
      None      -> write (wp, N) rows straight into dst's interior.
      "lane"    -> output superpixels hold 2 columns in lanes; row pairs are
                   maxed in registers, adjacent columns with a lane-slice max
                   (N -> N//2 lanes); writes wp pooled pixels per row pair.
      "strided" -> output superpixels are single pixels; row pairs maxed in
                   registers, adjacent columns via a strided-sublane max
                   through pool_scr; writes wp//2 pooled pixels per row pair.
    """
    cw = b_ref.shape[-1]
    offs = [(di * wp + dj, dj) for (di, dj) in meta]
    need_r = any(dj == 1 for _, dj in meta)

    assert lead_in >= wp + 1
    assert src.shape[-2] >= lead_in + (h + 1) * wp + (1 if need_r else 0)

    col = lax.broadcasted_iota(jnp.int32, (wp, 1), 0)
    mask_l = col == 0                                # first sp of an image row
    mask_r = (col == wp - 1) if need_r else None     # last sp of an image row
    bvec = b_ref[...]

    def row_out(r):
        base = r * wp
        acc = jnp.zeros((wp, cw), jnp.float32)
        for t, (off, dj) in enumerate(offs):
            start = base + lead_in + off
            if wp % 8 == 0 and (lead_in + off) % 8 == 0:
                start = pl.multiple_of(start, 8)
            xs = src[pl.ds(start, wp), :]
            if dj == -1:
                xs = jnp.where(mask_l, 0.0, xs)
            elif dj == 1:
                xs = jnp.where(mask_r, 0.0, xs)
            acc = acc + jnp.dot(xs, w_ref[t],
                                preferred_element_type=jnp.float32)
        return jnp.maximum(acc + bvec, 0.0)

    if pool is None:
        assert dst.shape[-1] == cw and dst.shape[-2] >= lead_out + h * wp

        def body(r, carry):
            start = lead_out + r * wp
            if wp % 8 == 0 and lead_out % 8 == 0:
                start = pl.multiple_of(start, 8)
            dst[pl.ds(start, wp), :] = row_out(r)
            return carry

        lax.fori_loop(0, h, body, 0)

    elif pool == "lane":
        cp = cw // 2
        assert dst.shape[-1] == cp
        assert dst.shape[-2] >= lead_out + (h // 2) * wp

        def body(g, carry):
            ym = jnp.maximum(row_out(2 * g), row_out(2 * g + 1))
            start = lead_out + g * wp
            if wp % 8 == 0 and lead_out % 8 == 0:
                start = pl.multiple_of(start, 8)
            dst[pl.ds(start, wp), :] = jnp.maximum(ym[:, :cp], ym[:, cp:])
            return carry

        lax.fori_loop(0, h // 2, body, 0)

    else:  # "strided"
        wq = wp // 2
        assert dst.shape[-1] == cw
        assert dst.shape[-2] >= lead_out + (h // 2) * wq
        assert pool_scr.shape == (wp, cw)

        def body(g, carry):
            pool_scr[...] = jnp.maximum(row_out(2 * g), row_out(2 * g + 1))
            ye = pool_scr[pl.ds(0, wq, stride=2), :]
            yo = pool_scr[pl.ds(1, wq, stride=2), :]
            start = lead_out + g * wq
            if wq % 8 == 0 and lead_out % 8 == 0:
                start = pl.multiple_of(start, 8)
            dst[pl.ds(start, wq), :] = jnp.maximum(ye, yo)
            return carry

        lax.fori_loop(0, h // 2, body, 0)


# ---------------------------------------------------------------------------
# Fully fused conv1..conv6 network kernel (activations stay in VMEM)
# ---------------------------------------------------------------------------

# Slab geometry per layer *input*: (lead zeros, interior rows, tail zeros, lanes)
_X1 = (88, 128 * 80, 88, 16)     # conv1 input  (16 raw cols / superpixel)
_A1 = (88, 128 * 80, 88, 128)    # conv2 input  (8 cols x 16 ch)
_A2 = (88, 128 * 80, 88, 128)    # conv3 input  (4 cols x 32 ch)
_A3 = (88, 64 * 80, 88, 64)      # conv4 input  (pooled, 64-ch pixels)
_A4 = (48, 32 * 40, 48, 64)      # conv5 input
_A5 = (24, 16 * 20, 24, 32)      # conv6 input


def _slab_rows(g):
    return g[0] + g[1] + g[2]


def fused_convnet(x1, t1, b1, t2, b2, t3, b3, t4, b4, t5, b5, t6, b6,
                  m1, m2, m3, m4, m5, m6):
    """conv1..conv6 (+bias+ReLU+pools) for the whole net in one pallas_call.

    x1: (B, 10416, 16) zero-padded conv1 input slabs.  Returns the pooled
    conv6 activations (B, 80, 16) in HWC pixel order; everything else stays
    in VMEM scratch.
    """
    B, n0, c0 = x1.shape
    assert (n0, c0) == (_slab_rows(_X1), _X1[3])

    def kernel(x_ref, t1_ref, b1_ref, t2_ref, b2_ref, t3_ref, b3_ref,
               t4_ref, b4_ref, t5_ref, b5_ref, t6_ref, b6_ref, o_ref,
               a1, a2, a3, a4, a5, p4, p5, p6):
        # Zero the halo rows of the VMEM activation slabs (their interiors
        # are fully overwritten below, so this is all the init they need).
        for ref, (lead, interior, tail, c) in ((a1, _A1), (a2, _A2),
                                               (a3, _A3), (a4, _A4),
                                               (a5, _A5)):
            ref[pl.ds(0, lead), :] = jnp.zeros((lead, c), jnp.float32)
            ref[pl.ds(lead + interior, tail), :] = jnp.zeros((tail, c),
                                                             jnp.float32)

        # conv1: (128,1280,1) -> (128,640,16); 8-output-col superpixels.
        _conv_layer(x_ref, a1, t1_ref, b1_ref, wp=80, h=128,
                    lead_in=88, lead_out=88, meta=m1)
        # conv2: -> (128,320,32); 4-output-col superpixels, K=128 taps.
        _conv_layer(a1, a2, t2_ref, b2_ref, wp=80, h=128,
                    lead_in=88, lead_out=88, meta=m2)
        # conv3 + pool: -> (64,80,64); columns pooled in-lane.
        _conv_layer(a2, a3, t3_ref, b3_ref, wp=80, h=128,
                    lead_in=88, lead_out=88, meta=m3, pool="lane")
        # conv4 + pool: -> (32,40,64).
        _conv_layer(a3, a4, t4_ref, b4_ref, wp=80, h=64,
                    lead_in=88, lead_out=48, meta=m4, pool="strided",
                    pool_scr=p4)
        # conv5 + pool: -> (16,20,32).
        _conv_layer(a4, a5, t5_ref, b5_ref, wp=40, h=32,
                    lead_in=48, lead_out=24, meta=m5, pool="strided",
                    pool_scr=p5)
        # conv6 + pool: -> (8,10,16), written straight to the output block.
        _conv_layer(a5, o_ref, t6_ref, b6_ref, wp=20, h=16,
                    lead_in=24, lead_out=0, meta=m6, pool="strided",
                    pool_scr=p6)

    weights = (t1, b1, t2, b2, t3, b3, t4, b4, t5, b5, t6, b6)
    w_specs = [pl.BlockSpec(a.shape, lambda b, n=a.ndim: (0,) * n)
               for a in weights]
    scratch = [pltpu.VMEM((_slab_rows(g), g[3]), jnp.float32)
               for g in (_A1, _A2, _A3, _A4, _A5)]
    scratch += [pltpu.VMEM((80, 64), jnp.float32),   # conv4 pool buffer
                pltpu.VMEM((40, 32), jnp.float32),   # conv5 pool buffer
                pltpu.VMEM((20, 16), jnp.float32)]   # conv6 pool buffer

    return pl.pallas_call(
        kernel,
        out_shape=jax.ShapeDtypeStruct((B, 80, 16), jnp.float32),
        grid=(B,),
        in_specs=[pl.BlockSpec((None, n0, c0), lambda b: (b, 0, 0))] + w_specs,
        out_specs=pl.BlockSpec((None, 80, 16), lambda b: (b, 0, 0)),
        scratch_shapes=scratch,
        compiler_params=pltpu.CompilerParams(
            dimension_semantics=("parallel",),
            vmem_limit_bytes=48 << 20,
        ),
    )(x1, *weights)


# ---------------------------------------------------------------------------
# Fused fc1 + ReLU + fc2 + log_softmax kernel
# ---------------------------------------------------------------------------

def fc_block(x, w1, b1, w2, b2):
    B, k1 = x.shape
    n1 = w1.shape[1]
    n2 = w2.shape[1]

    def kernel(x_ref, w1_ref, b1_ref, w2_ref, b2_ref, o_ref):
        hdn = jnp.dot(x_ref[...], w1_ref[...],
                      preferred_element_type=jnp.float32) + b1_ref[...]
        hdn = jnp.maximum(hdn, 0.0)
        logits = jnp.dot(hdn, w2_ref[...],
                         preferred_element_type=jnp.float32) + b2_ref[...]
        m = jnp.max(logits, axis=-1, keepdims=True)
        s = logits - m
        lse = jnp.log(jnp.sum(jnp.exp(s), axis=-1, keepdims=True))
        o_ref[...] = (s - lse).astype(o_ref.dtype)

    return pl.pallas_call(
        kernel,
        out_shape=jax.ShapeDtypeStruct((B, n2), jnp.float32),
        grid=(1,),
        in_specs=[
            pl.BlockSpec((B, k1), lambda i: (0, 0)),
            pl.BlockSpec((k1, n1), lambda i: (0, 0)),
            pl.BlockSpec((1, n1), lambda i: (0, 0)),
            pl.BlockSpec((n1, n2), lambda i: (0, 0)),
            pl.BlockSpec((1, n2), lambda i: (0, 0)),
        ],
        out_specs=pl.BlockSpec((B, n2), lambda i: (0, 0)),
    )(x, w1, b1.reshape(1, n1), w2, b2.reshape(1, n2))


# ---------------------------------------------------------------------------
# Parameters / forward / reference
# ---------------------------------------------------------------------------

def init_params(key):
    ks = jax.random.split(key, 16)

    def cw(k, cin, cout):  # HWIO conv weight
        return jax.random.normal(k, (3, 3, cin, cout), jnp.float32) * 0.05

    def bias(k, n):
        return jax.random.normal(k, (n,), jnp.float32) * 0.01

    return {
        "w1": cw(ks[0], 1, 16),   "b1": bias(ks[1], 16),
        "w2": cw(ks[2], 16, 32),  "b2": bias(ks[3], 32),
        "w3": cw(ks[4], 32, 64),  "b3": bias(ks[5], 64),
        "w4": cw(ks[6], 64, 64),  "b4": bias(ks[7], 64),
        "w5": cw(ks[8], 64, 32),  "b5": bias(ks[9], 32),
        "w6": cw(ks[10], 32, 16), "b6": bias(ks[11], 16),
        "fc1_w": jax.random.normal(ks[12], (16 * 8 * 10, 256), jnp.float32) * 0.02,
        "fc1_b": bias(ks[13], 256),
        "fc2_w": jax.random.normal(ks[14], (256, 5), jnp.float32) * 0.05,
        "fc2_b": bias(ks[15], 5),
    }


def net_latent_forward(x_nchw, p):
    B = x_nchw.shape[0]
    x = x_nchw.astype(jnp.float32)

    # conv1 input as zero-padded flat superpixels of 16 raw columns.
    x1 = jnp.pad(x.reshape(B, 128 * 80, 16), ((0, 0), (88, 88), (0, 0)))

    t1, m1 = _taps_stride2_grouped(p["w1"], 8)    # (6, 16, 128)
    t2, m2 = _taps_stride2_grouped(p["w2"], 4)    # (6, 128, 128)
    t3, m3 = _taps_stride2_grouped(p["w3"], 2)    # (6, 128, 128)
    t4, m4 = _taps_stride1_grouped(p["w4"], 1)    # (9, 64, 64)
    t5, m5 = _taps_stride1_grouped(p["w5"], 1)    # (9, 64, 32)
    t6, m6 = _taps_stride1_grouped(p["w6"], 1)    # (9, 32, 16)
    b1 = jnp.tile(p["b1"], 8).reshape(1, 128)
    b2 = jnp.tile(p["b2"], 4).reshape(1, 128)
    b3 = jnp.tile(p["b3"], 2).reshape(1, 128)
    b4 = p["b4"].reshape(1, 64)
    b5 = p["b5"].reshape(1, 32)
    b6 = p["b6"].reshape(1, 16)

    a6 = fused_convnet(x1, t1, b1, t2, b2, t3, b3, t4, b4, t5, b5, t6, b6,
                       m1, m2, m3, m4, m5, m6)          # (B, 80, 16), HWC

    # dropout1 / dropout2: inference-mode identities.
    # fc1 rows permuted to HWC flatten order (removes the NCHW transpose).
    z = a6.reshape(B, 16 * 8 * 10)
    fc1_w_hwc = (p["fc1_w"].reshape(16, 80, 256)
                 .transpose(1, 0, 2).reshape(16 * 8 * 10, 256))
    return fc_block(z, fc1_w_hwc, p["fc1_b"], p["fc2_w"], p["fc2_b"])


def reference_forward(x_nchw, p):
    """Pure-JAX reference for numerical validation."""
    x = jnp.transpose(x_nchw, (0, 2, 3, 1))

    def conv(x, w, b, stride):
        y = lax.conv_general_dilated(
            x, w, window_strides=stride, padding=((1, 1), (1, 1)),
            dimension_numbers=("NHWC", "HWIO", "NHWC"))
        return jax.nn.relu(y + b)

    def pool(x):
        return lax.reduce_window(x, -jnp.inf, lax.max,
                                 (1, 2, 2, 1), (1, 2, 2, 1), "VALID")

    x = conv(x, p["w1"], p["b1"], (1, 2))
    x = conv(x, p["w2"], p["b2"], (1, 2))
    x = conv(x, p["w3"], p["b3"], (1, 2))
    x = pool(x)
    x = conv(x, p["w4"], p["b4"], (1, 1)); x = pool(x)
    x = conv(x, p["w5"], p["b5"], (1, 1)); x = pool(x)
    x = conv(x, p["w6"], p["b6"], (1, 1)); x = pool(x)
    B = x.shape[0]
    x = jnp.transpose(x, (0, 3, 1, 2)).reshape(B, -1)
    x = jax.nn.relu(x @ p["fc1_w"] + p["fc1_b"])
    x = x @ p["fc2_w"] + p["fc2_b"]
    return jax.nn.log_softmax(x, axis=1)


if __name__ == "__main__":
    key = jax.random.PRNGKey(0)
    kx, kp = jax.random.split(key)
    # smallest input consistent with fc1 = Linear(16*8*10, 256): (B=2, 1, 128, 1280)
    x = jax.random.normal(kx, (2, 1, 128, 1280), jnp.float32)
    params = init_params(kp)

    out = jax.block_until_ready(jax.jit(net_latent_forward)(x, params))
    assert out.shape == (2, 5) and out.dtype == jnp.float32

    ref = jax.block_until_ready(jax.jit(reference_forward)(x, params))
    np.testing.assert_allclose(np.asarray(out), np.asarray(ref),
                               rtol=2e-3, atol=2e-3)

    print("KERNEL_OK")
</pallas_src>

<mosaic_0001>
module attributes {stable_mosaic.version = 11 : i64} {
  func.func @kernel(%arg0: i32, %arg1: memref<2x1280xf32, #tpu.memory_space<vmem>>, %arg2: memref<1280x256xf32, #tpu.memory_space<vmem>>, %arg3: memref<1x256xf32, #tpu.memory_space<vmem>>, %arg4: memref<256x5xf32, #tpu.memory_space<vmem>>, %arg5: memref<1x5xf32, #tpu.memory_space<vmem>>, %arg6: memref<2x5xf32, #tpu.memory_space<vmem>>) attributes {dimension_semantics = [#tpu.dimension_semantics<arbitrary>], iteration_bounds = array<i64: 1>, scalar_prefetch = 0 : i64, scratch_operands = 0 : i64, tpu.core_type = #tpu.core_type<tc>, window_params = [{pipeline_mode = #tpu.pipeline_mode<synchronous>, transform_indices = @transform_0, window_bounds = array<i64: 2, 1280>}, {pipeline_mode = #tpu.pipeline_mode<synchronous>, transform_indices = @transform_1, window_bounds = array<i64: 1280, 256>}, {pipeline_mode = #tpu.pipeline_mode<synchronous>, transform_indices = @transform_2, window_bounds = array<i64: 1, 256>}, {pipeline_mode = #tpu.pipeline_mode<synchronous>, transform_indices = @transform_3, window_bounds = array<i64: 256, 5>}, {pipeline_mode = #tpu.pipeline_mode<synchronous>, transform_indices = @transform_4, window_bounds = array<i64: 1, 5>}, {pipeline_mode = #tpu.pipeline_mode<synchronous>, transform_indices = @transform_5, window_bounds = array<i64: 2, 5>}]} {
    %c0 = arith.constant 0 : index
    %c0_0 = arith.constant 0 : index
    %0 = vector.load %arg1[%c0, %c0_0] : memref<2x1280xf32, #tpu.memory_space<vmem>>, vector<2x1280xf32>
    %c0_1 = arith.constant 0 : index
    %c0_2 = arith.constant 0 : index
    %1 = vector.load %arg2[%c0_1, %c0_2] : memref<1280x256xf32, #tpu.memory_space<vmem>>, vector<1280x256xf32>
    %cst = arith.constant dense<0.000000e+00> : vector<2x256xf32>
    %2 = tpu.matmul %0, %1, %cst {dimension_numbers = #tpu.dot_dimension_numbers<[1], [0], [0], [1], [0, 0, 1, 1], [], []>} : vector<2x1280xf32>, vector<1280x256xf32>, vector<2x256xf32> -> vector<2x256xf32>
    %c0_3 = arith.constant 0 : index
    %c0_4 = arith.constant 0 : index
    %3 = vector.load %arg3[%c0_3, %c0_4] : memref<1x256xf32, #tpu.memory_space<vmem>>, vector<1x256xf32>
    %4 = vector.broadcast %3 : vector<1x256xf32> to vector<2x256xf32>
    %5 = arith.addf %2, %4 : vector<2x256xf32>
    %cst_5 = arith.constant 0.000000e+00 : f32
    %6 = vector.broadcast %cst_5 : f32 to vector<2x256xf32>
    %7 = arith.maximumf %5, %6 : vector<2x256xf32>
    %c0_6 = arith.constant 0 : index
    %c0_7 = arith.constant 0 : index
    %8 = vector.load %arg4[%c0_6, %c0_7] : memref<256x5xf32, #tpu.memory_space<vmem>>, vector<256x5xf32>
    %cst_8 = arith.constant dense<0.000000e+00> : vector<2x5xf32>
    %9 = tpu.matmul %7, %8, %cst_8 {dimension_numbers = #tpu.dot_dimension_numbers<[1], [0], [0], [1], [0, 0, 1, 1], [], []>} : vector<2x256xf32>, vector<256x5xf32>, vector<2x5xf32> -> vector<2x5xf32>
    %c0_9 = arith.constant 0 : index
    %c0_10 = arith.constant 0 : index
    %10 = vector.load %arg5[%c0_9, %c0_10] : memref<1x5xf32, #tpu.memory_space<vmem>>, vector<1x5xf32>
    %11 = vector.broadcast %10 : vector<1x5xf32> to vector<2x5xf32>
    %12 = arith.addf %9, %11 : vector<2x5xf32>
    %cst_11 = arith.constant dense<0xFF800000> : vector<2xf32>
    %13 = vector.multi_reduction <maximumf>, %12, %cst_11 [1] : vector<2x5xf32> to vector<2xf32>
    %14 = vector.shape_cast %13 : vector<2xf32> to vector<2x1xf32>
    %15 = vector.broadcast %14 : vector<2x1xf32> to vector<2x5xf32>
    %16 = arith.subf %12, %15 : vector<2x5xf32>
    %17 = math.exp %16 : vector<2x5xf32>
    %cst_12 = arith.constant dense<0.000000e+00> : vector<2xf32>
    %18 = vector.multi_reduction <add>, %17, %cst_12 [1] : vector<2x5xf32> to vector<2xf32>
    %19 = vector.shape_cast %18 : vector<2xf32> to vector<2x1xf32>
    %20 = math.log %19 : vector<2x1xf32>
    %21 = vector.broadcast %20 : vector<2x1xf32> to vector<2x5xf32>
    %22 = arith.subf %16, %21 : vector<2x5xf32>
    %c0_13 = arith.constant 0 : index
    %c0_14 = arith.constant 0 : index
    %23 = vector.load %arg6[%c0_13, %c0_14] : memref<2x5xf32, #tpu.memory_space<vmem>>, vector<2x5xf32>
    tpu.vector_store %arg6[%c0_13, %c0_14], %22 {strides = array<i32>} : memref<2x5xf32, #tpu.memory_space<vmem>>, vector<2x5xf32>,
    return
  }
  func.func @transform_0(%arg0: i32) -> (i32, i32) {
    %c0_i32 = arith.constant 0 : i32
    %c0_i32_0 = arith.constant 0 : i32
    %c0_i32_1 = arith.constant 0 : i32
    return %c0_i32, %c0_i32_0 : i32, i32
  }
  func.func @transform_1(%arg0: i32) -> (i32, i32) {
    %c0_i32 = arith.constant 0 : i32
    %c0_i32_0 = arith.constant 0 : i32
    %c0_i32_1 = arith.constant 0 : i32
    return %c0_i32, %c0_i32_0 : i32, i32
  }
  func.func @transform_2(%arg0: i32) -> (i32, i32) {
    %c0_i32 = arith.constant 0 : i32
    %c0_i32_0 = arith.constant 0 : i32
    %c0_i32_1 = arith.constant 0 : i32
    return %c0_i32, %c0_i32_0 : i32, i32
  }
  func.func @transform_3(%arg0: i32) -> (i32, i32) {
    %c0_i32 = arith.constant 0 : i32
    %c0_i32_0 = arith.constant 0 : i32
    %c0_i32_1 = arith.constant 0 : i32
    return %c0_i32, %c0_i32_0 : i32, i32
  }
  func.func @transform_4(%arg0: i32) -> (i32, i32) {
    %c0_i32 = arith.constant 0 : i32
    %c0_i32_0 = arith.constant 0 : i32
    %c0_i32_1 = arith.constant 0 : i32
    return %c0_i32, %c0_i32_0 : i32, i32
  }
  func.func @transform_5(%arg0: i32) -> (i32, i32) {
    %c0_i32 = arith.constant 0 : i32
    %c0_i32_0 = arith.constant 0 : i32
    %c0_i32_1 = arith.constant 0 : i32
    return %c0_i32, %c0_i32_0 : i32, i32
  }
}

module attributes {stable_mosaic.version = 11 : i64} {
  func.func @kernel(%arg0: i32, %arg1: memref<1x10416x16xf32, #tpu.memory_space<vmem>>, %arg2: memref<6x16x128xf32, #tpu.memory_space<vmem>>, %arg3: memref<1x128xf32, #tpu.memory_space<vmem>>, %arg4: memref<6x128x128xf32, #tpu.memory_space<vmem>>, %arg5: memref<1x128xf32, #tpu.memory_space<vmem>>, %arg6: memref<6x128x128xf32, #tpu.memory_space<vmem>>, %arg7: memref<1x128xf32, #tpu.memory_space<vmem>>, %arg8: memref<9x64x64xf32, #tpu.memory_space<vmem>>, %arg9: memref<1x64xf32, #tpu.memory_space<vmem>>, %arg10: memref<9x64x32xf32, #tpu.memory_space<vmem>>, %arg11: memref<1x32xf32, #tpu.memory_space<vmem>>, %arg12: memref<9x32x16xf32, #tpu.memory_space<vmem>>, %arg13: memref<1x16xf32, #tpu.memory_space<vmem>>, %arg14: memref<1x80x16xf32, #tpu.memory_space<vmem>>, %arg15: memref<10416x128xf32, #tpu.memory_space<vmem>>, %arg16: memref<10416x128xf32, #tpu.memory_space<vmem>>, %arg17: memref<5296x64xf32, #tpu.memory_space<vmem>>, %arg18: memref<1376x64xf32, #tpu.memory_space<vmem>>, %arg19: memref<368x32xf32, #tpu.memory_space<vmem>>, %arg20: memref<80x64xf32, #tpu.memory_space<vmem>>, %arg21: memref<40x32xf32, #tpu.memory_space<vmem>>, %arg22: memref<20x16xf32, #tpu.memory_space<vmem>>) attributes {dimension_semantics = [#tpu.dimension_semantics<parallel>], iteration_bounds = array<i64: 2>, scalar_prefetch = 0 : i64, scratch_operands = 8 : i64, tpu.core_type = #tpu.core_type<tc>, window_params = [{transform_indices = @transform_0, window_bounds = array<i64: 1, 10416, 16>}, {pipeline_mode = #tpu.pipeline_mode<synchronous>, transform_indices = @transform_1, window_bounds = array<i64: 6, 16, 128>}, {pipeline_mode = #tpu.pipeline_mode<synchronous>, transform_indices = @transform_2, window_bounds = array<i64: 1, 128>}, {pipeline_mode = #tpu.pipeline_mode<synchronous>, transform_indices = @transform_3, window_bounds = array<i64: 6, 128, 128>}, {pipeline_mode = #tpu.pipeline_mode<synchronous>, transform_indices = @transform_4, window_bounds = array<i64: 1, 128>}, {pipeline_mode = #tpu.pipeline_mode<synchronous>, transform_indices = @transform_5, window_bounds = array<i64: 6, 128, 128>}, {pipeline_mode = #tpu.pipeline_mode<synchronous>, transform_indices = @transform_6, window_bounds = array<i64: 1, 128>}, {pipeline_mode = #tpu.pipeline_mode<synchronous>, transform_indices = @transform_7, window_bounds = array<i64: 9, 64, 64>}, {pipeline_mode = #tpu.pipeline_mode<synchronous>, transform_indices = @transform_8, window_bounds = array<i64: 1, 64>}, {pipeline_mode = #tpu.pipeline_mode<synchronous>, transform_indices = @transform_9, window_bounds = array<i64: 9, 64, 32>}, {pipeline_mode = #tpu.pipeline_mode<synchronous>, transform_indices = @transform_10, window_bounds = array<i64: 1, 32>}, {pipeline_mode = #tpu.pipeline_mode<synchronous>, transform_indices = @transform_11, window_bounds = array<i64: 9, 32, 16>}, {pipeline_mode = #tpu.pipeline_mode<synchronous>, transform_indices = @transform_12, window_bounds = array<i64: 1, 16>}, {transform_indices = @transform_13, window_bounds = array<i64: 1, 80, 16>}]} {
    %cst = arith.constant 0.000000e+00 : f32
    %0 = vector.broadcast %cst : f32 to vector<88x128xf32>
    %c0 = arith.constant 0 : index
    %c0_0 = arith.constant 0 : index
    %1 = vector.load %arg15[%c0, %c0_0] : memref<10416x128xf32, #tpu.memory_space<vmem>>, vector<88x128xf32>
    tpu.vector_store %arg15[%c0, %c0_0], %0 {strides = array<i32>} : memref<10416x128xf32, #tpu.memory_space<vmem>>, vector<88x128xf32>,
    %cst_1 = arith.constant 0.000000e+00 : f32
    %2 = vector.broadcast %cst_1 : f32 to vector<88x128xf32>
    %c10328 = arith.constant 10328 : index
    %c0_2 = arith.constant 0 : index
    %3 = vector.load %arg15[%c10328, %c0_2] : memref<10416x128xf32, #tpu.memory_space<vmem>>, vector<88x128xf32>
    tpu.vector_store %arg15[%c10328, %c0_2], %2 {strides = array<i32>} : memref<10416x128xf32, #tpu.memory_space<vmem>>, vector<88x128xf32>,
    %cst_3 = arith.constant 0.000000e+00 : f32
    %4 = vector.broadcast %cst_3 : f32 to vector<88x128xf32>
    %c0_4 = arith.constant 0 : index
    %c0_5 = arith.constant 0 : index
    %5 = vector.load %arg16[%c0_4, %c0_5] : memref<10416x128xf32, #tpu.memory_space<vmem>>, vector<88x128xf32>
    tpu.vector_store %arg16[%c0_4, %c0_5], %4 {strides = array<i32>} : memref<10416x128xf32, #tpu.memory_space<vmem>>, vector<88x128xf32>,
    %cst_6 = arith.constant 0.000000e+00 : f32
    %6 = vector.broadcast %cst_6 : f32 to vector<88x128xf32>
    %c10328_7 = arith.constant 10328 : index
    %c0_8 = arith.constant 0 : index
    %7 = vector.load %arg16[%c10328_7, %c0_8] : memref<10416x128xf32, #tpu.memory_space<vmem>>, vector<88x128xf32>
    tpu.vector_store %arg16[%c10328_7, %c0_8], %6 {strides = array<i32>} : memref<10416x128xf32, #tpu.memory_space<vmem>>, vector<88x128xf32>,
    %cst_9 = arith.constant 0.000000e+00 : f32
    %8 = vector.broadcast %cst_9 : f32 to vector<88x64xf32>
    %c0_10 = arith.constant 0 : index
    %c0_11 = arith.constant 0 : index
    %9 = vector.load %arg17[%c0_10, %c0_11] : memref<5296x64xf32, #tpu.memory_space<vmem>>, vector<88x64xf32>
    tpu.vector_store %arg17[%c0_10, %c0_11], %8 {strides = array<i32>} : memref<5296x64xf32, #tpu.memory_space<vmem>>, vector<88x64xf32>,
    %cst_12 = arith.constant 0.000000e+00 : f32
    %10 = vector.broadcast %cst_12 : f32 to vector<88x64xf32>
    %c5208 = arith.constant 5208 : index
    %c0_13 = arith.constant 0 : index
    %11 = vector.load %arg17[%c5208, %c0_13] : memref<5296x64xf32, #tpu.memory_space<vmem>>, vector<88x64xf32>
    tpu.vector_store %arg17[%c5208, %c0_13], %10 {strides = array<i32>} : memref<5296x64xf32, #tpu.memory_space<vmem>>, vector<88x64xf32>,
    %cst_14 = arith.constant 0.000000e+00 : f32
    %12 = vector.broadcast %cst_14 : f32 to vector<48x64xf32>
    %c0_15 = arith.constant 0 : index
    %c0_16 = arith.constant 0 : index
    %13 = vector.load %arg18[%c0_15, %c0_16] : memref<1376x64xf32, #tpu.memory_space<vmem>>, vector<48x64xf32>
    tpu.vector_store %arg18[%c0_15, %c0_16], %12 {strides = array<i32>} : memref<1376x64xf32, #tpu.memory_space<vmem>>, vector<48x64xf32>,
    %cst_17 = arith.constant 0.000000e+00 : f32
    %14 = vector.broadcast %cst_17 : f32 to vector<48x64xf32>
    %c1328 = arith.constant 1328 : index
    %c0_18 = arith.constant 0 : index
    %15 = vector.load %arg18[%c1328, %c0_18] : memref<1376x64xf32, #tpu.memory_space<vmem>>, vector<48x64xf32>
    tpu.vector_store %arg18[%c1328, %c0_18], %14 {strides = array<i32>} : memref<1376x64xf32, #tpu.memory_space<vmem>>, vector<48x64xf32>,
    %cst_19 = arith.constant 0.000000e+00 : f32
    %16 = vector.broadcast %cst_19 : f32 to vector<24x32xf32>
    %c0_20 = arith.constant 0 : index
    %c0_21 = arith.constant 0 : index
    %17 = vector.load %arg19[%c0_20, %c0_21] : memref<368x32xf32, #tpu.memory_space<vmem>>, vector<24x32xf32>
    tpu.vector_store %arg19[%c0_20, %c0_21], %16 {strides = array<i32>} : memref<368x32xf32, #tpu.memory_space<vmem>>, vector<24x32xf32>,
    %cst_22 = arith.constant 0.000000e+00 : f32
    %18 = vector.broadcast %cst_22 : f32 to vector<24x32xf32>
    %c344 = arith.constant 344 : index
    %c0_23 = arith.constant 0 : index
    %19 = vector.load %arg19[%c344, %c0_23] : memref<368x32xf32, #tpu.memory_space<vmem>>, vector<24x32xf32>
    tpu.vector_store %arg19[%c344, %c0_23], %18 {strides = array<i32>} : memref<368x32xf32, #tpu.memory_space<vmem>>, vector<24x32xf32>,
    %20 = tpu.iota {dimensions = array<i32: 0>} : vector<80x1xi32>
    %c0_i32 = arith.constant 0 : i32
    %21 = vector.broadcast %c0_i32 : i32 to vector<80x1xi32>
    %22 = arith.cmpi eq, %20, %21 : vector<80x1xi32>
    %c0_24 = arith.constant 0 : index
    %c0_25 = arith.constant 0 : index
    %23 = vector.load %arg3[%c0_24, %c0_25] : memref<1x128xf32, #tpu.memory_space<vmem>>, vector<1x128xf32>
    %c0_i32_26 = arith.constant 0 : i32
    %c128_i32 = arith.constant 128 : i32
    %24 = arith.addi %c0_i32_26, %c128_i32 : i32
    %c1_i32 = arith.constant 1 : i32
    scf.for %arg23 = %c0_i32_26 to %24 step %c1_i32  : i32 {
      %c80_i32 = arith.constant 80 : i32
      %56 = arith.muli %arg23, %c80_i32 : i32
      %c88_i32 = arith.constant 88 : i32
      %57 = arith.addi %c88_i32, %56 : i32
      %58 = tpu.assume_multiple %57, 8 : i32
      %c80_i32_59 = arith.constant 80 : i32
      %59 = arith.muli %arg23, %c80_i32_59 : i32
      %cst_60 = arith.constant 0.000000e+00 : f32
      %60 = vector.broadcast %cst_60 : f32 to vector<80x128xf32>
      %c88_i32_61 = arith.constant 88 : i32
      %61 = arith.addi %59, %c88_i32_61 : i32
      %c-80_i32 = arith.constant -80 : i32
      %62 = arith.addi %61, %c-80_i32 : i32
      %63 = tpu.assume_multiple %62, 8 : i32
      %c0_62 = arith.constant 0 : index
      %64 = arith.index_cast %63 : i32 to index
      %c0_63 = arith.constant 0 : index
      %65 = vector.load %arg1[%c0_62, %64, %c0_63] : memref<1x10416x16xf32, #tpu.memory_space<vmem>>, vector<1x80x16xf32>
      %66 = vector.shape_cast %65 : vector<1x80x16xf32> to vector<80x16xf32>
      %c0_64 = arith.constant 0 : index
      %c0_65 = arith.constant 0 : index
      %c0_66 = arith.constant 0 : index
      %67 = vector.load %arg2[%c0_64, %c0_65, %c0_66] : memref<6x16x128xf32, #tpu.memory_space<vmem>>, vector<1x16x128xf32>
      %68 = vector.shape_cast %67 : vector<1x16x128xf32> to vector<16x128xf32>
      %cst_67 = arith.constant dense<0.000000e+00> : vector<80x128xf32>
      %69 = tpu.matmul %66, %68, %cst_67 {dimension_numbers = #tpu.dot_dimension_numbers<[1], [0], [0], [1], [0, 0, 1, 1], [], []>} : vector<80x16xf32>, vector<16x128xf32>, vector<80x128xf32> -> vector<80x128xf32>
      %70 = arith.addf %60, %69 : vector<80x128xf32>
      %c88_i32_68 = arith.constant 88 : i32
      %71 = arith.addi %59, %c88_i32_68 : i32
      %c-81_i32 = arith.constant -81 : i32
      %72 = arith.addi %71, %c-81_i32 : i32
      %c0_69 = arith.constant 0 : index
      %73 = arith.index_cast %72 : i32 to index
      %c0_70 = arith.constant 0 : index
      %74 = vector.load %arg1[%c0_69, %73, %c0_70] : memref<1x10416x16xf32, #tpu.memory_space<vmem>>, vector<1x80x16xf32>
      %75 = vector.shape_cast %74 : vector<1x80x16xf32> to vector<80x16xf32>
      %cst_71 = arith.constant 0.000000e+00 : f32
      %76 = vector.shape_cast %22 : vector<80x1xi1> to vector<80x1xi1>
      %77 = vector.broadcast %76 : vector<80x1xi1> to vector<80x16xi1>
      %78 = vector.broadcast %cst_71 : f32 to vector<80x16xf32>
      %79 = arith.select %77, %78, %75 : vector<80x16xi1>, vector<80x16xf32>
      %c1 = arith.constant 1 : index
      %c0_72 = arith.constant 0 : index
      %c0_73 = arith.constant 0 : index
      %80 = vector.load %arg2[%c1, %c0_72, %c0_73] : memref<6x16x128xf32, #tpu.memory_space<vmem>>, vector<1x16x128xf32>
      %81 = vector.shape_cast %80 : vector<1x16x128xf32> to vector<16x128xf32>
      %cst_74 = arith.constant dense<0.000000e+00> : vector<80x128xf32>
      %82 = tpu.matmul %79, %81, %cst_74 {dimension_numbers = #tpu.dot_dimension_numbers<[1], [0], [0], [1], [0, 0, 1, 1], [], []>} : vector<80x16xf32>, vector<16x128xf32>, vector<80x128xf32> -> vector<80x128xf32>
      %83 = arith.addf %70, %82 : vector<80x128xf32>
      %c88_i32_75 = arith.constant 88 : i32
      %84 = arith.addi %59, %c88_i32_75 : i32
      %c0_i32_76 = arith.constant 0 : i32
      %85 = arith.addi %84, %c0_i32_76 : i32
      %86 = tpu.assume_multiple %85, 8 : i32
      %c0_77 = arith.constant 0 : index
      %87 = arith.index_cast %86 : i32 to index
      %c0_78 = arith.constant 0 : index
      %88 = vector.load %arg1[%c0_77, %87, %c0_78] : memref<1x10416x16xf32, #tpu.memory_space<vmem>>, vector<1x80x16xf32>
      %89 = vector.shape_cast %88 : vector<1x80x16xf32> to vector<80x16xf32>
      %c2 = arith.constant 2 : index
      %c0_79 = arith.constant 0 : index
      %c0_80 = arith.constant 0 : index
      %90 = vector.load %arg2[%c2, %c0_79, %c0_80] : memref<6x16x128xf32, #tpu.memory_space<vmem>>, vector<1x16x128xf32>
      %91 = vector.shape_cast %90 : vector<1x16x128xf32> to vector<16x128xf32>
      %cst_81 = arith.constant dense<0.000000e+00> : vector<80x128xf32>
      %92 = tpu.matmul %89, %91, %cst_81 {dimension_numbers = #tpu.dot_dimension_numbers<[1], [0], [0], [1], [0, 0, 1, 1], [], []>} : vector<80x16xf32>, vector<16x128xf32>, vector<80x128xf32> -> vector<80x128xf32>
      %93 = arith.addf %83, %92 : vector<80x128xf32>
      %c88_i32_82 = arith.constant 88 : i32
      %94 = arith.addi %59, %c88_i32_82 : i32
      %c-1_i32 = arith.constant -1 : i32
      %95 = arith.addi %94, %c-1_i32 : i32
      %c0_83 = arith.constant 0 : index
      %96 = arith.index_cast %95 : i32 to index
      %c0_84 = arith.constant 0 : index
      %97 = vector.load %arg1[%c0_83, %96, %c0_84] : memref<1x10416x16xf32, #tpu.memory_space<vmem>>, vector<1x80x16xf32>
      %98 = vector.shape_cast %97 : vector<1x80x16xf32> to vector<80x16xf32>
      %cst_85 = arith.constant 0.000000e+00 : f32
      %99 = vector.shape_cast %22 : vector<80x1xi1> to vector<80x1xi1>
      %100 = vector.broadcast %99 : vector<80x1xi1> to vector<80x16xi1>
      %101 = vector.broadcast %cst_85 : f32 to vector<80x16xf32>
      %102 = arith.select %100, %101, %98 : vector<80x16xi1>, vector<80x16xf32>
      %c3 = arith.constant 3 : index
      %c0_86 = arith.constant 0 : index
      %c0_87 = arith.constant 0 : index
      %103 = vector.load %arg2[%c3, %c0_86, %c0_87] : memref<6x16x128xf32, #tpu.memory_space<vmem>>, vector<1x16x128xf32>
      %104 = vector.shape_cast %103 : vector<1x16x128xf32> to vector<16x128xf32>
      %cst_88 = arith.constant dense<0.000000e+00> : vector<80x128xf32>
      %105 = tpu.matmul %102, %104, %cst_88 {dimension_numbers = #tpu.dot_dimension_numbers<[1], [0], [0], [1], [0, 0, 1, 1], [], []>} : vector<80x16xf32>, vector<16x128xf32>, vector<80x128xf32> -> vector<80x128xf32>
      %106 = arith.addf %93, %105 : vector<80x128xf32>
      %c88_i32_89 = arith.constant 88 : i32
      %107 = arith.addi %59, %c88_i32_89 : i32
      %c80_i32_90 = arith.constant 80 : i32
      %108 = arith.addi %107, %c80_i32_90 : i32
      %109 = tpu.assume_multiple %108, 8 : i32
      %c0_91 = arith.constant 0 : index
      %110 = arith.index_cast %109 : i32 to index
      %c0_92 = arith.constant 0 : index
      %111 = vector.load %arg1[%c0_91, %110, %c0_92] : memref<1x10416x16xf32, #tpu.memory_space<vmem>>, vector<1x80x16xf32>
      %112 = vector.shape_cast %111 : vector<1x80x16xf32> to vector<80x16xf32>
      %c4 = arith.constant 4 : index
      %c0_93 = arith.constant 0 : index
      %c0_94 = arith.constant 0 : index
      %113 = vector.load %arg2[%c4, %c0_93, %c0_94] : memref<6x16x128xf32, #tpu.memory_space<vmem>>, vector<1x16x128xf32>
      %114 = vector.shape_cast %113 : vector<1x16x128xf32> to vector<16x128xf32>
      %cst_95 = arith.constant dense<0.000000e+00> : vector<80x128xf32>
      %115 = tpu.matmul %112, %114, %cst_95 {dimension_numbers = #tpu.dot_dimension_numbers<[1], [0], [0], [1], [0, 0, 1, 1], [], []>} : vector<80x16xf32>, vector<16x128xf32>, vector<80x128xf32> -> vector<80x128xf32>
      %116 = arith.addf %106, %115 : vector<80x128xf32>
      %c88_i32_96 = arith.constant 88 : i32
      %117 = arith.addi %59, %c88_i32_96 : i32
      %c79_i32_97 = arith.constant 79 : i32
      %118 = arith.addi %117, %c79_i32_97 : i32
      %c0_98 = arith.constant 0 : index
      %119 = arith.index_cast %118 : i32 to index
      %c0_99 = arith.constant 0 : index
      %120 = vector.load %arg1[%c0_98, %119, %c0_99] : memref<1x10416x16xf32, #tpu.memory_space<vmem>>, vector<1x80x16xf32>
      %121 = vector.shape_cast %120 : vector<1x80x16xf32> to vector<80x16xf32>
      %cst_100 = arith.constant 0.000000e+00 : f32
      %122 = vector.shape_cast %22 : vector<80x1xi1> to vector<80x1xi1>
      %123 = vector.broadcast %122 : vector<80x1xi1> to vector<80x16xi1>
      %124 = vector.broadcast %cst_100 : f32 to vector<80x16xf32>
      %125 = arith.select %123, %124, %121 : vector<80x16xi1>, vector<80x16xf32>
      %c5 = arith.constant 5 : index
      %c0_101 = arith.constant 0 : index
      %c0_102 = arith.constant 0 : index
      %126 = vector.load %arg2[%c5, %c0_101, %c0_102] : memref<6x16x128xf32, #tpu.memory_space<vmem>>, vector<1x16x128xf32>
      %127 = vector.shape_cast %126 : vector<1x16x128xf32> to vector<16x128xf32>
      %cst_103 = arith.constant dense<0.000000e+00> : vector<80x128xf32>
      %128 = tpu.matmul %125, %127, %cst_103 {dimension_numbers = #tpu.dot_dimension_numbers<[1], [0], [0], [1], [0, 0, 1, 1], [], []>} : vector<80x16xf32>, vector<16x128xf32>, vector<80x128xf32> -> vector<80x128xf32>
      %129 = arith.addf %116, %128 : vector<80x128xf32>
      %130 = vector.broadcast %23 : vector<1x128xf32> to vector<80x128xf32>
      %131 = arith.addf %129, %130 : vector<80x128xf32>
      %cst_104 = arith.constant 0.000000e+00 : f32
      %132 = vector.broadcast %cst_104 : f32 to vector<80x128xf32>
      %133 = arith.maximumf %131, %132 : vector<80x128xf32>
      %134 = arith.index_cast %58 : i32 to index
      %c0_105 = arith.constant 0 : index
      %135 = vector.load %arg15[%134, %c0_105] : memref<10416x128xf32, #tpu.memory_space<vmem>>, vector<80x128xf32>
      tpu.vector_store %arg15[%134, %c0_105], %133 {strides = array<i32>} : memref<10416x128xf32, #tpu.memory_space<vmem>>, vector<80x128xf32>,
    }
    %c128_i32_27 = arith.constant 128 : i32
    %25 = tpu.iota {dimensions = array<i32: 0>} : vector<80x1xi32>
    %c0_i32_28 = arith.constant 0 : i32
    %26 = vector.broadcast %c0_i32_28 : i32 to vector<80x1xi32>
    %27 = arith.cmpi eq, %25, %26 : vector<80x1xi32>
    %c0_29 = arith.constant 0 : index
    %c0_30 = arith.constant 0 : index
    %28 = vector.load %arg5[%c0_29, %c0_30] : memref<1x128xf32, #tpu.memory_space<vmem>>, vector<1x128xf32>
    %c0_i32_31 = arith.constant 0 : i32
    %c128_i32_32 = arith.constant 128 : i32
    %29 = arith.addi %c0_i32_31, %c128_i32_32 : i32
    %c1_i32_33 = arith.constant 1 : i32
    scf.for %arg23 = %c0_i32_31 to %29 step %c1_i32_33  : i32 {
      %c80_i32 = arith.constant 80 : i32
      %56 = arith.muli %arg23, %c80_i32 : i32
      %c88_i32 = arith.constant 88 : i32
      %57 = arith.addi %c88_i32, %56 : i32
      %58 = tpu.assume_multiple %57, 8 : i32
      %c80_i32_59 = arith.constant 80 : i32
      %59 = arith.muli %arg23, %c80_i32_59 : i32
      %cst_60 = arith.constant 0.000000e+00 : f32
      %60 = vector.broadcast %cst_60 : f32 to vector<80x128xf32>
      %c88_i32_61 = arith.constant 88 : i32
      %61 = arith.addi %59, %c88_i32_61 : i32
      %c-80_i32 = arith.constant -80 : i32
      %62 = arith.addi %61, %c-80_i32 : i32
      %63 = tpu.assume_multiple %62, 8 : i32
      %64 = arith.index_cast %63 : i32 to index
      %c0_62 = arith.constant 0 : index
      %65 = vector.load %arg15[%64, %c0_62] : memref<10416x128xf32, #tpu.memory_space<vmem>>, vector<80x128xf32>
      %c0_63 = arith.constant 0 : index
      %c0_64 = arith.constant 0 : index
      %c0_65 = arith.constant 0 : index
      %66 = vector.load %arg4[%c0_63, %c0_64, %c0_65] : memref<6x128x128xf32, #tpu.memory_space<vmem>>, vector<1x128x128xf32>
      %67 = vector.shape_cast %66 : vector<1x128x128xf32> to vector<128x128xf32>
      %cst_66 = arith.constant dense<0.000000e+00> : vector<80x128xf32>
      %68 = tpu.matmul %65, %67, %cst_66 {dimension_numbers = #tpu.dot_dimension_numbers<[1], [0], [0], [1], [0, 0, 1, 1], [], []>} : vector<80x128xf32>, vector<128x128xf32>, vector<80x128xf32> -> vector<80x128xf32>
      %69 = arith.addf %60, %68 : vector<80x128xf32>
      %c88_i32_67 = arith.constant 88 : i32
      %70 = arith.addi %59, %c88_i32_67 : i32
      %c-81_i32 = arith.constant -81 : i32
      %71 = arith.addi %70, %c-81_i32 : i32
      %72 = arith.index_cast %71 : i32 to index
      %c0_68 = arith.constant 0 : index
      %73 = vector.load %arg15[%72, %c0_68] : memref<10416x128xf32, #tpu.memory_space<vmem>>, vector<80x128xf32>
      %cst_69 = arith.constant 0.000000e+00 : f32
      %74 = vector.shape_cast %27 : vector<80x1xi1> to vector<80x1xi1>
      %75 = vector.broadcast %74 : vector<80x1xi1> to vector<80x128xi1>
      %76 = vector.broadcast %cst_69 : f32 to vector<80x128xf32>
      %77 = arith.select %75, %76, %73 : vector<80x128xi1>, vector<80x128xf32>
      %c1 = arith.constant 1 : index
      %c0_70 = arith.constant 0 : index
      %c0_71 = arith.constant 0 : index
      %78 = vector.load %arg4[%c1, %c0_70, %c0_71] : memref<6x128x128xf32, #tpu.memory_space<vmem>>, vector<1x128x128xf32>
      %79 = vector.shape_cast %78 : vector<1x128x128xf32> to vector<128x128xf32>
      %cst_72 = arith.constant dense<0.000000e+00> : vector<80x128xf32>
      %80 = tpu.matmul %77, %79, %cst_72 {dimension_numbers = #tpu.dot_dimension_numbers<[1], [0], [0], [1], [0, 0, 1, 1], [], []>} : vector<80x128xf32>, vector<128x128xf32>, vector<80x128xf32> -> vector<80x128xf32>
      %81 = arith.addf %69, %80 : vector<80x128xf32>
      %c88_i32_73 = arith.constant 88 : i32
      %82 = arith.addi %59, %c88_i32_73 : i32
      %c0_i32_74 = arith.constant 0 : i32
      %83 = arith.addi %82, %c0_i32_74 : i32
      %84 = tpu.assume_multiple %83, 8 : i32
      %85 = arith.index_cast %84 : i32 to index
      %c0_75 = arith.constant 0 : index
      %86 = vector.load %arg15[%85, %c0_75] : memref<10416x128xf32, #tpu.memory_space<vmem>>, vector<80x128xf32>
      %c2 = arith.constant 2 : index
      %c0_76 = arith.constant 0 : index
      %c0_77 = arith.constant 0 : index
      %87 = vector.load %arg4[%c2, %c0_76, %c0_77] : memref<6x128x128xf32, #tpu.memory_space<vmem>>, vector<1x128x128xf32>
      %88 = vector.shape_cast %87 : vector<1x128x128xf32> to vector<128x128xf32>
      %cst_78 = arith.constant dense<0.000000e+00> : vector<80x128xf32>
      %89 = tpu.matmul %86, %88, %cst_78 {dimension_numbers = #tpu.dot_dimension_numbers<[1], [0], [0], [1], [0, 0, 1, 1], [], []>} : vector<80x128xf32>, vector<128x128xf32>, vector<80x128xf32> -> vector<80x128xf32>
      %90 = arith.addf %81, %89 : vector<80x128xf32>
      %c88_i32_79 = arith.constant 88 : i32
      %91 = arith.addi %59, %c88_i32_79 : i32
      %c-1_i32 = arith.constant -1 : i32
      %92 = arith.addi %91, %c-1_i32 : i32
      %93 = arith.index_cast %92 : i32 to index
      %c0_80 = arith.constant 0 : index
      %94 = vector.load %arg15[%93, %c0_80] : memref<10416x128xf32, #tpu.memory_space<vmem>>, vector<80x128xf32>
      %cst_81 = arith.constant 0.000000e+00 : f32
      %95 = vector.shape_cast %27 : vector<80x1xi1> to vector<80x1xi1>
      %96 = vector.broadcast %95 : vector<80x1xi1> to vector<80x128xi1>
      %97 = vector.broadcast %cst_81 : f32 to vector<80x128xf32>
      %98 = arith.select %96, %97, %94 : vector<80x128xi1>, vector<80x128xf32>
      %c3 = arith.constant 3 : index
      %c0_82 = arith.constant 0 : index
      %c0_83 = arith.constant 0 : index
      %99 = vector.load %arg4[%c3, %c0_82, %c0_83] : memref<6x128x128xf32, #tpu.memory_space<vmem>>, vector<1x128x128xf32>
      %100 = vector.shape_cast %99 : vector<1x128x128xf32> to vector<128x128xf32>
      %cst_84 = arith.constant dense<0.000000e+00> : vector<80x128xf32>
      %101 = tpu.matmul %98, %100, %cst_84 {dimension_numbers = #tpu.dot_dimension_numbers<[1], [0], [0], [1], [0, 0, 1, 1], [], []>} : vector<80x128xf32>, vector<128x128xf32>, vector<80x128xf32> -> vector<80x128xf32>
      %102 = arith.addf %90, %101 : vector<80x128xf32>
      %c88_i32_85 = arith.constant 88 : i32
      %103 = arith.addi %59, %c88_i32_85 : i32
      %c80_i32_86 = arith.constant 80 : i32
      %104 = arith.addi %103, %c80_i32_86 : i32
      %105 = tpu.assume_multiple %104, 8 : i32
      %106 = arith.index_cast %105 : i32 to index
      %c0_87 = arith.constant 0 : index
      %107 = vector.load %arg15[%106, %c0_87] : memref<10416x128xf32, #tpu.memory_space<vmem>>, vector<80x128xf32>
      %c4 = arith.constant 4 : index
      %c0_88 = arith.constant 0 : index
      %c0_89 = arith.constant 0 : index
      %108 = vector.load %arg4[%c4, %c0_88, %c0_89] : memref<6x128x128xf32, #tpu.memory_space<vmem>>, vector<1x128x128xf32>
      %109 = vector.shape_cast %108 : vector<1x128x128xf32> to vector<128x128xf32>
      %cst_90 = arith.constant dense<0.000000e+00> : vector<80x128xf32>
      %110 = tpu.matmul %107, %109, %cst_90 {dimension_numbers = #tpu.dot_dimension_numbers<[1], [0], [0], [1], [0, 0, 1, 1], [], []>} : vector<80x128xf32>, vector<128x128xf32>, vector<80x128xf32> -> vector<80x128xf32>
      %111 = arith.addf %102, %110 : vector<80x128xf32>
      %c88_i32_91 = arith.constant 88 : i32
      %112 = arith.addi %59, %c88_i32_91 : i32
      %c79_i32_92 = arith.constant 79 : i32
      %113 = arith.addi %112, %c79_i32_92 : i32
      %114 = arith.index_cast %113 : i32 to index
      %c0_93 = arith.constant 0 : index
      %115 = vector.load %arg15[%114, %c0_93] : memref<10416x128xf32, #tpu.memory_space<vmem>>, vector<80x128xf32>
      %cst_94 = arith.constant 0.000000e+00 : f32
      %116 = vector.shape_cast %27 : vector<80x1xi1> to vector<80x1xi1>
      %117 = vector.broadcast %116 : vector<80x1xi1> to vector<80x128xi1>
      %118 = vector.broadcast %cst_94 : f32 to vector<80x128xf32>
      %119 = arith.select %117, %118, %115 : vector<80x128xi1>, vector<80x128xf32>
      %c5 = arith.constant 5 : index
      %c0_95 = arith.constant 0 : index
      %c0_96 = arith.constant 0 : index
      %120 = vector.load %arg4[%c5, %c0_95, %c0_96] : memref<6x128x128xf32, #tpu.memory_space<vmem>>, vector<1x128x128xf32>
      %121 = vector.shape_cast %120 : vector<1x128x128xf32> to vector<128x128xf32>
      %cst_97 = arith.constant dense<0.000000e+00> : vector<80x128xf32>
      %122 = tpu.matmul %119, %121, %cst_97 {dimension_numbers = #tpu.dot_dimension_numbers<[1], [0], [0], [1], [0, 0, 1, 1], [], []>} : vector<80x128xf32>, vector<128x128xf32>, vector<80x128xf32> -> vector<80x128xf32>
      %123 = arith.addf %111, %122 : vector<80x128xf32>
      %124 = vector.broadcast %28 : vector<1x128xf32> to vector<80x128xf32>
      %125 = arith.addf %123, %124 : vector<80x128xf32>
      %cst_98 = arith.constant 0.000000e+00 : f32
      %126 = vector.broadcast %cst_98 : f32 to vector<80x128xf32>
      %127 = arith.maximumf %125, %126 : vector<80x128xf32>
      %128 = arith.index_cast %58 : i32 to index
      %c0_99 = arith.constant 0 : index
      %129 = vector.load %arg16[%128, %c0_99] : memref<10416x128xf32, #tpu.memory_space<vmem>>, vector<80x128xf32>
      tpu.vector_store %arg16[%128, %c0_99], %127 {strides = array<i32>} : memref<10416x128xf32, #tpu.memory_space<vmem>>, vector<80x128xf32>,
    }
    %c128_i32_34 = arith.constant 128 : i32
    %30 = tpu.iota {dimensions = array<i32: 0>} : vector<80x1xi32>
    %c0_i32_35 = arith.constant 0 : i32
    %31 = vector.broadcast %c0_i32_35 : i32 to vector<80x1xi32>
    %32 = arith.cmpi eq, %30, %31 : vector<80x1xi32>
    %c0_36 = arith.constant 0 : index
    %c0_37 = arith.constant 0 : index
    %33 = vector.load %arg7[%c0_36, %c0_37] : memref<1x128xf32, #tpu.memory_space<vmem>>, vector<1x128xf32>
    %c0_i32_38 = arith.constant 0 : i32
    %c64_i32 = arith.constant 64 : i32
    %34 = arith.addi %c0_i32_38, %c64_i32 : i32
    %c1_i32_39 = arith.constant 1 : i32
    scf.for %arg23 = %c0_i32_38 to %34 step %c1_i32_39  : i32 {
      %c2_i32 = arith.constant 2 : i32
      %56 = arith.muli %c2_i32, %arg23 : i32
      %c80_i32 = arith.constant 80 : i32
      %57 = arith.muli %56, %c80_i32 : i32
      %cst_59 = arith.constant 0.000000e+00 : f32
      %58 = vector.broadcast %cst_59 : f32 to vector<80x128xf32>
      %c88_i32 = arith.constant 88 : i32
      %59 = arith.addi %57, %c88_i32 : i32
      %c-80_i32 = arith.constant -80 : i32
      %60 = arith.addi %59, %c-80_i32 : i32
      %61 = tpu.assume_multiple %60, 8 : i32
      %62 = arith.index_cast %61 : i32 to index
      %c0_60 = arith.constant 0 : index
      %63 = vector.load %arg16[%62, %c0_60] : memref<10416x128xf32, #tpu.memory_space<vmem>>, vector<80x128xf32>
      %c0_61 = arith.constant 0 : index
      %c0_62 = arith.constant 0 : index
      %c0_63 = arith.constant 0 : index
      %64 = vector.load %arg6[%c0_61, %c0_62, %c0_63] : memref<6x128x128xf32, #tpu.memory_space<vmem>>, vector<1x128x128xf32>
      %65 = vector.shape_cast %64 : vector<1x128x128xf32> to vector<128x128xf32>
      %cst_64 = arith.constant dense<0.000000e+00> : vector<80x128xf32>
      %66 = tpu.matmul %63, %65, %cst_64 {dimension_numbers = #tpu.dot_dimension_numbers<[1], [0], [0], [1], [0, 0, 1, 1], [], []>} : vector<80x128xf32>, vector<128x128xf32>, vector<80x128xf32> -> vector<80x128xf32>
      %67 = arith.addf %58, %66 : vector<80x128xf32>
      %c88_i32_65 = arith.constant 88 : i32
      %68 = arith.addi %57, %c88_i32_65 : i32
      %c-81_i32 = arith.constant -81 : i32
      %69 = arith.addi %68, %c-81_i32 : i32
      %70 = arith.index_cast %69 : i32 to index
      %c0_66 = arith.constant 0 : index
      %71 = vector.load %arg16[%70, %c0_66] : memref<10416x128xf32, #tpu.memory_space<vmem>>, vector<80x128xf32>
      %cst_67 = arith.constant 0.000000e+00 : f32
      %72 = vector.shape_cast %32 : vector<80x1xi1> to vector<80x1xi1>
      %73 = vector.broadcast %72 : vector<80x1xi1> to vector<80x128xi1>
      %74 = vector.broadcast %cst_67 : f32 to vector<80x128xf32>
      %75 = arith.select %73, %74, %71 : vector<80x128xi1>, vector<80x128xf32>
      %c1 = arith.constant 1 : index
      %c0_68 = arith.constant 0 : index
      %c0_69 = arith.constant 0 : index
      %76 = vector.load %arg6[%c1, %c0_68, %c0_69] : memref<6x128x128xf32, #tpu.memory_space<vmem>>, vector<1x128x128xf32>
      %77 = vector.shape_cast %76 : vector<1x128x128xf32> to vector<128x128xf32>
      %cst_70 = arith.constant dense<0.000000e+00> : vector<80x128xf32>
      %78 = tpu.matmul %75, %77, %cst_70 {dimension_numbers = #tpu.dot_dimension_numbers<[1], [0], [0], [1], [0, 0, 1, 1], [], []>} : vector<80x128xf32>, vector<128x128xf32>, vector<80x128xf32> -> vector<80x128xf32>
      %79 = arith.addf %67, %78 : vector<80x128xf32>
      %c88_i32_71 = arith.constant 88 : i32
      %80 = arith.addi %57, %c88_i32_71 : i32
      %c0_i32_72 = arith.constant 0 : i32
      %81 = arith.addi %80, %c0_i32_72 : i32
      %82 = tpu.assume_multiple %81, 8 : i32
      %83 = arith.index_cast %82 : i32 to index
      %c0_73 = arith.constant 0 : index
      %84 = vector.load %arg16[%83, %c0_73] : memref<10416x128xf32, #tpu.memory_space<vmem>>, vector<80x128xf32>
      %c2 = arith.constant 2 : index
      %c0_74 = arith.constant 0 : index
      %c0_75 = arith.constant 0 : index
      %85 = vector.load %arg6[%c2, %c0_74, %c0_75] : memref<6x128x128xf32, #tpu.memory_space<vmem>>, vector<1x128x128xf32>
      %86 = vector.shape_cast %85 : vector<1x128x128xf32> to vector<128x128xf32>
      %cst_76 = arith.constant dense<0.000000e+00> : vector<80x128xf32>
      %87 = tpu.matmul %84, %86, %cst_76 {dimension_numbers = #tpu.dot_dimension_numbers<[1], [0], [0], [1], [0, 0, 1, 1], [], []>} : vector<80x128xf32>, vector<128x128xf32>, vector<80x128xf32> -> vector<80x128xf32>
      %88 = arith.addf %79, %87 : vector<80x128xf32>
      %c88_i32_77 = arith.constant 88 : i32
      %89 = arith.addi %57, %c88_i32_77 : i32
      %c-1_i32 = arith.constant -1 : i32
      %90 = arith.addi %89, %c-1_i32 : i32
      %91 = arith.index_cast %90 : i32 to index
      %c0_78 = arith.constant 0 : index
      %92 = vector.load %arg16[%91, %c0_78] : memref<10416x128xf32, #tpu.memory_space<vmem>>, vector<80x128xf32>
      %cst_79 = arith.constant 0.000000e+00 : f32
      %93 = vector.shape_cast %32 : vector<80x1xi1> to vector<80x1xi1>
      %94 = vector.broadcast %93 : vector<80x1xi1> to vector<80x128xi1>
      %95 = vector.broadcast %cst_79 : f32 to vector<80x128xf32>
      %96 = arith.select %94, %95, %92 : vector<80x128xi1>, vector<80x128xf32>
      %c3 = arith.constant 3 : index
      %c0_80 = arith.constant 0 : index
      %c0_81 = arith.constant 0 : index
      %97 = vector.load %arg6[%c3, %c0_80, %c0_81] : memref<6x128x128xf32, #tpu.memory_space<vmem>>, vector<1x128x128xf32>
      %98 = vector.shape_cast %97 : vector<1x128x128xf32> to vector<128x128xf32>
      %cst_82 = arith.constant dense<0.000000e+00> : vector<80x128xf32>
      %99 = tpu.matmul %96, %98, %cst_82 {dimension_numbers = #tpu.dot_dimension_numbers<[1], [0], [0], [1], [0, 0, 1, 1], [], []>} : vector<80x128xf32>, vector<128x128xf32>, vector<80x128xf32> -> vector<80x128xf32>
      %100 = arith.addf %88, %99 : vector<80x128xf32>
      %c88_i32_83 = arith.constant 88 : i32
      %101 = arith.addi %57, %c88_i32_83 : i32
      %c80_i32_84 = arith.constant 80 : i32
      %102 = arith.addi %101, %c80_i32_84 : i32
      %103 = tpu.assume_multiple %102, 8 : i32
      %104 = arith.index_cast %103 : i32 to index
      %c0_85 = arith.constant 0 : index
      %105 = vector.load %arg16[%104, %c0_85] : memref<10416x128xf32, #tpu.memory_space<vmem>>, vector<80x128xf32>
      %c4 = arith.constant 4 : index
      %c0_86 = arith.constant 0 : index
      %c0_87 = arith.constant 0 : index
      %106 = vector.load %arg6[%c4, %c0_86, %c0_87] : memref<6x128x128xf32, #tpu.memory_space<vmem>>, vector<1x128x128xf32>
      %107 = vector.shape_cast %106 : vector<1x128x128xf32> to vector<128x128xf32>
      %cst_88 = arith.constant dense<0.000000e+00> : vector<80x128xf32>
      %108 = tpu.matmul %105, %107, %cst_88 {dimension_numbers = #tpu.dot_dimension_numbers<[1], [0], [0], [1], [0, 0, 1, 1], [], []>} : vector<80x128xf32>, vector<128x128xf32>, vector<80x128xf32> -> vector<80x128xf32>
      %109 = arith.addf %100, %108 : vector<80x128xf32>
      %c88_i32_89 = arith.constant 88 : i32
      %110 = arith.addi %57, %c88_i32_89 : i32
      %c79_i32_90 = arith.constant 79 : i32
      %111 = arith.addi %110, %c79_i32_90 : i32
      %112 = arith.index_cast %111 : i32 to index
      %c0_91 = arith.constant 0 : index
      %113 = vector.load %arg16[%112, %c0_91] : memref<10416x128xf32, #tpu.memory_space<vmem>>, vector<80x128xf32>
      %cst_92 = arith.constant 0.000000e+00 : f32
      %114 = vector.shape_cast %32 : vector<80x1xi1> to vector<80x1xi1>
      %115 = vector.broadcast %114 : vector<80x1xi1> to vector<80x128xi1>
      %116 = vector.broadcast %cst_92 : f32 to vector<80x128xf32>
      %117 = arith.select %115, %116, %113 : vector<80x128xi1>, vector<80x128xf32>
      %c5 = arith.constant 5 : index
      %c0_93 = arith.constant 0 : index
      %c0_94 = arith.constant 0 : index
      %118 = vector.load %arg6[%c5, %c0_93, %c0_94] : memref<6x128x128xf32, #tpu.memory_space<vmem>>, vector<1x128x128xf32>
      %119 = vector.shape_cast %118 : vector<1x128x128xf32> to vector<128x128xf32>
      %cst_95 = arith.constant dense<0.000000e+00> : vector<80x128xf32>
      %120 = tpu.matmul %117, %119, %cst_95 {dimension_numbers = #tpu.dot_dimension_numbers<[1], [0], [0], [1], [0, 0, 1, 1], [], []>} : vector<80x128xf32>, vector<128x128xf32>, vector<80x128xf32> -> vector<80x128xf32>
      %121 = arith.addf %109, %120 : vector<80x128xf32>
      %122 = vector.broadcast %33 : vector<1x128xf32> to vector<80x128xf32>
      %123 = arith.addf %121, %122 : vector<80x128xf32>
      %cst_96 = arith.constant 0.000000e+00 : f32
      %124 = vector.broadcast %cst_96 : f32 to vector<80x128xf32>
      %125 = arith.maximumf %123, %124 : vector<80x128xf32>
      %c2_i32_97 = arith.constant 2 : i32
      %126 = arith.muli %c2_i32_97, %arg23 : i32
      %c1_i32_98 = arith.constant 1 : i32
      %127 = arith.addi %126, %c1_i32_98 : i32
      %c80_i32_99 = arith.constant 80 : i32
      %128 = arith.muli %127, %c80_i32_99 : i32
      %cst_100 = arith.constant 0.000000e+00 : f32
      %129 = vector.broadcast %cst_100 : f32 to vector<80x128xf32>
      %c88_i32_101 = arith.constant 88 : i32
      %130 = arith.addi %128, %c88_i32_101 : i32
      %c-80_i32_102 = arith.constant -80 : i32
      %131 = arith.addi %130, %c-80_i32_102 : i32
      %132 = tpu.assume_multiple %131, 8 : i32
      %133 = arith.index_cast %132 : i32 to index
      %c0_103 = arith.constant 0 : index
      %134 = vector.load %arg16[%133, %c0_103] : memref<10416x128xf32, #tpu.memory_space<vmem>>, vector<80x128xf32>
      %c0_104 = arith.constant 0 : index
      %c0_105 = arith.constant 0 : index
      %c0_106 = arith.constant 0 : index
      %135 = vector.load %arg6[%c0_104, %c0_105, %c0_106] : memref<6x128x128xf32, #tpu.memory_space<vmem>>, vector<1x128x128xf32>
      %136 = vector.shape_cast %135 : vector<1x128x128xf32> to vector<128x128xf32>
      %cst_107 = arith.constant dense<0.000000e+00> : vector<80x128xf32>
      %137 = tpu.matmul %134, %136, %cst_107 {dimension_numbers = #tpu.dot_dimension_numbers<[1], [0], [0], [1], [0, 0, 1, 1], [], []>} : vector<80x128xf32>, vector<128x128xf32>, vector<80x128xf32> -> vector<80x128xf32>
      %138 = arith.addf %129, %137 : vector<80x128xf32>
      %c88_i32_108 = arith.constant 88 : i32
      %139 = arith.addi %128, %c88_i32_108 : i32
      %c-81_i32_109 = arith.constant -81 : i32
      %140 = arith.addi %139, %c-81_i32_109 : i32
      %141 = arith.index_cast %140 : i32 to index
      %c0_110 = arith.constant 0 : index
      %142 = vector.load %arg16[%141, %c0_110] : memref<10416x128xf32, #tpu.memory_space<vmem>>, vector<80x128xf32>
      %cst_111 = arith.constant 0.000000e+00 : f32
      %143 = vector.shape_cast %32 : vector<80x1xi1> to vector<80x1xi1>
      %144 = vector.broadcast %143 : vector<80x1xi1> to vector<80x128xi1>
      %145 = vector.broadcast %cst_111 : f32 to vector<80x128xf32>
      %146 = arith.select %144, %145, %142 : vector<80x128xi1>, vector<80x128xf32>
      %c1_112 = arith.constant 1 : index
      %c0_113 = arith.constant 0 : index
      %c0_114 = arith.constant 0 : index
      %147 = vector.load %arg6[%c1_112, %c0_113, %c0_114] : memref<6x128x128xf32, #tpu.memory_space<vmem>>, vector<1x128x128xf32>
      %148 = vector.shape_cast %147 : vector<1x128x128xf32> to vector<128x128xf32>
      %cst_115 = arith.constant dense<0.000000e+00> : vector<80x128xf32>
      %149 = tpu.matmul %146, %148, %cst_115 {dimension_numbers = #tpu.dot_dimension_numbers<[1], [0], [0], [1], [0, 0, 1, 1], [], []>} : vector<80x128xf32>, vector<128x128xf32>, vector<80x128xf32> -> vector<80x128xf32>
      %150 = arith.addf %138, %149 : vector<80x128xf32>
      %c88_i32_116 = arith.constant 88 : i32
      %151 = arith.addi %128, %c88_i32_116 : i32
      %c0_i32_117 = arith.constant 0 : i32
      %152 = arith.addi %151, %c0_i32_117 : i32
      %153 = tpu.assume_multiple %152, 8 : i32
      %154 = arith.index_cast %153 : i32 to index
      %c0_118 = arith.constant 0 : index
      %155 = vector.load %arg16[%154, %c0_118] : memref<10416x128xf32, #tpu.memory_space<vmem>>, vector<80x128xf32>
      %c2_119 = arith.constant 2 : index
      %c0_120 = arith.constant 0 : index
      %c0_121 = arith.constant 0 : index
      %156 = vector.load %arg6[%c2_119, %c0_120, %c0_121] : memref<6x128x128xf32, #tpu.memory_space<vmem>>, vector<1x128x128xf32>
      %157 = vector.shape_cast %156 : vector<1x128x128xf32> to vector<128x128xf32>
      %cst_122 = arith.constant dense<0.000000e+00> : vector<80x128xf32>
      %158 = tpu.matmul %155, %157, %cst_122 {dimension_numbers = #tpu.dot_dimension_numbers<[1], [0], [0], [1], [0, 0, 1, 1], [], []>} : vector<80x128xf32>, vector<128x128xf32>, vector<80x128xf32> -> vector<80x128xf32>
      %159 = arith.addf %150, %158 : vector<80x128xf32>
      %c88_i32_123 = arith.constant 88 : i32
      %160 = arith.addi %128, %c88_i32_123 : i32
      %c-1_i32_124 = arith.constant -1 : i32
      %161 = arith.addi %160, %c-1_i32_124 : i32
      %162 = arith.index_cast %161 : i32 to index
      %c0_125 = arith.constant 0 : index
      %163 = vector.load %arg16[%162, %c0_125] : memref<10416x128xf32, #tpu.memory_space<vmem>>, vector<80x128xf32>
      %cst_126 = arith.constant 0.000000e+00 : f32
      %164 = vector.shape_cast %32 : vector<80x1xi1> to vector<80x1xi1>
      %165 = vector.broadcast %164 : vector<80x1xi1> to vector<80x128xi1>
      %166 = vector.broadcast %cst_126 : f32 to vector<80x128xf32>
      %167 = arith.select %165, %166, %163 : vector<80x128xi1>, vector<80x128xf32>
      %c3_127 = arith.constant 3 : index
      %c0_128 = arith.constant 0 : index
      %c0_129 = arith.constant 0 : index
      %168 = vector.load %arg6[%c3_127, %c0_128, %c0_129] : memref<6x128x128xf32, #tpu.memory_space<vmem>>, vector<1x128x128xf32>
      %169 = vector.shape_cast %168 : vector<1x128x128xf32> to vector<128x128xf32>
      %cst_130 = arith.constant dense<0.000000e+00> : vector<80x128xf32>
      %170 = tpu.matmul %167, %169, %cst_130 {dimension_numbers = #tpu.dot_dimension_numbers<[1], [0], [0], [1], [0, 0, 1, 1], [], []>} : vector<80x128xf32>, vector<128x128xf32>, vector<80x128xf32> -> vector<80x128xf32>
      %171 = arith.addf %159, %170 : vector<80x128xf32>
      %c88_i32_131 = arith.constant 88 : i32
      %172 = arith.addi %128, %c88_i32_131 : i32
      %c80_i32_132 = arith.constant 80 : i32
      %173 = arith.addi %172, %c80_i32_132 : i32
      %174 = tpu.assume_multiple %173, 8 : i32
      %175 = arith.index_cast %174 : i32 to index
      %c0_133 = arith.constant 0 : index
      %176 = vector.load %arg16[%175, %c0_133] : memref<10416x128xf32, #tpu.memory_space<vmem>>, vector<80x128xf32>
      %c4_134 = arith.constant 4 : index
      %c0_135 = arith.constant 0 : index
      %c0_136 = arith.constant 0 : index
      %177 = vector.load %arg6[%c4_134, %c0_135, %c0_136] : memref<6x128x128xf32, #tpu.memory_space<vmem>>, vector<1x128x128xf32>
      %178 = vector.shape_cast %177 : vector<1x128x128xf32> to vector<128x128xf32>
      %cst_137 = arith.constant dense<0.000000e+00> : vector<80x128xf32>
      %179 = tpu.matmul %176, %178, %cst_137 {dimension_numbers = #tpu.dot_dimension_numbers<[1], [0], [0], [1], [0, 0, 1, 1], [], []>} : vector<80x128xf32>, vector<128x128xf32>, vector<80x128xf32> -> vector<80x128xf32>
      %180 = arith.addf %171, %179 : vector<80x128xf32>
      %c88_i32_138 = arith.constant 88 : i32
      %181 = arith.addi %128, %c88_i32_138 : i32
      %c79_i32_139 = arith.constant 79 : i32
      %182 = arith.addi %181, %c79_i32_139 : i32
      %183 = arith.index_cast %182 : i32 to index
      %c0_140 = arith.constant 0 : index
      %184 = vector.load %arg16[%183, %c0_140] : memref<10416x128xf32, #tpu.memory_space<vmem>>, vector<80x128xf32>
      %cst_141 = arith.constant 0.000000e+00 : f32
      %185 = vector.shape_cast %32 : vector<80x1xi1> to vector<80x1xi1>
      %186 = vector.broadcast %185 : vector<80x1xi1> to vector<80x128xi1>
      %187 = vector.broadcast %cst_141 : f32 to vector<80x128xf32>
      %188 = arith.select %186, %187, %184 : vector<80x128xi1>, vector<80x128xf32>
      %c5_142 = arith.constant 5 : index
      %c0_143 = arith.constant 0 : index
      %c0_144 = arith.constant 0 : index
      %189 = vector.load %arg6[%c5_142, %c0_143, %c0_144] : memref<6x128x128xf32, #tpu.memory_space<vmem>>, vector<1x128x128xf32>
      %190 = vector.shape_cast %189 : vector<1x128x128xf32> to vector<128x128xf32>
      %cst_145 = arith.constant dense<0.000000e+00> : vector<80x128xf32>
      %191 = tpu.matmul %188, %190, %cst_145 {dimension_numbers = #tpu.dot_dimension_numbers<[1], [0], [0], [1], [0, 0, 1, 1], [], []>} : vector<80x128xf32>, vector<128x128xf32>, vector<80x128xf32> -> vector<80x128xf32>
      %192 = arith.addf %180, %191 : vector<80x128xf32>
      %193 = vector.broadcast %33 : vector<1x128xf32> to vector<80x128xf32>
      %194 = arith.addf %192, %193 : vector<80x128xf32>
      %cst_146 = arith.constant 0.000000e+00 : f32
      %195 = vector.broadcast %cst_146 : f32 to vector<80x128xf32>
      %196 = arith.maximumf %194, %195 : vector<80x128xf32>
      %197 = arith.maximumf %125, %196 : vector<80x128xf32>
      %c80_i32_147 = arith.constant 80 : i32
      %198 = arith.muli %arg23, %c80_i32_147 : i32
      %c88_i32_148 = arith.constant 88 : i32
      %199 = arith.addi %c88_i32_148, %198 : i32
      %200 = tpu.assume_multiple %199, 8 : i32
      %201 = vector.extract_strided_slice %197 {offsets = [0, 0], sizes = [80, 64], strides = [1, 1]} : vector<80x128xf32> to vector<80x64xf32>
      %202 = vector.extract_strided_slice %197 {offsets = [0, 64], sizes = [80, 64], strides = [1, 1]} : vector<80x128xf32> to vector<80x64xf32>
      %203 = arith.maximumf %201, %202 : vector<80x64xf32>
      %204 = arith.index_cast %200 : i32 to index
      %c0_149 = arith.constant 0 : index
      %205 = vector.load %arg17[%204, %c0_149] : memref<5296x64xf32, #tpu.memory_space<vmem>>, vector<80x64xf32>
      tpu.vector_store %arg17[%204, %c0_149], %203 {strides = array<i32>} : memref<5296x64xf32, #tpu.memory_space<vmem>>, vector<80x64xf32>,
    }
    %c64_i32_40 = arith.constant 64 : i32
    %35 = tpu.iota {dimensions = array<i32: 0>} : vector<80x1xi32>
    %c0_i32_41 = arith.constant 0 : i32
    %36 = vector.broadcast %c0_i32_41 : i32 to vector<80x1xi32>
    %37 = arith.cmpi eq, %35, %36 : vector<80x1xi32>
    %c79_i32 = arith.constant 79 : i32
    %38 = vector.broadcast %c79_i32 : i32 to vector<80x1xi32>
    %39 = arith.cmpi eq, %35, %38 : vector<80x1xi32>
    %c0_42 = arith.constant 0 : index
    %c0_43 = arith.constant 0 : index
    %40 = vector.load %arg9[%c0_42, %c0_43] : memref<1x64xf32, #tpu.memory_space<vmem>>, vector<1x64xf32>
    %c0_i32_44 = arith.constant 0 : i32
    %c32_i32 = arith.constant 32 : i32
    %41 = arith.addi %c0_i32_44, %c32_i32 : i32
    %c1_i32_45 = arith.constant 1 : i32
    scf.for %arg23 = %c0_i32_44 to %41 step %c1_i32_45  : i32 {
      %c2_i32 = arith.constant 2 : i32
      %56 = arith.muli %c2_i32, %arg23 : i32
      %c80_i32 = arith.constant 80 : i32
      %57 = arith.muli %56, %c80_i32 : i32
      %cst_59 = arith.constant 0.000000e+00 : f32
      %58 = vector.broadcast %cst_59 : f32 to vector<80x64xf32>
      %c88_i32 = arith.constant 88 : i32
      %59 = arith.addi %57, %c88_i32 : i32
      %c-81_i32 = arith.constant -81 : i32
      %60 = arith.addi %59, %c-81_i32 : i32
      %61 = arith.index_cast %60 : i32 to index
      %c0_60 = arith.constant 0 : index
      %62 = vector.load %arg17[%61, %c0_60] : memref<5296x64xf32, #tpu.memory_space<vmem>>, vector<80x64xf32>
      %cst_61 = arith.constant 0.000000e+00 : f32
      %63 = vector.shape_cast %37 : vector<80x1xi1> to vector<80x1xi1>
      %64 = vector.broadcast %63 : vector<80x1xi1> to vector<80x64xi1>
      %65 = vector.broadcast %cst_61 : f32 to vector<80x64xf32>
      %66 = arith.select %64, %65, %62 : vector<80x64xi1>, vector<80x64xf32>
      %c0_62 = arith.constant 0 : index
      %c0_63 = arith.constant 0 : index
      %c0_64 = arith.constant 0 : index
      %67 = vector.load %arg8[%c0_62, %c0_63, %c0_64] : memref<9x64x64xf32, #tpu.memory_space<vmem>>, vector<1x64x64xf32>
      %68 = vector.shape_cast %67 : vector<1x64x64xf32> to vector<64x64xf32>
      %cst_65 = arith.constant dense<0.000000e+00> : vector<80x64xf32>
      %69 = tpu.matmul %66, %68, %cst_65 {dimension_numbers = #tpu.dot_dimension_numbers<[1], [0], [0], [1], [0, 0, 1, 1], [], []>} : vector<80x64xf32>, vector<64x64xf32>, vector<80x64xf32> -> vector<80x64xf32>
      %70 = arith.addf %58, %69 : vector<80x64xf32>
      %c88_i32_66 = arith.constant 88 : i32
      %71 = arith.addi %57, %c88_i32_66 : i32
      %c-80_i32 = arith.constant -80 : i32
      %72 = arith.addi %71, %c-80_i32 : i32
      %73 = tpu.assume_multiple %72, 8 : i32
      %74 = arith.index_cast %73 : i32 to index
      %c0_67 = arith.constant 0 : index
      %75 = vector.load %arg17[%74, %c0_67] : memref<5296x64xf32, #tpu.memory_space<vmem>>, vector<80x64xf32>
      %c1 = arith.constant 1 : index
      %c0_68 = arith.constant 0 : index
      %c0_69 = arith.constant 0 : index
      %76 = vector.load %arg8[%c1, %c0_68, %c0_69] : memref<9x64x64xf32, #tpu.memory_space<vmem>>, vector<1x64x64xf32>
      %77 = vector.shape_cast %76 : vector<1x64x64xf32> to vector<64x64xf32>
      %cst_70 = arith.constant dense<0.000000e+00> : vector<80x64xf32>
      %78 = tpu.matmul %75, %77, %cst_70 {dimension_numbers = #tpu.dot_dimension_numbers<[1], [0], [0], [1], [0, 0, 1, 1], [], []>} : vector<80x64xf32>, vector<64x64xf32>, vector<80x64xf32> -> vector<80x64xf32>
      %79 = arith.addf %70, %78 : vector<80x64xf32>
      %c88_i32_71 = arith.constant 88 : i32
      %80 = arith.addi %57, %c88_i32_71 : i32
      %c-79_i32 = arith.constant -79 : i32
      %81 = arith.addi %80, %c-79_i32 : i32
      %82 = arith.index_cast %81 : i32 to index
      %c0_72 = arith.constant 0 : index
      %83 = vector.load %arg17[%82, %c0_72] : memref<5296x64xf32, #tpu.memory_space<vmem>>, vector<80x64xf32>
      %cst_73 = arith.constant 0.000000e+00 : f32
      %84 = vector.shape_cast %39 : vector<80x1xi1> to vector<80x1xi1>
      %85 = vector.broadcast %84 : vector<80x1xi1> to vector<80x64xi1>
      %86 = vector.broadcast %cst_73 : f32 to vector<80x64xf32>
      %87 = arith.select %85, %86, %83 : vector<80x64xi1>, vector<80x64xf32>
      %c2 = arith.constant 2 : index
      %c0_74 = arith.constant 0 : index
      %c0_75 = arith.constant 0 : index
      %88 = vector.load %arg8[%c2, %c0_74, %c0_75] : memref<9x64x64xf32, #tpu.memory_space<vmem>>, vector<1x64x64xf32>
      %89 = vector.shape_cast %88 : vector<1x64x64xf32> to vector<64x64xf32>
      %cst_76 = arith.constant dense<0.000000e+00> : vector<80x64xf32>
      %90 = tpu.matmul %87, %89, %cst_76 {dimension_numbers = #tpu.dot_dimension_numbers<[1], [0], [0], [1], [0, 0, 1, 1], [], []>} : vector<80x64xf32>, vector<64x64xf32>, vector<80x64xf32> -> vector<80x64xf32>
      %91 = arith.addf %79, %90 : vector<80x64xf32>
      %c88_i32_77 = arith.constant 88 : i32
      %92 = arith.addi %57, %c88_i32_77 : i32
      %c-1_i32 = arith.constant -1 : i32
      %93 = arith.addi %92, %c-1_i32 : i32
      %94 = arith.index_cast %93 : i32 to index
      %c0_78 = arith.constant 0 : index
      %95 = vector.load %arg17[%94, %c0_78] : memref<5296x64xf32, #tpu.memory_space<vmem>>, vector<80x64xf32>
      %cst_79 = arith.constant 0.000000e+00 : f32
      %96 = vector.shape_cast %37 : vector<80x1xi1> to vector<80x1xi1>
      %97 = vector.broadcast %96 : vector<80x1xi1> to vector<80x64xi1>
      %98 = vector.broadcast %cst_79 : f32 to vector<80x64xf32>
      %99 = arith.select %97, %98, %95 : vector<80x64xi1>, vector<80x64xf32>
      %c3 = arith.constant 3 : index
      %c0_80 = arith.constant 0 : index
      %c0_81 = arith.constant 0 : index
      %100 = vector.load %arg8[%c3, %c0_80, %c0_81] : memref<9x64x64xf32, #tpu.memory_space<vmem>>, vector<1x64x64xf32>
      %101 = vector.shape_cast %100 : vector<1x64x64xf32> to vector<64x64xf32>
      %cst_82 = arith.constant dense<0.000000e+00> : vector<80x64xf32>
      %102 = tpu.matmul %99, %101, %cst_82 {dimension_numbers = #tpu.dot_dimension_numbers<[1], [0], [0], [1], [0, 0, 1, 1], [], []>} : vector<80x64xf32>, vector<64x64xf32>, vector<80x64xf32> -> vector<80x64xf32>
      %103 = arith.addf %91, %102 : vector<80x64xf32>
      %c88_i32_83 = arith.constant 88 : i32
      %104 = arith.addi %57, %c88_i32_83 : i32
      %c0_i32_84 = arith.constant 0 : i32
      %105 = arith.addi %104, %c0_i32_84 : i32
      %106 = tpu.assume_multiple %105, 8 : i32
      %107 = arith.index_cast %106 : i32 to index
      %c0_85 = arith.constant 0 : index
      %108 = vector.load %arg17[%107, %c0_85] : memref<5296x64xf32, #tpu.memory_space<vmem>>, vector<80x64xf32>
      %c4 = arith.constant 4 : index
      %c0_86 = arith.constant 0 : index
      %c0_87 = arith.constant 0 : index
      %109 = vector.load %arg8[%c4, %c0_86, %c0_87] : memref<9x64x64xf32, #tpu.memory_space<vmem>>, vector<1x64x64xf32>
      %110 = vector.shape_cast %109 : vector<1x64x64xf32> to vector<64x64xf32>
      %cst_88 = arith.constant dense<0.000000e+00> : vector<80x64xf32>
      %111 = tpu.matmul %108, %110, %cst_88 {dimension_numbers = #tpu.dot_dimension_numbers<[1], [0], [0], [1], [0, 0, 1, 1], [], []>} : vector<80x64xf32>, vector<64x64xf32>, vector<80x64xf32> -> vector<80x64xf32>
      %112 = arith.addf %103, %111 : vector<80x64xf32>
      %c88_i32_89 = arith.constant 88 : i32
      %113 = arith.addi %57, %c88_i32_89 : i32
      %c1_i32_90 = arith.constant 1 : i32
      %114 = arith.addi %113, %c1_i32_90 : i32
      %115 = arith.index_cast %114 : i32 to index
      %c0_91 = arith.constant 0 : index
      %116 = vector.load %arg17[%115, %c0_91] : memref<5296x64xf32, #tpu.memory_space<vmem>>, vector<80x64xf32>
      %cst_92 = arith.constant 0.000000e+00 : f32
      %117 = vector.shape_cast %39 : vector<80x1xi1> to vector<80x1xi1>
      %118 = vector.broadcast %117 : vector<80x1xi1> to vector<80x64xi1>
      %119 = vector.broadcast %cst_92 : f32 to vector<80x64xf32>
      %120 = arith.select %118, %119, %116 : vector<80x64xi1>, vector<80x64xf32>
      %c5 = arith.constant 5 : index
      %c0_93 = arith.constant 0 : index
      %c0_94 = arith.constant 0 : index
      %121 = vector.load %arg8[%c5, %c0_93, %c0_94] : memref<9x64x64xf32, #tpu.memory_space<vmem>>, vector<1x64x64xf32>
      %122 = vector.shape_cast %121 : vector<1x64x64xf32> to vector<64x64xf32>
      %cst_95 = arith.constant dense<0.000000e+00> : vector<80x64xf32>
      %123 = tpu.matmul %120, %122, %cst_95 {dimension_numbers = #tpu.dot_dimension_numbers<[1], [0], [0], [1], [0, 0, 1, 1], [], []>} : vector<80x64xf32>, vector<64x64xf32>, vector<80x64xf32> -> vector<80x64xf32>
      %124 = arith.addf %112, %123 : vector<80x64xf32>
      %c88_i32_96 = arith.constant 88 : i32
      %125 = arith.addi %57, %c88_i32_96 : i32
      %c79_i32_97 = arith.constant 79 : i32
      %126 = arith.addi %125, %c79_i32_97 : i32
      %127 = arith.index_cast %126 : i32 to index
      %c0_98 = arith.constant 0 : index
      %128 = vector.load %arg17[%127, %c0_98] : memref<5296x64xf32, #tpu.memory_space<vmem>>, vector<80x64xf32>
      %cst_99 = arith.constant 0.000000e+00 : f32
      %129 = vector.shape_cast %37 : vector<80x1xi1> to vector<80x1xi1>
      %130 = vector.broadcast %129 : vector<80x1xi1> to vector<80x64xi1>
      %131 = vector.broadcast %cst_99 : f32 to vector<80x64xf32>
      %132 = arith.select %130, %131, %128 : vector<80x64xi1>, vector<80x64xf32>
      %c6 = arith.constant 6 : index
      %c0_100 = arith.constant 0 : index
      %c0_101 = arith.constant 0 : index
      %133 = vector.load %arg8[%c6, %c0_100, %c0_101] : memref<9x64x64xf32, #tpu.memory_space<vmem>>, vector<1x64x64xf32>
      %134 = vector.shape_cast %133 : vector<1x64x64xf32> to vector<64x64xf32>
      %cst_102 = arith.constant dense<0.000000e+00> : vector<80x64xf32>
      %135 = tpu.matmul %132, %134, %cst_102 {dimension_numbers = #tpu.dot_dimension_numbers<[1], [0], [0], [1], [0, 0, 1, 1], [], []>} : vector<80x64xf32>, vector<64x64xf32>, vector<80x64xf32> -> vector<80x64xf32>
      %136 = arith.addf %124, %135 : vector<80x64xf32>
      %c88_i32_103 = arith.constant 88 : i32
      %137 = arith.addi %57, %c88_i32_103 : i32
      %c80_i32_104 = arith.constant 80 : i32
      %138 = arith.addi %137, %c80_i32_104 : i32
      %139 = tpu.assume_multiple %138, 8 : i32
      %140 = arith.index_cast %139 : i32 to index
      %c0_105 = arith.constant 0 : index
      %141 = vector.load %arg17[%140, %c0_105] : memref<5296x64xf32, #tpu.memory_space<vmem>>, vector<80x64xf32>
      %c7 = arith.constant 7 : index
      %c0_106 = arith.constant 0 : index
      %c0_107 = arith.constant 0 : index
      %142 = vector.load %arg8[%c7, %c0_106, %c0_107] : memref<9x64x64xf32, #tpu.memory_space<vmem>>, vector<1x64x64xf32>
      %143 = vector.shape_cast %142 : vector<1x64x64xf32> to vector<64x64xf32>
      %cst_108 = arith.constant dense<0.000000e+00> : vector<80x64xf32>
      %144 = tpu.matmul %141, %143, %cst_108 {dimension_numbers = #tpu.dot_dimension_numbers<[1], [0], [0], [1], [0, 0, 1, 1], [], []>} : vector<80x64xf32>, vector<64x64xf32>, vector<80x64xf32> -> vector<80x64xf32>
      %145 = arith.addf %136, %144 : vector<80x64xf32>
      %c88_i32_109 = arith.constant 88 : i32
      %146 = arith.addi %57, %c88_i32_109 : i32
      %c81_i32 = arith.constant 81 : i32
      %147 = arith.addi %146, %c81_i32 : i32
      %148 = arith.index_cast %147 : i32 to index
      %c0_110 = arith.constant 0 : index
      %149 = vector.load %arg17[%148, %c0_110] : memref<5296x64xf32, #tpu.memory_space<vmem>>, vector<80x64xf32>
      %cst_111 = arith.constant 0.000000e+00 : f32
      %150 = vector.shape_cast %39 : vector<80x1xi1> to vector<80x1xi1>
      %151 = vector.broadcast %150 : vector<80x1xi1> to vector<80x64xi1>
      %152 = vector.broadcast %cst_111 : f32 to vector<80x64xf32>
      %153 = arith.select %151, %152, %149 : vector<80x64xi1>, vector<80x64xf32>
      %c8 = arith.constant 8 : index
      %c0_112 = arith.constant 0 : index
      %c0_113 = arith.constant 0 : index
      %154 = vector.load %arg8[%c8, %c0_112, %c0_113] : memref<9x64x64xf32, #tpu.memory_space<vmem>>, vector<1x64x64xf32>
      %155 = vector.shape_cast %154 : vector<1x64x64xf32> to vector<64x64xf32>
      %cst_114 = arith.constant dense<0.000000e+00> : vector<80x64xf32>
      %156 = tpu.matmul %153, %155, %cst_114 {dimension_numbers = #tpu.dot_dimension_numbers<[1], [0], [0], [1], [0, 0, 1, 1], [], []>} : vector<80x64xf32>, vector<64x64xf32>, vector<80x64xf32> -> vector<80x64xf32>
      %157 = arith.addf %145, %156 : vector<80x64xf32>
      %158 = vector.broadcast %40 : vector<1x64xf32> to vector<80x64xf32>
      %159 = arith.addf %157, %158 : vector<80x64xf32>
      %cst_115 = arith.constant 0.000000e+00 : f32
      %160 = vector.broadcast %cst_115 : f32 to vector<80x64xf32>
      %161 = arith.maximumf %159, %160 : vector<80x64xf32>
      %c2_i32_116 = arith.constant 2 : i32
      %162 = arith.muli %c2_i32_116, %arg23 : i32
      %c1_i32_117 = arith.constant 1 : i32
      %163 = arith.addi %162, %c1_i32_117 : i32
      %c80_i32_118 = arith.constant 80 : i32
      %164 = arith.muli %163, %c80_i32_118 : i32
      %cst_119 = arith.constant 0.000000e+00 : f32
      %165 = vector.broadcast %cst_119 : f32 to vector<80x64xf32>
      %c88_i32_120 = arith.constant 88 : i32
      %166 = arith.addi %164, %c88_i32_120 : i32
      %c-81_i32_121 = arith.constant -81 : i32
      %167 = arith.addi %166, %c-81_i32_121 : i32
      %168 = arith.index_cast %167 : i32 to index
      %c0_122 = arith.constant 0 : index
      %169 = vector.load %arg17[%168, %c0_122] : memref<5296x64xf32, #tpu.memory_space<vmem>>, vector<80x64xf32>
      %cst_123 = arith.constant 0.000000e+00 : f32
      %170 = vector.shape_cast %37 : vector<80x1xi1> to vector<80x1xi1>
      %171 = vector.broadcast %170 : vector<80x1xi1> to vector<80x64xi1>
      %172 = vector.broadcast %cst_123 : f32 to vector<80x64xf32>
      %173 = arith.select %171, %172, %169 : vector<80x64xi1>, vector<80x64xf32>
      %c0_124 = arith.constant 0 : index
      %c0_125 = arith.constant 0 : index
      %c0_126 = arith.constant 0 : index
      %174 = vector.load %arg8[%c0_124, %c0_125, %c0_126] : memref<9x64x64xf32, #tpu.memory_space<vmem>>, vector<1x64x64xf32>
      %175 = vector.shape_cast %174 : vector<1x64x64xf32> to vector<64x64xf32>
      %cst_127 = arith.constant dense<0.000000e+00> : vector<80x64xf32>
      %176 = tpu.matmul %173, %175, %cst_127 {dimension_numbers = #tpu.dot_dimension_numbers<[1], [0], [0], [1], [0, 0, 1, 1], [], []>} : vector<80x64xf32>, vector<64x64xf32>, vector<80x64xf32> -> vector<80x64xf32>
      %177 = arith.addf %165, %176 : vector<80x64xf32>
      %c88_i32_128 = arith.constant 88 : i32
      %178 = arith.addi %164, %c88_i32_128 : i32
      %c-80_i32_129 = arith.constant -80 : i32
      %179 = arith.addi %178, %c-80_i32_129 : i32
      %180 = tpu.assume_multiple %179, 8 : i32
      %181 = arith.index_cast %180 : i32 to index
      %c0_130 = arith.constant 0 : index
      %182 = vector.load %arg17[%181, %c0_130] : memref<5296x64xf32, #tpu.memory_space<vmem>>, vector<80x64xf32>
      %c1_131 = arith.constant 1 : index
      %c0_132 = arith.constant 0 : index
      %c0_133 = arith.constant 0 : index
      %183 = vector.load %arg8[%c1_131, %c0_132, %c0_133] : memref<9x64x64xf32, #tpu.memory_space<vmem>>, vector<1x64x64xf32>
      %184 = vector.shape_cast %183 : vector<1x64x64xf32> to vector<64x64xf32>
      %cst_134 = arith.constant dense<0.000000e+00> : vector<80x64xf32>
      %185 = tpu.matmul %182, %184, %cst_134 {dimension_numbers = #tpu.dot_dimension_numbers<[1], [0], [0], [1], [0, 0, 1, 1], [], []>} : vector<80x64xf32>, vector<64x64xf32>, vector<80x64xf32> -> vector<80x64xf32>
      %186 = arith.addf %177, %185 : vector<80x64xf32>
      %c88_i32_135 = arith.constant 88 : i32
      %187 = arith.addi %164, %c88_i32_135 : i32
      %c-79_i32_136 = arith.constant -79 : i32
      %188 = arith.addi %187, %c-79_i32_136 : i32
      %189 = arith.index_cast %188 : i32 to index
      %c0_137 = arith.constant 0 : index
      %190 = vector.load %arg17[%189, %c0_137] : memref<5296x64xf32, #tpu.memory_space<vmem>>, vector<80x64xf32>
      %cst_138 = arith.constant 0.000000e+00 : f32
      %191 = vector.shape_cast %39 : vector<80x1xi1> to vector<80x1xi1>
      %192 = vector.broadcast %191 : vector<80x1xi1> to vector<80x64xi1>
      %193 = vector.broadcast %cst_138 : f32 to vector<80x64xf32>
      %194 = arith.select %192, %193, %190 : vector<80x64xi1>, vector<80x64xf32>
      %c2_139 = arith.constant 2 : index
      %c0_140 = arith.constant 0 : index
      %c0_141 = arith.constant 0 : index
      %195 = vector.load %arg8[%c2_139, %c0_140, %c0_141] : memref<9x64x64xf32, #tpu.memory_space<vmem>>, vector<1x64x64xf32>
      %196 = vector.shape_cast %195 : vector<1x64x64xf32> to vector<64x64xf32>
      %cst_142 = arith.constant dense<0.000000e+00> : vector<80x64xf32>
      %197 = tpu.matmul %194, %196, %cst_142 {dimension_numbers = #tpu.dot_dimension_numbers<[1], [0], [0], [1], [0, 0, 1, 1], [], []>} : vector<80x64xf32>, vector<64x64xf32>, vector<80x64xf32> -> vector<80x64xf32>
      %198 = arith.addf %186, %197 : vector<80x64xf32>
      %c88_i32_143 = arith.constant 88 : i32
      %199 = arith.addi %164, %c88_i32_143 : i32
      %c-1_i32_144 = arith.constant -1 : i32
      %200 = arith.addi %199, %c-1_i32_144 : i32
      %201 = arith.index_cast %200 : i32 to index
      %c0_145 = arith.constant 0 : index
      %202 = vector.load %arg17[%201, %c0_145] : memref<5296x64xf32, #tpu.memory_space<vmem>>, vector<80x64xf32>
      %cst_146 = arith.constant 0.000000e+00 : f32
      %203 = vector.shape_cast %37 : vector<80x1xi1> to vector<80x1xi1>
      %204 = vector.broadcast %203 : vector<80x1xi1> to vector<80x64xi1>
      %205 = vector.broadcast %cst_146 : f32 to vector<80x64xf32>
      %206 = arith.select %204, %205, %202 : vector<80x64xi1>, vector<80x64xf32>
      %c3_147 = arith.constant 3 : index
      %c0_148 = arith.constant 0 : index
      %c0_149 = arith.constant 0 : index
      %207 = vector.load %arg8[%c3_147, %c0_148, %c0_149] : memref<9x64x64xf32, #tpu.memory_space<vmem>>, vector<1x64x64xf32>
      %208 = vector.shape_cast %207 : vector<1x64x64xf32> to vector<64x64xf32>
      %cst_150 = arith.constant dense<0.000000e+00> : vector<80x64xf32>
      %209 = tpu.matmul %206, %208, %cst_150 {dimension_numbers = #tpu.dot_dimension_numbers<[1], [0], [0], [1], [0, 0, 1, 1], [], []>} : vector<80x64xf32>, vector<64x64xf32>, vector<80x64xf32> -> vector<80x64xf32>
      %210 = arith.addf %198, %209 : vector<80x64xf32>
      %c88_i32_151 = arith.constant 88 : i32
      %211 = arith.addi %164, %c88_i32_151 : i32
      %c0_i32_152 = arith.constant 0 : i32
      %212 = arith.addi %211, %c0_i32_152 : i32
      %213 = tpu.assume_multiple %212, 8 : i32
      %214 = arith.index_cast %213 : i32 to index
      %c0_153 = arith.constant 0 : index
      %215 = vector.load %arg17[%214, %c0_153] : memref<5296x64xf32, #tpu.memory_space<vmem>>, vector<80x64xf32>
      %c4_154 = arith.constant 4 : index
      %c0_155 = arith.constant 0 : index
      %c0_156 = arith.constant 0 : index
      %216 = vector.load %arg8[%c4_154, %c0_155, %c0_156] : memref<9x64x64xf32, #tpu.memory_space<vmem>>, vector<1x64x64xf32>
      %217 = vector.shape_cast %216 : vector<1x64x64xf32> to vector<64x64xf32>
      %cst_157 = arith.constant dense<0.000000e+00> : vector<80x64xf32>
      %218 = tpu.matmul %215, %217, %cst_157 {dimension_numbers = #tpu.dot_dimension_numbers<[1], [0], [0], [1], [0, 0, 1, 1], [], []>} : vector<80x64xf32>, vector<64x64xf32>, vector<80x64xf32> -> vector<80x64xf32>
      %219 = arith.addf %210, %218 : vector<80x64xf32>
      %c88_i32_158 = arith.constant 88 : i32
      %220 = arith.addi %164, %c88_i32_158 : i32
      %c1_i32_159 = arith.constant 1 : i32
      %221 = arith.addi %220, %c1_i32_159 : i32
      %222 = arith.index_cast %221 : i32 to index
      %c0_160 = arith.constant 0 : index
      %223 = vector.load %arg17[%222, %c0_160] : memref<5296x64xf32, #tpu.memory_space<vmem>>, vector<80x64xf32>
      %cst_161 = arith.constant 0.000000e+00 : f32
      %224 = vector.shape_cast %39 : vector<80x1xi1> to vector<80x1xi1>
      %225 = vector.broadcast %224 : vector<80x1xi1> to vector<80x64xi1>
      %226 = vector.broadcast %cst_161 : f32 to vector<80x64xf32>
      %227 = arith.select %225, %226, %223 : vector<80x64xi1>, vector<80x64xf32>
      %c5_162 = arith.constant 5 : index
      %c0_163 = arith.constant 0 : index
      %c0_164 = arith.constant 0 : index
      %228 = vector.load %arg8[%c5_162, %c0_163, %c0_164] : memref<9x64x64xf32, #tpu.memory_space<vmem>>, vector<1x64x64xf32>
      %229 = vector.shape_cast %228 : vector<1x64x64xf32> to vector<64x64xf32>
      %cst_165 = arith.constant dense<0.000000e+00> : vector<80x64xf32>
      %230 = tpu.matmul %227, %229, %cst_165 {dimension_numbers = #tpu.dot_dimension_numbers<[1], [0], [0], [1], [0, 0, 1, 1], [], []>} : vector<80x64xf32>, vector<64x64xf32>, vector<80x64xf32> -> vector<80x64xf32>
      %231 = arith.addf %219, %230 : vector<80x64xf32>
      %c88_i32_166 = arith.constant 88 : i32
      %232 = arith.addi %164, %c88_i32_166 : i32
      %c79_i32_167 = arith.constant 79 : i32
      %233 = arith.addi %232, %c79_i32_167 : i32
      %234 = arith.index_cast %233 : i32 to index
      %c0_168 = arith.constant 0 : index
      %235 = vector.load %arg17[%234, %c0_168] : memref<5296x64xf32, #tpu.memory_space<vmem>>, vector<80x64xf32>
      %cst_169 = arith.constant 0.000000e+00 : f32
      %236 = vector.shape_cast %37 : vector<80x1xi1> to vector<80x1xi1>
      %237 = vector.broadcast %236 : vector<80x1xi1> to vector<80x64xi1>
      %238 = vector.broadcast %cst_169 : f32 to vector<80x64xf32>
      %239 = arith.select %237, %238, %235 : vector<80x64xi1>, vector<80x64xf32>
      %c6_170 = arith.constant 6 : index
      %c0_171 = arith.constant 0 : index
      %c0_172 = arith.constant 0 : index
      %240 = vector.load %arg8[%c6_170, %c0_171, %c0_172] : memref<9x64x64xf32, #tpu.memory_space<vmem>>, vector<1x64x64xf32>
      %241 = vector.shape_cast %240 : vector<1x64x64xf32> to vector<64x64xf32>
      %cst_173 = arith.constant dense<0.000000e+00> : vector<80x64xf32>
      %242 = tpu.matmul %239, %241, %cst_173 {dimension_numbers = #tpu.dot_dimension_numbers<[1], [0], [0], [1], [0, 0, 1, 1], [], []>} : vector<80x64xf32>, vector<64x64xf32>, vector<80x64xf32> -> vector<80x64xf32>
      %243 = arith.addf %231, %242 : vector<80x64xf32>
      %c88_i32_174 = arith.constant 88 : i32
      %244 = arith.addi %164, %c88_i32_174 : i32
      %c80_i32_175 = arith.constant 80 : i32
      %245 = arith.addi %244, %c80_i32_175 : i32
      %246 = tpu.assume_multiple %245, 8 : i32
      %247 = arith.index_cast %246 : i32 to index
      %c0_176 = arith.constant 0 : index
      %248 = vector.load %arg17[%247, %c0_176] : memref<5296x64xf32, #tpu.memory_space<vmem>>, vector<80x64xf32>
      %c7_177 = arith.constant 7 : index
      %c0_178 = arith.constant 0 : index
      %c0_179 = arith.constant 0 : index
      %249 = vector.load %arg8[%c7_177, %c0_178, %c0_179] : memref<9x64x64xf32, #tpu.memory_space<vmem>>, vector<1x64x64xf32>
      %250 = vector.shape_cast %249 : vector<1x64x64xf32> to vector<64x64xf32>
      %cst_180 = arith.constant dense<0.000000e+00> : vector<80x64xf32>
      %251 = tpu.matmul %248, %250, %cst_180 {dimension_numbers = #tpu.dot_dimension_numbers<[1], [0], [0], [1], [0, 0, 1, 1], [], []>} : vector<80x64xf32>, vector<64x64xf32>, vector<80x64xf32> -> vector<80x64xf32>
      %252 = arith.addf %243, %251 : vector<80x64xf32>
      %c88_i32_181 = arith.constant 88 : i32
      %253 = arith.addi %164, %c88_i32_181 : i32
      %c81_i32_182 = arith.constant 81 : i32
      %254 = arith.addi %253, %c81_i32_182 : i32
      %255 = arith.index_cast %254 : i32 to index
      %c0_183 = arith.constant 0 : index
      %256 = vector.load %arg17[%255, %c0_183] : memref<5296x64xf32, #tpu.memory_space<vmem>>, vector<80x64xf32>
      %cst_184 = arith.constant 0.000000e+00 : f32
      %257 = vector.shape_cast %39 : vector<80x1xi1> to vector<80x1xi1>
      %258 = vector.broadcast %257 : vector<80x1xi1> to vector<80x64xi1>
      %259 = vector.broadcast %cst_184 : f32 to vector<80x64xf32>
      %260 = arith.select %258, %259, %256 : vector<80x64xi1>, vector<80x64xf32>
      %c8_185 = arith.constant 8 : index
      %c0_186 = arith.constant 0 : index
      %c0_187 = arith.constant 0 : index
      %261 = vector.load %arg8[%c8_185, %c0_186, %c0_187] : memref<9x64x64xf32, #tpu.memory_space<vmem>>, vector<1x64x64xf32>
      %262 = vector.shape_cast %261 : vector<1x64x64xf32> to vector<64x64xf32>
      %cst_188 = arith.constant dense<0.000000e+00> : vector<80x64xf32>
      %263 = tpu.matmul %260, %262, %cst_188 {dimension_numbers = #tpu.dot_dimension_numbers<[1], [0], [0], [1], [0, 0, 1, 1], [], []>} : vector<80x64xf32>, vector<64x64xf32>, vector<80x64xf32> -> vector<80x64xf32>
      %264 = arith.addf %252, %263 : vector<80x64xf32>
      %265 = vector.broadcast %40 : vector<1x64xf32> to vector<80x64xf32>
      %266 = arith.addf %264, %265 : vector<80x64xf32>
      %cst_189 = arith.constant 0.000000e+00 : f32
      %267 = vector.broadcast %cst_189 : f32 to vector<80x64xf32>
      %268 = arith.maximumf %266, %267 : vector<80x64xf32>
      %269 = arith.maximumf %161, %268 : vector<80x64xf32>
      %c0_190 = arith.constant 0 : index
      %c0_191 = arith.constant 0 : index
      %270 = vector.load %arg20[%c0_190, %c0_191] : memref<80x64xf32, #tpu.memory_space<vmem>>, vector<80x64xf32>
      tpu.vector_store %arg20[%c0_190, %c0_191], %269 {strides = array<i32>} : memref<80x64xf32, #tpu.memory_space<vmem>>, vector<80x64xf32>,
      %c0_192 = arith.constant 0 : index
      %c0_193 = arith.constant 0 : index
      %271 = tpu.strided_load %arg20[%c0_192, %c0_193] {strides = array<i32: 2, 1>} : memref<80x64xf32, #tpu.memory_space<vmem>>, vector<40x64xf32>
      %c1_194 = arith.constant 1 : index
      %c0_195 = arith.constant 0 : index
      %272 = tpu.strided_load %arg20[%c1_194, %c0_195] {strides = array<i32: 2, 1>} : memref<80x64xf32, #tpu.memory_space<vmem>>, vector<40x64xf32>
      %c40_i32 = arith.constant 40 : i32
      %273 = arith.muli %arg23, %c40_i32 : i32
      %c48_i32 = arith.constant 48 : i32
      %274 = arith.addi %c48_i32, %273 : i32
      %275 = tpu.assume_multiple %274, 8 : i32
      %276 = arith.maximumf %271, %272 : vector<40x64xf32>
      %277 = arith.index_cast %275 : i32 to index
      %c0_196 = arith.constant 0 : index
      %278 = vector.load %arg18[%277, %c0_196] : memref<1376x64xf32, #tpu.memory_space<vmem>>, vector<40x64xf32>
      tpu.vector_store %arg18[%277, %c0_196], %276 {strides = array<i32>} : memref<1376x64xf32, #tpu.memory_space<vmem>>, vector<40x64xf32>,
    }
    %c32_i32_46 = arith.constant 32 : i32
    %42 = tpu.iota {dimensions = array<i32: 0>} : vector<40x1xi32>
    %c0_i32_47 = arith.constant 0 : i32
    %43 = vector.broadcast %c0_i32_47 : i32 to vector<40x1xi32>
    %44 = arith.cmpi eq, %42, %43 : vector<40x1xi32>
    %c39_i32 = arith.constant 39 : i32
    %45 = vector.broadcast %c39_i32 : i32 to vector<40x1xi32>
    %46 = arith.cmpi eq, %42, %45 : vector<40x1xi32>
    %c0_48 = arith.constant 0 : index
    %c0_49 = arith.constant 0 : index
    %47 = vector.load %arg11[%c0_48, %c0_49] : memref<1x32xf32, #tpu.memory_space<vmem>>, vector<1x32xf32>
    %c0_i32_50 = arith.constant 0 : i32
    %c16_i32 = arith.constant 16 : i32
    %48 = arith.addi %c0_i32_50, %c16_i32 : i32
    %c1_i32_51 = arith.constant 1 : i32
    scf.for %arg23 = %c0_i32_50 to %48 step %c1_i32_51  : i32 {
      %c2_i32 = arith.constant 2 : i32
      %56 = arith.muli %c2_i32, %arg23 : i32
      %c40_i32 = arith.constant 40 : i32
      %57 = arith.muli %56, %c40_i32 : i32
      %cst_59 = arith.constant 0.000000e+00 : f32
      %58 = vector.broadcast %cst_59 : f32 to vector<40x32xf32>
      %c48_i32 = arith.constant 48 : i32
      %59 = arith.addi %57, %c48_i32 : i32
      %c-41_i32 = arith.constant -41 : i32
      %60 = arith.addi %59, %c-41_i32 : i32
      %61 = arith.index_cast %60 : i32 to index
      %c0_60 = arith.constant 0 : index
      %62 = vector.load %arg18[%61, %c0_60] : memref<1376x64xf32, #tpu.memory_space<vmem>>, vector<40x64xf32>
      %cst_61 = arith.constant 0.000000e+00 : f32
      %63 = vector.shape_cast %44 : vector<40x1xi1> to vector<40x1xi1>
      %64 = vector.broadcast %63 : vector<40x1xi1> to vector<40x64xi1>
      %65 = vector.broadcast %cst_61 : f32 to vector<40x64xf32>
      %66 = arith.select %64, %65, %62 : vector<40x64xi1>, vector<40x64xf32>
      %c0_62 = arith.constant 0 : index
      %c0_63 = arith.constant 0 : index
      %c0_64 = arith.constant 0 : index
      %67 = vector.load %arg10[%c0_62, %c0_63, %c0_64] : memref<9x64x32xf32, #tpu.memory_space<vmem>>, vector<1x64x32xf32>
      %68 = vector.shape_cast %67 : vector<1x64x32xf32> to vector<64x32xf32>
      %cst_65 = arith.constant dense<0.000000e+00> : vector<40x32xf32>
      %69 = tpu.matmul %66, %68, %cst_65 {dimension_numbers = #tpu.dot_dimension_numbers<[1], [0], [0], [1], [0, 0, 1, 1], [], []>} : vector<40x64xf32>, vector<64x32xf32>, vector<40x32xf32> -> vector<40x32xf32>
      %70 = arith.addf %58, %69 : vector<40x32xf32>
      %c48_i32_66 = arith.constant 48 : i32
      %71 = arith.addi %57, %c48_i32_66 : i32
      %c-40_i32 = arith.constant -40 : i32
      %72 = arith.addi %71, %c-40_i32 : i32
      %73 = tpu.assume_multiple %72, 8 : i32
      %74 = arith.index_cast %73 : i32 to index
      %c0_67 = arith.constant 0 : index
      %75 = vector.load %arg18[%74, %c0_67] : memref<1376x64xf32, #tpu.memory_space<vmem>>, vector<40x64xf32>
      %c1 = arith.constant 1 : index
      %c0_68 = arith.constant 0 : index
      %c0_69 = arith.constant 0 : index
      %76 = vector.load %arg10[%c1, %c0_68, %c0_69] : memref<9x64x32xf32, #tpu.memory_space<vmem>>, vector<1x64x32xf32>
      %77 = vector.shape_cast %76 : vector<1x64x32xf32> to vector<64x32xf32>
      %cst_70 = arith.constant dense<0.000000e+00> : vector<40x32xf32>
      %78 = tpu.matmul %75, %77, %cst_70 {dimension_numbers = #tpu.dot_dimension_numbers<[1], [0], [0], [1], [0, 0, 1, 1], [], []>} : vector<40x64xf32>, vector<64x32xf32>, vector<40x32xf32> -> vector<40x32xf32>
      %79 = arith.addf %70, %78 : vector<40x32xf32>
      %c48_i32_71 = arith.constant 48 : i32
      %80 = arith.addi %57, %c48_i32_71 : i32
      %c-39_i32 = arith.constant -39 : i32
      %81 = arith.addi %80, %c-39_i32 : i32
      %82 = arith.index_cast %81 : i32 to index
      %c0_72 = arith.constant 0 : index
      %83 = vector.load %arg18[%82, %c0_72] : memref<1376x64xf32, #tpu.memory_space<vmem>>, vector<40x64xf32>
      %cst_73 = arith.constant 0.000000e+00 : f32
      %84 = vector.shape_cast %46 : vector<40x1xi1> to vector<40x1xi1>
      %85 = vector.broadcast %84 : vector<40x1xi1> to vector<40x64xi1>
      %86 = vector.broadcast %cst_73 : f32 to vector<40x64xf32>
      %87 = arith.select %85, %86, %83 : vector<40x64xi1>, vector<40x64xf32>
      %c2 = arith.constant 2 : index
      %c0_74 = arith.constant 0 : index
      %c0_75 = arith.constant 0 : index
      %88 = vector.load %arg10[%c2, %c0_74, %c0_75] : memref<9x64x32xf32, #tpu.memory_space<vmem>>, vector<1x64x32xf32>
      %89 = vector.shape_cast %88 : vector<1x64x32xf32> to vector<64x32xf32>
      %cst_76 = arith.constant dense<0.000000e+00> : vector<40x32xf32>
      %90 = tpu.matmul %87, %89, %cst_76 {dimension_numbers = #tpu.dot_dimension_numbers<[1], [0], [0], [1], [0, 0, 1, 1], [], []>} : vector<40x64xf32>, vector<64x32xf32>, vector<40x32xf32> -> vector<40x32xf32>
      %91 = arith.addf %79, %90 : vector<40x32xf32>
      %c48_i32_77 = arith.constant 48 : i32
      %92 = arith.addi %57, %c48_i32_77 : i32
      %c-1_i32 = arith.constant -1 : i32
      %93 = arith.addi %92, %c-1_i32 : i32
      %94 = arith.index_cast %93 : i32 to index
      %c0_78 = arith.constant 0 : index
      %95 = vector.load %arg18[%94, %c0_78] : memref<1376x64xf32, #tpu.memory_space<vmem>>, vector<40x64xf32>
      %cst_79 = arith.constant 0.000000e+00 : f32
      %96 = vector.shape_cast %44 : vector<40x1xi1> to vector<40x1xi1>
      %97 = vector.broadcast %96 : vector<40x1xi1> to vector<40x64xi1>
      %98 = vector.broadcast %cst_79 : f32 to vector<40x64xf32>
      %99 = arith.select %97, %98, %95 : vector<40x64xi1>, vector<40x64xf32>
      %c3 = arith.constant 3 : index
      %c0_80 = arith.constant 0 : index
      %c0_81 = arith.constant 0 : index
      %100 = vector.load %arg10[%c3, %c0_80, %c0_81] : memref<9x64x32xf32, #tpu.memory_space<vmem>>, vector<1x64x32xf32>
      %101 = vector.shape_cast %100 : vector<1x64x32xf32> to vector<64x32xf32>
      %cst_82 = arith.constant dense<0.000000e+00> : vector<40x32xf32>
      %102 = tpu.matmul %99, %101, %cst_82 {dimension_numbers = #tpu.dot_dimension_numbers<[1], [0], [0], [1], [0, 0, 1, 1], [], []>} : vector<40x64xf32>, vector<64x32xf32>, vector<40x32xf32> -> vector<40x32xf32>
      %103 = arith.addf %91, %102 : vector<40x32xf32>
      %c48_i32_83 = arith.constant 48 : i32
      %104 = arith.addi %57, %c48_i32_83 : i32
      %c0_i32_84 = arith.constant 0 : i32
      %105 = arith.addi %104, %c0_i32_84 : i32
      %106 = tpu.assume_multiple %105, 8 : i32
      %107 = arith.index_cast %106 : i32 to index
      %c0_85 = arith.constant 0 : index
      %108 = vector.load %arg18[%107, %c0_85] : memref<1376x64xf32, #tpu.memory_space<vmem>>, vector<40x64xf32>
      %c4 = arith.constant 4 : index
      %c0_86 = arith.constant 0 : index
      %c0_87 = arith.constant 0 : index
      %109 = vector.load %arg10[%c4, %c0_86, %c0_87] : memref<9x64x32xf32, #tpu.memory_space<vmem>>, vector<1x64x32xf32>
      %110 = vector.shape_cast %109 : vector<1x64x32xf32> to vector<64x32xf32>
      %cst_88 = arith.constant dense<0.000000e+00> : vector<40x32xf32>
      %111 = tpu.matmul %108, %110, %cst_88 {dimension_numbers = #tpu.dot_dimension_numbers<[1], [0], [0], [1], [0, 0, 1, 1], [], []>} : vector<40x64xf32>, vector<64x32xf32>, vector<40x32xf32> -> vector<40x32xf32>
      %112 = arith.addf %103, %111 : vector<40x32xf32>
      %c48_i32_89 = arith.constant 48 : i32
      %113 = arith.addi %57, %c48_i32_89 : i32
      %c1_i32_90 = arith.constant 1 : i32
      %114 = arith.addi %113, %c1_i32_90 : i32
      %115 = arith.index_cast %114 : i32 to index
      %c0_91 = arith.constant 0 : index
      %116 = vector.load %arg18[%115, %c0_91] : memref<1376x64xf32, #tpu.memory_space<vmem>>, vector<40x64xf32>
      %cst_92 = arith.constant 0.000000e+00 : f32
      %117 = vector.shape_cast %46 : vector<40x1xi1> to vector<40x1xi1>
      %118 = vector.broadcast %117 : vector<40x1xi1> to vector<40x64xi1>
      %119 = vector.broadcast %cst_92 : f32 to vector<40x64xf32>
      %120 = arith.select %118, %119, %116 : vector<40x64xi1>, vector<40x64xf32>
      %c5 = arith.constant 5 : index
      %c0_93 = arith.constant 0 : index
      %c0_94 = arith.constant 0 : index
      %121 = vector.load %arg10[%c5, %c0_93, %c0_94] : memref<9x64x32xf32, #tpu.memory_space<vmem>>, vector<1x64x32xf32>
      %122 = vector.shape_cast %121 : vector<1x64x32xf32> to vector<64x32xf32>
      %cst_95 = arith.constant dense<0.000000e+00> : vector<40x32xf32>
      %123 = tpu.matmul %120, %122, %cst_95 {dimension_numbers = #tpu.dot_dimension_numbers<[1], [0], [0], [1], [0, 0, 1, 1], [], []>} : vector<40x64xf32>, vector<64x32xf32>, vector<40x32xf32> -> vector<40x32xf32>
      %124 = arith.addf %112, %123 : vector<40x32xf32>
      %c48_i32_96 = arith.constant 48 : i32
      %125 = arith.addi %57, %c48_i32_96 : i32
      %c39_i32_97 = arith.constant 39 : i32
      %126 = arith.addi %125, %c39_i32_97 : i32
      %127 = arith.index_cast %126 : i32 to index
      %c0_98 = arith.constant 0 : index
      %128 = vector.load %arg18[%127, %c0_98] : memref<1376x64xf32, #tpu.memory_space<vmem>>, vector<40x64xf32>
      %cst_99 = arith.constant 0.000000e+00 : f32
      %129 = vector.shape_cast %44 : vector<40x1xi1> to vector<40x1xi1>
      %130 = vector.broadcast %129 : vector<40x1xi1> to vector<40x64xi1>
      %131 = vector.broadcast %cst_99 : f32 to vector<40x64xf32>
      %132 = arith.select %130, %131, %128 : vector<40x64xi1>, vector<40x64xf32>
      %c6 = arith.constant 6 : index
      %c0_100 = arith.constant 0 : index
      %c0_101 = arith.constant 0 : index
      %133 = vector.load %arg10[%c6, %c0_100, %c0_101] : memref<9x64x32xf32, #tpu.memory_space<vmem>>, vector<1x64x32xf32>
      %134 = vector.shape_cast %133 : vector<1x64x32xf32> to vector<64x32xf32>
      %cst_102 = arith.constant dense<0.000000e+00> : vector<40x32xf32>
      %135 = tpu.matmul %132, %134, %cst_102 {dimension_numbers = #tpu.dot_dimension_numbers<[1], [0], [0], [1], [0, 0, 1, 1], [], []>} : vector<40x64xf32>, vector<64x32xf32>, vector<40x32xf32> -> vector<40x32xf32>
      %136 = arith.addf %124, %135 : vector<40x32xf32>
      %c48_i32_103 = arith.constant 48 : i32
      %137 = arith.addi %57, %c48_i32_103 : i32
      %c40_i32_104 = arith.constant 40 : i32
      %138 = arith.addi %137, %c40_i32_104 : i32
      %139 = tpu.assume_multiple %138, 8 : i32
      %140 = arith.index_cast %139 : i32 to index
      %c0_105 = arith.constant 0 : index
      %141 = vector.load %arg18[%140, %c0_105] : memref<1376x64xf32, #tpu.memory_space<vmem>>, vector<40x64xf32>
      %c7 = arith.constant 7 : index
      %c0_106 = arith.constant 0 : index
      %c0_107 = arith.constant 0 : index
      %142 = vector.load %arg10[%c7, %c0_106, %c0_107] : memref<9x64x32xf32, #tpu.memory_space<vmem>>, vector<1x64x32xf32>
      %143 = vector.shape_cast %142 : vector<1x64x32xf32> to vector<64x32xf32>
      %cst_108 = arith.constant dense<0.000000e+00> : vector<40x32xf32>
      %144 = tpu.matmul %141, %143, %cst_108 {dimension_numbers = #tpu.dot_dimension_numbers<[1], [0], [0], [1], [0, 0, 1, 1], [], []>} : vector<40x64xf32>, vector<64x32xf32>, vector<40x32xf32> -> vector<40x32xf32>
      %145 = arith.addf %136, %144 : vector<40x32xf32>
      %c48_i32_109 = arith.constant 48 : i32
      %146 = arith.addi %57, %c48_i32_109 : i32
      %c41_i32 = arith.constant 41 : i32
      %147 = arith.addi %146, %c41_i32 : i32
      %148 = arith.index_cast %147 : i32 to index
      %c0_110 = arith.constant 0 : index
      %149 = vector.load %arg18[%148, %c0_110] : memref<1376x64xf32, #tpu.memory_space<vmem>>, vector<40x64xf32>
      %cst_111 = arith.constant 0.000000e+00 : f32
      %150 = vector.shape_cast %46 : vector<40x1xi1> to vector<40x1xi1>
      %151 = vector.broadcast %150 : vector<40x1xi1> to vector<40x64xi1>
      %152 = vector.broadcast %cst_111 : f32 to vector<40x64xf32>
      %153 = arith.select %151, %152, %149 : vector<40x64xi1>, vector<40x64xf32>
      %c8 = arith.constant 8 : index
      %c0_112 = arith.constant 0 : index
      %c0_113 = arith.constant 0 : index
      %154 = vector.load %arg10[%c8, %c0_112, %c0_113] : memref<9x64x32xf32, #tpu.memory_space<vmem>>, vector<1x64x32xf32>
      %155 = vector.shape_cast %154 : vector<1x64x32xf32> to vector<64x32xf32>
      %cst_114 = arith.constant dense<0.000000e+00> : vector<40x32xf32>
      %156 = tpu.matmul %153, %155, %cst_114 {dimension_numbers = #tpu.dot_dimension_numbers<[1], [0], [0], [1], [0, 0, 1, 1], [], []>} : vector<40x64xf32>, vector<64x32xf32>, vector<40x32xf32> -> vector<40x32xf32>
      %157 = arith.addf %145, %156 : vector<40x32xf32>
      %158 = vector.broadcast %47 : vector<1x32xf32> to vector<40x32xf32>
      %159 = arith.addf %157, %158 : vector<40x32xf32>
      %cst_115 = arith.constant 0.000000e+00 : f32
      %160 = vector.broadcast %cst_115 : f32 to vector<40x32xf32>
      %161 = arith.maximumf %159, %160 : vector<40x32xf32>
      %c2_i32_116 = arith.constant 2 : i32
      %162 = arith.muli %c2_i32_116, %arg23 : i32
      %c1_i32_117 = arith.constant 1 : i32
      %163 = arith.addi %162, %c1_i32_117 : i32
      %c40_i32_118 = arith.constant 40 : i32
      %164 = arith.muli %163, %c40_i32_118 : i32
      %cst_119 = arith.constant 0.000000e+00 : f32
      %165 = vector.broadcast %cst_119 : f32 to vector<40x32xf32>
      %c48_i32_120 = arith.constant 48 : i32
      %166 = arith.addi %164, %c48_i32_120 : i32
      %c-41_i32_121 = arith.constant -41 : i32
      %167 = arith.addi %166, %c-41_i32_121 : i32
      %168 = arith.index_cast %167 : i32 to index
      %c0_122 = arith.constant 0 : index
      %169 = vector.load %arg18[%168, %c0_122] : memref<1376x64xf32, #tpu.memory_space<vmem>>, vector<40x64xf32>
      %cst_123 = arith.constant 0.000000e+00 : f32
      %170 = vector.shape_cast %44 : vector<40x1xi1> to vector<40x1xi1>
      %171 = vector.broadcast %170 : vector<40x1xi1> to vector<40x64xi1>
      %172 = vector.broadcast %cst_123 : f32 to vector<40x64xf32>
      %173 = arith.select %171, %172, %169 : vector<40x64xi1>, vector<40x64xf32>
      %c0_124 = arith.constant 0 : index
      %c0_125 = arith.constant 0 : index
      %c0_126 = arith.constant 0 : index
      %174 = vector.load %arg10[%c0_124, %c0_125, %c0_126] : memref<9x64x32xf32, #tpu.memory_space<vmem>>, vector<1x64x32xf32>
      %175 = vector.shape_cast %174 : vector<1x64x32xf32> to vector<64x32xf32>
      %cst_127 = arith.constant dense<0.000000e+00> : vector<40x32xf32>
      %176 = tpu.matmul %173, %175, %cst_127 {dimension_numbers = #tpu.dot_dimension_numbers<[1], [0], [0], [1], [0, 0, 1, 1], [], []>} : vector<40x64xf32>, vector<64x32xf32>, vector<40x32xf32> -> vector<40x32xf32>
      %177 = arith.addf %165, %176 : vector<40x32xf32>
      %c48_i32_128 = arith.constant 48 : i32
      %178 = arith.addi %164, %c48_i32_128 : i32
      %c-40_i32_129 = arith.constant -40 : i32
      %179 = arith.addi %178, %c-40_i32_129 : i32
      %180 = tpu.assume_multiple %179, 8 : i32
      %181 = arith.index_cast %180 : i32 to index
      %c0_130 = arith.constant 0 : index
      %182 = vector.load %arg18[%181, %c0_130] : memref<1376x64xf32, #tpu.memory_space<vmem>>, vector<40x64xf32>
      %c1_131 = arith.constant 1 : index
      %c0_132 = arith.constant 0 : index
      %c0_133 = arith.constant 0 : index
      %183 = vector.load %arg10[%c1_131, %c0_132, %c0_133] : memref<9x64x32xf32, #tpu.memory_space<vmem>>, vector<1x64x32xf32>
      %184 = vector.shape_cast %183 : vector<1x64x32xf32> to vector<64x32xf32>
      %cst_134 = arith.constant dense<0.000000e+00> : vector<40x32xf32>
      %185 = tpu.matmul %182, %184, %cst_134 {dimension_numbers = #tpu.dot_dimension_numbers<[1], [0], [0], [1], [0, 0, 1, 1], [], []>} : vector<40x64xf32>, vector<64x32xf32>, vector<40x32xf32> -> vector<40x32xf32>
      %186 = arith.addf %177, %185 : vector<40x32xf32>
      %c48_i32_135 = arith.constant 48 : i32
      %187 = arith.addi %164, %c48_i32_135 : i32
      %c-39_i32_136 = arith.constant -39 : i32
      %188 = arith.addi %187, %c-39_i32_136 : i32
      %189 = arith.index_cast %188 : i32 to index
      %c0_137 = arith.constant 0 : index
      %190 = vector.load %arg18[%189, %c0_137] : memref<1376x64xf32, #tpu.memory_space<vmem>>, vector<40x64xf32>
      %cst_138 = arith.constant 0.000000e+00 : f32
      %191 = vector.shape_cast %46 : vector<40x1xi1> to vector<40x1xi1>
      %192 = vector.broadcast %191 : vector<40x1xi1> to vector<40x64xi1>
      %193 = vector.broadcast %cst_138 : f32 to vector<40x64xf32>
      %194 = arith.select %192, %193, %190 : vector<40x64xi1>, vector<40x64xf32>
      %c2_139 = arith.constant 2 : index
      %c0_140 = arith.constant 0 : index
      %c0_141 = arith.constant 0 : index
      %195 = vector.load %arg10[%c2_139, %c0_140, %c0_141] : memref<9x64x32xf32, #tpu.memory_space<vmem>>, vector<1x64x32xf32>
      %196 = vector.shape_cast %195 : vector<1x64x32xf32> to vector<64x32xf32>
      %cst_142 = arith.constant dense<0.000000e+00> : vector<40x32xf32>
      %197 = tpu.matmul %194, %196, %cst_142 {dimension_numbers = #tpu.dot_dimension_numbers<[1], [0], [0], [1], [0, 0, 1, 1], [], []>} : vector<40x64xf32>, vector<64x32xf32>, vector<40x32xf32> -> vector<40x32xf32>
      %198 = arith.addf %186, %197 : vector<40x32xf32>
      %c48_i32_143 = arith.constant 48 : i32
      %199 = arith.addi %164, %c48_i32_143 : i32
      %c-1_i32_144 = arith.constant -1 : i32
      %200 = arith.addi %199, %c-1_i32_144 : i32
      %201 = arith.index_cast %200 : i32 to index
      %c0_145 = arith.constant 0 : index
      %202 = vector.load %arg18[%201, %c0_145] : memref<1376x64xf32, #tpu.memory_space<vmem>>, vector<40x64xf32>
      %cst_146 = arith.constant 0.000000e+00 : f32
      %203 = vector.shape_cast %44 : vector<40x1xi1> to vector<40x1xi1>
      %204 = vector.broadcast %203 : vector<40x1xi1> to vector<40x64xi1>
      %205 = vector.broadcast %cst_146 : f32 to vector<40x64xf32>
      %206 = arith.select %204, %205, %202 : vector<40x64xi1>, vector<40x64xf32>
      %c3_147 = arith.constant 3 : index
      %c0_148 = arith.constant 0 : index
      %c0_149 = arith.constant 0 : index
      %207 = vector.load %arg10[%c3_147, %c0_148, %c0_149] : memref<9x64x32xf32, #tpu.memory_space<vmem>>, vector<1x64x32xf32>
      %208 = vector.shape_cast %207 : vector<1x64x32xf32> to vector<64x32xf32>
      %cst_150 = arith.constant dense<0.000000e+00> : vector<40x32xf32>
      %209 = tpu.matmul %206, %208, %cst_150 {dimension_numbers = #tpu.dot_dimension_numbers<[1], [0], [0], [1], [0, 0, 1, 1], [], []>} : vector<40x64xf32>, vector<64x32xf32>, vector<40x32xf32> -> vector<40x32xf32>
      %210 = arith.addf %198, %209 : vector<40x32xf32>
      %c48_i32_151 = arith.constant 48 : i32
      %211 = arith.addi %164, %c48_i32_151 : i32
      %c0_i32_152 = arith.constant 0 : i32
      %212 = arith.addi %211, %c0_i32_152 : i32
      %213 = tpu.assume_multiple %212, 8 : i32
      %214 = arith.index_cast %213 : i32 to index
      %c0_153 = arith.constant 0 : index
      %215 = vector.load %arg18[%214, %c0_153] : memref<1376x64xf32, #tpu.memory_space<vmem>>, vector<40x64xf32>
      %c4_154 = arith.constant 4 : index
      %c0_155 = arith.constant 0 : index
      %c0_156 = arith.constant 0 : index
      %216 = vector.load %arg10[%c4_154, %c0_155, %c0_156] : memref<9x64x32xf32, #tpu.memory_space<vmem>>, vector<1x64x32xf32>
      %217 = vector.shape_cast %216 : vector<1x64x32xf32> to vector<64x32xf32>
      %cst_157 = arith.constant dense<0.000000e+00> : vector<40x32xf32>
      %218 = tpu.matmul %215, %217, %cst_157 {dimension_numbers = #tpu.dot_dimension_numbers<[1], [0], [0], [1], [0, 0, 1, 1], [], []>} : vector<40x64xf32>, vector<64x32xf32>, vector<40x32xf32> -> vector<40x32xf32>
      %219 = arith.addf %210, %218 : vector<40x32xf32>
      %c48_i32_158 = arith.constant 48 : i32
      %220 = arith.addi %164, %c48_i32_158 : i32
      %c1_i32_159 = arith.constant 1 : i32
      %221 = arith.addi %220, %c1_i32_159 : i32
      %222 = arith.index_cast %221 : i32 to index
      %c0_160 = arith.constant 0 : index
      %223 = vector.load %arg18[%222, %c0_160] : memref<1376x64xf32, #tpu.memory_space<vmem>>, vector<40x64xf32>
      %cst_161 = arith.constant 0.000000e+00 : f32
      %224 = vector.shape_cast %46 : vector<40x1xi1> to vector<40x1xi1>
      %225 = vector.broadcast %224 : vector<40x1xi1> to vector<40x64xi1>
      %226 = vector.broadcast %cst_161 : f32 to vector<40x64xf32>
      %227 = arith.select %225, %226, %223 : vector<40x64xi1>, vector<40x64xf32>
      %c5_162 = arith.constant 5 : index
      %c0_163 = arith.constant 0 : index
      %c0_164 = arith.constant 0 : index
      %228 = vector.load %arg10[%c5_162, %c0_163, %c0_164] : memref<9x64x32xf32, #tpu.memory_space<vmem>>, vector<1x64x32xf32>
      %229 = vector.shape_cast %228 : vector<1x64x32xf32> to vector<64x32xf32>
      %cst_165 = arith.constant dense<0.000000e+00> : vector<40x32xf32>
      %230 = tpu.matmul %227, %229, %cst_165 {dimension_numbers = #tpu.dot_dimension_numbers<[1], [0], [0], [1], [0, 0, 1, 1], [], []>} : vector<40x64xf32>, vector<64x32xf32>, vector<40x32xf32> -> vector<40x32xf32>
      %231 = arith.addf %219, %230 : vector<40x32xf32>
      %c48_i32_166 = arith.constant 48 : i32
      %232 = arith.addi %164, %c48_i32_166 : i32
      %c39_i32_167 = arith.constant 39 : i32
      %233 = arith.addi %232, %c39_i32_167 : i32
      %234 = arith.index_cast %233 : i32 to index
      %c0_168 = arith.constant 0 : index
      %235 = vector.load %arg18[%234, %c0_168] : memref<1376x64xf32, #tpu.memory_space<vmem>>, vector<40x64xf32>
      %cst_169 = arith.constant 0.000000e+00 : f32
      %236 = vector.shape_cast %44 : vector<40x1xi1> to vector<40x1xi1>
      %237 = vector.broadcast %236 : vector<40x1xi1> to vector<40x64xi1>
      %238 = vector.broadcast %cst_169 : f32 to vector<40x64xf32>
      %239 = arith.select %237, %238, %235 : vector<40x64xi1>, vector<40x64xf32>
      %c6_170 = arith.constant 6 : index
      %c0_171 = arith.constant 0 : index
      %c0_172 = arith.constant 0 : index
      %240 = vector.load %arg10[%c6_170, %c0_171, %c0_172] : memref<9x64x32xf32, #tpu.memory_space<vmem>>, vector<1x64x32xf32>
      %241 = vector.shape_cast %240 : vector<1x64x32xf32> to vector<64x32xf32>
      %cst_173 = arith.constant dense<0.000000e+00> : vector<40x32xf32>
      %242 = tpu.matmul %239, %241, %cst_173 {dimension_numbers = #tpu.dot_dimension_numbers<[1], [0], [0], [1], [0, 0, 1, 1], [], []>} : vector<40x64xf32>, vector<64x32xf32>, vector<40x32xf32> -> vector<40x32xf32>
      %243 = arith.addf %231, %242 : vector<40x32xf32>
      %c48_i32_174 = arith.constant 48 : i32
      %244 = arith.addi %164, %c48_i32_174 : i32
      %c40_i32_175 = arith.constant 40 : i32
      %245 = arith.addi %244, %c40_i32_175 : i32
      %246 = tpu.assume_multiple %245, 8 : i32
      %247 = arith.index_cast %246 : i32 to index
      %c0_176 = arith.constant 0 : index
      %248 = vector.load %arg18[%247, %c0_176] : memref<1376x64xf32, #tpu.memory_space<vmem>>, vector<40x64xf32>
      %c7_177 = arith.constant 7 : index
      %c0_178 = arith.constant 0 : index
      %c0_179 = arith.constant 0 : index
      %249 = vector.load %arg10[%c7_177, %c0_178, %c0_179] : memref<9x64x32xf32, #tpu.memory_space<vmem>>, vector<1x64x32xf32>
      %250 = vector.shape_cast %249 : vector<1x64x32xf32> to vector<64x32xf32>
      %cst_180 = arith.constant dense<0.000000e+00> : vector<40x32xf32>
      %251 = tpu.matmul %248, %250, %cst_180 {dimension_numbers = #tpu.dot_dimension_numbers<[1], [0], [0], [1], [0, 0, 1, 1], [], []>} : vector<40x64xf32>, vector<64x32xf32>, vector<40x32xf32> -> vector<40x32xf32>
      %252 = arith.addf %243, %251 : vector<40x32xf32>
      %c48_i32_181 = arith.constant 48 : i32
      %253 = arith.addi %164, %c48_i32_181 : i32
      %c41_i32_182 = arith.constant 41 : i32
      %254 = arith.addi %253, %c41_i32_182 : i32
      %255 = arith.index_cast %254 : i32 to index
      %c0_183 = arith.constant 0 : index
      %256 = vector.load %arg18[%255, %c0_183] : memref<1376x64xf32, #tpu.memory_space<vmem>>, vector<40x64xf32>
      %cst_184 = arith.constant 0.000000e+00 : f32
      %257 = vector.shape_cast %46 : vector<40x1xi1> to vector<40x1xi1>
      %258 = vector.broadcast %257 : vector<40x1xi1> to vector<40x64xi1>
      %259 = vector.broadcast %cst_184 : f32 to vector<40x64xf32>
      %260 = arith.select %258, %259, %256 : vector<40x64xi1>, vector<40x64xf32>
      %c8_185 = arith.constant 8 : index
      %c0_186 = arith.constant 0 : index
      %c0_187 = arith.constant 0 : index
      %261 = vector.load %arg10[%c8_185, %c0_186, %c0_187] : memref<9x64x32xf32, #tpu.memory_space<vmem>>, vector<1x64x32xf32>
      %262 = vector.shape_cast %261 : vector<1x64x32xf32> to vector<64x32xf32>
      %cst_188 = arith.constant dense<0.000000e+00> : vector<40x32xf32>
      %263 = tpu.matmul %260, %262, %cst_188 {dimension_numbers = #tpu.dot_dimension_numbers<[1], [0], [0], [1], [0, 0, 1, 1], [], []>} : vector<40x64xf32>, vector<64x32xf32>, vector<40x32xf32> -> vector<40x32xf32>
      %264 = arith.addf %252, %263 : vector<40x32xf32>
      %265 = vector.broadcast %47 : vector<1x32xf32> to vector<40x32xf32>
      %266 = arith.addf %264, %265 : vector<40x32xf32>
      %cst_189 = arith.constant 0.000000e+00 : f32
      %267 = vector.broadcast %cst_189 : f32 to vector<40x32xf32>
      %268 = arith.maximumf %266, %267 : vector<40x32xf32>
      %269 = arith.maximumf %161, %268 : vector<40x32xf32>
      %c0_190 = arith.constant 0 : index
      %c0_191 = arith.constant 0 : index
      %270 = vector.load %arg21[%c0_190, %c0_191] : memref<40x32xf32, #tpu.memory_space<vmem>>, vector<40x32xf32>
      tpu.vector_store %arg21[%c0_190, %c0_191], %269 {strides = array<i32>} : memref<40x32xf32, #tpu.memory_space<vmem>>, vector<40x32xf32>,
      %c0_192 = arith.constant 0 : index
      %c0_193 = arith.constant 0 : index
      %271 = tpu.strided_load %arg21[%c0_192, %c0_193] {strides = array<i32: 2, 1>} : memref<40x32xf32, #tpu.memory_space<vmem>>, vector<20x32xf32>
      %c1_194 = arith.constant 1 : index
      %c0_195 = arith.constant 0 : index
      %272 = tpu.strided_load %arg21[%c1_194, %c0_195] {strides = array<i32: 2, 1>} : memref<40x32xf32, #tpu.memory_space<vmem>>, vector<20x32xf32>
      %c20_i32 = arith.constant 20 : i32
      %273 = arith.muli %arg23, %c20_i32 : i32
      %c24_i32 = arith.constant 24 : i32
      %274 = arith.addi %c24_i32, %273 : i32
      %275 = arith.maximumf %271, %272 : vector<20x32xf32>
      %276 = arith.index_cast %274 : i32 to index
      %c0_196 = arith.constant 0 : index
      %277 = vector.load %arg19[%276, %c0_196] : memref<368x32xf32, #tpu.memory_space<vmem>>, vector<20x32xf32>
      tpu.vector_store %arg19[%276, %c0_196], %275 {strides = array<i32>} : memref<368x32xf32, #tpu.memory_space<vmem>>, vector<20x32xf32>,
    }
    %c16_i32_52 = arith.constant 16 : i32
    %49 = tpu.iota {dimensions = array<i32: 0>} : vector<20x1xi32>
    %c0_i32_53 = arith.constant 0 : i32
    %50 = vector.broadcast %c0_i32_53 : i32 to vector<20x1xi32>
    %51 = arith.cmpi eq, %49, %50 : vector<20x1xi32>
    %c19_i32 = arith.constant 19 : i32
    %52 = vector.broadcast %c19_i32 : i32 to vector<20x1xi32>
    %53 = arith.cmpi eq, %49, %52 : vector<20x1xi32>
    %c0_54 = arith.constant 0 : index
    %c0_55 = arith.constant 0 : index
    %54 = vector.load %arg13[%c0_54, %c0_55] : memref<1x16xf32, #tpu.memory_space<vmem>>, vector<1x16xf32>
    %c0_i32_56 = arith.constant 0 : i32
    %c8_i32 = arith.constant 8 : i32
    %55 = arith.addi %c0_i32_56, %c8_i32 : i32
    %c1_i32_57 = arith.constant 1 : i32
    scf.for %arg23 = %c0_i32_56 to %55 step %c1_i32_57  : i32 {
      %c2_i32 = arith.constant 2 : i32
      %56 = arith.muli %c2_i32, %arg23 : i32
      %c20_i32 = arith.constant 20 : i32
      %57 = arith.muli %56, %c20_i32 : i32
      %cst_59 = arith.constant 0.000000e+00 : f32
      %58 = vector.broadcast %cst_59 : f32 to vector<20x16xf32>
      %c24_i32 = arith.constant 24 : i32
      %59 = arith.addi %57, %c24_i32 : i32
      %c-21_i32 = arith.constant -21 : i32
      %60 = arith.addi %59, %c-21_i32 : i32
      %61 = arith.index_cast %60 : i32 to index
      %c0_60 = arith.constant 0 : index
      %62 = vector.load %arg19[%61, %c0_60] : memref<368x32xf32, #tpu.memory_space<vmem>>, vector<20x32xf32>
      %cst_61 = arith.constant 0.000000e+00 : f32
      %63 = vector.shape_cast %51 : vector<20x1xi1> to vector<20x1xi1>
      %64 = vector.broadcast %63 : vector<20x1xi1> to vector<20x32xi1>
      %65 = vector.broadcast %cst_61 : f32 to vector<20x32xf32>
      %66 = arith.select %64, %65, %62 : vector<20x32xi1>, vector<20x32xf32>
      %c0_62 = arith.constant 0 : index
      %c0_63 = arith.constant 0 : index
      %c0_64 = arith.constant 0 : index
      %67 = vector.load %arg12[%c0_62, %c0_63, %c0_64] : memref<9x32x16xf32, #tpu.memory_space<vmem>>, vector<1x32x16xf32>
      %68 = vector.shape_cast %67 : vector<1x32x16xf32> to vector<32x16xf32>
      %cst_65 = arith.constant dense<0.000000e+00> : vector<20x16xf32>
      %69 = tpu.matmul %66, %68, %cst_65 {dimension_numbers = #tpu.dot_dimension_numbers<[1], [0], [0], [1], [0, 0, 1, 1], [], []>} : vector<20x32xf32>, vector<32x16xf32>, vector<20x16xf32> -> vector<20x16xf32>
      %70 = arith.addf %58, %69 : vector<20x16xf32>
      %c24_i32_66 = arith.constant 24 : i32
      %71 = arith.addi %57, %c24_i32_66 : i32
      %c-20_i32 = arith.constant -20 : i32
      %72 = arith.addi %71, %c-20_i32 : i32
      %73 = arith.index_cast %72 : i32 to index
      %c0_67 = arith.constant 0 : index
      %74 = vector.load %arg19[%73, %c0_67] : memref<368x32xf32, #tpu.memory_space<vmem>>, vector<20x32xf32>
      %c1 = arith.constant 1 : index
      %c0_68 = arith.constant 0 : index
      %c0_69 = arith.constant 0 : index
      %75 = vector.load %arg12[%c1, %c0_68, %c0_69] : memref<9x32x16xf32, #tpu.memory_space<vmem>>, vector<1x32x16xf32>
      %76 = vector.shape_cast %75 : vector<1x32x16xf32> to vector<32x16xf32>
      %cst_70 = arith.constant dense<0.000000e+00> : vector<20x16xf32>
      %77 = tpu.matmul %74, %76, %cst_70 {dimension_numbers = #tpu.dot_dimension_numbers<[1], [0], [0], [1], [0, 0, 1, 1], [], []>} : vector<20x32xf32>, vector<32x16xf32>, vector<20x16xf32> -> vector<20x16xf32>
      %78 = arith.addf %70, %77 : vector<20x16xf32>
      %c24_i32_71 = arith.constant 24 : i32
      %79 = arith.addi %57, %c24_i32_71 : i32
      %c-19_i32 = arith.constant -19 : i32
      %80 = arith.addi %79, %c-19_i32 : i32
      %81 = arith.index_cast %80 : i32 to index
      %c0_72 = arith.constant 0 : index
      %82 = vector.load %arg19[%81, %c0_72] : memref<368x32xf32, #tpu.memory_space<vmem>>, vector<20x32xf32>
      %cst_73 = arith.constant 0.000000e+00 : f32
      %83 = vector.shape_cast %53 : vector<20x1xi1> to vector<20x1xi1>
      %84 = vector.broadcast %83 : vector<20x1xi1> to vector<20x32xi1>
      %85 = vector.broadcast %cst_73 : f32 to vector<20x32xf32>
      %86 = arith.select %84, %85, %82 : vector<20x32xi1>, vector<20x32xf32>
      %c2 = arith.constant 2 : index
      %c0_74 = arith.constant 0 : index
      %c0_75 = arith.constant 0 : index
      %87 = vector.load %arg12[%c2, %c0_74, %c0_75] : memref<9x32x16xf32, #tpu.memory_space<vmem>>, vector<1x32x16xf32>
      %88 = vector.shape_cast %87 : vector<1x32x16xf32> to vector<32x16xf32>
      %cst_76 = arith.constant dense<0.000000e+00> : vector<20x16xf32>
      %89 = tpu.matmul %86, %88, %cst_76 {dimension_numbers = #tpu.dot_dimension_numbers<[1], [0], [0], [1], [0, 0, 1, 1], [], []>} : vector<20x32xf32>, vector<32x16xf32>, vector<20x16xf32> -> vector<20x16xf32>
      %90 = arith.addf %78, %89 : vector<20x16xf32>
      %c24_i32_77 = arith.constant 24 : i32
      %91 = arith.addi %57, %c24_i32_77 : i32
      %c-1_i32 = arith.constant -1 : i32
      %92 = arith.addi %91, %c-1_i32 : i32
      %93 = arith.index_cast %92 : i32 to index
      %c0_78 = arith.constant 0 : index
      %94 = vector.load %arg19[%93, %c0_78] : memref<368x32xf32, #tpu.memory_space<vmem>>, vector<20x32xf32>
      %cst_79 = arith.constant 0.000000e+00 : f32
      %95 = vector.shape_cast %51 : vector<20x1xi1> to vector<20x1xi1>
      %96 = vector.broadcast %95 : vector<20x1xi1> to vector<20x32xi1>
      %97 = vector.broadcast %cst_79 : f32 to vector<20x32xf32>
      %98 = arith.select %96, %97, %94 : vector<20x32xi1>, vector<20x32xf32>
      %c3 = arith.constant 3 : index
      %c0_80 = arith.constant 0 : index
      %c0_81 = arith.constant 0 : index
      %99 = vector.load %arg12[%c3, %c0_80, %c0_81] : memref<9x32x16xf32, #tpu.memory_space<vmem>>, vector<1x32x16xf32>
      %100 = vector.shape_cast %99 : vector<1x32x16xf32> to vector<32x16xf32>
      %cst_82 = arith.constant dense<0.000000e+00> : vector<20x16xf32>
      %101 = tpu.matmul %98, %100, %cst_82 {dimension_numbers = #tpu.dot_dimension_numbers<[1], [0], [0], [1], [0, 0, 1, 1], [], []>} : vector<20x32xf32>, vector<32x16xf32>, vector<20x16xf32> -> vector<20x16xf32>
      %102 = arith.addf %90, %101 : vector<20x16xf32>
      %c24_i32_83 = arith.constant 24 : i32
      %103 = arith.addi %57, %c24_i32_83 : i32
      %c0_i32_84 = arith.constant 0 : i32
      %104 = arith.addi %103, %c0_i32_84 : i32
      %105 = arith.index_cast %104 : i32 to index
      %c0_85 = arith.constant 0 : index
      %106 = vector.load %arg19[%105, %c0_85] : memref<368x32xf32, #tpu.memory_space<vmem>>, vector<20x32xf32>
      %c4 = arith.constant 4 : index
      %c0_86 = arith.constant 0 : index
      %c0_87 = arith.constant 0 : index
      %107 = vector.load %arg12[%c4, %c0_86, %c0_87] : memref<9x32x16xf32, #tpu.memory_space<vmem>>, vector<1x32x16xf32>
      %108 = vector.shape_cast %107 : vector<1x32x16xf32> to vector<32x16xf32>
      %cst_88 = arith.constant dense<0.000000e+00> : vector<20x16xf32>
      %109 = tpu.matmul %106, %108, %cst_88 {dimension_numbers = #tpu.dot_dimension_numbers<[1], [0], [0], [1], [0, 0, 1, 1], [], []>} : vector<20x32xf32>, vector<32x16xf32>, vector<20x16xf32> -> vector<20x16xf32>
      %110 = arith.addf %102, %109 : vector<20x16xf32>
      %c24_i32_89 = arith.constant 24 : i32
      %111 = arith.addi %57, %c24_i32_89 : i32
      %c1_i32_90 = arith.constant 1 : i32
      %112 = arith.addi %111, %c1_i32_90 : i32
      %113 = arith.index_cast %112 : i32 to index
      %c0_91 = arith.constant 0 : index
      %114 = vector.load %arg19[%113, %c0_91] : memref<368x32xf32, #tpu.memory_space<vmem>>, vector<20x32xf32>
      %cst_92 = arith.constant 0.000000e+00 : f32
      %115 = vector.shape_cast %53 : vector<20x1xi1> to vector<20x1xi1>
      %116 = vector.broadcast %115 : vector<20x1xi1> to vector<20x32xi1>
      %117 = vector.broadcast %cst_92 : f32 to vector<20x32xf32>
      %118 = arith.select %116, %117, %114 : vector<20x32xi1>, vector<20x32xf32>
      %c5 = arith.constant 5 : index
      %c0_93 = arith.constant 0 : index
      %c0_94 = arith.constant 0 : index
      %119 = vector.load %arg12[%c5, %c0_93, %c0_94] : memref<9x32x16xf32, #tpu.memory_space<vmem>>, vector<1x32x16xf32>
      %120 = vector.shape_cast %119 : vector<1x32x16xf32> to vector<32x16xf32>
      %cst_95 = arith.constant dense<0.000000e+00> : vector<20x16xf32>
      %121 = tpu.matmul %118, %120, %cst_95 {dimension_numbers = #tpu.dot_dimension_numbers<[1], [0], [0], [1], [0, 0, 1, 1], [], []>} : vector<20x32xf32>, vector<32x16xf32>, vector<20x16xf32> -> vector<20x16xf32>
      %122 = arith.addf %110, %121 : vector<20x16xf32>
      %c24_i32_96 = arith.constant 24 : i32
      %123 = arith.addi %57, %c24_i32_96 : i32
      %c19_i32_97 = arith.constant 19 : i32
      %124 = arith.addi %123, %c19_i32_97 : i32
      %125 = arith.index_cast %124 : i32 to index
      %c0_98 = arith.constant 0 : index
      %126 = vector.load %arg19[%125, %c0_98] : memref<368x32xf32, #tpu.memory_space<vmem>>, vector<20x32xf32>
      %cst_99 = arith.constant 0.000000e+00 : f32
      %127 = vector.shape_cast %51 : vector<20x1xi1> to vector<20x1xi1>
      %128 = vector.broadcast %127 : vector<20x1xi1> to vector<20x32xi1>
      %129 = vector.broadcast %cst_99 : f32 to vector<20x32xf32>
      %130 = arith.select %128, %129, %126 : vector<20x32xi1>, vector<20x32xf32>
      %c6 = arith.constant 6 : index
      %c0_100 = arith.constant 0 : index
      %c0_101 = arith.constant 0 : index
      %131 = vector.load %arg12[%c6, %c0_100, %c0_101] : memref<9x32x16xf32, #tpu.memory_space<vmem>>, vector<1x32x16xf32>
      %132 = vector.shape_cast %131 : vector<1x32x16xf32> to vector<32x16xf32>
      %cst_102 = arith.constant dense<0.000000e+00> : vector<20x16xf32>
      %133 = tpu.matmul %130, %132, %cst_102 {dimension_numbers = #tpu.dot_dimension_numbers<[1], [0], [0], [1], [0, 0, 1, 1], [], []>} : vector<20x32xf32>, vector<32x16xf32>, vector<20x16xf32> -> vector<20x16xf32>
      %134 = arith.addf %122, %133 : vector<20x16xf32>
      %c24_i32_103 = arith.constant 24 : i32
      %135 = arith.addi %57, %c24_i32_103 : i32
      %c20_i32_104 = arith.constant 20 : i32
      %136 = arith.addi %135, %c20_i32_104 : i32
      %137 = arith.index_cast %136 : i32 to index
      %c0_105 = arith.constant 0 : index
      %138 = vector.load %arg19[%137, %c0_105] : memref<368x32xf32, #tpu.memory_space<vmem>>, vector<20x32xf32>
      %c7 = arith.constant 7 : index
      %c0_106 = arith.constant 0 : index
      %c0_107 = arith.constant 0 : index
      %139 = vector.load %arg12[%c7, %c0_106, %c0_107] : memref<9x32x16xf32, #tpu.memory_space<vmem>>, vector<1x32x16xf32>
      %140 = vector.shape_cast %139 : vector<1x32x16xf32> to vector<32x16xf32>
      %cst_108 = arith.constant dense<0.000000e+00> : vector<20x16xf32>
      %141 = tpu.matmul %138, %140, %cst_108 {dimension_numbers = #tpu.dot_dimension_numbers<[1], [0], [0], [1], [0, 0, 1, 1], [], []>} : vector<20x32xf32>, vector<32x16xf32>, vector<20x16xf32> -> vector<20x16xf32>
      %142 = arith.addf %134, %141 : vector<20x16xf32>
      %c24_i32_109 = arith.constant 24 : i32
      %143 = arith.addi %57, %c24_i32_109 : i32
      %c21_i32 = arith.constant 21 : i32
      %144 = arith.addi %143, %c21_i32 : i32
      %145 = arith.index_cast %144 : i32 to index
      %c0_110 = arith.constant 0 : index
      %146 = vector.load %arg19[%145, %c0_110] : memref<368x32xf32, #tpu.memory_space<vmem>>, vector<20x32xf32>
      %cst_111 = arith.constant 0.000000e+00 : f32
      %147 = vector.shape_cast %53 : vector<20x1xi1> to vector<20x1xi1>
      %148 = vector.broadcast %147 : vector<20x1xi1> to vector<20x32xi1>
      %149 = vector.broadcast %cst_111 : f32 to vector<20x32xf32>
      %150 = arith.select %148, %149, %146 : vector<20x32xi1>, vector<20x32xf32>
      %c8 = arith.constant 8 : index
      %c0_112 = arith.constant 0 : index
      %c0_113 = arith.constant 0 : index
      %151 = vector.load %arg12[%c8, %c0_112, %c0_113] : memref<9x32x16xf32, #tpu.memory_space<vmem>>, vector<1x32x16xf32>
      %152 = vector.shape_cast %151 : vector<1x32x16xf32> to vector<32x16xf32>
      %cst_114 = arith.constant dense<0.000000e+00> : vector<20x16xf32>
      %153 = tpu.matmul %150, %152, %cst_114 {dimension_numbers = #tpu.dot_dimension_numbers<[1], [0], [0], [1], [0, 0, 1, 1], [], []>} : vector<20x32xf32>, vector<32x16xf32>, vector<20x16xf32> -> vector<20x16xf32>
      %154 = arith.addf %142, %153 : vector<20x16xf32>
      %155 = vector.broadcast %54 : vector<1x16xf32> to vector<20x16xf32>
      %156 = arith.addf %154, %155 : vector<20x16xf32>
      %cst_115 = arith.constant 0.000000e+00 : f32
      %157 = vector.broadcast %cst_115 : f32 to vector<20x16xf32>
      %158 = arith.maximumf %156, %157 : vector<20x16xf32>
      %c2_i32_116 = arith.constant 2 : i32
      %159 = arith.muli %c2_i32_116, %arg23 : i32
      %c1_i32_117 = arith.constant 1 : i32
      %160 = arith.addi %159, %c1_i32_117 : i32
      %c20_i32_118 = arith.constant 20 : i32
      %161 = arith.muli %160, %c20_i32_118 : i32
      %cst_119 = arith.constant 0.000000e+00 : f32
      %162 = vector.broadcast %cst_119 : f32 to vector<20x16xf32>
      %c24_i32_120 = arith.constant 24 : i32
      %163 = arith.addi %161, %c24_i32_120 : i32
      %c-21_i32_121 = arith.constant -21 : i32
      %164 = arith.addi %163, %c-21_i32_121 : i32
      %165 = arith.index_cast %164 : i32 to index
      %c0_122 = arith.constant 0 : index
      %166 = vector.load %arg19[%165, %c0_122] : memref<368x32xf32, #tpu.memory_space<vmem>>, vector<20x32xf32>
      %cst_123 = arith.constant 0.000000e+00 : f32
      %167 = vector.shape_cast %51 : vector<20x1xi1> to vector<20x1xi1>
      %168 = vector.broadcast %167 : vector<20x1xi1> to vector<20x32xi1>
      %169 = vector.broadcast %cst_123 : f32 to vector<20x32xf32>
      %170 = arith.select %168, %169, %166 : vector<20x32xi1>, vector<20x32xf32>
      %c0_124 = arith.constant 0 : index
      %c0_125 = arith.constant 0 : index
      %c0_126 = arith.constant 0 : index
      %171 = vector.load %arg12[%c0_124, %c0_125, %c0_126] : memref<9x32x16xf32, #tpu.memory_space<vmem>>, vector<1x32x16xf32>
      %172 = vector.shape_cast %171 : vector<1x32x16xf32> to vector<32x16xf32>
      %cst_127 = arith.constant dense<0.000000e+00> : vector<20x16xf32>
      %173 = tpu.matmul %170, %172, %cst_127 {dimension_numbers = #tpu.dot_dimension_numbers<[1], [0], [0], [1], [0, 0, 1, 1], [], []>} : vector<20x32xf32>, vector<32x16xf32>, vector<20x16xf32> -> vector<20x16xf32>
      %174 = arith.addf %162, %173 : vector<20x16xf32>
      %c24_i32_128 = arith.constant 24 : i32
      %175 = arith.addi %161, %c24_i32_128 : i32
      %c-20_i32_129 = arith.constant -20 : i32
      %176 = arith.addi %175, %c-20_i32_129 : i32
      %177 = arith.index_cast %176 : i32 to index
      %c0_130 = arith.constant 0 : index
      %178 = vector.load %arg19[%177, %c0_130] : memref<368x32xf32, #tpu.memory_space<vmem>>, vector<20x32xf32>
      %c1_131 = arith.constant 1 : index
      %c0_132 = arith.constant 0 : index
      %c0_133 = arith.constant 0 : index
      %179 = vector.load %arg12[%c1_131, %c0_132, %c0_133] : memref<9x32x16xf32, #tpu.memory_space<vmem>>, vector<1x32x16xf32>
      %180 = vector.shape_cast %179 : vector<1x32x16xf32> to vector<32x16xf32>
      %cst_134 = arith.constant dense<0.000000e+00> : vector<20x16xf32>
      %181 = tpu.matmul %178, %180, %cst_134 {dimension_numbers = #tpu.dot_dimension_numbers<[1], [0], [0], [1], [0, 0, 1, 1], [], []>} : vector<20x32xf32>, vector<32x16xf32>, vector<20x16xf32> -> vector<20x16xf32>
      %182 = arith.addf %174, %181 : vector<20x16xf32>
      %c24_i32_135 = arith.constant 24 : i32
      %183 = arith.addi %161, %c24_i32_135 : i32
      %c-19_i32_136 = arith.constant -19 : i32
      %184 = arith.addi %183, %c-19_i32_136 : i32
      %185 = arith.index_cast %184 : i32 to index
      %c0_137 = arith.constant 0 : index
      %186 = vector.load %arg19[%185, %c0_137] : memref<368x32xf32, #tpu.memory_space<vmem>>, vector<20x32xf32>
      %cst_138 = arith.constant 0.000000e+00 : f32
      %187 = vector.shape_cast %53 : vector<20x1xi1> to vector<20x1xi1>
      %188 = vector.broadcast %187 : vector<20x1xi1> to vector<20x32xi1>
      %189 = vector.broadcast %cst_138 : f32 to vector<20x32xf32>
      %190 = arith.select %188, %189, %186 : vector<20x32xi1>, vector<20x32xf32>
      %c2_139 = arith.constant 2 : index
      %c0_140 = arith.constant 0 : index
      %c0_141 = arith.constant 0 : index
      %191 = vector.load %arg12[%c2_139, %c0_140, %c0_141] : memref<9x32x16xf32, #tpu.memory_space<vmem>>, vector<1x32x16xf32>
      %192 = vector.shape_cast %191 : vector<1x32x16xf32> to vector<32x16xf32>
      %cst_142 = arith.constant dense<0.000000e+00> : vector<20x16xf32>
      %193 = tpu.matmul %190, %192, %cst_142 {dimension_numbers = #tpu.dot_dimension_numbers<[1], [0], [0], [1], [0, 0, 1, 1], [], []>} : vector<20x32xf32>, vector<32x16xf32>, vector<20x16xf32> -> vector<20x16xf32>
      %194 = arith.addf %182, %193 : vector<20x16xf32>
      %c24_i32_143 = arith.constant 24 : i32
      %195 = arith.addi %161, %c24_i32_143 : i32
      %c-1_i32_144 = arith.constant -1 : i32
      %196 = arith.addi %195, %c-1_i32_144 : i32
      %197 = arith.index_cast %196 : i32 to index
      %c0_145 = arith.constant 0 : index
      %198 = vector.load %arg19[%197, %c0_145] : memref<368x32xf32, #tpu.memory_space<vmem>>, vector<20x32xf32>
      %cst_146 = arith.constant 0.000000e+00 : f32
      %199 = vector.shape_cast %51 : vector<20x1xi1> to vector<20x1xi1>
      %200 = vector.broadcast %199 : vector<20x1xi1> to vector<20x32xi1>
      %201 = vector.broadcast %cst_146 : f32 to vector<20x32xf32>
      %202 = arith.select %200, %201, %198 : vector<20x32xi1>, vector<20x32xf32>
      %c3_147 = arith.constant 3 : index
      %c0_148 = arith.constant 0 : index
      %c0_149 = arith.constant 0 : index
      %203 = vector.load %arg12[%c3_147, %c0_148, %c0_149] : memref<9x32x16xf32, #tpu.memory_space<vmem>>, vector<1x32x16xf32>
      %204 = vector.shape_cast %203 : vector<1x32x16xf32> to vector<32x16xf32>
      %cst_150 = arith.constant dense<0.000000e+00> : vector<20x16xf32>
      %205 = tpu.matmul %202, %204, %cst_150 {dimension_numbers = #tpu.dot_dimension_numbers<[1], [0], [0], [1], [0, 0, 1, 1], [], []>} : vector<20x32xf32>, vector<32x16xf32>, vector<20x16xf32> -> vector<20x16xf32>
      %206 = arith.addf %194, %205 : vector<20x16xf32>
      %c24_i32_151 = arith.constant 24 : i32
      %207 = arith.addi %161, %c24_i32_151 : i32
      %c0_i32_152 = arith.constant 0 : i32
      %208 = arith.addi %207, %c0_i32_152 : i32
      %209 = arith.index_cast %208 : i32 to index
      %c0_153 = arith.constant 0 : index
      %210 = vector.load %arg19[%209, %c0_153] : memref<368x32xf32, #tpu.memory_space<vmem>>, vector<20x32xf32>
      %c4_154 = arith.constant 4 : index
      %c0_155 = arith.constant 0 : index
      %c0_156 = arith.constant 0 : index
      %211 = vector.load %arg12[%c4_154, %c0_155, %c0_156] : memref<9x32x16xf32, #tpu.memory_space<vmem>>, vector<1x32x16xf32>
      %212 = vector.shape_cast %211 : vector<1x32x16xf32> to vector<32x16xf32>
      %cst_157 = arith.constant dense<0.000000e+00> : vector<20x16xf32>
      %213 = tpu.matmul %210, %212, %cst_157 {dimension_numbers = #tpu.dot_dimension_numbers<[1], [0], [0], [1], [0, 0, 1, 1], [], []>} : vector<20x32xf32>, vector<32x16xf32>, vector<20x16xf32> -> vector<20x16xf32>
      %214 = arith.addf %206, %213 : vector<20x16xf32>
      %c24_i32_158 = arith.constant 24 : i32
      %215 = arith.addi %161, %c24_i32_158 : i32
      %c1_i32_159 = arith.constant 1 : i32
      %216 = arith.addi %215, %c1_i32_159 : i32
      %217 = arith.index_cast %216 : i32 to index
      %c0_160 = arith.constant 0 : index
      %218 = vector.load %arg19[%217, %c0_160] : memref<368x32xf32, #tpu.memory_space<vmem>>, vector<20x32xf32>
      %cst_161 = arith.constant 0.000000e+00 : f32
      %219 = vector.shape_cast %53 : vector<20x1xi1> to vector<20x1xi1>
      %220 = vector.broadcast %219 : vector<20x1xi1> to vector<20x32xi1>
      %221 = vector.broadcast %cst_161 : f32 to vector<20x32xf32>
      %222 = arith.select %220, %221, %218 : vector<20x32xi1>, vector<20x32xf32>
      %c5_162 = arith.constant 5 : index
      %c0_163 = arith.constant 0 : index
      %c0_164 = arith.constant 0 : index
      %223 = vector.load %arg12[%c5_162, %c0_163, %c0_164] : memref<9x32x16xf32, #tpu.memory_space<vmem>>, vector<1x32x16xf32>
      %224 = vector.shape_cast %223 : vector<1x32x16xf32> to vector<32x16xf32>
      %cst_165 = arith.constant dense<0.000000e+00> : vector<20x16xf32>
      %225 = tpu.matmul %222, %224, %cst_165 {dimension_numbers = #tpu.dot_dimension_numbers<[1], [0], [0], [1], [0, 0, 1, 1], [], []>} : vector<20x32xf32>, vector<32x16xf32>, vector<20x16xf32> -> vector<20x16xf32>
      %226 = arith.addf %214, %225 : vector<20x16xf32>
      %c24_i32_166 = arith.constant 24 : i32
      %227 = arith.addi %161, %c24_i32_166 : i32
      %c19_i32_167 = arith.constant 19 : i32
      %228 = arith.addi %227, %c19_i32_167 : i32
      %229 = arith.index_cast %228 : i32 to index
      %c0_168 = arith.constant 0 : index
      %230 = vector.load %arg19[%229, %c0_168] : memref<368x32xf32, #tpu.memory_space<vmem>>, vector<20x32xf32>
      %cst_169 = arith.constant 0.000000e+00 : f32
      %231 = vector.shape_cast %51 : vector<20x1xi1> to vector<20x1xi1>
      %232 = vector.broadcast %231 : vector<20x1xi1> to vector<20x32xi1>
      %233 = vector.broadcast %cst_169 : f32 to vector<20x32xf32>
      %234 = arith.select %232, %233, %230 : vector<20x32xi1>, vector<20x32xf32>
      %c6_170 = arith.constant 6 : index
      %c0_171 = arith.constant 0 : index
      %c0_172 = arith.constant 0 : index
      %235 = vector.load %arg12[%c6_170, %c0_171, %c0_172] : memref<9x32x16xf32, #tpu.memory_space<vmem>>, vector<1x32x16xf32>
      %236 = vector.shape_cast %235 : vector<1x32x16xf32> to vector<32x16xf32>
      %cst_173 = arith.constant dense<0.000000e+00> : vector<20x16xf32>
      %237 = tpu.matmul %234, %236, %cst_173 {dimension_numbers = #tpu.dot_dimension_numbers<[1], [0], [0], [1], [0, 0, 1, 1], [], []>} : vector<20x32xf32>, vector<32x16xf32>, vector<20x16xf32> -> vector<20x16xf32>
      %238 = arith.addf %226, %237 : vector<20x16xf32>
      %c24_i32_174 = arith.constant 24 : i32
      %239 = arith.addi %161, %c24_i32_174 : i32
      %c20_i32_175 = arith.constant 20 : i32
      %240 = arith.addi %239, %c20_i32_175 : i32
      %241 = arith.index_cast %240 : i32 to index
      %c0_176 = arith.constant 0 : index
      %242 = vector.load %arg19[%241, %c0_176] : memref<368x32xf32, #tpu.memory_space<vmem>>, vector<20x32xf32>
      %c7_177 = arith.constant 7 : index
      %c0_178 = arith.constant 0 : index
      %c0_179 = arith.constant 0 : index
      %243 = vector.load %arg12[%c7_177, %c0_178, %c0_179] : memref<9x32x16xf32, #tpu.memory_space<vmem>>, vector<1x32x16xf32>
      %244 = vector.shape_cast %243 : vector<1x32x16xf32> to vector<32x16xf32>
      %cst_180 = arith.constant dense<0.000000e+00> : vector<20x16xf32>
      %245 = tpu.matmul %242, %244, %cst_180 {dimension_numbers = #tpu.dot_dimension_numbers<[1], [0], [0], [1], [0, 0, 1, 1], [], []>} : vector<20x32xf32>, vector<32x16xf32>, vector<20x16xf32> -> vector<20x16xf32>
      %246 = arith.addf %238, %245 : vector<20x16xf32>
      %c24_i32_181 = arith.constant 24 : i32
      %247 = arith.addi %161, %c24_i32_181 : i32
      %c21_i32_182 = arith.constant 21 : i32
      %248 = arith.addi %247, %c21_i32_182 : i32
      %249 = arith.index_cast %248 : i32 to index
      %c0_183 = arith.constant 0 : index
      %250 = vector.load %arg19[%249, %c0_183] : memref<368x32xf32, #tpu.memory_space<vmem>>, vector<20x32xf32>
      %cst_184 = arith.constant 0.000000e+00 : f32
      %251 = vector.shape_cast %53 : vector<20x1xi1> to vector<20x1xi1>
      %252 = vector.broadcast %251 : vector<20x1xi1> to vector<20x32xi1>
      %253 = vector.broadcast %cst_184 : f32 to vector<20x32xf32>
      %254 = arith.select %252, %253, %250 : vector<20x32xi1>, vector<20x32xf32>
      %c8_185 = arith.constant 8 : index
      %c0_186 = arith.constant 0 : index
      %c0_187 = arith.constant 0 : index
      %255 = vector.load %arg12[%c8_185, %c0_186, %c0_187] : memref<9x32x16xf32, #tpu.memory_space<vmem>>, vector<1x32x16xf32>
      %256 = vector.shape_cast %255 : vector<1x32x16xf32> to vector<32x16xf32>
      %cst_188 = arith.constant dense<0.000000e+00> : vector<20x16xf32>
      %257 = tpu.matmul %254, %256, %cst_188 {dimension_numbers = #tpu.dot_dimension_numbers<[1], [0], [0], [1], [0, 0, 1, 1], [], []>} : vector<20x32xf32>, vector<32x16xf32>, vector<20x16xf32> -> vector<20x16xf32>
      %258 = arith.addf %246, %257 : vector<20x16xf32>
      %259 = vector.broadcast %54 : vector<1x16xf32> to vector<20x16xf32>
      %260 = arith.addf %258, %259 : vector<20x16xf32>
      %cst_189 = arith.constant 0.000000e+00 : f32
      %261 = vector.broadcast %cst_189 : f32 to vector<20x16xf32>
      %262 = arith.maximumf %260, %261 : vector<20x16xf32>
      %263 = arith.maximumf %158, %262 : vector<20x16xf32>
      %c0_190 = arith.constant 0 : index
      %c0_191 = arith.constant 0 : index
      %264 = vector.load %arg22[%c0_190, %c0_191] : memref<20x16xf32, #tpu.memory_space<vmem>>, vector<20x16xf32>
      tpu.vector_store %arg22[%c0_190, %c0_191], %263 {strides = array<i32>} : memref<20x16xf32, #tpu.memory_space<vmem>>, vector<20x16xf32>,
      %c0_192 = arith.constant 0 : index
      %c0_193 = arith.constant 0 : index
      %265 = tpu.strided_load %arg22[%c0_192, %c0_193] {strides = array<i32: 2, 1>} : memref<20x16xf32, #tpu.memory_space<vmem>>, vector<10x16xf32>
      %c1_194 = arith.constant 1 : index
      %c0_195 = arith.constant 0 : index
      %266 = tpu.strided_load %arg22[%c1_194, %c0_195] {strides = array<i32: 2, 1>} : memref<20x16xf32, #tpu.memory_space<vmem>>, vector<10x16xf32>
      %c10_i32 = arith.constant 10 : i32
      %267 = arith.muli %arg23, %c10_i32 : i32
      %c0_i32_196 = arith.constant 0 : i32
      %268 = arith.addi %c0_i32_196, %267 : i32
      %269 = arith.maximumf %265, %266 : vector<10x16xf32>
      %c0_197 = arith.constant 0 : index
      %270 = arith.index_cast %268 : i32 to index
      %c0_198 = arith.constant 0 : index
      %271 = vector.load %arg14[%c0_197, %270, %c0_198] : memref<1x80x16xf32, #tpu.memory_space<vmem>>, vector<1x10x16xf32>
      %272 = vector.shape_cast %271 : vector<1x10x16xf32> to vector<10x16xf32>
      %273 = vector.shape_cast %269 : vector<10x16xf32> to vector<1x10x16xf32>
      tpu.vector_store %arg14[%c0_197, %270, %c0_198], %273 {strides = array<i32>} : memref<1x80x16xf32, #tpu.memory_space<vmem>>, vector<1x10x16xf32>,
    }
    %c8_i32_58 = arith.constant 8 : i32
    return
  }
  func.func @transform_0(%arg0: i32) -> (i32, i32, i32) {
    %c0_i32 = arith.constant 0 : i32
    %c0_i32_0 = arith.constant 0 : i32
    %c0_i32_1 = arith.constant 0 : i32
    return %arg0, %c0_i32, %c0_i32_0 : i32, i32, i32
  }
  func.func @transform_1(%arg0: i32) -> (i32, i32, i32) {
    %c0_i32 = arith.constant 0 : i32
    %c0_i32_0 = arith.constant 0 : i32
    %c0_i32_1 = arith.constant 0 : i32
    %c0_i32_2 = arith.constant 0 : i32
    return %c0_i32, %c0_i32_0, %c0_i32_1 : i32, i32, i32
  }
  func.func @transform_2(%arg0: i32) -> (i32, i32) {
    %c0_i32 = arith.constant 0 : i32
    %c0_i32_0 = arith.constant 0 : i32
    %c0_i32_1 = arith.constant 0 : i32
    return %c0_i32, %c0_i32_0 : i32, i32
  }
  func.func @transform_3(%arg0: i32) -> (i32, i32, i32) {
    %c0_i32 = arith.constant 0 : i32
    %c0_i32_0 = arith.constant 0 : i32
    %c0_i32_1 = arith.constant 0 : i32
    %c0_i32_2 = arith.constant 0 : i32
    return %c0_i32, %c0_i32_0, %c0_i32_1 : i32, i32, i32
  }
  func.func @transform_4(%arg0: i32) -> (i32, i32) {
    %c0_i32 = arith.constant 0 : i32
    %c0_i32_0 = arith.constant 0 : i32
    %c0_i32_1 = arith.constant 0 : i32
    return %c0_i32, %c0_i32_0 : i32, i32
  }
  func.func @transform_5(%arg0: i32) -> (i32, i32, i32) {
    %c0_i32 = arith.constant 0 : i32
    %c0_i32_0 = arith.constant 0 : i32
    %c0_i32_1 = arith.constant 0 : i32
    %c0_i32_2 = arith.constant 0 : i32
    return %c0_i32, %c0_i32_0, %c0_i32_1 : i32, i32, i32
  }
  func.func @transform_6(%arg0: i32) -> (i32, i32) {
    %c0_i32 = arith.constant 0 : i32
    %c0_i32_0 = arith.constant 0 : i32
    %c0_i32_1 = arith.constant 0 : i32
    return %c0_i32, %c0_i32_0 : i32, i32
  }
  func.func @transform_7(%arg0: i32) -> (i32, i32, i32) {
    %c0_i32 = arith.constant 0 : i32
    %c0_i32_0 = arith.constant 0 : i32
    %c0_i32_1 = arith.constant 0 : i32
    %c0_i32_2 = arith.constant 0 : i32
    return %c0_i32, %c0_i32_0, %c0_i32_1 : i32, i32, i32
  }
  func.func @transform_8(%arg0: i32) -> (i32, i32) {
    %c0_i32 = arith.constant 0 : i32
    %c0_i32_0 = arith.constant 0 : i32
    %c0_i32_1 = arith.constant 0 : i32
    return %c0_i32, %c0_i32_0 : i32, i32
  }
  func.func @transform_9(%arg0: i32) -> (i32, i32, i32) {
    %c0_i32 = arith.constant 0 : i32
    %c0_i32_0 = arith.constant 0 : i32
    %c0_i32_1 = arith.constant 0 : i32
    %c0_i32_2 = arith.constant 0 : i32
    return %c0_i32, %c0_i32_0, %c0_i32_1 : i32, i32, i32
  }
  func.func @transform_10(%arg0: i32) -> (i32, i32) {
    %c0_i32 = arith.constant 0 : i32
    %c0_i32_0 = arith.constant 0 : i32
    %c0_i32_1 = arith.constant 0 : i32
    return %c0_i32, %c0_i32_0 : i32, i32
  }
  func.func @transform_11(%arg0: i32) -> (i32, i32, i32) {
    %c0_i32 = arith.constant 0 : i32
    %c0_i32_0 = arith.constant 0 : i32
    %c0_i32_1 = arith.constant 0 : i32
    %c0_i32_2 = arith.constant 0 : i32
    return %c0_i32, %c0_i32_0, %c0_i32_1 : i32, i32, i32
  }
  func.func @transform_12(%arg0: i32) -> (i32, i32) {
    %c0_i32 = arith.constant 0 : i32
    %c0_i32_0 = arith.constant 0 : i32
    %c0_i32_1 = arith.constant 0 : i32
    return %c0_i32, %c0_i32_0 : i32, i32
  }
  func.func @transform_13(%arg0: i32) -> (i32, i32, i32) {
    %c0_i32 = arith.constant 0 : i32
    %c0_i32_0 = arith.constant 0 : i32
    %c0_i32_1 = arith.constant 0 : i32
    return %arg0, %c0_i32, %c0_i32_0 : i32, i32, i32
  }
}

</mosaic_0001>

<bundles_post_ra>
// kernel: tile.19
= control target key start
LH: loop header
LB: loop body
LE: loop exit
PB: predicated region body
PF: predicated region fallthrough
CT: control target
= control target key end

     0   :  { %s67_s10 = smov 112   ;;  %s68_s11 = smov 80   ;;  %vm3_vm0 = vcmask 130048   ;;  %vm9_vm1 = vcmask 1048448   ;;  %vm15_vm2 = vcmask 917248   ;;  %vm21_vm3 = vcmask 786048   ;;  %s111_s0 = inlined_call_operand.vmem [shape: f32[8,16], index: 0, kind: input, shape index: {}]   ;;  %s112_s1 = inlined_call_operand.vmem [shape: f32[1,128], index: 1, kind: output, shape index: {}]  }
   0x1   :  { %v53_v0 = vld [vmem:[%s111_s0 + $0x7] sm:$0x1]   ;;  %v55_v1 = vld [vmem:[%s111_s0 + $0x5] sm:$0x1]   ;;  %v54_v2 = vld [vmem:[%s111_s0 + $0x6] sm:$0x1]  }
   0x2   :  { %7 = vrot.lane.b32.xlu0 %v53_v0, %s67_s10  ;;  %19 = vrot.lane.b32.xlu1 %v55_v1, %s68_s11  ;;  %v56_v3 = vld [vmem:[%s111_s0 + $0x4] sm:$0x1]   ;;  %v2_v4 = vld [vmem:[%s111_s0] sm:$0x1]   ;;  %s69_s18 = smov 96   ;;  %s70_s19 = smov 64  }
   0x3   :  { %4 = vst.msk [vmem:[#allocation0] sm:$0x1] %vm3_vm0, %v2_v4   ;;  %v57_v5 = vld [vmem:[%s111_s0 + $0x3] sm:$0x1]   ;;  %v58_v6 = vld [vmem:[%s111_s0 + $0x2] sm:$0x1]  }
   0x4   :  { %s71_s24 = smov 48   ;;  %s72_s25 = smov 32   ;;  %v59_v7 = vld [vmem:[%s111_s0 + $0x1] sm:$0x1]   ;;  %vm27_vm4 = vcmask 654848   ;;  %vm33_vm5 = vcmask 523648  }
   0x5   :  { %s73_s0 = smov 16   ;;  %vm39_vm6 = vcmask 392448   ;;  %vm45_vm7 = vcmask 261248  }
   0x6   :  { %13 = vrot.lane.b32.xlu0 %v54_v2, %s69_s18  ;;  %25 = vrot.lane.b32.xlu1 %v56_v3, %s70_s19 }
   0xa   :  { %31 = vrot.lane.b32.xlu0 %v57_v5, %s71_s24  ;;  %37 = vrot.lane.b32.xlu1 %v58_v6, %s72_s25 }
   0xe   :  { %43 = vrot.lane.b32.xlu0 %v59_v7, %s73_s0 }
  0x74   :  { %v8_v8 = vpop.permute.xlu0 %7   ;;  %v20_v9 = vpop.permute.xlu1 %19  }
  0x75   :  { %10 = vst.msk [vmem:[#allocation0] sm:$0x1] %vm9_vm1, %v8_v8  }
  0x78   :  { %v14_v10 = vpop.permute.xlu0 %13   ;;  %v26_v11 = vpop.permute.xlu1 %25  }
  0x79   :  { %16 = vst.msk [vmem:[#allocation0] sm:$0x1] %vm15_vm2, %v14_v10  }
  0x7a   :  { %22 = vst.msk [vmem:[#allocation0] sm:$0x1] %vm21_vm3, %v20_v9  }
  0x7b   :  { %28 = vst.msk [vmem:[#allocation0] sm:$0x1] %vm27_vm4, %v26_v11  }
  0x7c   :  { %v32_v12 = vpop.permute.xlu0 %31   ;;  %v38_v13 = vpop.permute.xlu1 %37  }
  0x7d   :  { %34 = vst.msk [vmem:[#allocation0] sm:$0x1] %vm33_vm5, %v32_v12  }
  0x7e   :  { %40 = vst.msk [vmem:[#allocation0] sm:$0x1] %vm39_vm6, %v38_v13  }
  0x80   :  { %v44_v14 = vpop.permute.xlu0 %43  }
  0x81   :  { %46 = vst.msk [vmem:[#allocation0] sm:$0x1] %vm45_vm7, %v44_v14  }
  0x88   :  { %v50_v15 = vld [vmem:[#allocation0] sm:$0x1] }
  0x89   :  { %52 = vst [vmem:[%s112_s1] sm:$0x1] %v50_v15 }

// kernel: tile.18
= control target key start
LH: loop header
LB: loop body
LE: loop exit
PB: predicated region body
PF: predicated region fallthrough
CT: control target
= control target key end

     0   :  { %s22_s0 = inlined_call_operand.vmem [shape: f32[16], index: 0, kind: input, shape index: {}]   ;;  %s23_s1 = inlined_call_operand.vmem [shape: f32[8,16], index: 1, kind: output, shape index: {}]  }
   0x1   :  { %v4_v0 = vld [vmem:[%s22_s0] ss:$0 sm:$0xff] }
   0x2   :  { %5 = vst [vmem:[%s23_s1] sm:$0xff] %v4_v0 }

// kernel: tile.23
= control target key start
LH: loop header
LB: loop body
LE: loop exit
PB: predicated region body
PF: predicated region fallthrough
CT: control target
= control target key end

     0   :  { %s22_s0 = inlined_call_operand.vmem [shape: f32[32], index: 0, kind: input, shape index: {}]   ;;  %s23_s1 = inlined_call_operand.vmem [shape: f32[4,32], index: 1, kind: output, shape index: {}]  }
   0x1   :  { %v4_v0 = vld [vmem:[%s22_s0] ss:$0 sm:$0xff] }
   0x2   :  { %5 = vst [vmem:[%s23_s1] sm:$0xf] %v4_v0 }

// kernel: tile.24
= control target key start
LH: loop header
LB: loop body
LE: loop exit
PB: predicated region body
PF: predicated region fallthrough
CT: control target
= control target key end

     0   :  { %vm7_vm0 = vcmask 261120   ;;  %s37_s8 = smov 32   ;;  %s38_s9 = smov 64   ;;  %vm13_vm1 = vcmask 1048320   ;;  %vm19_vm2 = vcmask 785920   ;;  %vm25_vm3 = vcmask 523520   ;;  %s55_s0 = inlined_call_operand.vmem [shape: f32[4,32], index: 0, kind: input, shape index: {}]   ;;  %s56_s1 = inlined_call_operand.vmem [shape: f32[1,128], index: 1, kind: output, shape index: {}]  }
   0x1   :  { %v4_v0 = vld [vmem:[%s55_s0] sm:$0xf]  ;;  %s36_s0 = smov 96  }
   0x2   :  { %5 = vst [vmem:[#allocation1] sm:$0xf] %v4_v0 }
   0x9   :  { %v10_v1 = vld [vmem:[#allocation1 + $0x3] sm:$0x1]   ;;  %v22_v2 = vld [vmem:[#allocation1 + $0x1] sm:$0x1]   ;;  %v6_v3 = vld [vmem:[#allocation1] sm:$0x1]  }
   0xa   :  { %11 = vrot.lane.b32.xlu0 %v10_v1, %s36_s0  ;;  %23 = vrot.lane.b32.xlu1 %v22_v2, %s37_s8  ;;  %v16_v4 = vld [vmem:[#allocation1 + $0x2] sm:$0x1]   ;;  %8 = vst.msk [vmem:[#allocation0] sm:$0x1] %vm7_vm0, %v6_v3  }
   0xe   :  { %17 = vrot.lane.b32.xlu0 %v16_v4, %s38_s9 }
  0x7c   :  { %v12_v5 = vpop.permute.xlu0 %11   ;;  %v24_v6 = vpop.permute.xlu1 %23  }
  0x7d   :  { %14 = vst.msk [vmem:[#allocation0] sm:$0x1] %vm13_vm1, %v12_v5  }
  0x80   :  { %v18_v7 = vpop.permute.xlu0 %17  }
  0x81   :  { %20 = vst.msk [vmem:[#allocation0] sm:$0x1] %vm19_vm2, %v18_v7  }
  0x82   :  { %26 = vst.msk [vmem:[#allocation0] sm:$0x1] %vm25_vm3, %v24_v6  }
  0x89   :  { %v30_v8 = vld [vmem:[#allocation0] sm:$0x1] }
  0x8a   :  { %32 = vst [vmem:[%s56_s1] sm:$0x1] %v30_v8 }

// kernel: tile.28
= control target key start
LH: loop header
LB: loop body
LE: loop exit
PB: predicated region body
PF: predicated region fallthrough
CT: control target
= control target key end

     0   :  { %s22_s0 = inlined_call_operand.vmem [shape: f32[64], index: 0, kind: input, shape index: {}]   ;;  %s23_s1 = inlined_call_operand.vmem [shape: f32[2,64], index: 1, kind: output, shape index: {}]  }
   0x1   :  { %v4_v0 = vld [vmem:[%s22_s0] ss:$0 sm:$0xff] }
   0x2   :  { %5 = vst [vmem:[%s23_s1] sm:$0x3] %v4_v0 }

// kernel: tile.29
= control target key start
LH: loop header
LB: loop body
LE: loop exit
PB: predicated region body
PF: predicated region fallthrough
CT: control target
= control target key end

     0   :  { %vm7_vm0 = vcmask 523264   ;;  %vm13_vm1 = vcmask 1048064   ;;  %s39_s0 = inlined_call_operand.vmem [shape: f32[2,64], index: 0, kind: input, shape index: {}]   ;;  %s40_s1 = inlined_call_operand.vmem [shape: f32[1,128], index: 1, kind: output, shape index: {}]  }
   0x1   :  { %v4_v0 = vld [vmem:[%s39_s0] sm:$0x3]  ;;  %s22_s0 = smov 64  }
   0x2   :  { %5 = vst [vmem:[#allocation1] sm:$0x3] %v4_v0 }
   0x9   :  { %v10_v1 = vld [vmem:[#allocation1 + $0x1] sm:$0x1]   ;;  %v6_v2 = vld [vmem:[#allocation1] sm:$0x1]  }
   0xa   :  { %11 = vrot.lane.b32.xlu0 %v10_v1, %s22_s0  ;;  %8 = vst.msk [vmem:[#allocation0] sm:$0x1] %vm7_vm0, %v6_v2  }
  0x7c   :  { %v12_v3 = vpop.permute.xlu0 %11  }
  0x7d   :  { %14 = vst.msk [vmem:[#allocation0] sm:$0x1] %vm13_vm1, %v12_v3  }
  0x84   :  { %v18_v4 = vld [vmem:[#allocation0] sm:$0x1] }
  0x85   :  { %20 = vst [vmem:[%s40_s1] sm:$0x1] %v18_v4 }

// kernel: net_latent_forward.3
= control target key start
LH: loop header
LB: loop body
LE: loop exit
PB: predicated region body
PF: predicated region fallthrough
CT: control target
= control target key end

     0   :  { %s2500_s0 = inlined_call_operand.vmem [shape: f32[2,1280], index: 0, kind: input, shape index: {}]   ;;  %s2501_s1 = inlined_call_operand.vmem [shape: f32[1280,256], index: 1, kind: input, shape index: {}]   ;;  %s2502_s2 = inlined_call_operand.vmem [shape: f32[1,256], index: 2, kind: input, shape index: {}]   ;;  %s2503_s3 = inlined_call_operand.vmem [shape: f32[256,5], index: 3, kind: input, shape index: {}]   ;;  %s2504_s4 = inlined_call_operand.vmem [shape: f32[1,5], index: 4, kind: input, shape index: {}]   ;;  %s2505_s5 = inlined_call_operand.hbm [shape: f32[2,5], index: 5, kind: output, shape index: {}]  }
   0x1   :  { %v25_v0 = vld [vmem:[%s2501_s1 + $0x8] sm:$0xff]  ;;  %v27_v1 = vld [vmem:[%s2501_s1 + $0x18] sm:$0xff]  ;;  %v24_v5 = vld [vmem:[%s2501_s1] sm:$0xff] }
   0x2   :  { %v153_v2 = vld [vmem:[%s2501_s1 + $0x408] sm:$0xff]  ;;  %v942_v3 = vpack.c.bf16 %v27_v1, %v25_v0  ;;  %v155_v4 = vld [vmem:[%s2501_s1 + $0x418] sm:$0xff]  ;;  %v26_v6 = vld [vmem:[%s2501_s1 + $0x10] sm:$0xff] }
   0x3   :  { %v1070_v7 = vpack.c.bf16 %v155_v4, %v153_v2  ;;  %v944_v8 = vpack.c.bf16 %v26_v6, %v24_v5  ;;  %v152_v9 = vld [vmem:[%s2501_s1 + $0x400] sm:$0xff]  ;;  %v154_v10 = vld [vmem:[%s2501_s1 + $0x410] sm:$0xff]  ;;  %v29_v11 = vld [vmem:[%s2501_s1 + $0x28] sm:$0xff] }
   0x4   :  { %943 = vmatprep.subr.bf16.mxu1 %v942_v3  ;;  %v1072_v12 = vpack.c.bf16 %v154_v10, %v152_v9  ;;  %v31_v13 = vld [vmem:[%s2501_s1 + $0x38] sm:$0xff]  ;;  %v157_v14 = vld [vmem:[%s2501_s1 + $0x428] sm:$0xff]  ;;  %v28_v18 = vld [vmem:[%s2501_s1 + $0x20] sm:$0xff] }
   0x5   :  { %v159_v15 = vld [vmem:[%s2501_s1 + $0x438] sm:$0xff]  ;;  %1071 = vmatprep.subr.bf16.mxu0 %v1070_v7  ;;  %945 = vmatpush1.bf16.msra.mxu1 %v944_v8  ;;  %v946_v16 = vpack.c.bf16 %v31_v13, %v29_v11  ;;  %v30_v19 = vld [vmem:[%s2501_s1 + $0x30] sm:$0xff]  ;;  %v156_v20 = vld [vmem:[%s2501_s1 + $0x420] sm:$0xff] }
   0x6   :  { %v1074_v17 = vpack.c.bf16 %v159_v15, %v157_v14  ;;  %1073 = vmatpush1.bf16.msra.mxu0 %v1072_v12  ;;  %v948_v21 = vpack.c.bf16 %v30_v19, %v28_v18  ;;  %v158_v22 = vld [vmem:[%s2501_s1 + $0x430] sm:$0xff]  ;;  %v33_v23 = vld [vmem:[%s2501_s1 + $0x48] sm:$0xff]  ;;  %v35_v24 = vld [vmem:[%s2501_s1 + $0x58] sm:$0xff] }
   0x7   :  { %947 = vmatprep.subr.bf16.mxu1 %v946_v16  ;;  %v1076_v25 = vpack.c.bf16 %v158_v22, %v156_v20  ;;  %v950_v26 = vpack.c.bf16 %v35_v24, %v33_v23  ;;  %v161_v27 = vld [vmem:[%s2501_s1 + $0x448] sm:$0xff]  ;;  %v163_v28 = vld [vmem:[%s2501_s1 + $0x458] sm:$0xff]  ;;  %v32_v29 = vld [vmem:[%s2501_s1 + $0x40] sm:$0xff] }
   0x8   :  { %1075 = vmatprep.subr.bf16.mxu0 %v1074_v17  ;;  %v1078_v30 = vpack.c.bf16 %v163_v28, %v161_v27  ;;  %v34_v31 = vld [vmem:[%s2501_s1 + $0x50] sm:$0xff]  ;;  %v160_v32 = vld [vmem:[%s2501_s1 + $0x440] sm:$0xff]  ;;  %v37_v35 = vld [vmem:[%s2501_s1 + $0x68] sm:$0xff] }
   0x9   :  { %v162_v33 = vld [vmem:[%s2501_s1 + $0x450] sm:$0xff]  ;;  %949 = vmatpush1.bf16.msra.mxu1 %v948_v21  ;;  %v952_v34 = vpack.c.bf16 %v34_v31, %v32_v29  ;;  %v39_v36 = vld [vmem:[%s2501_s1 + $0x78] sm:$0xff]  ;;  %v165_v37 = vld [vmem:[%s2501_s1 + $0x468] sm:$0xff] }
   0xa   :  { %1077 = vmatpush1.bf16.msra.mxu0 %v1076_v25  ;;  %951 = vmatprep.subr.bf16.mxu1 %v950_v26  ;;  %v1080_v38 = vpack.c.bf16 %v162_v33, %v160_v32  ;;  %v954_v39 = vpack.c.bf16 %v39_v36, %v37_v35  ;;  %v167_v40 = vld [vmem:[%s2501_s1 + $0x478] sm:$0xff]  ;;  %v36_v41 = vld [vmem:[%s2501_s1 + $0x60] sm:$0xff]  ;;  %v38_v42 = vld [vmem:[%s2501_s1 + $0x70] sm:$0xff] }
   0xb   :  { %1079 = vmatprep.subr.bf16.mxu0 %v1078_v30  ;;  %v1082_v43 = vpack.c.bf16 %v167_v40, %v165_v37  ;;  %v164_v44 = vld [vmem:[%s2501_s1 + $0x460] sm:$0xff]  ;;  %v166_v45 = vld [vmem:[%s2501_s1 + $0x470] sm:$0xff]  ;;  %v41_v46 = vld [vmem:[%s2501_s1 + $0x88] sm:$0xff]  ;;  %v956_v50 = vpack.c.bf16 %v38_v42, %v36_v41 }
   0xc   :  { %v43_v47 = vld [vmem:[%s2501_s1 + $0x98] sm:$0xff]  ;;  %v169_v48 = vld [vmem:[%s2501_s1 + $0x488] sm:$0xff]  ;;  %v1084_v51 = vpack.c.bf16 %v166_v45, %v164_v44  ;;  %v40_v53 = vld [vmem:[%s2501_s1 + $0x80] sm:$0xff] }
   0xd   :  { %v171_v49 = vld [vmem:[%s2501_s1 + $0x498] sm:$0xff]  ;;  %953 = vmatpush1.bf16.msra.mxu1 %v952_v34  ;;  %v958_v52 = vpack.c.bf16 %v43_v47, %v41_v46  ;;  %v42_v54 = vld [vmem:[%s2501_s1 + $0x90] sm:$0xff]  ;;  %v168_v55 = vld [vmem:[%s2501_s1 + $0x480] sm:$0xff]  ;;  %v346_v46 = vlaneseq  ;;  %v1336_v47 = vmov 1983009808  }
   0xe   :  { %1081 = vmatpush1.bf16.msra.mxu0 %v1080_v38  ;;  %955 = vmatprep.subr.bf16.mxu1 %v954_v39  ;;  %v1086_v56 = vpack.c.bf16 %v171_v49, %v169_v48  ;;  %v170_v57 = vld [vmem:[%s2501_s1 + $0x490] sm:$0xff]  ;;  %v45_v58 = vld [vmem:[%s2501_s1 + $0xa8] sm:$0xff]  ;;  %v47_v59 = vld [vmem:[%s2501_s1 + $0xb8] sm:$0xff]  ;;  %v960_v62 = vpack.c.bf16 %v42_v54, %v40_v53  ;;  %v361_v48 = vunpack.c.l.s4 %v1336_v47 }
   0xf   :  { %1083 = vmatprep.subr.bf16.mxu0 %v1082_v43  ;;  %v173_v60 = vld [vmem:[%s2501_s1 + $0x4a8] sm:$0xff]  ;;  %v175_v61 = vld [vmem:[%s2501_s1 + $0x4b8] sm:$0xff]  ;;  %v1088_v63 = vpack.c.bf16 %v170_v57, %v168_v55  ;;  %v962_v0 = vpack.c.bf16 %v47_v59, %v45_v58  ;;  %v44_v1 = vld [vmem:[%s2501_s1 + $0xa0] sm:$0xff] }
  0x10   :  { %v46_v2 = vld [vmem:[%s2501_s1 + $0xb0] sm:$0xff]  ;;  %v172_v3 = vld [vmem:[%s2501_s1 + $0x4a0] sm:$0xff]  ;;  %v1090_v4 = vpack.c.bf16 %v175_v61, %v173_v60  ;;  %v49_v6 = vld [vmem:[%s2501_s1 + $0xc8] sm:$0xff]  ;;  %v1620_v61 = vshrl.u32 %v346_v46, 7 }
  0x11   :  { %957 = vmatpush1.bf16.msra.mxu1 %v956_v50  ;;  %v174_v5 = vld [vmem:[%s2501_s1 + $0x4b0] sm:$0xff]  ;;  %v51_v7 = vld [vmem:[%s2501_s1 + $0xd8] sm:$0xff]  ;;  %v177_v8 = vld [vmem:[%s2501_s1 + $0x4c8] sm:$0xff]  ;;  %v964_v10 = vpack.c.bf16 %v46_v2, %v44_v1 }
  0x12   :  { %1085 = vmatpush1.bf16.msra.mxu0 %v1084_v51  ;;  %959 = vmatprep.subr.bf16.mxu1 %v958_v52  ;;  %v179_v9 = vld [vmem:[%s2501_s1 + $0x4d8] sm:$0xff]  ;;  %v1092_v11 = vpack.c.bf16 %v174_v5, %v172_v3  ;;  %v966_v12 = vpack.c.bf16 %v51_v7, %v49_v6  ;;  %v48_v13 = vld [vmem:[%s2501_s1 + $0xc0] sm:$0xff]  ;;  %v50_v14 = vld [vmem:[%s2501_s1 + $0xd0] sm:$0xff] }
  0x13   :  { %1087 = vmatprep.subr.bf16.mxu0 %v1086_v56  ;;  %v176_v15 = vld [vmem:[%s2501_s1 + $0x4c0] sm:$0xff]  ;;  %v1094_v16 = vpack.c.bf16 %v179_v9, %v177_v8  ;;  %v178_v17 = vld [vmem:[%s2501_s1 + $0x4d0] sm:$0xff]  ;;  %v53_v18 = vld [vmem:[%s2501_s1 + $0xe8] sm:$0xff]  ;;  %v968_v22 = vpack.c.bf16 %v50_v14, %v48_v13 }
  0x14   :  { %v55_v19 = vld [vmem:[%s2501_s1 + $0xf8] sm:$0xff]  ;;  %v181_v20 = vld [vmem:[%s2501_s1 + $0x4e8] sm:$0xff]  ;;  %v1096_v23 = vpack.c.bf16 %v178_v17, %v176_v15  ;;  %v52_v25 = vld [vmem:[%s2501_s1 + $0xe0] sm:$0xff] }
  0x15   :  { %961 = vmatpush1.bf16.msra.mxu1 %v960_v62  ;;  %v183_v21 = vld [vmem:[%s2501_s1 + $0x4f8] sm:$0xff]  ;;  %v970_v24 = vpack.c.bf16 %v55_v19, %v53_v18  ;;  %v54_v26 = vld [vmem:[%s2501_s1 + $0xf0] sm:$0xff]  ;;  %v180_v27 = vld [vmem:[%s2501_s1 + $0x4e0] sm:$0xff]  ;;  %v362_v62 = vunpack.c.0.s8 %v361_v48 }
  0x16   :  { %1089 = vmatpush1.bf16.msra.mxu0 %v1088_v63  ;;  %963 = vmatprep.subr.bf16.mxu1 %v962_v0  ;;  %v1098_v28 = vpack.c.bf16 %v183_v21, %v181_v20  ;;  %v182_v29 = vld [vmem:[%s2501_s1 + $0x4f0] sm:$0xff]  ;;  %v57_v30 = vld [vmem:[%s2501_s1 + $0x108] sm:$0xff]  ;;  %v59_v31 = vld [vmem:[%s2501_s1 + $0x118] sm:$0xff]  ;;  %v972_v34 = vpack.c.bf16 %v54_v26, %v52_v25 }
  0x17   :  { %1091 = vmatprep.subr.bf16.mxu0 %v1090_v4  ;;  %v185_v32 = vld [vmem:[%s2501_s1 + $0x508] sm:$0xff]  ;;  %v187_v33 = vld [vmem:[%s2501_s1 + $0x518] sm:$0xff]  ;;  %v1100_v35 = vpack.c.bf16 %v182_v29, %v180_v27  ;;  %v974_v36 = vpack.c.bf16 %v59_v31, %v57_v30  ;;  %v56_v37 = vld [vmem:[%s2501_s1 + $0x100] sm:$0xff] }
  0x18   :  { %v58_v38 = vld [vmem:[%s2501_s1 + $0x110] sm:$0xff]  ;;  %v184_v39 = vld [vmem:[%s2501_s1 + $0x500] sm:$0xff]  ;;  %v1102_v40 = vpack.c.bf16 %v187_v33, %v185_v32  ;;  %v61_v42 = vld [vmem:[%s2501_s1 + $0x128] sm:$0xff] }
  0x19   :  { %965 = vmatpush1.bf16.msra.mxu1 %v964_v10  ;;  %v186_v41 = vld [vmem:[%s2501_s1 + $0x510] sm:$0xff]  ;;  %v63_v43 = vld [vmem:[%s2501_s1 + $0x138] sm:$0xff]  ;;  %v189_v44 = vld [vmem:[%s2501_s1 + $0x528] sm:$0xff]  ;;  %v976_v49 = vpack.c.bf16 %v58_v38, %v56_v37 }
  0x1a   :  { %1093 = vmatpush1.bf16.msra.mxu0 %v1092_v11  ;;  %967 = vmatprep.subr.bf16.mxu1 %v966_v12  ;;  %v191_v45 = vld [vmem:[%s2501_s1 + $0x538] sm:$0xff]  ;;  %v1104_v50 = vpack.c.bf16 %v186_v41, %v184_v39  ;;  %v978_v51 = vpack.c.bf16 %v63_v43, %v61_v42  ;;  %v60_v52 = vld [vmem:[%s2501_s1 + $0x120] sm:$0xff]  ;;  %v62_v53 = vld [vmem:[%s2501_s1 + $0x130] sm:$0xff]  ;;  %v1647_v11 = vsub.s32 %v362_v62, %v1620_v61 }
  0x1b   :  { %1095 = vmatprep.subr.bf16.mxu0 %v1094_v16  ;;  %v188_v54 = vld [vmem:[%s2501_s1 + $0x520] sm:$0xff]  ;;  %v1106_v55 = vpack.c.bf16 %v191_v45, %v189_v44  ;;  %v190_v56 = vld [vmem:[%s2501_s1 + $0x530] sm:$0xff]  ;;  %v65_v57 = vld [vmem:[%s2501_s1 + $0x148] sm:$0xff]  ;;  %v980_v63 = vpack.c.bf16 %v62_v53, %v60_v52 }
  0x1c   :  { %v67_v58 = vld [vmem:[%s2501_s1 + $0x158] sm:$0xff]  ;;  %v193_v59 = vld [vmem:[%s2501_s1 + $0x548] sm:$0xff]  ;;  %v1108_v0 = vpack.c.bf16 %v190_v56, %v188_v54  ;;  %v64_v2 = vld [vmem:[%s2501_s1 + $0x140] sm:$0xff] }
  0x1d   :  { %969 = vmatpush1.bf16.msra.mxu1 %v968_v22  ;;  %v195_v60 = vld [vmem:[%s2501_s1 + $0x558] sm:$0xff]  ;;  %v982_v1 = vpack.c.bf16 %v67_v58, %v65_v57  ;;  %v66_v3 = vld [vmem:[%s2501_s1 + $0x150] sm:$0xff]  ;;  %v192_v4 = vld [vmem:[%s2501_s1 + $0x540] sm:$0xff] }
  0x1e   :  { %1097 = vmatpush1.bf16.msra.mxu0 %v1096_v23  ;;  %971 = vmatprep.subr.bf16.mxu1 %v970_v24  ;;  %v1110_v5 = vpack.c.bf16 %v195_v60, %v193_v59  ;;  %v194_v6 = vld [vmem:[%s2501_s1 + $0x550] sm:$0xff]  ;;  %v69_v7 = vld [vmem:[%s2501_s1 + $0x168] sm:$0xff]  ;;  %v71_v8 = vld [vmem:[%s2501_s1 + $0x178] sm:$0xff]  ;;  %v984_v12 = vpack.c.bf16 %v66_v3, %v64_v2 }
  0x1f   :  { %1099 = vmatprep.subr.bf16.mxu0 %v1098_v28  ;;  %v197_v9 = vld [vmem:[%s2501_s1 + $0x568] sm:$0xff]  ;;  %v199_v10 = vld [vmem:[%s2501_s1 + $0x578] sm:$0xff]  ;;  %v68_v13 = vld [vmem:[%s2501_s1 + $0x160] sm:$0xff]  ;;  %v1112_v14 = vpack.c.bf16 %v194_v6, %v192_v4  ;;  %v986_v15 = vpack.c.bf16 %v71_v8, %v69_v7 }
  0x20   :  { %v70_v16 = vld [vmem:[%s2501_s1 + $0x170] sm:$0xff]  ;;  %v196_v17 = vld [vmem:[%s2501_s1 + $0x560] sm:$0xff]  ;;  %v1114_v19 = vpack.c.bf16 %v199_v10, %v197_v9  ;;  %v73_v20 = vld [vmem:[%s2501_s1 + $0x188] sm:$0xff] }
  0x21   :  { %973 = vmatpush1.bf16.msra.mxu1 %v972_v34  ;;  %v198_v18 = vld [vmem:[%s2501_s1 + $0x570] sm:$0xff]  ;;  %v75_v21 = vld [vmem:[%s2501_s1 + $0x198] sm:$0xff]  ;;  %v1670_v22 = vld [vmem:[%s2500_s0] sm:$0xff]  ;;  %v988_v27 = vpack.c.bf16 %v70_v16, %v68_v13 }
  0x22   :  { %1101 = vmatpush1.bf16.msra.mxu0 %v1100_v35  ;;  %975 = vmatprep.subr.bf16.mxu1 %v974_v36  ;;  %v201_v23 = vld [vmem:[%s2501_s1 + $0x588] sm:$0xff]  ;;  %v203_v24 = vld [vmem:[%s2501_s1 + $0x598] sm:$0xff]  ;;  %v1680_v25 = vrot.slane %v1670_v22, %v1647_v11  ;;  %v1116_v29 = vpack.c.bf16 %v198_v18, %v196_v17  ;;  %v990_v30 = vpack.c.bf16 %v75_v21, %v73_v20  ;;  %v72_v31 = vld [vmem:[%s2501_s1 + $0x180] sm:$0xff] }
  0x23   :  { %1103 = vmatprep.subr.bf16.mxu0 %v1102_v40  ;;  %v1685_v26 = vld [vmem:[%s2500_s0 + $0x8] sm:$0xff]  ;;  %v74_v32 = vld [vmem:[%s2501_s1 + $0x190] sm:$0xff]  ;;  %v200_v33 = vld [vmem:[%s2501_s1 + $0x580] sm:$0xff]  ;;  %v1118_v35 = vpack.c.bf16 %v203_v24, %v201_v23 }
  0x24   :  { %v1689_v28 = vrot.slane %v1685_v26, %v1647_v11  ;;  %v374_v34 = vcombine.high %v1680_v25, %v1680_v25  ;;  %v202_v36 = vld [vmem:[%s2501_s1 + $0x590] sm:$0xff]  ;;  %v77_v37 = vld [vmem:[%s2501_s1 + $0x1a8] sm:$0xff]  ;;  %v79_v38 = vld [vmem:[%s2501_s1 + $0x1b8] sm:$0xff]  ;;  %v992_v42 = vpack.c.bf16 %v74_v32, %v72_v31 }
  0x25   :  { %977 = vmatpush1.bf16.msra.mxu1 %v976_v49  ;;  %v205_v40 = vld [vmem:[%s2501_s1 + $0x5a8] sm:$0xff]  ;;  %v207_v41 = vld [vmem:[%s2501_s1 + $0x5b8] sm:$0xff]  ;;  %v1120_v43 = vpack.c.bf16 %v202_v36, %v200_v33  ;;  %v994_v44 = vpack.c.bf16 %v79_v38, %v77_v37  ;;  %v76_v45 = vld [vmem:[%s2501_s1 + $0x1a0] sm:$0xff] }
  0x26   :  { %1105 = vmatpush1.bf16.msra.mxu0 %v1104_v50  ;;  %979 = vmatprep.subr.bf16.mxu1 %v978_v51  ;;  %v391_v39 = vcombine.high %v1689_v28, %v1689_v28  ;;  %v78_v46 = vld [vmem:[%s2501_s1 + $0x1b0] sm:$0xff]  ;;  %v204_v47 = vld [vmem:[%s2501_s1 + $0x5a0] sm:$0xff]  ;;  %v1122_v48 = vpack.c.bf16 %v207_v41, %v205_v40  ;;  %v81_v50 = vld [vmem:[%s2501_s1 + $0x1c8] sm:$0xff] }
  0x27   :  { %1107 = vmatprep.subr.bf16.mxu0 %v1106_v55  ;;  %475 = vmatprep.mubr.f32.mxu1 %v374_v34  ;;  %v206_v49 = vld [vmem:[%s2501_s1 + $0x5b0] sm:$0xff]  ;;  %v83_v51 = vld [vmem:[%s2501_s1 + $0x1d8] sm:$0xff]  ;;  %v209_v52 = vld [vmem:[%s2501_s1 + $0x5c8] sm:$0xff]  ;;  %v996_v54 = vpack.c.bf16 %v78_v46, %v76_v45 }
  0x28   :  { %617 = vmatprep.mubr.f32.mxu0 %v391_v39  ;;  %v211_v53 = vld [vmem:[%s2501_s1 + $0x5d8] sm:$0xff]  ;;  %v1124_v55 = vpack.c.bf16 %v206_v49, %v204_v47  ;;  %v998_v56 = vpack.c.bf16 %v83_v51, %v81_v50  ;;  %v80_v57 = vld [vmem:[%s2501_s1 + $0x1c0] sm:$0xff]  ;;  %v82_v58 = vld [vmem:[%s2501_s1 + $0x1d0] sm:$0xff] }
  0x29   :  { %981 = vmatpush1.bf16.msra.mxu1 %v980_v63  ;;  %v208_v59 = vld [vmem:[%s2501_s1 + $0x5c0] sm:$0xff]  ;;  %v1126_v60 = vpack.c.bf16 %v211_v53, %v209_v52  ;;  %v210_v62 = vld [vmem:[%s2501_s1 + $0x5d0] sm:$0xff]  ;;  %v85_v63 = vld [vmem:[%s2501_s1 + $0x1e8] sm:$0xff]  ;;  %v1000_v3 = vpack.c.bf16 %v82_v58, %v80_v57 }
  0x2a   :  { %1109 = vmatpush1.bf16.msra.mxu0 %v1108_v0  ;;  %983 = vmatprep.subr.bf16.mxu1 %v982_v1  ;;  %v87_v0 = vld [vmem:[%s2501_s1 + $0x1f8] sm:$0xff]  ;;  %v213_v1 = vld [vmem:[%s2501_s1 + $0x5e8] sm:$0xff]  ;;  %v1128_v4 = vpack.c.bf16 %v210_v62, %v208_v59  ;;  %v84_v6 = vld [vmem:[%s2501_s1 + $0x1e0] sm:$0xff] }
  0x2b   :  { %1111 = vmatprep.subr.bf16.mxu0 %v1110_v5  ;;  %v215_v2 = vld [vmem:[%s2501_s1 + $0x5f8] sm:$0xff]  ;;  %v1002_v5 = vpack.c.bf16 %v87_v0, %v85_v63  ;;  %v86_v7 = vld [vmem:[%s2501_s1 + $0x1f0] sm:$0xff]  ;;  %v212_v8 = vld [vmem:[%s2501_s1 + $0x5e0] sm:$0xff] }
  0x2c   :  { %v1130_v9 = vpack.c.bf16 %v215_v2, %v213_v1  ;;  %v214_v10 = vld [vmem:[%s2501_s1 + $0x5f0] sm:$0xff]  ;;  %v89_v13 = vld [vmem:[%s2501_s1 + $0x208] sm:$0xff]  ;;  %v219_v17 = vld [vmem:[%s2501_s1 + $0x618] sm:$0xff]  ;;  %v1004_v18 = vpack.c.bf16 %v86_v7, %v84_v6 }
  0x2d   :  { %985 = vmatpush1.bf16.msra.mxu1 %v984_v12  ;;  %v359_v12 = vcombine.high %v1670_v22, %v1670_v22  ;;  %v217_v16 = vld [vmem:[%s2501_s1 + $0x608] sm:$0xff]  ;;  %v88_v21 = vld [vmem:[%s2501_s1 + $0x200] sm:$0xff]  ;;  %v90_v22 = vld [vmem:[%s2501_s1 + $0x210] sm:$0xff] }
  0x2e   :  { %1113 = vmatpush1.bf16.msra.mxu0 %v1112_v14  ;;  %987 = vmatprep.subr.bf16.mxu1 %v986_v15  ;;  %v91_v14 = vld [vmem:[%s2501_s1 + $0x218] sm:$0xff]  ;;  %v376_v15 = vcombine.high %v1685_v26, %v1685_v26  ;;  %v216_v23 = vld [vmem:[%s2501_s1 + $0x600] sm:$0xff]  ;;  %v1134_v24 = vpack.c.bf16 %v219_v17, %v217_v16  ;;  %v218_v26 = vld [vmem:[%s2501_s1 + $0x610] sm:$0xff]  ;;  %v1008_v34 = vpack.c.bf16 %v90_v22, %v88_v21 }
  0x2f   :  { %1115 = vmatprep.subr.bf16.mxu0 %v1114_v19  ;;  %v1132_v19 = vpack.c.bf16 %v214_v10, %v212_v8  ;;  %v1006_v20 = vpack.c.bf16 %v91_v14, %v89_v13  ;;  %v221_v31 = vld [vmem:[%s2501_s1 + $0x628] sm:$0xff]  ;;  %v223_v32 = vld [vmem:[%s2501_s1 + $0x638] sm:$0xff]  ;;  %v92_v37 = vld [vmem:[%s2501_s1 + $0x220] sm:$0xff] }
  0x30   :  { %v1823_v33 = vrot.slane %v376_v15, %v1647_v11  ;;  %v94_v38 = vld [vmem:[%s2501_s1 + $0x230] sm:$0xff]  ;;  %v220_v39 = vld [vmem:[%s2501_s1 + $0x620] sm:$0xff]  ;;  %v97_v41 = vld [vmem:[%s2501_s1 + $0x248] sm:$0xff] }
  0x31   :  { %989 = vmatpush1.bf16.msra.mxu1 %v988_v27  ;;  %v93_v27 = vld [vmem:[%s2501_s1 + $0x228] sm:$0xff]  ;;  %v222_v40 = vld [vmem:[%s2501_s1 + $0x630] sm:$0xff]  ;;  %v227_v45 = vld [vmem:[%s2501_s1 + $0x658] sm:$0xff]  ;;  %v1012_v47 = vpack.c.bf16 %v94_v38, %v92_v37 }
  0x32   :  { %1117 = vmatpush1.bf16.msra.mxu0 %v1116_v29  ;;  %991 = vmatprep.subr.bf16.mxu1 %v990_v30  ;;  %v95_v29 = vld [vmem:[%s2501_s1 + $0x238] sm:$0xff]  ;;  %v1814_v30 = vrot.slane %v359_v12, %v1647_v11  ;;  %v1138_v11 = vpack.c.bf16 %v223_v32, %v221_v31  ;;  %v392_v46 = vcombine.high %v1823_v33, %v1823_v33  ;;  %v98_v50 = vld [vmem:[%s2501_s1 + $0x250] sm:$0xff]  ;;  %v224_v51 = vld [vmem:[%s2501_s1 + $0x640] sm:$0xff] }
  0x33   :  { %1119 = vmatprep.subr.bf16.mxu0 %v1118_v35  ;;  %v1136_v35 = vpack.c.bf16 %v218_v26, %v216_v23  ;;  %v1010_v36 = vpack.c.bf16 %v95_v29, %v93_v27  ;;  %v101_v53 = vld [vmem:[%s2501_s1 + $0x268] sm:$0xff]  ;;  %v102_v62 = vld [vmem:[%s2501_s1 + $0x270] sm:$0xff]  ;;  %v228_v63 = vld [vmem:[%s2501_s1 + $0x660] sm:$0xff] }
  0x34   :  { %v230_v1 = vld [vmem:[%s2501_s1 + $0x670] sm:$0xff]  ;;  %v105_v2 = vld [vmem:[%s2501_s1 + $0x288] sm:$0xff]  ;;  %v232_v12 = vld [vmem:[%s2501_s1 + $0x680] sm:$0xff] }
  0x35   :  { %993 = vmatpush1.bf16.msra.mxu1 %v992_v42  ;;  %v99_v42 = vld [vmem:[%s2501_s1 + $0x258] sm:$0xff]  ;;  %v1148_v7 = vpack.c.bf16 %v230_v1, %v228_v63  ;;  %v106_v10 = vld [vmem:[%s2501_s1 + $0x290] sm:$0xff]  ;;  %v109_v15 = vld [vmem:[%s2501_s1 + $0x2a8] sm:$0xff] }
  0x36   :  { %1121 = vmatpush1.bf16.msra.mxu0 %v1120_v43  ;;  %995 = vmatprep.subr.bf16.mxu1 %v994_v44  ;;  %v375_v43 = vcombine.high %v1814_v30, %v1814_v30  ;;  %v225_v44 = vld [vmem:[%s2501_s1 + $0x648] sm:$0xff]  ;;  %v1014_v49 = vpack.c.bf16 %v99_v42, %v97_v41  ;;  %v234_v14 = vld [vmem:[%s2501_s1 + $0x690] sm:$0xff]  ;;  %v111_v16 = vld [vmem:[%s2501_s1 + $0x2b8] sm:$0xff] }
  0x37   :  { %1123 = vmatprep.subr.bf16.mxu0 %v1122_v48  ;;  %v1140_v48 = vpack.c.bf16 %v222_v40, %v220_v39  ;;  %v1142_v52 = vpack.c.bf16 %v227_v45, %v225_v44  ;;  %v237_v17 = vld [vmem:[%s2501_s1 + $0x6a8] sm:$0xff]  ;;  %v1026_v21 = vpack.c.bf16 %v111_v16, %v109_v15  ;;  %v108_v22 = vld [vmem:[%s2501_s1 + $0x2a0] sm:$0xff]  ;;  %v110_v23 = vld [vmem:[%s2501_s1 + $0x2b0] sm:$0xff] }
  0x38   :  { %v238_v27 = vld [vmem:[%s2501_s1 + $0x6b0] sm:$0xff]  ;;  %v113_v29 = vld [vmem:[%s2501_s1 + $0x2c8] sm:$0xff]  ;;  %v115_v31 = vld [vmem:[%s2501_s1 + $0x2d8] sm:$0xff] }
  0x39   :  { %997 = vmatpush1.bf16.msra.mxu1 %v996_v54  ;;  %v103_v54 = vld [vmem:[%s2501_s1 + $0x278] sm:$0xff]  ;;  %v241_v32 = vld [vmem:[%s2501_s1 + $0x6c8] sm:$0xff]  ;;  %v1030_v37 = vpack.c.bf16 %v115_v31, %v113_v29  ;;  %v112_v38 = vld [vmem:[%s2501_s1 + $0x2c0] sm:$0xff] }
  0x3a   :  { %1125 = vmatpush1.bf16.msra.mxu0 %v1124_v55  ;;  %999 = vmatprep.subr.bf16.mxu1 %v998_v56  ;;  %v229_v55 = vld [vmem:[%s2501_s1 + $0x668] sm:$0xff]  ;;  %v231_v56 = vld [vmem:[%s2501_s1 + $0x678] sm:$0xff]  ;;  %v1018_v59 = vpack.c.bf16 %v103_v54, %v101_v53  ;;  %v114_v39 = vld [vmem:[%s2501_s1 + $0x2d0] sm:$0xff] }
  0x3b   :  { %1127 = vmatprep.subr.bf16.mxu0 %v1126_v60  ;;  %v100_v60 = vld [vmem:[%s2501_s1 + $0x260] sm:$0xff]  ;;  %v1146_v0 = vpack.c.bf16 %v231_v56, %v229_v55  ;;  %v242_v41 = vld [vmem:[%s2501_s1 + $0x6d0] sm:$0xff]  ;;  %v117_v42 = vld [vmem:[%s2501_s1 + $0x2e8] sm:$0xff] }
  0x3c   :  { %v1020_v6 = vpack.c.bf16 %v102_v62, %v100_v60  ;;  %v245_v44 = vld [vmem:[%s2501_s1 + $0x6e8] sm:$0xff]  ;;  %v247_v45 = vld [vmem:[%s2501_s1 + $0x6f8] sm:$0xff]  ;;  %v122_v60 = vld [vmem:[%s2501_s1 + $0x310] sm:$0xff] }
  0x3d   :  { %1001 = vmatpush1.bf16.msra.mxu1 %v1000_v3  ;;  %v107_v3 = vld [vmem:[%s2501_s1 + $0x298] sm:$0xff]  ;;  %v249_v54 = vld [vmem:[%s2501_s1 + $0x708] sm:$0xff]  ;;  %v248_v62 = vld [vmem:[%s2501_s1 + $0x700] sm:$0xff] }
  0x3e   :  { %1129 = vmatpush1.bf16.msra.mxu0 %v1128_v4  ;;  %1003 = vmatprep.subr.bf16.mxu1 %v1002_v5  ;;  %v233_v4 = vld [vmem:[%s2501_s1 + $0x688] sm:$0xff]  ;;  %v235_v5 = vld [vmem:[%s2501_s1 + $0x698] sm:$0xff]  ;;  %v1022_v8 = vpack.c.bf16 %v107_v3, %v105_v2 }
  0x3f   :  { %1131 = vmatprep.subr.bf16.mxu0 %v1130_v9  ;;  %v104_v9 = vld [vmem:[%s2501_s1 + $0x280] sm:$0xff]  ;;  %v1150_v13 = vpack.c.bf16 %v235_v5, %v233_v4  ;;  %v123_v53 = vld [vmem:[%s2501_s1 + $0x318] sm:$0xff]  ;;  %v125_v1 = vld [vmem:[%s2501_s1 + $0x328] sm:$0xff] }
  0x40   :  { %v251_v55 = vld [vmem:[%s2501_s1 + $0x718] sm:$0xff]  ;;  %v253_v3 = vld [vmem:[%s2501_s1 + $0x728] sm:$0xff] }
  0x41   :  { %1005 = vmatpush1.bf16.msra.mxu1 %v1004_v18  ;;  %v239_v18 = vld [vmem:[%s2501_s1 + $0x6b8] sm:$0xff]  ;;  %v1166_v63 = vpack.c.bf16 %v251_v55, %v249_v54  ;;  %v257_v16 = vld [vmem:[%s2501_s1 + $0x748] sm:$0xff] }
  0x42   :  { %1133 = vmatpush1.bf16.msra.mxu0 %v1132_v19  ;;  %1007 = vmatprep.subr.bf16.mxu1 %v1006_v20  ;;  %v1024_v19 = vpack.c.bf16 %v106_v10, %v104_v9  ;;  %v1152_v20 = vpack.c.bf16 %v234_v14, %v232_v12  ;;  %v1154_v26 = vpack.c.bf16 %v239_v18, %v237_v17  ;;  %v127_v2 = vld [vmem:[%s2501_s1 + $0x338] sm:$0xff]  ;;  %v126_v9 = vld [vmem:[%s2501_s1 + $0x330] sm:$0xff]  ;;  %v252_v10 = vld [vmem:[%s2501_s1 + $0x720] sm:$0xff] }
  0x43   :  { %1135 = vmatprep.subr.bf16.mxu0 %v1134_v24  ;;  %v236_v24 = vld [vmem:[%s2501_s1 + $0x6a0] sm:$0xff]  ;;  %v255_v4 = vld [vmem:[%s2501_s1 + $0x738] sm:$0xff]  ;;  %v129_v14 = vld [vmem:[%s2501_s1 + $0x348] sm:$0xff] }
  0x44   :  { %476 = vmatmul.mubr.f32.vlgmr.msra.gmra.mrb[0].mxu1 %v1680_v25  ;;  %v96_v25 = vld [vmem:[%s2501_s1 + $0x240] sm:$0xff]  ;;  %v1170_v12 = vpack.c.bf16 %v255_v4, %v253_v3  ;;  %v131_v15 = vld [vmem:[%s2501_s1 + $0x358] sm:$0xff]  ;;  %v261_v31 = vld [vmem:[%s2501_s1 + $0x768] sm:$0xff] }
  0x45   :  { %1009 = vmatpush1.bf16.msra.mxu1 %v1008_v34  ;;  %618 = vmatmul.mubr.f32.vlgmr.msra.gmra.mrb[0].mxu0 %v1689_v28  ;;  %v226_v28 = vld [vmem:[%s2501_s1 + $0x650] sm:$0xff]  ;;  %v1016_v57 = vpack.c.bf16 %v98_v50, %v96_v25  ;;  %v243_v34 = vld [vmem:[%s2501_s1 + $0x6d8] sm:$0xff]  ;;  %v244_v50 = vld [vmem:[%s2501_s1 + $0x6e0] sm:$0xff] }
  0x46   :  { %1137 = vmatpush1.bf16.msra.mxu0 %v1136_v35  ;;  %1011 = vmatprep.subr.bf16.mxu1 %v1010_v36  ;;  %v1144_v58 = vpack.c.bf16 %v226_v28, %v224_v51  ;;  %v1028_v35 = vpack.c.bf16 %v110_v23, %v108_v22  ;;  %v1156_v36 = vpack.c.bf16 %v238_v27, %v236_v24  ;;  %v118_v25 = vld [vmem:[%s2501_s1 + $0x2f0] sm:$0xff]  ;;  %v121_v28 = vld [vmem:[%s2501_s1 + $0x308] sm:$0xff]  ;;  %v259_v17 = vld [vmem:[%s2501_s1 + $0x758] sm:$0xff] }
  0x47   :  { %1139 = vmatprep.subr.bf16.mxu0 %v1138_v11  ;;  %546 = vmatprep.mubr.f32.mxu1 %v375_v43  ;;  %v240_v11 = vld [vmem:[%s2501_s1 + $0x6c0] sm:$0xff]  ;;  %v1158_v40 = vpack.c.bf16 %v243_v34, %v241_v32  ;;  %v119_v43 = vld [vmem:[%s2501_s1 + $0x2f8] sm:$0xff]  ;;  %v1162_v51 = vpack.c.bf16 %v247_v45, %v245_v44  ;;  %v130_v22 = vld [vmem:[%s2501_s1 + $0x350] sm:$0xff]  ;;  %v1174_v24 = vpack.c.bf16 %v259_v17, %v257_v16 }
  0x48   :  { %688 = vmatprep.mubr.f32.mxu0 %v392_v46  ;;  %v1032_v46 = vpack.c.bf16 %v114_v39, %v112_v38  ;;  %v256_v23 = vld [vmem:[%s2501_s1 + $0x740] sm:$0xff]  ;;  %v133_v27 = vld [vmem:[%s2501_s1 + $0x368] sm:$0xff]  ;;  %v135_v29 = vld [vmem:[%s2501_s1 + $0x378] sm:$0xff] }
  0x49   :  { %1013 = vmatpush1.bf16.msra.mxu1 %v1012_v47  ;;  %v1160_v47 = vpack.c.bf16 %v242_v41, %v240_v11  ;;  %v263_v32 = vld [vmem:[%s2501_s1 + $0x778] sm:$0xff]  ;;  %v134_v38 = vld [vmem:[%s2501_s1 + $0x370] sm:$0xff]  ;;  %v260_v39 = vld [vmem:[%s2501_s1 + $0x760] sm:$0xff] }
  0x4a   :  { %1141 = vmatpush1.bf16.msra.mxu0 %v1140_v48  ;;  %1015 = vmatprep.subr.bf16.mxu1 %v1014_v49  ;;  %v1034_v48 = vpack.c.bf16 %v119_v43, %v117_v42  ;;  %v116_v49 = vld [vmem:[%s2501_s1 + $0x2e0] sm:$0xff]  ;;  %v1178_v11 = vpack.c.bf16 %v263_v32, %v261_v31  ;;  %v137_v41 = vld [vmem:[%s2501_s1 + $0x388] sm:$0xff]  ;;  %v139_v42 = vld [vmem:[%s2501_s1 + $0x398] sm:$0xff] }
  0x4b   :  { %1143 = vmatprep.subr.bf16.mxu0 %v1142_v52  ;;  %v246_v52 = vld [vmem:[%s2501_s1 + $0x6f0] sm:$0xff]  ;;  %v1036_v56 = vpack.c.bf16 %v118_v25, %v116_v49  ;;  %v265_v43 = vld [vmem:[%s2501_s1 + $0x788] sm:$0xff]  ;;  %v267_v44 = vld [vmem:[%s2501_s1 + $0x798] sm:$0xff] }
  0x4d   :  { %1017 = vmatpush1.bf16.msra.mxu1 %v1016_v57  ;;  %v1164_v57 = vpack.c.bf16 %v246_v52, %v244_v50 }
  0x4e   :  { %1145 = vmatpush1.bf16.msra.mxu0 %v1144_v58  ;;  %1019 = vmatprep.subr.bf16.mxu1 %v1018_v59  ;;  %v1038_v58 = vpack.c.bf16 %v123_v53, %v121_v28  ;;  %v120_v59 = vld [vmem:[%s2501_s1 + $0x300] sm:$0xff] }
  0x4f   :  { %1147 = vmatprep.subr.bf16.mxu0 %v1146_v0  ;;  %v250_v0 = vld [vmem:[%s2501_s1 + $0x710] sm:$0xff]  ;;  %v1040_v5 = vpack.c.bf16 %v122_v60, %v120_v59 }
  0x51   :  { %1021 = vmatpush1.bf16.msra.mxu1 %v1020_v6  ;;  %v1168_v6 = vpack.c.bf16 %v250_v0, %v248_v62 }
  0x52   :  { %1149 = vmatpush1.bf16.msra.mxu0 %v1148_v7  ;;  %1023 = vmatprep.subr.bf16.mxu1 %v1022_v8  ;;  %v1042_v7 = vpack.c.bf16 %v127_v2, %v125_v1  ;;  %v124_v8 = vld [vmem:[%s2501_s1 + $0x320] sm:$0xff] }
  0x53   :  { %1151 = vmatprep.subr.bf16.mxu0 %v1150_v13  ;;  %v254_v13 = vld [vmem:[%s2501_s1 + $0x730] sm:$0xff]  ;;  %v1044_v18 = vpack.c.bf16 %v126_v9, %v124_v8 }
  0x55   :  { %1025 = vmatpush1.bf16.msra.mxu1 %v1024_v19  ;;  %v1172_v19 = vpack.c.bf16 %v254_v13, %v252_v10 }
  0x56   :  { %1153 = vmatpush1.bf16.msra.mxu0 %v1152_v20  ;;  %1027 = vmatprep.subr.bf16.mxu1 %v1026_v21  ;;  %v1046_v20 = vpack.c.bf16 %v131_v15, %v129_v14  ;;  %v128_v21 = vld [vmem:[%s2501_s1 + $0x340] sm:$0xff] }
  0x57   :  { %1155 = vmatprep.subr.bf16.mxu0 %v1154_v26  ;;  %v258_v26 = vld [vmem:[%s2501_s1 + $0x750] sm:$0xff]  ;;  %v1048_v34 = vpack.c.bf16 %v130_v22, %v128_v21 }
  0x59   :  { %1029 = vmatpush1.bf16.msra.mxu1 %v1028_v35  ;;  %v1176_v35 = vpack.c.bf16 %v258_v26, %v256_v23 }
  0x5a   :  { %1157 = vmatpush1.bf16.msra.mxu0 %v1156_v36  ;;  %1031 = vmatprep.subr.bf16.mxu1 %v1030_v37  ;;  %v1050_v36 = vpack.c.bf16 %v135_v29, %v133_v27  ;;  %v132_v37 = vld [vmem:[%s2501_s1 + $0x360] sm:$0xff] }
  0x5b   :  { %1159 = vmatprep.subr.bf16.mxu0 %v1158_v40  ;;  %v262_v40 = vld [vmem:[%s2501_s1 + $0x770] sm:$0xff]  ;;  %v1052_v45 = vpack.c.bf16 %v134_v38, %v132_v37 }
  0x5d   :  { %1033 = vmatpush1.bf16.msra.mxu1 %v1032_v46 }
  0x5e   :  { %1161 = vmatpush1.bf16.msra.mxu0 %v1160_v47  ;;  %1035 = vmatprep.subr.bf16.mxu1 %v1034_v48 }
  0x5f   :  { %1163 = vmatprep.subr.bf16.mxu0 %v1162_v51 }
  0x61   :  { %1037 = vmatpush1.bf16.msra.mxu1 %v1036_v56 }
  0x62   :  { %1165 = vmatpush1.bf16.msra.mxu0 %v1164_v57  ;;  %1039 = vmatprep.subr.bf16.mxu1 %v1038_v58 }
  0x63   :  { %1167 = vmatprep.subr.bf16.mxu0 %v1166_v63 }
  0x65   :  { %1041 = vmatpush1.bf16.msra.mxu1 %v1040_v5 }
  0x66   :  { %1169 = vmatpush1.bf16.msra.mxu0 %v1168_v6  ;;  %1043 = vmatprep.subr.bf16.mxu1 %v1042_v7 }
  0x67   :  { %1171 = vmatprep.subr.bf16.mxu0 %v1170_v12 }
  0x69   :  { %1045 = vmatpush1.bf16.msra.mxu1 %v1044_v18 }
  0x6a   :  { %1173 = vmatpush1.bf16.msra.mxu0 %v1172_v19  ;;  %1047 = vmatprep.subr.bf16.mxu1 %v1046_v20 }
  0x6b   :  { %1175 = vmatprep.subr.bf16.mxu0 %v1174_v24 }
  0x6d   :  { %1049 = vmatpush1.bf16.msra.mxu1 %v1048_v34 }
  0x6e   :  { %10 = vsyncpa [#allocation3], 0  ;;  %1177 = vmatpush1.bf16.msra.mxu0 %v1176_v35  ;;  %1051 = vmatprep.subr.bf16.mxu1 %v1050_v36  ;;  %v1180_v46 = vpack.c.bf16 %v262_v40, %v260_v39  ;;  %v1054_v47 = vpack.c.bf16 %v139_v42, %v137_v41  ;;  %v136_v48 = vld [vmem:[%s2501_s1 + $0x380] sm:$0xff]  ;;  %v138_v49 = vld [vmem:[%s2501_s1 + $0x390] sm:$0xff]  ;;  %v1182_v50 = vpack.c.bf16 %v267_v44, %v265_v43  ;;  %vm877_vm0 = vcmask 33792  }
  0x6f   :  { %v264_v25 = vld [vmem:[%s2501_s1 + $0x780] sm:$0xff]  ;;  %1179 = vmatprep.subr.bf16.mxu0 %v1178_v11  ;;  %v266_v51 = vld [vmem:[%s2501_s1 + $0x790] sm:$0xff]  ;;  %v141_v52 = vld [vmem:[%s2501_s1 + $0x3a8] sm:$0xff]  ;;  %v1056_v55 = vpack.c.bf16 %v138_v49, %v136_v48 }
  0x70   :  { %v143_v28 = vld [vmem:[%s2501_s1 + $0x3b8] sm:$0xff]  ;;  %v269_v53 = vld [vmem:[%s2501_s1 + $0x7a8] sm:$0xff]  ;;  %v1184_v56 = vpack.c.bf16 %v266_v51, %v264_v25  ;;  %v140_v58 = vld [vmem:[%s2501_s1 + $0x3a0] sm:$0xff] }
  0x71   :  { %v271_v54 = vld [vmem:[%s2501_s1 + $0x7b8] sm:$0xff]  ;;  %1053 = vmatpush1.bf16.msra.mxu1 %v1052_v45  ;;  %v1058_v57 = vpack.c.bf16 %v143_v28, %v141_v52  ;;  %v142_v59 = vld [vmem:[%s2501_s1 + $0x3b0] sm:$0xff]  ;;  %v268_v60 = vld [vmem:[%s2501_s1 + $0x7a0] sm:$0xff] }
  0x72   :  { %1181 = vmatpush1.bf16.msra.mxu0 %v1180_v46  ;;  %1055 = vmatprep.subr.bf16.mxu1 %v1054_v47  ;;  %v1186_v62 = vpack.c.bf16 %v271_v54, %v269_v53  ;;  %v270_v63 = vld [vmem:[%s2501_s1 + $0x7b0] sm:$0xff]  ;;  %v145_v0 = vld [vmem:[%s2501_s1 + $0x3c8] sm:$0xff]  ;;  %v147_v1 = vld [vmem:[%s2501_s1 + $0x3d8] sm:$0xff]  ;;  %v1060_v4 = vpack.c.bf16 %v142_v59, %v140_v58 }
  0x73   :  { %1183 = vmatprep.subr.bf16.mxu0 %v1182_v50  ;;  %v273_v2 = vld [vmem:[%s2501_s1 + $0x7c8] sm:$0xff]  ;;  %v275_v3 = vld [vmem:[%s2501_s1 + $0x7d8] sm:$0xff]  ;;  %v1188_v5 = vpack.c.bf16 %v270_v63, %v268_v60  ;;  %v1062_v6 = vpack.c.bf16 %v147_v1, %v145_v0  ;;  %v144_v7 = vld [vmem:[%s2501_s1 + $0x3c0] sm:$0xff] }
  0x74   :  { %v146_v8 = vld [vmem:[%s2501_s1 + $0x3d0] sm:$0xff]  ;;  %v272_v9 = vld [vmem:[%s2501_s1 + $0x7c0] sm:$0xff]  ;;  %v1190_v10 = vpack.c.bf16 %v275_v3, %v273_v2  ;;  %v149_v13 = vld [vmem:[%s2501_s1 + $0x3e8] sm:$0xff] }
  0x75   :  { %1057 = vmatpush1.bf16.msra.mxu1 %v1056_v55  ;;  %v274_v12 = vld [vmem:[%s2501_s1 + $0x7d0] sm:$0xff]  ;;  %v151_v14 = vld [vmem:[%s2501_s1 + $0x3f8] sm:$0xff]  ;;  %v277_v15 = vld [vmem:[%s2501_s1 + $0x7e8] sm:$0xff]  ;;  %v1064_v17 = vpack.c.bf16 %v146_v8, %v144_v7 }
  0x76   :  { %1185 = vmatpush1.bf16.msra.mxu0 %v1184_v56  ;;  %1059 = vmatprep.subr.bf16.mxu1 %v1058_v57  ;;  %v279_v16 = vld [vmem:[%s2501_s1 + $0x7f8] sm:$0xff]  ;;  %v1192_v18 = vpack.c.bf16 %v274_v12, %v272_v9  ;;  %v1066_v19 = vpack.c.bf16 %v151_v14, %v149_v13  ;;  %v148_v20 = vld [vmem:[%s2501_s1 + $0x3e0] sm:$0xff]  ;;  %v150_v21 = vld [vmem:[%s2501_s1 + $0x3f0] sm:$0xff] }
  0x77   :  { %1187 = vmatprep.subr.bf16.mxu0 %v1186_v62  ;;  %v1194_v22 = vpack.c.bf16 %v279_v16, %v277_v15  ;;  %v276_v23 = vld [vmem:[%s2501_s1 + $0x7e0] sm:$0xff]  ;;  %v278_v24 = vld [vmem:[%s2501_s1 + $0x7f0] sm:$0xff]  ;;  %v281_v26 = vld [vmem:[%s2501_s1 + $0x808] sm:$0xff]  ;;  %v1068_v29 = vpack.c.bf16 %v150_v21, %v148_v20 }
  0x78   :  { %v283_v27 = vld [vmem:[%s2501_s1 + $0x818] sm:$0xff]  ;;  %v1196_v31 = vpack.c.bf16 %v278_v24, %v276_v23  ;;  %v280_v34 = vld [vmem:[%s2501_s1 + $0x800] sm:$0xff]  ;;  %v282_v35 = vld [vmem:[%s2501_s1 + $0x810] sm:$0xff] }
  0x79   :  { %1061 = vmatpush1.bf16.msra.mxu1 %v1060_v4  ;;  %v1198_v32 = vpack.c.bf16 %v283_v27, %v281_v26  ;;  %v2194_v36 = vld.sshfl [vmem:[%s2500_s0 + $0x10] sm:$0x33 pattern:$0x76325410]  ;;  %v285_v37 = vld [vmem:[%s2501_s1 + $0x828] sm:$0xff]  ;;  %v287_v38 = vld [vmem:[%s2501_s1 + $0x838] sm:$0xff]  ;;  %v1200_v39 = vpack.c.bf16 %v282_v35, %v280_v34 }
  0x7a   :  { %1189 = vmatpush1.bf16.msra.mxu0 %v1188_v5  ;;  %1063 = vmatprep.subr.bf16.mxu1 %v1062_v6  ;;  %v400_v11 = vcombine.high %v2194_v36, %v2194_v36  ;;  %v1202_v40 = vpack.c.bf16 %v287_v38, %v285_v37  ;;  %v284_v41 = vld [vmem:[%s2501_s1 + $0x820] sm:$0xff]  ;;  %v286_v42 = vld [vmem:[%s2501_s1 + $0x830] sm:$0xff]  ;;  %v289_v43 = vld [vmem:[%s2501_s1 + $0x848] sm:$0xff] }
  0x7b   :  { %1191 = vmatprep.subr.bf16.mxu0 %v1190_v10  ;;  %v291_v44 = vld [vmem:[%s2501_s1 + $0x858] sm:$0xff]  ;;  %v1204_v45 = vpack.c.bf16 %v286_v42, %v284_v41  ;;  %v288_v47 = vld [vmem:[%s2501_s1 + $0x840] sm:$0xff]  ;;  %v293_v48 = vld [vmem:[%s2501_s1 + $0x868] sm:$0xff] }
  0x7c   :  { %v1206_v46 = vpack.c.bf16 %v291_v44, %v289_v43  ;;  %v292_v50 = vld [vmem:[%s2501_s1 + $0x860] sm:$0xff]  ;;  %v294_v51 = vld [vmem:[%s2501_s1 + $0x870] sm:$0xff]  ;;  %v297_v52 = vld [vmem:[%s2501_s1 + $0x888] sm:$0xff] }
  0x7d   :  { %1065 = vmatpush1.bf16.msra.mxu1 %v1064_v17  ;;  %v299_v28 = vld [vmem:[%s2501_s1 + $0x898] sm:$0xff]  ;;  %v1212_v53 = vpack.c.bf16 %v294_v51, %v292_v50  ;;  %v296_v55 = vld [vmem:[%s2501_s1 + $0x880] sm:$0xff]  ;;  %v298_v56 = vld [vmem:[%s2501_s1 + $0x890] sm:$0xff] }
  0x7e   :  { %1193 = vmatpush1.bf16.msra.mxu0 %v1192_v18  ;;  %1067 = vmatprep.subr.bf16.mxu1 %v1066_v19  ;;  %v1214_v54 = vpack.c.bf16 %v299_v28, %v297_v52  ;;  %v301_v57 = vld [vmem:[%s2501_s1 + $0x8a8] sm:$0xff]  ;;  %v303_v58 = vld [vmem:[%s2501_s1 + $0x8b8] sm:$0xff]  ;;  %v1216_v59 = vpack.c.bf16 %v298_v56, %v296_v55  ;;  %v300_v62 = vld [vmem:[%s2501_s1 + $0x8a0] sm:$0xff] }
  0x7f   :  { %1195 = vmatprep.subr.bf16.mxu0 %v1194_v22  ;;  %v1218_v60 = vpack.c.bf16 %v303_v58, %v301_v57  ;;  %v302_v63 = vld [vmem:[%s2501_s1 + $0x8b0] sm:$0xff]  ;;  %v305_v0 = vld [vmem:[%s2501_s1 + $0x8c8] sm:$0xff]  ;;  %v307_v1 = vld [vmem:[%s2501_s1 + $0x8d8] sm:$0xff] }
  0x80   :  { %v1220_v2 = vpack.c.bf16 %v302_v63, %v300_v62  ;;  %v1222_v3 = vpack.c.bf16 %v307_v1, %v305_v0  ;;  %v304_v4 = vld [vmem:[%s2501_s1 + $0x8c0] sm:$0xff]  ;;  %v306_v5 = vld [vmem:[%s2501_s1 + $0x8d0] sm:$0xff]  ;;  %v309_v6 = vld [vmem:[%s2501_s1 + $0x8e8] sm:$0xff] }
  0x81   :  { %1069 = vmatpush1.bf16.msra.mxu1 %v1068_v29  ;;  %v311_v7 = vld [vmem:[%s2501_s1 + $0x8f8] sm:$0xff]  ;;  %v1224_v8 = vpack.c.bf16 %v306_v5, %v304_v4  ;;  %v308_v10 = vld [vmem:[%s2501_s1 + $0x8e0] sm:$0xff]  ;;  %v310_v12 = vld [vmem:[%s2501_s1 + $0x8f0] sm:$0xff] }
  0x82   :  { %1197 = vmatpush1.bf16.msra.mxu0 %v1196_v31  ;;  %v1226_v9 = vpack.c.bf16 %v311_v7, %v309_v6  ;;  %v313_v13 = vld [vmem:[%s2501_s1 + $0x908] sm:$0xff]  ;;  %v315_v14 = vld [vmem:[%s2501_s1 + $0x918] sm:$0xff]  ;;  %v1228_v15 = vpack.c.bf16 %v310_v12, %v308_v10  ;;  %v312_v17 = vld [vmem:[%s2501_s1 + $0x900] sm:$0xff] }
  0x83   :  { %1199 = vmatprep.subr.bf16.mxu0 %v1198_v32  ;;  %v1230_v16 = vpack.c.bf16 %v315_v14, %v313_v13  ;;  %v314_v18 = vld [vmem:[%s2501_s1 + $0x910] sm:$0xff]  ;;  %v317_v19 = vld [vmem:[%s2501_s1 + $0x928] sm:$0xff]  ;;  %v319_v20 = vld [vmem:[%s2501_s1 + $0x938] sm:$0xff] }
  0x84   :  { %547 = vmatmul.mubr.f32.vlgmr.msra.gmra.mrb[0].mxu1 %v1814_v30  ;;  %v290_v30 = vld [vmem:[%s2501_s1 + $0x850] sm:$0xff]  ;;  %v1232_v21 = vpack.c.bf16 %v314_v18, %v312_v17  ;;  %v1234_v22 = vpack.c.bf16 %v319_v20, %v317_v19  ;;  %v316_v23 = vld [vmem:[%s2501_s1 + $0x920] sm:$0xff]  ;;  %v321_v26 = vld [vmem:[%s2501_s1 + $0x948] sm:$0xff] }
  0x85   :  { %689 = vmatmul.mubr.f32.vlgmr.msra.gmra.mrb[0].mxu0 %v1823_v33  ;;  %v295_v33 = vld [vmem:[%s2501_s1 + $0x878] sm:$0xff]  ;;  %v1208_v49 = vpack.c.bf16 %v290_v30, %v288_v47  ;;  %v318_v24 = vld [vmem:[%s2501_s1 + $0x930] sm:$0xff]  ;;  %v320_v32 = vld [vmem:[%s2501_s1 + $0x940] sm:$0xff] }
  0x86   :  { %1201 = vmatpush1.bf16.msra.mxu0 %v1200_v39  ;;  %759 = vmatprep.mubr.f32.mxu0 %v400_v11  ;;  %v1210_v25 = vpack.c.bf16 %v295_v33, %v293_v48  ;;  %v323_v27 = vld [vmem:[%s2501_s1 + $0x958] sm:$0xff]  ;;  %v1236_v29 = vpack.c.bf16 %v318_v24, %v316_v23  ;;  %v322_v34 = vld [vmem:[%s2501_s1 + $0x950] sm:$0xff]  ;;  %v325_v35 = vld [vmem:[%s2501_s1 + $0x968] sm:$0xff] }
  0x87   :  { %1203 = vmatprep.subr.bf16.mxu0 %v1202_v40  ;;  %v1238_v31 = vpack.c.bf16 %v323_v27, %v321_v26  ;;  %v327_v37 = vld [vmem:[%s2501_s1 + $0x978] sm:$0xff]  ;;  %v1240_v38 = vpack.c.bf16 %v322_v34, %v320_v32  ;;  %v324_v11 = vld [vmem:[%s2501_s1 + $0x960] sm:$0xff]  ;;  %v326_v40 = vld [vmem:[%s2501_s1 + $0x970] sm:$0xff] }
  0x88   :  { %v1242_v39 = vpack.c.bf16 %v327_v37, %v325_v35  ;;  %v329_v41 = vld [vmem:[%s2501_s1 + $0x988] sm:$0xff]  ;;  %v331_v42 = vld [vmem:[%s2501_s1 + $0x998] sm:$0xff]  ;;  %v1244_v43 = vpack.c.bf16 %v326_v40, %v324_v11  ;;  %v784_v63 = vld [vmem:[%s2503_s3 + $0x80] sm:$0xff] }
  0x89   :  { %v1246_v44 = vpack.c.bf16 %v331_v42, %v329_v41  ;;  %v333_v47 = vld [vmem:[%s2501_s1 + $0x9a8] sm:$0xff]  ;;  %v335_v30 = vld [vmem:[%s2501_s1 + $0x9b8] sm:$0xff]  ;;  %v768_v1 = vld [vmem:[%s2503_s3] sm:$0xff] }
  0x8a   :  { %1205 = vmatpush1.bf16.msra.mxu0 %v1204_v45  ;;  %v328_v45 = vld [vmem:[%s2501_s1 + $0x980] sm:$0xff]  ;;  %v1250_v33 = vpack.c.bf16 %v335_v30, %v333_v47  ;;  %v337_v50 = vld [vmem:[%s2501_s1 + $0x9c8] sm:$0xff]  ;;  %v339_v51 = vld [vmem:[%s2501_s1 + $0x9d8] sm:$0xff] }
  0x8b   :  { %1207 = vmatprep.subr.bf16.mxu0 %v1206_v46  ;;  %v330_v46 = vld [vmem:[%s2501_s1 + $0x990] sm:$0xff]  ;;  %v1254_v28 = vpack.c.bf16 %v339_v51, %v337_v50  ;;  %v341_v55 = vld [vmem:[%s2501_s1 + $0x9e8] sm:$0xff]  ;;  %v343_v56 = vld [vmem:[%s2501_s1 + $0x9f8] sm:$0xff]  ;;  %v348_v50 = vsub.s32 0, %v1620_v61 }
  0x8c   :  { %v1248_v48 = vpack.c.bf16 %v330_v46, %v328_v45  ;;  %v1258_v58 = vpack.c.bf16 %v343_v56, %v341_v55  ;;  %v785_v0 = vld [vmem:[%s2503_s3 + $0x88] sm:$0xff]  ;;  %v787_v4 = vld [vmem:[%s2503_s3 + $0x98] sm:$0xff]  ;;  %v770_v7 = vld [vmem:[%s2503_s3 + $0x10] sm:$0xff] }
  0x8d   :  { %v789_v10 = vld [vmem:[%s2503_s3 + $0xa8] sm:$0xff]  ;;  %v772_v14 = vld [vmem:[%s2503_s3 + $0x20] sm:$0xff]  ;;  %v791_v17 = vld [vmem:[%s2503_s3 + $0xb8] sm:$0xff] }
  0x8e   :  { %1209 = vmatpush1.bf16.msra.mxu0 %v1208_v49  ;;  %v332_v49 = vld [vmem:[%s2501_s1 + $0x9a0] sm:$0xff]  ;;  %v774_v20 = vld [vmem:[%s2503_s3 + $0x30] sm:$0xff]  ;;  %v793_v23 = vld [vmem:[%s2503_s3 + $0xc8] sm:$0xff] }
  0x8f   :  { %1211 = vmatprep.subr.bf16.mxu0 %v1210_v25  ;;  %v334_v25 = vld [vmem:[%s2501_s1 + $0x9b0] sm:$0xff]  ;;  %v776_v27 = vld [vmem:[%s2503_s3 + $0x40] sm:$0xff]  ;;  %v795_v32 = vld [vmem:[%s2503_s3 + $0xd8] sm:$0xff] }
  0x90   :  { %v1252_v52 = vpack.c.bf16 %v334_v25, %v332_v49  ;;  %v778_v37 = vld [vmem:[%s2503_s3 + $0x50] sm:$0xff]  ;;  %v797_v11 = vld [vmem:[%s2503_s3 + $0xe8] sm:$0xff]  ;;  %v780_v42 = vld [vmem:[%s2503_s3 + $0x60] sm:$0xff] }
  0x91   :  { %v798_v45 = vld [vmem:[%s2503_s3 + $0xf0] sm:$0xff]  ;;  %v799_v46 = vld [vmem:[%s2503_s3 + $0xf8] sm:$0xff]  ;;  %v344_v51 = vld [vmem:[%s2502_s2] sm:$0x3]  ;;  %s1337_s2 = smov [#allocation2]  }
  0x92   :  { %1213 = vmatpush1.bf16.msra.mxu0 %v1212_v53  ;;  %v336_v53 = vld [vmem:[%s2501_s1 + $0x9c0] sm:$0xff]  ;;  %v1290_v47 = vpack.c.bf16 %v799_v46, %v798_v45  ;;  %v782_v30 = vld [vmem:[%s2503_s3 + $0x70] sm:$0xff]  ;;  %s897_s21 = sshll.u32 %s1337_s2, 4  ;;  %s898_s21 = int_to_ptr.vmem [resolvable:$true] %s897_s21 }
  0x93   :  { %1215 = vmatprep.subr.bf16.mxu0 %v1214_v54  ;;  %v338_v54 = vld [vmem:[%s2501_s1 + $0x9d0] sm:$0xff]  ;;  %p1317_p1 = scmp.lt.s32.totalorder %s898_s21, %s898_s21 }
  0x94   :  { %v1256_v57 = vpack.c.bf16 %v338_v54, %v336_v53 }
  0x96   :  { %1217 = vmatpush1.bf16.msra.mxu0 %v1216_v59  ;;  %v340_v59 = vld [vmem:[%s2501_s1 + $0x9e0] sm:$0xff] }
  0x97   :  { %1219 = vmatprep.subr.bf16.mxu0 %v1218_v60  ;;  %v342_v60 = vld [vmem:[%s2501_s1 + $0x9f0] sm:$0xff] }
  0x98   :  { %v1260_v62 = vpack.c.bf16 %v342_v60, %v340_v59 }
  0x9a   :  { %1221 = vmatpush1.bf16.msra.mxu0 %v1220_v2  ;;  %v1262_v2 = vpack.c.bf16 %v785_v0, %v784_v63 }
  0x9b   :  { %1223 = vmatprep.subr.bf16.mxu0 %v1222_v3  ;;  %v769_v3 = vld [vmem:[%s2503_s3 + $0x8] sm:$0xff] }
  0x9c   :  { %v1264_v5 = vpack.c.bf16 %v769_v3, %v768_v1  ;;  %1263 = vmatprep.subr.bf16.mxu1 %v1262_v2  ;;  %v906_v1 = vld [vmem:[%s2504_s4] ss:$0 sm:$0xff]  ;;  %s1312_s4 = scalar_lea.vmem %s898_s21, 32 }
  0x9d   :  { %p1313_p0 = scmp.ne.s32.totalorder %s898_s21, %s1312_s4  ;;  %p1318_p2 = scmp.lt.s32.totalorder %s1312_s4, %s1312_s4 }
  0x9e   :  { %1225 = vmatpush1.bf16.msra.mxu0 %v1224_v8  ;;  %v771_v8 = vld [vmem:[%s2503_s3 + $0x18] sm:$0xff]  ;;  %1265 = vmatpush3.bf16.msra.mxu1 %v1264_v5 }
  0x9f   :  { %1227 = vmatprep.subr.bf16.mxu0 %v1226_v9  ;;  %v788_v9 = vld [vmem:[%s2503_s3 + $0xa0] sm:$0xff]  ;;  %v1268_v12 = vpack.c.bf16 %v771_v8, %v770_v7  ;;  %p1319_p3 = por %p1318_p2, %p1317_p1 }
  0xa0   :  { %v1270_v13 = vpack.c.bf16 %v789_v10, %v788_v9 }
  0xa1   :  { %p1320_p4 = pnand %p1319_p3, %p1313_p0 }
  0xa2   :  { %1229 = vmatpush1.bf16.msra.mxu0 %v1228_v15  ;;  %v773_v15 = vld [vmem:[%s2503_s3 + $0x28] sm:$0xff] }
  0xa3   :  { %1231 = vmatprep.subr.bf16.mxu0 %v1230_v16  ;;  %v790_v16 = vld [vmem:[%s2503_s3 + $0xb0] sm:$0xff]  ;;  %v1272_v18 = vpack.c.bf16 %v773_v15, %v772_v14 }
  0xa4   :  { %v1274_v19 = vpack.c.bf16 %v791_v17, %v790_v16 }
  0xa6   :  { %1233 = vmatpush1.bf16.msra.mxu0 %v1232_v21  ;;  %v775_v21 = vld [vmem:[%s2503_s3 + $0x38] sm:$0xff] }
  0xa7   :  { %1235 = vmatprep.subr.bf16.mxu0 %v1234_v22  ;;  %v792_v22 = vld [vmem:[%s2503_s3 + $0xc0] sm:$0xff]  ;;  %v1276_v24 = vpack.c.bf16 %v775_v21, %v774_v20 }
  0xa8   :  { %v1278_v26 = vpack.c.bf16 %v793_v23, %v792_v22 }
  0xaa   :  { %1237 = vmatpush1.bf16.msra.mxu0 %v1236_v29  ;;  %v777_v29 = vld [vmem:[%s2503_s3 + $0x48] sm:$0xff] }
  0xab   :  { %1239 = vmatprep.subr.bf16.mxu0 %v1238_v31  ;;  %v794_v31 = vld [vmem:[%s2503_s3 + $0xd0] sm:$0xff]  ;;  %v1280_v34 = vpack.c.bf16 %v777_v29, %v776_v27 }
  0xac   :  { %v1282_v35 = vpack.c.bf16 %v795_v32, %v794_v31 }
  0xae   :  { %1241 = vmatpush1.bf16.msra.mxu0 %v1240_v38  ;;  %v779_v38 = vld [vmem:[%s2503_s3 + $0x58] sm:$0xff] }
  0xaf   :  { %1243 = vmatprep.subr.bf16.mxu0 %v1242_v39  ;;  %v796_v39 = vld [vmem:[%s2503_s3 + $0xe0] sm:$0xff]  ;;  %v1284_v40 = vpack.c.bf16 %v779_v38, %v778_v37 }
  0xb0   :  { %v1286_v41 = vpack.c.bf16 %v797_v11, %v796_v39 }
  0xb2   :  { %1245 = vmatpush1.bf16.msra.mxu0 %v1244_v43  ;;  %v781_v43 = vld [vmem:[%s2503_s3 + $0x68] sm:$0xff] }
  0xb3   :  { %1247 = vmatprep.subr.bf16.mxu0 %v1246_v44  ;;  %v1288_v44 = vpack.c.bf16 %v781_v43, %v780_v42 }
  0xb6   :  { %1249 = vmatpush1.bf16.msra.mxu0 %v1248_v48  ;;  %v783_v48 = vld [vmem:[%s2503_s3 + $0x78] sm:$0xff] }
  0xb7   :  { %1251 = vmatprep.subr.bf16.mxu0 %v1250_v33  ;;  %v1292_v33 = vpack.c.bf16 %v783_v48, %v782_v30 }
  0xba   :  { %1253 = vmatpush1.bf16.msra.mxu0 %v1252_v52  ;;  %v352_v52 = vsub.s32 1, %v1620_v61 }
  0xbb   :  { %1255 = vmatprep.subr.bf16.mxu0 %v1254_v28  ;;  %v349_v28 = vrot.slane %v344_v51, %v348_v50 }
  0xbc   :  { %v353_v53 = vrot.slane %v344_v51, %v352_v52 }
  0xbe   :  { %1257 = vmatpush1.bf16.msra.mxu0 %v1256_v57 }
  0xbf   :  { %1259 = vmatprep.subr.bf16.mxu0 %v1258_v58 }
  0xc2   :  { %1261 = vmatpush1.bf16.msra.mxu0 %v1260_v62 }
  0xc5   :  { %760 = vmatmul.mubr.f32.vlgmr.msra.gmra.mrb[0].mxu0 %v2194_v36  ;;  %v786_v36 = vld [vmem:[%s2503_s3 + $0x90] sm:$0xff] }
  0xc6   :  { %v1266_v6 = vpack.c.bf16 %v787_v4, %v786_v36 }
  0xc8   :  { %1267 = vmatprep.subr.bf16.mxu1 %v1266_v6 }
  0xc9   :  { %1269 = vmatpush3.bf16.msra.mxu1 %v1268_v12 }
  0xca   :  { %1271 = vmatprep.subr.bf16.mxu1 %v1270_v13 }
  0xcd   :  { %1273 = vmatpush3.bf16.msra.mxu1 %v1272_v18 }
  0xce   :  { %1275 = vmatprep.subr.bf16.mxu1 %v1274_v19 }
  0xd1   :  { %1277 = vmatpush3.bf16.msra.mxu1 %v1276_v24 }
  0xd2   :  { %1279 = vmatprep.subr.bf16.mxu1 %v1278_v26 }
  0xd5   :  { %1281 = vmatpush3.bf16.msra.mxu1 %v1280_v34 }
  0xd6   :  { %1283 = vmatprep.subr.bf16.mxu1 %v1282_v35 }
  0xd9   :  { %1285 = vmatpush3.bf16.msra.mxu1 %v1284_v40 }
  0xda   :  { %1287 = vmatprep.subr.bf16.mxu1 %v1286_v41 }
  0xdd   :  { %1289 = vmatpush3.bf16.msra.mxu1 %v1288_v44 }
  0xde   :  { %1291 = vmatprep.subr.bf16.mxu1 %v1290_v47 }
  0xe1   :  { %1293 = vmatpush3.bf16.msra.mxu1 %v1292_v33 }
 0x157   :  { %v548_v49 = vpop.f32.mrb[0].mxu1 }
 0x158   :  { %v550_v25 = vpop.f32.mrb[1].mxu1  ;;  %v1294_v54 = vadd.f32 %v548_v49, %v349_v28 }
 0x159   :  { %v1296_v55 = vadd.f32 %v550_v25, %v353_v53 }
 0x198   :  { %v761_v56 = vpop.f32.mrb[0].mxu0 }
 0x199   :  { %v1295_v57 = vadd.f32 %v1294_v54, %v761_v56  ;;  %v763_v58 = vpop.f32.mrb[1].mxu0 }
 0x19a   :  { %v1297_v59 = vadd.f32 %v1296_v55, %v763_v58 }
 0x19b   :  { %v766_v62 = vmax.f32 %v1295_v57, 0.0 }
 0x19c   :  { %v767_v60 = vmax.f32 %v1297_v59, 0.0 }
 0x19e   :  { %871 = vmatprep.mubr.f32.mxu1 %v767_v60 }
 0x19f   :  { %872 = vmatmul.mubr.f32.vlgmr.msra.gmra.mrb[2].mxu1 %v766_v62 }
 0x272   :  { %v939_v63 = vpop.f32.mrb[2].mxu1 }
 0x273   :  { %v940_v0 = vpop.f32.mrb[3].mxu1 }
 0x274   :  { %v941_v2 = vadd.f32 %v940_v0, %v939_v63 }
 0x276   :  { %v874_v61 = vadd.f32 %v941_v2, %v906_v1 }
 0x278   :  { %v878_v3 = vsel %vm877_vm0, %v874_v61, -inf }
 0x279   :  { %879 = vmax.xlane.f32.xlu0 %v878_v3 }
 0x306   :  { %v880_v36 = vpop.xlane.xlu0 %879 }
 0x307   :  { %v881_v4 = vsub.f32 %v874_v61, %v880_v36 }
 0x309   :  { %v882_v5 = vmul.f32 1.442695, %v881_v4 }
 0x30b   :  { %1308 = vpow2.f32 %v882_v5 }
 0x315   :  { %v1309_v6 = vpop.eup %1308 }
 0x316   :  { %v884_v7 = vsel %vm877_vm0, %v1309_v6, 0.0 }
 0x317   :  { %885 = vadd.xlane.f32.xlu0 %v884_v7 }
 0x3a4   :  { %v886_v8 = vpop.xlane.xlu0 %885 }
 0x3a5   :  { %1310 = vlog2.f32 %v886_v8 }
 0x3af   :  { %v1311_v9 = vpop.eup %1310 }
 0x3b0   :  { %v888_v10 = vmul.f32 0.6931472, %v1311_v9 }
 0x3b2   :  { %v889_v12 = vsub.f32 %v881_v4, %v888_v10 }
 0x3b4   :  { %890 = vst.msk [vmem:[#allocation2] sm:$0x3] %vm877_vm0, %v889_v12 }
 0x3b5   :  { %1323 = shalt.err (!%p1320_p4)
}
 0x3b6   :  { %s1324_s24 = scalar_lea.hbm %s2505_s5, 32 }
 0x3b7   :  { %p1325_p5 = scmp.ne.s32.totalorder %s2505_s5, %s1324_s24  ;;  %p1328_p6 = scmp.lt.u32.totalorder %s1324_s24, %s2505_s5 }
 0x3b9   :  { %p1330_p7 = pnand %p1328_p6, %p1325_p5 }
 0x3bb   :  { %1333 = shalt.err (!%p1330_p7)
}
 0x3bc   :  { %900 = dma.vmem_to_hbm [thread:$0]  %s898_s21, 32, %s2505_s5, [#allocation3]  }
 0x3bd   :  { %1334 = dma.done.wait [#allocation3], 32  }
 0x3be   :  { %1335 = vsyncadd [#allocation3], 4294967264 }
 0x3bf   :  { %904 = vsyncpa [#allocation3], 1 }

// kernel: net_latent_forward.2
= control target key start
LH: loop header
LB: loop body
LE: loop exit
PB: predicated region body
PF: predicated region fallthrough
CT: control target
= control target key end

     0   :  { %s19242_s25 = smov 0   ;;  %s22922_s0 = inlined_call_operand.vmem [shape: f32[2,10416,16], index: 0, kind: input, shape index: {}]   ;;  %s22923_s1 = inlined_call_operand.vmem [shape: f32[6,16,128], index: 1, kind: input, shape index: {}]   ;;  %s22924_s2 = inlined_call_operand.vmem [shape: f32[1,128], index: 2, kind: input, shape index: {}]   ;;  %s22925_s3 = inlined_call_operand.vmem [shape: f32[6,128,128], index: 3, kind: input, shape index: {}]   ;;  %s22926_s4 = inlined_call_operand.vmem [shape: f32[1,128], index: 4, kind: input, shape index: {}]   ;;  %s22927_s5 = inlined_call_operand.vmem [shape: f32[6,128,128], index: 5, kind: input, shape index: {}]   ;;  %s22928_s6 = inlined_call_operand.vmem [shape: f32[1,128], index: 6, kind: input, shape index: {}]   ;;  %s22929_s7 = inlined_call_operand.vmem [shape: f32[9,64,64], index: 7, kind: input, shape index: {}]   ;;  %s22930_s8 = inlined_call_operand.vmem [shape: f32[1,64], index: 8, kind: input, shape index: {}]   ;;  %s22931_s9 = inlined_call_operand.vmem [shape: f32[9,64,32], index: 9, kind: input, shape index: {}]   ;;  %s22932_s10 = inlined_call_operand.vmem [shape: f32[1,32], index: 10, kind: input, shape index: {}]   ;;  %s22933_s11 = inlined_call_operand.vmem [shape: f32[9,32,16], index: 11, kind: input, shape index: {}]   ;;  %s22934_s12 = inlined_call_operand.vmem [shape: f32[1,16], index: 12, kind: input, shape index: {}]   ;;  %s22935_s13 = inlined_call_operand.vmem [shape: f32[2,80,16], index: 13, kind: output, shape index: {}]  }
   0x1 LB: > { %s12449_s26 = sadd.s32 4294967295, %s19138_s25   ;;  %p12453_p0 = scmp.ge.s32.totalorder %s19138_s25, 1  ;;  %s19138_s25 = sphi %s19242_s25, %s23_s25  }
   0x2   : > { %p387_p1 = scmp.lt.s32.totalorder %s19138_s25, 3 }
   0x4   : > { %p388_p2 = pnand %p12453_p0, %p387_p1 }
   0x6   : > { %391 = sbr.rel (%p388_p2) target bundleno = 2427 (0x97b), region = 72 }
   0xd   : > { %p19252_p3 = scmp.lt.s32.totalorder %s12449_s26, 1  ;;  %v527_v0 = vlaneseq  ;;  %v19259_v1 = vld [vmem:[%s22924_s2] ss:$0 sm:$0xff]  ;;  %vm485_vm0 = vcmask 523264   ;;  %vm520_vm1 = vcmask 261120   ;;  %v19164_v2 = vmov 0.0  }
   0xe   : > { %441 = vst [vmem:[#allocation2] sm:$0xff] %v19164_v2  ;;  %442 = vst [vmem:[#allocation2 + $0x8] sm:$0xff] %v19164_v2  ;;  %s19412_s21 = smov 0  }
   0xf   : > { %443 = vst [vmem:[#allocation2 + $0x10] sm:$0xff] %v19164_v2  ;;  %444 = vst [vmem:[#allocation2 + $0x18] sm:$0xff] %v19164_v2  ;;  %s22947_s26 = smov (!%p19252_p3, %s12449_s26), 1  ;;  %v19390_v3 = vshrl.u32 %v527_v0, 7 }
  0x10   : > { %445 = vst [vmem:[#allocation2 + $0x20] sm:$0xff] %v19164_v2  ;;  %446 = vst [vmem:[#allocation2 + $0x28] sm:$0xff] %v19164_v2  ;;  %s19042_s30 = smul.u32 10416, %s22947_s26 }
  0x11   : > { %447 = vst [vmem:[#allocation2 + $0x30] sm:$0xff] %v19164_v2  ;;  %448 = vst [vmem:[#allocation2 + $0x38] sm:$0xff] %v19164_v2  ;;  %v19393_v4 = vadd.s32 16, %v19390_v3  ;;  %v19396_v5 = vadd.s32 32, %v19390_v3  ;;  %v19399_v6 = vadd.s32 72, %v19390_v3  ;;  %vm538_vm2 = vcmp.eq.s32.totalorder %v19390_v3, 0 }
  0x12   : > { %449 = vst [vmem:[#allocation2 + $0x40] sm:$0xff] %v19164_v2  ;;  %450 = vst [vmem:[#allocation2 + $0x48] sm:$0xff] %v19164_v2  ;;  %s19043_s14 = smul.u32 80, %s22947_s26  ;;  %s19405_s17 = scalar_lea.vmem %s22922_s0, %s19042_s30 }
  0x13   : > { %451 = vst [vmem:[#allocation2 + $0x50] sm:$0xff] %v19164_v2  ;;  %452 = vst [vmem:[#allocation2 + $0x2858] sm:$0xff] %v19164_v2 }
  0x14   : > { %453 = vst [vmem:[#allocation2 + $0x2860] sm:$0xff] %v19164_v2  ;;  %454 = vst [vmem:[#allocation2 + $0x2868] sm:$0xff] %v19164_v2  ;;  %s19410_s20 = scalar_lea.vmem %s22935_s13, %s19043_s14 }
  0x15   : > { %455 = vst [vmem:[#allocation2 + $0x2870] sm:$0xff] %v19164_v2  ;;  %456 = vst [vmem:[#allocation2 + $0x2878] sm:$0xff] %v19164_v2 }
  0x16   : > { %457 = vst [vmem:[#allocation2 + $0x2880] sm:$0xff] %v19164_v2  ;;  %458 = vst [vmem:[#allocation2 + $0x2888] sm:$0xff] %v19164_v2 }
  0x17   : > { %459 = vst [vmem:[#allocation2 + $0x2890] sm:$0xff] %v19164_v2  ;;  %460 = vst [vmem:[#allocation2 + $0x2898] sm:$0xff] %v19164_v2 }
  0x18   : > { %461 = vst [vmem:[#allocation2 + $0x28a0] sm:$0xff] %v19164_v2  ;;  %462 = vst [vmem:[#allocation2 + $0x28a8] sm:$0xff] %v19164_v2 }
  0x19   : > { %463 = vst [vmem:[#allocation3] sm:$0xff] %v19164_v2  ;;  %464 = vst [vmem:[#allocation3 + $0x8] sm:$0xff] %v19164_v2 }
  0x1a   : > { %465 = vst [vmem:[#allocation3 + $0x10] sm:$0xff] %v19164_v2  ;;  %466 = vst [vmem:[#allocation3 + $0x18] sm:$0xff] %v19164_v2 }
  0x1b   : > { %467 = vst [vmem:[#allocation3 + $0x20] sm:$0xff] %v19164_v2  ;;  %468 = vst [vmem:[#allocation3 + $0x28] sm:$0xff] %v19164_v2 }
  0x1c   : > { %469 = vst [vmem:[#allocation3 + $0x30] sm:$0xff] %v19164_v2  ;;  %470 = vst [vmem:[#allocation3 + $0x38] sm:$0xff] %v19164_v2 }
  0x1d   : > { %471 = vst [vmem:[#allocation3 + $0x40] sm:$0xff] %v19164_v2  ;;  %472 = vst [vmem:[#allocation3 + $0x48] sm:$0xff] %v19164_v2 }
  0x1e   : > { %473 = vst [vmem:[#allocation3 + $0x50] sm:$0xff] %v19164_v2  ;;  %474 = vst [vmem:[#allocation3 + $0x2858] sm:$0xff] %v19164_v2 }
  0x1f   : > { %475 = vst [vmem:[#allocation3 + $0x2860] sm:$0xff] %v19164_v2  ;;  %476 = vst [vmem:[#allocation3 + $0x2868] sm:$0xff] %v19164_v2 }
  0x20   : > { %477 = vst [vmem:[#allocation3 + $0x2870] sm:$0xff] %v19164_v2  ;;  %478 = vst [vmem:[#allocation3 + $0x2878] sm:$0xff] %v19164_v2 }
  0x21   : > { %479 = vst [vmem:[#allocation3 + $0x2880] sm:$0xff] %v19164_v2  ;;  %480 = vst [vmem:[#allocation3 + $0x2888] sm:$0xff] %v19164_v2 }
  0x22   : > { %481 = vst [vmem:[#allocation3 + $0x2890] sm:$0xff] %v19164_v2  ;;  %482 = vst [vmem:[#allocation3 + $0x2898] sm:$0xff] %v19164_v2 }
  0x23   : > { %483 = vst [vmem:[#allocation3 + $0x28a0] sm:$0xff] %v19164_v2  ;;  %484 = vst [vmem:[#allocation3 + $0x28a8] sm:$0xff] %v19164_v2 }
  0x24   : > { %486 = vst.msk [vmem:[#allocation4] sm:$0xff] %vm485_vm0, %v19164_v2  ;;  %487 = vst.msk [vmem:[#allocation4 + $0x8] sm:$0xff] %vm485_vm0, %v19164_v2 }
  0x25   : > { %488 = vst.msk [vmem:[#allocation4 + $0x10] sm:$0xff] %vm485_vm0, %v19164_v2  ;;  %489 = vst.msk [vmem:[#allocation4 + $0x18] sm:$0xff] %vm485_vm0, %v19164_v2 }
  0x26   : > { %490 = vst.msk [vmem:[#allocation4 + $0x20] sm:$0xff] %vm485_vm0, %v19164_v2  ;;  %491 = vst.msk [vmem:[#allocation4 + $0x28] sm:$0xff] %vm485_vm0, %v19164_v2 }
  0x27   : > { %492 = vst.msk [vmem:[#allocation4 + $0x30] sm:$0xff] %vm485_vm0, %v19164_v2  ;;  %493 = vst.msk [vmem:[#allocation4 + $0x38] sm:$0xff] %vm485_vm0, %v19164_v2 }
  0x28   : > { %494 = vst.msk [vmem:[#allocation4 + $0x40] sm:$0xff] %vm485_vm0, %v19164_v2  ;;  %495 = vst.msk [vmem:[#allocation4 + $0x48] sm:$0xff] %vm485_vm0, %v19164_v2 }
  0x29   : > { %496 = vst.msk [vmem:[#allocation4 + $0x50] sm:$0xff] %vm485_vm0, %v19164_v2  ;;  %497 = vst.msk [vmem:[#allocation4 + $0x1458] sm:$0xff] %vm485_vm0, %v19164_v2 }
  0x2a   : > { %498 = vst.msk [vmem:[#allocation4 + $0x1460] sm:$0xff] %vm485_vm0, %v19164_v2  ;;  %499 = vst.msk [vmem:[#allocation4 + $0x1468] sm:$0xff] %vm485_vm0, %v19164_v2 }
  0x2b   : > { %500 = vst.msk [vmem:[#allocation4 + $0x1470] sm:$0xff] %vm485_vm0, %v19164_v2  ;;  %501 = vst.msk [vmem:[#allocation4 + $0x1478] sm:$0xff] %vm485_vm0, %v19164_v2 }
  0x2c   : > { %502 = vst.msk [vmem:[#allocation4 + $0x1480] sm:$0xff] %vm485_vm0, %v19164_v2  ;;  %503 = vst.msk [vmem:[#allocation4 + $0x1488] sm:$0xff] %vm485_vm0, %v19164_v2 }
  0x2d   : > { %504 = vst.msk [vmem:[#allocation4 + $0x1490] sm:$0xff] %vm485_vm0, %v19164_v2  ;;  %505 = vst.msk [vmem:[#allocation4 + $0x1498] sm:$0xff] %vm485_vm0, %v19164_v2 }
  0x2e   : > { %506 = vst.msk [vmem:[#allocation4 + $0x14a0] sm:$0xff] %vm485_vm0, %v19164_v2  ;;  %507 = vst.msk [vmem:[#allocation4 + $0x14a8] sm:$0xff] %vm485_vm0, %v19164_v2 }
  0x2f   : > { %508 = vst.msk [vmem:[#allocation5] sm:$0xff] %vm485_vm0, %v19164_v2  ;;  %509 = vst.msk [vmem:[#allocation5 + $0x8] sm:$0xff] %vm485_vm0, %v19164_v2 }
  0x30   : > { %510 = vst.msk [vmem:[#allocation5 + $0x10] sm:$0xff] %vm485_vm0, %v19164_v2  ;;  %511 = vst.msk [vmem:[#allocation5 + $0x18] sm:$0xff] %vm485_vm0, %v19164_v2 }
  0x31   : > { %512 = vst.msk [vmem:[#allocation5 + $0x20] sm:$0xff] %vm485_vm0, %v19164_v2  ;;  %513 = vst.msk [vmem:[#allocation5 + $0x28] sm:$0xff] %vm485_vm0, %v19164_v2 }
  0x32   : > { %514 = vst.msk [vmem:[#allocation5 + $0x530] sm:$0xff] %vm485_vm0, %v19164_v2  ;;  %515 = vst.msk [vmem:[#allocation5 + $0x538] sm:$0xff] %vm485_vm0, %v19164_v2 }
  0x33   : > { %516 = vst.msk [vmem:[#allocation5 + $0x540] sm:$0xff] %vm485_vm0, %v19164_v2  ;;  %517 = vst.msk [vmem:[#allocation5 + $0x548] sm:$0xff] %vm485_vm0, %v19164_v2 }
  0x34   : > { %518 = vst.msk [vmem:[#allocation5 + $0x550] sm:$0xff] %vm485_vm0, %v19164_v2  ;;  %519 = vst.msk [vmem:[#allocation5 + $0x558] sm:$0xff] %vm485_vm0, %v19164_v2 }
  0x35   : > { %521 = vst.msk [vmem:[#allocation6] sm:$0xff] %vm520_vm1, %v19164_v2  ;;  %522 = vst.msk [vmem:[#allocation6 + $0x8] sm:$0xff] %vm520_vm1, %v19164_v2 }
  0x36   : > { %523 = vst.msk [vmem:[#allocation6 + $0x10] sm:$0xff] %vm520_vm1, %v19164_v2  ;;  %524 = vst.msk [vmem:[#allocation6 + $0x158] sm:$0xff] %vm520_vm1, %v19164_v2 }
  0x37   : > { %525 = vst.msk [vmem:[#allocation6 + $0x160] sm:$0xff] %vm520_vm1, %v19164_v2  ;;  %526 = vst.msk [vmem:[#allocation6 + $0x168] sm:$0xff] %vm520_vm1, %v19164_v2 }
  0x38   : > { %22939 = vst [vmem:[#allocation10_spill] sm:$0xff] %v19393_v4 }
  0x39 LB: >> { %v12476_v7 = vld [vmem:[%s22923_s1 + $0x10] sm:$0xff]  ;;  %v12477_v8 = vld [vmem:[%s22923_s1 + $0x18] sm:$0xff]  ;;  %v569_v12 = vld [vmem:[%s22923_s1] sm:$0xff]  ;;  %s12111_s19 = smul.u32 80, %s19142_s21  ;;  %vm616_vm3 = vcmask 130048   ;;  %s554_s21 = sadd.s32 1, %s19142_s21   ;;  %s19142_s21 = sphi %s19412_s21, %s554_s21  }
  0x3a   : >> { %v12530_v9 = vld [vmem:[%s22923_s1 + $0x30] sm:$0xff]  ;;  %v17470_v10 = vpack.c.bf16 %v12477_v8, %v12476_v7  ;;  %v12531_v11 = vld [vmem:[%s22923_s1 + $0x38] sm:$0xff]  ;;  %v570_v13 = vld [vmem:[%s22923_s1 + $0x8] sm:$0xff]  ;;  %p551_p4 = scmp.ge.s32.totalorder %s554_s21, 128  }
  0x3b   : >> { %v17482_v14 = vpack.c.bf16 %v12531_v11, %v12530_v9  ;;  %v17474_v15 = vpack.c.bf16 %v570_v13, %v569_v12  ;;  %v12552_v16 = vld [vmem:[%s22923_s1 + $0x40] sm:$0xff]  ;;  %v12553_v17 = vld [vmem:[%s22923_s1 + $0x48] sm:$0xff]  ;;  %s19448_s29 = scalar_lea.vmem %s19405_s17, %s12111_s19  ;;  %v12574_v21 = vld [vmem:[%s22923_s1 + $0x50] sm:$0xff]  ;;  %s19589_s23 = scalar_lea.vmem [#allocation2], %s12111_s19 }
  0x3c   : >> { %17471 = vmatprep.subr.bf16.mxu1 %v17470_v10  ;;  %v17486_v18 = vpack.c.bf16 %v12553_v17, %v12552_v16  ;;  %v12508_v19 = vld [vmem:[%s22923_s1 + $0x20] sm:$0xff]  ;;  %v12509_v20 = vld [vmem:[%s22923_s1 + $0x28] sm:$0xff]  ;;  %v12575_v22 = vld [vmem:[%s22923_s1 + $0x58] sm:$0xff]  ;;  %s19617_s26 = smov (%p551_p4), 0  }
  0x3d   : >> { %17483 = vmatprep.subr.bf16.mxu0 %v17482_v14  ;;  %17473 = vmatpush3.bf16.msra.mxu1 %v17470_v10  ;;  %v12466_v23 = vld [vmem:[%s19448_s29 + $0x7] sm:$0xff]  ;;  %v12520_v24 = vld [vmem:[%s19448_s29 + $0x57] sm:$0xff]  ;;  %v12467_v25 = vld [vmem:[%s19448_s29 + $0xf] sm:$0xff]  ;;  %v17478_v31 = vpack.c.bf16 %v12509_v20, %v12508_v19  ;;  %v17490_v32 = vpack.c.bf16 %v12575_v22, %v12574_v21 }
  0x3e   : >> { %17485 = vmatpush3.bf16.msra.mxu0 %v17482_v14  ;;  %17475 = vmatprep.subr.bf16.mxu1 %v17474_v15  ;;  %v603_v26 = vsel %vm538_vm2, 0.0, %v12466_v23  ;;  %v1088_v27 = vsel %vm538_vm2, 0.0, %v12520_v24  ;;  %v12521_v28 = vld [vmem:[%s19448_s29 + $0x5f] sm:$0xff]  ;;  %v12468_v29 = vld [vmem:[%s19448_s29 + $0x17] sm:$0xff]  ;;  %v12522_v30 = vld [vmem:[%s19448_s29 + $0x67] sm:$0xff] }
  0x3f   : >> { %17487 = vmatprep.subr.bf16.mxu0 %v17486_v18  ;;  %15092 = vmatprep.mubr.msk.f32.mxu1 %vm616_vm3, %v603_v26  ;;  %v12469_v33 = vld [vmem:[%s19448_s29 + $0x1f] sm:$0xff]  ;;  %v12523_v34 = vld [vmem:[%s19448_s29 + $0x6f] sm:$0xff]  ;;  %v12470_v35 = vld [vmem:[%s19448_s29 + $0x27] sm:$0xff] }
  0x40   : >> { %15149 = vmatprep.mubr.msk.f32.mxu0 %vm616_vm3, %v1088_v27  ;;  %15093 = vmatmul.mubr.msk.f32.vlgmr.msra.gmra.mrb[0].mxu1 %vm616_vm3, %v12467_v25  ;;  %v12524_v36 = vld [vmem:[%s19448_s29 + $0x77] sm:$0xff]  ;;  %v12471_v37 = vld [vmem:[%s19448_s29 + $0x2f] sm:$0xff]  ;;  %v12525_v38 = vld [vmem:[%s19448_s29 + $0x7f] sm:$0xff] }
  0x41   : >> { %15150 = vmatmul.mubr.msk.f32.vlgmr.msra.gmra.mrb[0].mxu0 %vm616_vm3, %v12521_v28  ;;  %17477 = vmatpush3.bf16.msra.mxu1 %v17474_v15  ;;  %v12472_v39 = vld [vmem:[%s19448_s29 + $0x37] sm:$0xff]  ;;  %v12526_v40 = vld [vmem:[%s19448_s29 + $0x87] sm:$0xff]  ;;  %v12473_v41 = vld [vmem:[%s19448_s29 + $0x3f] sm:$0xff] }
  0x42   : >> { %17489 = vmatpush3.bf16.msra.mxu0 %v17486_v18  ;;  %15095 = vmatprep.mubr.msk.f32.mxu1 %vm616_vm3, %v12468_v29  ;;  %v12527_v42 = vld [vmem:[%s19448_s29 + $0x8f] sm:$0xff]  ;;  %v12474_v43 = vld [vmem:[%s19448_s29 + $0x47] sm:$0xff]  ;;  %v12528_v44 = vld [vmem:[%s19448_s29 + $0x97] sm:$0xff] }
  0x43   : >> { %15152 = vmatprep.mubr.msk.f32.mxu0 %vm616_vm3, %v12522_v30  ;;  %17479 = vmatprep.subr.bf16.mxu1 %v17478_v31  ;;  %v12475_v45 = vld [vmem:[%s19448_s29 + $0x4f] sm:$0xff]  ;;  %v12529_v46 = vld [vmem:[%s19448_s29 + $0x9f] sm:$0xff]  ;;  %v12564_v2 = vld [vmem:[%s19448_s29 + $0xa7] sm:$0xff] }
  0x44   : >> { %17491 = vmatprep.subr.bf16.mxu0 %v17490_v32  ;;  %15096 = vmatmul.mubr.msk.f32.gmra.mrb[2].mxu1 %vm616_vm3, %v12469_v33  ;;  %v12456_v47 = vld [vmem:[%s19448_s29 + $0x8] sm:$0xff]  ;;  %v12457_v49 = vld [vmem:[%s19448_s29 + $0x10] sm:$0xff]  ;;  %v12458_v51 = vld [vmem:[%s19448_s29 + $0x18] sm:$0xff]  ;;  %v1438_v10 = vsel %vm538_vm2, 0.0, %v12564_v2 }
  0x45   : >> { %15153 = vmatmul.mubr.msk.f32.gmra.mrb[2].mxu0 %vm616_vm3, %v12523_v34  ;;  %15098 = vmatprep.mubr.msk.f32.mxu1 %vm616_vm3, %v12470_v35  ;;  %v12542_v48 = vld [vmem:[%s19448_s29 + $0xa8] sm:$0xff]  ;;  %v12543_v50 = vld [vmem:[%s19448_s29 + $0xb0] sm:$0xff]  ;;  %v12544_v52 = vld [vmem:[%s19448_s29 + $0xb8] sm:$0xff] }
  0x46   : >> { %15155 = vmatprep.mubr.msk.f32.mxu0 %vm616_vm3, %v12524_v36  ;;  %v12459_v53 = vld [vmem:[%s19448_s29 + $0x20] sm:$0xff]  ;;  %v12460_v55 = vld [vmem:[%s19448_s29 + $0x28] sm:$0xff]  ;;  %v12461_v57 = vld [vmem:[%s19448_s29 + $0x30] sm:$0xff] }
  0x47   : >> { %v12545_v54 = vld [vmem:[%s19448_s29 + $0xc0] sm:$0xff]  ;;  %v12546_v56 = vld [vmem:[%s19448_s29 + $0xc8] sm:$0xff]  ;;  %v12547_v58 = vld [vmem:[%s19448_s29 + $0xd0] sm:$0xff] }
  0x48   : >> { %15099 = vmatmul.mubr.msk.f32.gmra.mrb[4].mxu1 %vm616_vm3, %v12471_v37  ;;  %v12462_v59 = vld [vmem:[%s19448_s29 + $0x38] sm:$0xff]  ;;  %v12463_v61 = vld [vmem:[%s19448_s29 + $0x40] sm:$0xff]  ;;  %v12464_v63 = vld [vmem:[%s19448_s29 + $0x48] sm:$0xff] }
  0x49   : >> { %15156 = vmatmul.mubr.msk.f32.gmra.mrb[4].mxu0 %vm616_vm3, %v12525_v38  ;;  %15101 = vmatprep.mubr.msk.f32.mxu1 %vm616_vm3, %v12472_v39  ;;  %v12548_v60 = vld [vmem:[%s19448_s29 + $0xd8] sm:$0xff]  ;;  %v12549_v62 = vld [vmem:[%s19448_s29 + $0xe0] sm:$0xff]  ;;  %v12550_v0 = vld [vmem:[%s19448_s29 + $0xe8] sm:$0xff] }
  0x4a   : >> { %15158 = vmatprep.mubr.msk.f32.mxu0 %vm616_vm3, %v12526_v40  ;;  %v12465_v7 = vld [vmem:[%s19448_s29 + $0x50] sm:$0xff]  ;;  %v12498_v9 = vld [vmem:[%s19448_s29 + $0x58] sm:$0xff]  ;;  %v12499_v11 = vld [vmem:[%s19448_s29 + $0x60] sm:$0xff] }
  0x4b   : >> { %v12551_v8 = vld [vmem:[%s19448_s29 + $0xf0] sm:$0xff]  ;;  %v12500_v13 = vld [vmem:[%s19448_s29 + $0x68] sm:$0xff]  ;;  %v12567_v16 = vld [vmem:[%s19448_s29 + $0xbf] sm:$0xff] }
  0x4c   : >> { %15102 = vmatmul.mubr.msk.f32.gmra.mrb[6].mxu1 %vm616_vm3, %v12473_v41  ;;  %v12565_v12 = vld [vmem:[%s19448_s29 + $0xaf] sm:$0xff]  ;;  %v12566_v14 = vld [vmem:[%s19448_s29 + $0xb7] sm:$0xff]  ;;  %v12568_v18 = vld [vmem:[%s19448_s29 + $0xc7] sm:$0xff] }
  0x4d   : >> { %15159 = vmatmul.mubr.msk.f32.gmra.mrb[6].mxu0 %vm616_vm3, %v12527_v42  ;;  %15104 = vmatprep.mubr.msk.f32.mxu1 %vm616_vm3, %v12474_v43  ;;  %v12501_v15 = vld [vmem:[%s19448_s29 + $0x70] sm:$0xff]  ;;  %v12502_v17 = vld [vmem:[%s19448_s29 + $0x78] sm:$0xff]  ;;  %v12503_v19 = vld [vmem:[%s19448_s29 + $0x80] sm:$0xff] }
  0x4e   : >> { %15161 = vmatprep.mubr.msk.f32.mxu0 %vm616_vm3, %v12528_v44  ;;  %v12569_v20 = vld [vmem:[%s19448_s29 + $0xcf] sm:$0xff]  ;;  %v12570_v22 = vld [vmem:[%s19448_s29 + $0xd7] sm:$0xff]  ;;  %v12571_v24 = vld [vmem:[%s19448_s29 + $0xdf] sm:$0xff] }
  0x4f   : >> { %v12504_v21 = vld [vmem:[%s19448_s29 + $0x88] sm:$0xff]  ;;  %v12505_v23 = vld [vmem:[%s19448_s29 + $0x90] sm:$0xff]  ;;  %v12506_v25 = vld [vmem:[%s19448_s29 + $0x98] sm:$0xff] }
  0x50   : >> { %15105 = vmatmul.mubr.msk.f32.gmra.mrb[8].mxu1 %vm616_vm3, %v12475_v45  ;;  %v12572_v26 = vld [vmem:[%s19448_s29 + $0xe7] sm:$0xff]  ;;  %v12573_v28 = vld [vmem:[%s19448_s29 + $0xef] sm:$0xff] }
  0x51   : >> { %15162 = vmatmul.mubr.msk.f32.gmra.mrb[8].mxu0 %vm616_vm3, %v12529_v46  ;;  %15111 = vmatprep.mubr.msk.f32.mxu1 %vm616_vm3, %v12456_v47  ;;  %v12507_v27 = vld [vmem:[%s19448_s29 + $0xa0] sm:$0xff] }
  0x52   : >> { %15168 = vmatprep.mubr.msk.f32.mxu0 %vm616_vm3, %v12542_v48 }
  0x54   : >> { %15112 = vmatmul.mubr.msk.f32.vlgmr.msra.gmra.mrb[0].mxu1 %vm616_vm3, %v12457_v49 }
  0x55   : >> { %15169 = vmatmul.mubr.msk.f32.vlgmr.msra.gmra.mrb[0].mxu0 %vm616_vm3, %v12543_v50  ;;  %17481 = vmatpush3.bf16.msra.mxu1 %v17478_v31 }
  0x56   : >> { %17493 = vmatpush3.bf16.msra.mxu0 %v17490_v32  ;;  %15114 = vmatprep.mubr.msk.f32.mxu1 %vm616_vm3, %v12458_v51 }
  0x57   : >> { %15171 = vmatprep.mubr.msk.f32.mxu0 %vm616_vm3, %v12544_v52 }
  0x58   : >> { %15115 = vmatmul.mubr.msk.f32.gmra.mrb[2].mxu1 %vm616_vm3, %v12459_v53 }
  0x59   : >> { %15172 = vmatmul.mubr.msk.f32.gmra.mrb[2].mxu0 %vm616_vm3, %v12545_v54  ;;  %15117 = vmatprep.mubr.msk.f32.mxu1 %vm616_vm3, %v12460_v55 }
  0x5a   : >> { %15174 = vmatprep.mubr.msk.f32.mxu0 %vm616_vm3, %v12546_v56 }
  0x5c   : >> { %15118 = vmatmul.mubr.msk.f32.gmra.mrb[4].mxu1 %vm616_vm3, %v12461_v57 }
  0x5d   : >> { %15175 = vmatmul.mubr.msk.f32.gmra.mrb[4].mxu0 %vm616_vm3, %v12547_v58  ;;  %15120 = vmatprep.mubr.msk.f32.mxu1 %vm616_vm3, %v12462_v59 }
  0x5e   : >> { %15177 = vmatprep.mubr.msk.f32.mxu0 %vm616_vm3, %v12548_v60 }
  0x60   : >> { %15121 = vmatmul.mubr.msk.f32.gmra.mrb[6].mxu1 %vm616_vm3, %v12463_v61 }
  0x61   : >> { %15178 = vmatmul.mubr.msk.f32.gmra.mrb[6].mxu0 %vm616_vm3, %v12549_v62  ;;  %15123 = vmatprep.mubr.msk.f32.mxu1 %vm616_vm3, %v12464_v63 }
  0x62   : >> { %15180 = vmatprep.mubr.msk.f32.mxu0 %vm616_vm3, %v12550_v0 }
  0x64   : >> { %15124 = vmatmul.mubr.msk.f32.gmra.mrb[8].mxu1 %vm616_vm3, %v12465_v7 }
  0x65   : >> { %15181 = vmatmul.mubr.msk.f32.gmra.mrb[8].mxu0 %vm616_vm3, %v12551_v8  ;;  %15130 = vmatprep.mubr.msk.f32.mxu1 %vm616_vm3, %v12498_v9 }
  0x66   : >> { %15187 = vmatprep.mubr.msk.f32.mxu0 %vm616_vm3, %v1438_v10 }
  0x68   : >> { %15131 = vmatmul.mubr.msk.f32.vlgmr.msra.gmra.mrb[0].mxu1 %vm616_vm3, %v12499_v11 }
  0x69   : >> { %15188 = vmatmul.mubr.msk.f32.vlgmr.msra.gmra.mrb[0].mxu0 %vm616_vm3, %v12565_v12  ;;  %15133 = vmatprep.mubr.msk.f32.mxu1 %vm616_vm3, %v12500_v13 }
  0x6a   : >> { %15190 = vmatprep.mubr.msk.f32.mxu0 %vm616_vm3, %v12566_v14 }
  0x6c   : >> { %15134 = vmatmul.mubr.msk.f32.gmra.mrb[2].mxu1 %vm616_vm3, %v12501_v15 }
  0x6d   : >> { %15191 = vmatmul.mubr.msk.f32.gmra.mrb[2].mxu0 %vm616_vm3, %v12567_v16  ;;  %15136 = vmatprep.mubr.msk.f32.mxu1 %vm616_vm3, %v12502_v17 }
  0x6e   : >> { %15193 = vmatprep.mubr.msk.f32.mxu0 %vm616_vm3, %v12568_v18 }
  0x70   : >> { %15137 = vmatmul.mubr.msk.f32.gmra.mrb[4].mxu1 %vm616_vm3, %v12503_v19 }
  0x71   : >> { %15194 = vmatmul.mubr.msk.f32.gmra.mrb[4].mxu0 %vm616_vm3, %v12569_v20  ;;  %15139 = vmatprep.mubr.msk.f32.mxu1 %vm616_vm3, %v12504_v21  ;;  %v19615_v20 = vld [vmem:[%s22926_s4] ss:$0 sm:$0xff] (%p551_p4) }
  0x72   : >> { %15196 = vmatprep.mubr.msk.f32.mxu0 %vm616_vm3, %v12570_v22 }
  0x74   : >> { %15140 = vmatmul.mubr.msk.f32.gmra.mrb[6].mxu1 %vm616_vm3, %v12505_v23 }
  0x75   : >> { %15197 = vmatmul.mubr.msk.f32.gmra.mrb[6].mxu0 %vm616_vm3, %v12571_v24  ;;  %15142 = vmatprep.mubr.msk.f32.mxu1 %vm616_vm3, %v12506_v25 }
  0x76   : >> { %15199 = vmatprep.mubr.msk.f32.mxu0 %vm616_vm3, %v12572_v26 }
  0x78   : >> { %15143 = vmatmul.mubr.msk.f32.gmra.mrb[8].mxu1 %vm616_vm3, %v12507_v27 }
  0x79   : >> { %15200 = vmatmul.mubr.msk.f32.gmra.mrb[8].mxu0 %vm616_vm3, %v12573_v28 }
 0x13b   : >> { %v15132_v29 = vpop.f32.mrb[0].mxu1 }
 0x13c   : >> { %v15189_v30 = vpop.f32.mrb[0].mxu0  ;;  %v1017_v32 = vpop.f32.mrb[1].mxu1 }
 0x13d   : >> { %v18682_v31 = vadd.f32 %v15189_v30, %v15132_v29  ;;  %v1547_v33 = vpop.f32.mrb[1].mxu0 }
 0x13e   : >> { %v18683_v34 = vadd.f32 %v1547_v33, %v1017_v32 }
 0x13f   : >> { %v1613_v35 = vadd.f32 %v18682_v31, %v19259_v1  ;;  %v15135_v37 = vpop.f32.mrb[2].mxu1 }
 0x140   : >> { %v1612_v36 = vadd.f32 %v18683_v34, %v19259_v1  ;;  %v15192_v38 = vpop.f32.mrb[2].mxu0  ;;  %v1027_v41 = vpop.f32.mrb[3].mxu1 }
 0x141   : >> { %v1623_v39 = vmax.f32 %v1613_v35, 0.0  ;;  %v18684_v40 = vadd.f32 %v15192_v38, %v15135_v37  ;;  %v1557_v42 = vpop.f32.mrb[3].mxu0 }
 0x142   : >> { %v1622_v43 = vmax.f32 %v1612_v36, 0.0  ;;  %v18685_v44 = vadd.f32 %v1557_v42, %v1027_v41 }
 0x143   : >> { %12588 = vst [vmem:[%s19589_s23 + $0x60] sm:$0xff] %v1623_v39  ;;  %v1615_v45 = vadd.f32 %v18684_v40, %v19259_v1  ;;  %v15138_v47 = vpop.f32.mrb[4].mxu1 }
 0x144   : >> { %12587 = vst [vmem:[%s19589_s23 + $0x58] sm:$0xff] %v1622_v43  ;;  %v1614_v46 = vadd.f32 %v18685_v44, %v19259_v1  ;;  %v15195_v48 = vpop.f32.mrb[4].mxu0  ;;  %v1037_v51 = vpop.f32.mrb[5].mxu1 }
 0x145   : >> { %v1625_v49 = vmax.f32 %v1615_v45, 0.0  ;;  %v18686_v50 = vadd.f32 %v15195_v48, %v15138_v47  ;;  %v1567_v52 = vpop.f32.mrb[5].mxu0 }
 0x146   : >> { %v1624_v53 = vmax.f32 %v1614_v46, 0.0  ;;  %v18687_v54 = vadd.f32 %v1567_v52, %v1037_v51 }
 0x147   : >> { %12590 = vst [vmem:[%s19589_s23 + $0x70] sm:$0xff] %v1625_v49  ;;  %v1617_v55 = vadd.f32 %v18686_v50, %v19259_v1  ;;  %v15141_v57 = vpop.f32.mrb[6].mxu1 }
 0x148   : >> { %12589 = vst [vmem:[%s19589_s23 + $0x68] sm:$0xff] %v1624_v53  ;;  %v1616_v56 = vadd.f32 %v18687_v54, %v19259_v1  ;;  %v15198_v58 = vpop.f32.mrb[6].mxu0  ;;  %v1047_v61 = vpop.f32.mrb[7].mxu1 }
 0x149   : >> { %v1627_v59 = vmax.f32 %v1617_v55, 0.0  ;;  %v18688_v60 = vadd.f32 %v15198_v58, %v15141_v57  ;;  %v1577_v62 = vpop.f32.mrb[7].mxu0 }
 0x14a   : >> { %v1626_v63 = vmax.f32 %v1616_v56, 0.0  ;;  %v18689_v0 = vadd.f32 %v1577_v62, %v1047_v61 }
 0x14b   : >> { %12592 = vst [vmem:[%s19589_s23 + $0x80] sm:$0xff] %v1627_v59  ;;  %v1619_v2 = vadd.f32 %v18688_v60, %v19259_v1  ;;  %v15144_v8 = vpop.f32.mrb[8].mxu1 }
 0x14c   : >> { %12591 = vst [vmem:[%s19589_s23 + $0x78] sm:$0xff] %v1626_v63  ;;  %v1618_v7 = vadd.f32 %v18689_v0, %v19259_v1  ;;  %v15201_v9 = vpop.f32.mrb[8].mxu0  ;;  %v1057_v12 = vpop.f32.mrb[9].mxu1 }
 0x14d   : >> { %v1629_v10 = vmax.f32 %v1619_v2, 0.0  ;;  %v18690_v11 = vadd.f32 %v15201_v9, %v15144_v8  ;;  %v1587_v13 = vpop.f32.mrb[9].mxu0 }
 0x14e   : >> { %v1628_v14 = vmax.f32 %v1618_v7, 0.0  ;;  %v18691_v15 = vadd.f32 %v1587_v13, %v1057_v12  ;;  %553 = sbr.rel (!%p551_p4) target bundleno = 57 (0x39), region = 284 }
 0x14f   : >> { %12594 = vst [vmem:[%s19589_s23 + $0x90] sm:$0xff] %v1629_v10  ;;  %v1621_v16 = vadd.f32 %v18690_v11, %v19259_v1 }
 0x150   : >> { %12593 = vst [vmem:[%s19589_s23 + $0x88] sm:$0xff] %v1628_v14  ;;  %v1620_v17 = vadd.f32 %v18691_v15, %v19259_v1 }
 0x151   : >> { %v1631_v18 = vmax.f32 %v1621_v16, 0.0 }
 0x152   : >> { %v1630_v19 = vmax.f32 %v1620_v17, 0.0 }
 0x153   : >> { %12596 = vst [vmem:[%s19589_s23 + $0xa0] sm:$0xff] %v1631_v18 }
 0x154   : >> { %12595 = vst [vmem:[%s19589_s23 + $0x98] sm:$0xff] %v1630_v19 }
 0x155 LB: >> { %v12617_v21 = vld [vmem:[%s22925_s3 + $0x80] sm:$0xff]  ;;  %v12618_v22 = vld [vmem:[%s22925_s3 + $0x88] sm:$0xff]  ;;  %v12619_v25 = vld [vmem:[%s22925_s3 + $0x90] sm:$0xff]  ;;  %s12132_s22 = smul.u32 80, %s19146_s26  ;;  %s1649_s26 = sadd.s32 1, %s19146_s26   ;;  %s19146_s26 = sphi %s19617_s26, %s1649_s26  }
 0x156   : >> { %v12671_v1 = vld [vmem:[%s22925_s3 + $0x180] sm:$0xff]  ;;  %v17494_v23 = vpack.c.bf16 %v12618_v22, %v12617_v21  ;;  %v12672_v24 = vld [vmem:[%s22925_s3 + $0x188] sm:$0xff]  ;;  %v12620_v26 = vld [vmem:[%s22925_s3 + $0x98] sm:$0xff]  ;;  %p1646_p5 = scmp.ge.s32.totalorder %s1649_s26, 128  }
 0x157   : >> { %v17590_v27 = vpack.c.bf16 %v12672_v24, %v12671_v1  ;;  %v17498_v28 = vpack.c.bf16 %v12620_v26, %v12619_v25  ;;  %v12673_v29 = vld [vmem:[%s22925_s3 + $0x190] sm:$0xff]  ;;  %v12674_v30 = vld [vmem:[%s22925_s3 + $0x198] sm:$0xff]  ;;  %v12621_v31 = vld [vmem:[%s22925_s3 + $0xa0] sm:$0xff]  ;;  %s19679_s18 = scalar_lea.vmem [#allocation2], %s12132_s22  ;;  %s20019_s19 = smov (%p1646_p5), 0  }
 0x158   : >> { %17495 = vmatprep.subr.bf16.mxu1 %v17494_v23  ;;  %v17594_v32 = vpack.c.bf16 %v12674_v30, %v12673_v29  ;;  %v12622_v33 = vld [vmem:[%s22925_s3 + $0xa8] sm:$0xff]  ;;  %v12675_v34 = vld [vmem:[%s22925_s3 + $0x1a0] sm:$0xff]  ;;  %v12623_v38 = vld [vmem:[%s22925_s3 + $0xb0] sm:$0xff] }
 0x159   : >> { %v12676_v35 = vld [vmem:[%s22925_s3 + $0x1a8] sm:$0xff]  ;;  %17591 = vmatprep.subr.bf16.mxu0 %v17590_v27  ;;  %17497 = vmatpush3.bf16.msra.mxu1 %v17494_v23  ;;  %v17502_v36 = vpack.c.bf16 %v12622_v33, %v12621_v31  ;;  %v12624_v39 = vld [vmem:[%s22925_s3 + $0xb8] sm:$0xff]  ;;  %v12677_v40 = vld [vmem:[%s22925_s3 + $0x1b0] sm:$0xff] }
 0x15a   : >> { %17593 = vmatpush3.bf16.msra.mxu0 %v17590_v27  ;;  %17499 = vmatprep.subr.bf16.mxu1 %v17498_v28  ;;  %v17598_v37 = vpack.c.bf16 %v12676_v35, %v12675_v34  ;;  %v12678_v41 = vld [vmem:[%s22925_s3 + $0x1b8] sm:$0xff]  ;;  %v17506_v42 = vpack.c.bf16 %v12624_v39, %v12623_v38  ;;  %v12625_v44 = vld [vmem:[%s22925_s3 + $0xc0] sm:$0xff]  ;;  %v12626_v45 = vld [vmem:[%s22925_s3 + $0xc8] sm:$0xff] }
 0x15b   : >> { %17595 = vmatprep.subr.bf16.mxu0 %v17594_v32  ;;  %v17602_v43 = vpack.c.bf16 %v12678_v41, %v12677_v40  ;;  %v12607_v46 = vld [vmem:[%s19679_s18 + $0x7] sm:$0xff]  ;;  %vm19690_vm4 = vmneg %vm538_vm2  ;;  %v12661_v50 = vld [vmem:[%s19679_s18 + $0x57] sm:$0xff]  ;;  %v17510_v51 = vpack.c.bf16 %v12626_v45, %v12625_v44 }
 0x15c   : >> { %v12679_v47 = vld [vmem:[%s22925_s3 + $0x1c0] sm:$0xff]  ;;  %v12680_v48 = vld [vmem:[%s22925_s3 + $0x1c8] sm:$0xff]  ;;  %15234 = vmatprep.mubr.msk.f32.mxu1 %vm19690_vm4, %v12607_v46  ;;  %v12627_v53 = vld [vmem:[%s22925_s3 + $0xd0] sm:$0xff]  ;;  %15375 = vmatprep.mubr.msk.f32.mxu0 %vm19690_vm4, %v12661_v50 }
 0x15d   : >> { %17501 = vmatpush3.bf16.msra.mxu1 %v17498_v28  ;;  %v17606_v52 = vpack.c.bf16 %v12680_v48, %v12679_v47  ;;  %v12628_v54 = vld [vmem:[%s22925_s3 + $0xd8] sm:$0xff]  ;;  %v12681_v55 = vld [vmem:[%s22925_s3 + $0x1d0] sm:$0xff]  ;;  %v12629_v59 = vld [vmem:[%s22925_s3 + $0xe0] sm:$0xff] }
 0x15e   : >> { %17597 = vmatpush3.bf16.msra.mxu0 %v17594_v32  ;;  %17503 = vmatprep.subr.bf16.mxu1 %v17502_v36  ;;  %v12682_v56 = vld [vmem:[%s22925_s3 + $0x1d8] sm:$0xff]  ;;  %v17514_v57 = vpack.c.bf16 %v12628_v54, %v12627_v53  ;;  %v12630_v60 = vld [vmem:[%s22925_s3 + $0xe8] sm:$0xff]  ;;  %v12683_v61 = vld [vmem:[%s22925_s3 + $0x1e0] sm:$0xff] }
 0x15f   : >> { %17599 = vmatprep.subr.bf16.mxu0 %v17598_v37  ;;  %v17610_v58 = vpack.c.bf16 %v12682_v56, %v12681_v55  ;;  %v12684_v62 = vld [vmem:[%s22925_s3 + $0x1e8] sm:$0xff]  ;;  %v17518_v63 = vpack.c.bf16 %v12630_v60, %v12629_v59  ;;  %v12631_v2 = vld [vmem:[%s22925_s3 + $0xf0] sm:$0xff]  ;;  %v12632_v7 = vld [vmem:[%s22925_s3 + $0xf8] sm:$0xff] }
 0x160   : >> { %v17614_v0 = vpack.c.bf16 %v12684_v62, %v12683_v61  ;;  %v12685_v8 = vld [vmem:[%s22925_s3 + $0x1f0] sm:$0xff]  ;;  %v12686_v9 = vld [vmem:[%s22925_s3 + $0x1f8] sm:$0xff]  ;;  %v17522_v10 = vpack.c.bf16 %v12632_v7, %v12631_v2  ;;  %v1664_v12 = vld [vmem:[%s22925_s3] sm:$0xff] }
 0x161   : >> { %17505 = vmatpush3.bf16.msra.mxu1 %v17502_v36  ;;  %v17618_v11 = vpack.c.bf16 %v12686_v9, %v12685_v8  ;;  %v1665_v13 = vld [vmem:[%s22925_s3 + $0x8] sm:$0xff]  ;;  %v12699_v14 = vld [vmem:[%s22925_s3 + $0x200] sm:$0xff]  ;;  %v1666_v18 = vld [vmem:[%s22925_s3 + $0x10] sm:$0xff] }
 0x162   : >> { %17601 = vmatpush3.bf16.msra.mxu0 %v17598_v37  ;;  %17507 = vmatprep.subr.bf16.mxu1 %v17506_v42  ;;  %v12700_v15 = vld [vmem:[%s22925_s3 + $0x208] sm:$0xff]  ;;  %v17526_v16 = vpack.c.bf16 %v1665_v13, %v1664_v12  ;;  %v1667_v19 = vld [vmem:[%s22925_s3 + $0x18] sm:$0xff]  ;;  %v12701_v21 = vld [vmem:[%s22925_s3 + $0x210] sm:$0xff] }
 0x163   : >> { %17603 = vmatprep.subr.bf16.mxu0 %v17602_v43  ;;  %v17622_v17 = vpack.c.bf16 %v12700_v15, %v12699_v14  ;;  %v12702_v22 = vld [vmem:[%s22925_s3 + $0x218] sm:$0xff]  ;;  %v12608_v1 = vld [vmem:[%s19679_s18 + $0xf] sm:$0xff]  ;;  %v17530_v24 = vpack.c.bf16 %v1667_v19, %v1666_v18  ;;  %v1668_v26 = vld [vmem:[%s22925_s3 + $0x20] sm:$0xff] }
 0x164   : >> { %v12662_v23 = vld [vmem:[%s19679_s18 + $0x5f] sm:$0xff]  ;;  %v17626_v25 = vpack.c.bf16 %v12702_v22, %v12701_v21  ;;  %v1669_v27 = vld [vmem:[%s22925_s3 + $0x28] sm:$0xff]  ;;  %v12609_v30 = vld [vmem:[%s19679_s18 + $0x17] sm:$0xff] }
 0x165   : >> { %17509 = vmatpush3.bf16.msra.mxu1 %v17506_v42  ;;  %v12703_v28 = vld [vmem:[%s22925_s3 + $0x220] sm:$0xff]  ;;  %v12704_v29 = vld [vmem:[%s22925_s3 + $0x228] sm:$0xff]  ;;  %v17534_v33 = vpack.c.bf16 %v1669_v27, %v1668_v26  ;;  %v1670_v36 = vld [vmem:[%s22925_s3 + $0x30] sm:$0xff] }
 0x166   : >> { %17605 = vmatpush3.bf16.msra.mxu0 %v17602_v43  ;;  %17511 = vmatprep.subr.bf16.mxu1 %v17510_v51  ;;  %v12663_v31 = vld [vmem:[%s19679_s18 + $0x67] sm:$0xff]  ;;  %v12610_v32 = vld [vmem:[%s19679_s18 + $0x1f] sm:$0xff]  ;;  %v12664_v34 = vld [vmem:[%s19679_s18 + $0x6f] sm:$0xff]  ;;  %v17630_v35 = vpack.c.bf16 %v12704_v29, %v12703_v28 }
 0x167   : >> { %17607 = vmatprep.subr.bf16.mxu0 %v17606_v52  ;;  %v1671_v37 = vld [vmem:[%s22925_s3 + $0x38] sm:$0xff]  ;;  %v12705_v38 = vld [vmem:[%s22925_s3 + $0x230] sm:$0xff]  ;;  %v12611_v40 = vld [vmem:[%s19679_s18 + $0x27] sm:$0xff] }
 0x168   : >> { %v12706_v39 = vld [vmem:[%s22925_s3 + $0x238] sm:$0xff]  ;;  %v12612_v42 = vld [vmem:[%s19679_s18 + $0x2f] sm:$0xff]  ;;  %v17538_v43 = vpack.c.bf16 %v1671_v37, %v1670_v36  ;;  %v1672_v46 = vld [vmem:[%s22925_s3 + $0x40] sm:$0xff] }
 0x169   : >> { %17513 = vmatpush3.bf16.msra.mxu1 %v17510_v51  ;;  %v12665_v41 = vld [vmem:[%s19679_s18 + $0x77] sm:$0xff]  ;;  %v12666_v44 = vld [vmem:[%s19679_s18 + $0x7f] sm:$0xff]  ;;  %v17634_v45 = vpack.c.bf16 %v12706_v39, %v12705_v38  ;;  %v1673_v47 = vld [vmem:[%s22925_s3 + $0x48] sm:$0xff] }
 0x16a   : >> { %17609 = vmatpush3.bf16.msra.mxu0 %v17606_v52  ;;  %17515 = vmatprep.subr.bf16.mxu1 %v17514_v57  ;;  %v12707_v48 = vld [vmem:[%s22925_s3 + $0x240] sm:$0xff]  ;;  %v12708_v50 = vld [vmem:[%s22925_s3 + $0x248] sm:$0xff]  ;;  %v12613_v51 = vld [vmem:[%s19679_s18 + $0x37] sm:$0xff]  ;;  %v17542_v54 = vpack.c.bf16 %v1673_v47, %v1672_v46 }
 0x16b   : >> { %17611 = vmatprep.subr.bf16.mxu0 %v17610_v58  ;;  %v12667_v52 = vld [vmem:[%s19679_s18 + $0x87] sm:$0xff]  ;;  %v12614_v53 = vld [vmem:[%s19679_s18 + $0x3f] sm:$0xff]  ;;  %v12668_v55 = vld [vmem:[%s19679_s18 + $0x8f] sm:$0xff]  ;;  %v17638_v56 = vpack.c.bf16 %v12708_v50, %v12707_v48 }
 0x16c   : >> { %v12709_v59 = vld [vmem:[%s22925_s3 + $0x250] sm:$0xff]  ;;  %v12710_v60 = vld [vmem:[%s22925_s3 + $0x258] sm:$0xff]  ;;  %v12615_v61 = vld [vmem:[%s19679_s18 + $0x47] sm:$0xff] }
 0x16d   : >> { %17517 = vmatpush3.bf16.msra.mxu1 %v17514_v57  ;;  %v1674_v57 = vld [vmem:[%s22925_s3 + $0x50] sm:$0xff]  ;;  %v12670_v2 = vld [vmem:[%s19679_s18 + $0x9f] sm:$0xff]  ;;  %v17642_v7 = vpack.c.bf16 %v12710_v60, %v12709_v59  ;;  %v1677_v9 = vld [vmem:[%s22925_s3 + $0x68] sm:$0xff] }
 0x16e   : >> { %17613 = vmatpush3.bf16.msra.mxu0 %v17610_v58  ;;  %17519 = vmatprep.subr.bf16.mxu1 %v17518_v63  ;;  %v1675_v58 = vld [vmem:[%s22925_s3 + $0x58] sm:$0xff]  ;;  %v1676_v8 = vld [vmem:[%s22925_s3 + $0x60] sm:$0xff]  ;;  %v12597_v12 = vld [vmem:[%s19679_s18 + $0x8] sm:$0xff] }
 0x16f   : >> { %17615 = vmatprep.subr.bf16.mxu0 %v17614_v0  ;;  %v12669_v62 = vld [vmem:[%s19679_s18 + $0x97] sm:$0xff]  ;;  %v12689_v13 = vld [vmem:[%s19679_s18 + $0xa8] sm:$0xff]  ;;  %v17550_v14 = vpack.c.bf16 %v1677_v9, %v1676_v8  ;;  %v12649_v36 = vld [vmem:[%s22925_s3 + $0x120] sm:$0xff] }
 0x170   : >> { %v12713_v18 = vld [vmem:[%s22925_s3 + $0x270] sm:$0xff]  ;;  %v12714_v19 = vld [vmem:[%s22925_s3 + $0x278] sm:$0xff]  ;;  %v12650_v37 = vld [vmem:[%s22925_s3 + $0x128] sm:$0xff] }
 0x171   : >> { %17521 = vmatpush3.bf16.msra.mxu1 %v17518_v63  ;;  %v12616_v63 = vld [vmem:[%s19679_s18 + $0x4f] sm:$0xff]  ;;  %v17650_v22 = vpack.c.bf16 %v12714_v19, %v12713_v18  ;;  %v12648_v29 = vld [vmem:[%s22925_s3 + $0x118] sm:$0xff]  ;;  %v12729_v38 = vld [vmem:[%s22925_s3 + $0x2a0] sm:$0xff] }
 0x172   : >> { %17617 = vmatpush3.bf16.msra.mxu0 %v17614_v0  ;;  %17523 = vmatprep.subr.bf16.mxu1 %v17522_v10  ;;  %v17546_v0 = vpack.c.bf16 %v1675_v58, %v1674_v57  ;;  %v12647_v28 = vld [vmem:[%s22925_s3 + $0x110] sm:$0xff]  ;;  %v12730_v39 = vld [vmem:[%s22925_s3 + $0x2a8] sm:$0xff]  ;;  %v12652_v47 = vld [vmem:[%s22925_s3 + $0x138] sm:$0xff] }
 0x173   : >> { %17619 = vmatprep.subr.bf16.mxu0 %v17618_v11  ;;  %v12651_v46 = vld [vmem:[%s22925_s3 + $0x130] sm:$0xff]  ;;  %v12732_v50 = vld [vmem:[%s22925_s3 + $0x2b8] sm:$0xff]  ;;  %v12653_v57 = vld [vmem:[%s22925_s3 + $0x140] sm:$0xff] }
 0x174   : >> { %v12731_v48 = vld [vmem:[%s22925_s3 + $0x2b0] sm:$0xff]  ;;  %v12654_v58 = vld [vmem:[%s22925_s3 + $0x148] sm:$0xff]  ;;  %v12733_v59 = vld [vmem:[%s22925_s3 + $0x2c0] sm:$0xff] }
 0x175   : >> { %17525 = vmatpush3.bf16.msra.mxu1 %v17522_v10  ;;  %v12711_v10 = vld [vmem:[%s22925_s3 + $0x260] sm:$0xff]  ;;  %v12734_v60 = vld [vmem:[%s22925_s3 + $0x2c8] sm:$0xff]  ;;  %v12655_v8 = vld [vmem:[%s22925_s3 + $0x150] sm:$0xff] }
 0x176   : >> { %17621 = vmatpush3.bf16.msra.mxu0 %v17618_v11  ;;  %17527 = vmatprep.subr.bf16.mxu1 %v17526_v16  ;;  %v12712_v11 = vld [vmem:[%s22925_s3 + $0x268] sm:$0xff]  ;;  %v12656_v9 = vld [vmem:[%s22925_s3 + $0x158] sm:$0xff]  ;;  %v12657_v18 = vld [vmem:[%s22925_s3 + $0x160] sm:$0xff] }
 0x177   : >> { %17623 = vmatprep.subr.bf16.mxu0 %v17622_v17  ;;  %v17646_v15 = vpack.c.bf16 %v12712_v11, %v12711_v10  ;;  %v12735_v10 = vld [vmem:[%s22925_s3 + $0x2d0] sm:$0xff]  ;;  %v12736_v11 = vld [vmem:[%s22925_s3 + $0x2d8] sm:$0xff]  ;;  %v12658_v19 = vld [vmem:[%s22925_s3 + $0x168] sm:$0xff] }
 0x178   : >> { %15235 = vmatmul.mubr.f32.vlgmr.msra.gmra.mrb[0].mxu1 %v12608_v1  ;;  %v12645_v1 = vld [vmem:[%s22925_s3 + $0x100] sm:$0xff] }
 0x179   : >> { %17529 = vmatpush3.bf16.msra.mxu1 %v17526_v16  ;;  %15376 = vmatmul.mubr.f32.vlgmr.msra.gmra.mrb[0].mxu0 %v12662_v23  ;;  %v1678_v16 = vld [vmem:[%s22925_s3 + $0x70] sm:$0xff]  ;;  %v12646_v23 = vld [vmem:[%s22925_s3 + $0x108] sm:$0xff] }
 0x17a   : >> { %17625 = vmatpush3.bf16.msra.mxu0 %v17622_v17  ;;  %17531 = vmatprep.subr.bf16.mxu1 %v17530_v24  ;;  %v1679_v17 = vld [vmem:[%s22925_s3 + $0x78] sm:$0xff]  ;;  %v17558_v26 = vpack.c.bf16 %v12646_v23, %v12645_v1  ;;  %v12715_v23 = vld [vmem:[%s19679_s18 + $0xa7] sm:$0xff] }
 0x17b   : >> { %17627 = vmatprep.subr.bf16.mxu0 %v17626_v25  ;;  %15237 = vmatprep.mubr.f32.mxu1 %v12609_v30  ;;  %v17554_v21 = vpack.c.bf16 %v1679_v17, %v1678_v16  ;;  %v12727_v30 = vld [vmem:[%s22925_s3 + $0x290] sm:$0xff]  ;;  %v17674_v17 = vpack.c.bf16 %v12736_v11, %v12735_v10  ;;  %v12635_v1 = vld [vmem:[%s19679_s18 + $0x58] sm:$0xff] }
 0x17c   : >> { %15378 = vmatprep.mubr.f32.mxu0 %v12663_v31  ;;  %15238 = vmatmul.mubr.f32.gmra.mrb[2].mxu1 %v12610_v32  ;;  %v12728_v31 = vld [vmem:[%s22925_s3 + $0x298] sm:$0xff]  ;;  %v12598_v32 = vld [vmem:[%s19679_s18 + $0x10] sm:$0xff] }
 0x17d   : >> { %17533 = vmatpush3.bf16.msra.mxu1 %v17530_v24  ;;  %15379 = vmatmul.mubr.f32.gmra.mrb[2].mxu0 %v12664_v34  ;;  %v12725_v24 = vld [vmem:[%s22925_s3 + $0x280] sm:$0xff]  ;;  %v17562_v34 = vpack.c.bf16 %v12648_v29, %v12647_v28  ;;  %v12698_v16 = vld [vmem:[%s19679_s18 + $0xf0] sm:$0xff]  ;;  %v12740_v29 = vld [vmem:[%s22925_s3 + $0x2f8] sm:$0xff] }
 0x17e   : >> { %17629 = vmatpush3.bf16.msra.mxu0 %v17626_v25  ;;  %17535 = vmatprep.subr.bf16.mxu1 %v17534_v33  ;;  %v12726_v25 = vld [vmem:[%s22925_s3 + $0x288] sm:$0xff]  ;;  %v12739_v28 = vld [vmem:[%s22925_s3 + $0x2f0] sm:$0xff] }
 0x17f   : >> { %17631 = vmatprep.subr.bf16.mxu0 %v17630_v35  ;;  %15240 = vmatprep.mubr.f32.mxu1 %v12611_v40  ;;  %v17654_v27 = vpack.c.bf16 %v12726_v25, %v12725_v24  ;;  %v12599_v40 = vld [vmem:[%s19679_s18 + $0x18] sm:$0xff]  ;;  %v17582_v24 = vpack.c.bf16 %v12658_v19, %v12657_v18 }
 0x180   : >> { %15381 = vmatprep.mubr.f32.mxu0 %v12665_v41  ;;  %15241 = vmatmul.mubr.f32.gmra.mrb[4].mxu1 %v12612_v42  ;;  %v12691_v41 = vld [vmem:[%s19679_s18 + $0xb8] sm:$0xff]  ;;  %v12600_v42 = vld [vmem:[%s19679_s18 + $0x20] sm:$0xff] }
 0x181   : >> { %17537 = vmatpush3.bf16.msra.mxu1 %v17534_v33  ;;  %15382 = vmatmul.mubr.f32.gmra.mrb[4].mxu0 %v12666_v44  ;;  %v12690_v33 = vld [vmem:[%s19679_s18 + $0xb0] sm:$0xff]  ;;  %v12692_v44 = vld [vmem:[%s19679_s18 + $0xc0] sm:$0xff] }
 0x182   : >> { %17633 = vmatpush3.bf16.msra.mxu0 %v17630_v35  ;;  %17539 = vmatprep.subr.bf16.mxu1 %v17538_v43  ;;  %v17658_v35 = vpack.c.bf16 %v12728_v31, %v12727_v30  ;;  %v17682_v31 = vpack.c.bf16 %v12740_v29, %v12739_v28 }
 0x183   : >> { %17635 = vmatprep.subr.bf16.mxu0 %v17634_v45  ;;  %15243 = vmatprep.mubr.f32.mxu1 %v12613_v51  ;;  %v12601_v51 = vld [vmem:[%s19679_s18 + $0x28] sm:$0xff] }
 0x184   : >> { %15384 = vmatprep.mubr.f32.mxu0 %v12667_v52  ;;  %15244 = vmatmul.mubr.f32.gmra.mrb[6].mxu1 %v12614_v53  ;;  %v12693_v52 = vld [vmem:[%s19679_s18 + $0xc8] sm:$0xff]  ;;  %v12602_v53 = vld [vmem:[%s19679_s18 + $0x30] sm:$0xff] }
 0x185   : >> { %17541 = vmatpush3.bf16.msra.mxu1 %v17538_v43  ;;  %15385 = vmatmul.mubr.f32.gmra.mrb[6].mxu0 %v12668_v55  ;;  %v17566_v43 = vpack.c.bf16 %v12650_v37, %v12649_v36  ;;  %v12694_v55 = vld [vmem:[%s19679_s18 + $0xd0] sm:$0xff]  ;;  %v12718_v37 = vld [vmem:[%s19679_s18 + $0xbf] sm:$0xff] }
 0x186   : >> { %17637 = vmatpush3.bf16.msra.mxu0 %v17634_v45  ;;  %17543 = vmatprep.subr.bf16.mxu1 %v17542_v54  ;;  %v17662_v45 = vpack.c.bf16 %v12730_v39, %v12729_v38  ;;  %v12638_v36 = vld [vmem:[%s19679_s18 + $0x70] sm:$0xff]  ;;  %v12639_v38 = vld [vmem:[%s19679_s18 + $0x78] sm:$0xff]  ;;  %v12719_v39 = vld [vmem:[%s19679_s18 + $0xc7] sm:$0xff] }
 0x187   : >> { %17639 = vmatprep.subr.bf16.mxu0 %v17638_v56  ;;  %15246 = vmatprep.mubr.f32.mxu1 %v12615_v61  ;;  %v12603_v61 = vld [vmem:[%s19679_s18 + $0x38] sm:$0xff] }
 0x188   : >> { %15387 = vmatprep.mubr.f32.mxu0 %v12669_v62  ;;  %15247 = vmatmul.mubr.f32.gmra.mrb[8].mxu1 %v12616_v63  ;;  %v12695_v62 = vld [vmem:[%s19679_s18 + $0xd8] sm:$0xff]  ;;  %v12604_v63 = vld [vmem:[%s19679_s18 + $0x40] sm:$0xff] }
 0x189   : >> { %17545 = vmatpush3.bf16.msra.mxu1 %v17542_v54  ;;  %15388 = vmatmul.mubr.f32.gmra.mrb[8].mxu0 %v12670_v2  ;;  %v17570_v54 = vpack.c.bf16 %v12652_v47, %v12651_v46  ;;  %v12696_v2 = vld [vmem:[%s19679_s18 + $0xe0] sm:$0xff]  ;;  %v12643_v46 = vld [vmem:[%s19679_s18 + $0x98] sm:$0xff] }
 0x18a   : >> { %17641 = vmatpush3.bf16.msra.mxu0 %v17638_v56  ;;  %17547 = vmatprep.subr.bf16.mxu1 %v17546_v0  ;;  %v17666_v56 = vpack.c.bf16 %v12732_v50, %v12731_v48  ;;  %v12723_v47 = vld [vmem:[%s19679_s18 + $0xe7] sm:$0xff]  ;;  %v12724_v50 = vld [vmem:[%s19679_s18 + $0xef] sm:$0xff] }
 0x18b   : >> { %17643 = vmatprep.subr.bf16.mxu0 %v17642_v7  ;;  %15281 = vmatprep.mubr.f32.mxu1 %v12597_v12  ;;  %v12605_v12 = vld [vmem:[%s19679_s18 + $0x48] sm:$0xff]  ;;  %v12644_v48 = vld [vmem:[%s19679_s18 + $0xa0] sm:$0xff] }
 0x18c   : >> { %15422 = vmatprep.mubr.f32.mxu0 %v12689_v13  ;;  %v12697_v13 = vld [vmem:[%s19679_s18 + $0xe8] sm:$0xff] }
 0x18d   : >> { %17549 = vmatpush3.bf16.msra.mxu1 %v17546_v0  ;;  %v17574_v0 = vpack.c.bf16 %v12654_v58, %v12653_v57 }
 0x18e   : >> { %17645 = vmatpush3.bf16.msra.mxu0 %v17642_v7  ;;  %17551 = vmatprep.subr.bf16.mxu1 %v17550_v14  ;;  %v17670_v7 = vpack.c.bf16 %v12734_v60, %v12733_v59 }
 0x18f   : >> { %17647 = vmatprep.subr.bf16.mxu0 %v17646_v15 }
 0x191   : >> { %17553 = vmatpush3.bf16.msra.mxu1 %v17550_v14  ;;  %v12606_v14 = vld [vmem:[%s19679_s18 + $0x50] sm:$0xff] }
 0x192   : >> { %17649 = vmatpush3.bf16.msra.mxu0 %v17646_v15  ;;  %17555 = vmatprep.subr.bf16.mxu1 %v17554_v21  ;;  %v17578_v15 = vpack.c.bf16 %v12656_v9, %v12655_v8 }
 0x193   : >> { %17651 = vmatprep.subr.bf16.mxu0 %v17650_v22 }
 0x195   : >> { %17557 = vmatpush3.bf16.msra.mxu1 %v17554_v21  ;;  %v12737_v21 = vld [vmem:[%s22925_s3 + $0x2e0] sm:$0xff] }
 0x196   : >> { %17653 = vmatpush3.bf16.msra.mxu0 %v17650_v22  ;;  %17559 = vmatprep.subr.bf16.mxu1 %v17558_v26  ;;  %v12738_v22 = vld [vmem:[%s22925_s3 + $0x2e8] sm:$0xff] }
 0x197   : >> { %17655 = vmatprep.subr.bf16.mxu0 %v17654_v27  ;;  %v17678_v25 = vpack.c.bf16 %v12738_v22, %v12737_v21 }
 0x198   : >> { %15282 = vmatmul.mubr.f32.vlgmr.msra.gmra.mrb[0].mxu1 %v12598_v32  ;;  %v12636_v32 = vld [vmem:[%s19679_s18 + $0x60] sm:$0xff] }
 0x199   : >> { %17561 = vmatpush3.bf16.msra.mxu1 %v17558_v26  ;;  %15423 = vmatmul.mubr.f32.vlgmr.msra.gmra.mrb[0].mxu0 %v12690_v33  ;;  %v12659_v26 = vld [vmem:[%s22925_s3 + $0x170] sm:$0xff] }
 0x19a   : >> { %17657 = vmatpush3.bf16.msra.mxu0 %v17654_v27  ;;  %17563 = vmatprep.subr.bf16.mxu1 %v17562_v34  ;;  %v12660_v27 = vld [vmem:[%s22925_s3 + $0x178] sm:$0xff]  ;;  %v12716_v33 = vld [vmem:[%s19679_s18 + $0xaf] sm:$0xff] }
 0x19b   : >> { %17659 = vmatprep.subr.bf16.mxu0 %v17658_v35  ;;  %15284 = vmatprep.mubr.f32.mxu1 %v12599_v40  ;;  %v17586_v30 = vpack.c.bf16 %v12660_v27, %v12659_v26  ;;  %v12640_v40 = vld [vmem:[%s19679_s18 + $0x80] sm:$0xff] }
 0x19c   : >> { %15425 = vmatprep.mubr.f32.mxu0 %v12691_v41  ;;  %15285 = vmatmul.mubr.f32.gmra.mrb[2].mxu1 %v12600_v42  ;;  %v12720_v41 = vld [vmem:[%s19679_s18 + $0xcf] sm:$0xff] }
 0x19d   : >> { %17565 = vmatpush3.bf16.msra.mxu1 %v17562_v34  ;;  %15426 = vmatmul.mubr.f32.gmra.mrb[2].mxu0 %v12692_v44  ;;  %v12637_v34 = vld [vmem:[%s19679_s18 + $0x68] sm:$0xff]  ;;  %v12642_v44 = vld [vmem:[%s19679_s18 + $0x90] sm:$0xff] }
 0x19e   : >> { %17661 = vmatpush3.bf16.msra.mxu0 %v17658_v35  ;;  %17567 = vmatprep.subr.bf16.mxu1 %v17566_v43  ;;  %v12717_v35 = vld [vmem:[%s19679_s18 + $0xb7] sm:$0xff]  ;;  %v12641_v42 = vld [vmem:[%s19679_s18 + $0x88] sm:$0xff] }
 0x19f   : >> { %17663 = vmatprep.subr.bf16.mxu0 %v17662_v45  ;;  %15287 = vmatprep.mubr.f32.mxu1 %v12601_v51 }
 0x1a0   : >> { %15428 = vmatprep.mubr.f32.mxu0 %v12693_v52  ;;  %15288 = vmatmul.mubr.f32.gmra.mrb[4].mxu1 %v12602_v53 }
 0x1a1   : >> { %17569 = vmatpush3.bf16.msra.mxu1 %v17566_v43  ;;  %15429 = vmatmul.mubr.f32.gmra.mrb[4].mxu0 %v12694_v55  ;;  %v12721_v43 = vld [vmem:[%s19679_s18 + $0xd7] sm:$0xff] }
 0x1a2   : >> { %17665 = vmatpush3.bf16.msra.mxu0 %v17662_v45  ;;  %17571 = vmatprep.subr.bf16.mxu1 %v17570_v54  ;;  %v12722_v45 = vld [vmem:[%s19679_s18 + $0xdf] sm:$0xff]  ;;  %s19991_s18 = scalar_lea.vmem [#allocation3], %s12132_s22 }
 0x1a3   : >> { %17667 = vmatprep.subr.bf16.mxu0 %v17666_v56  ;;  %15290 = vmatprep.mubr.f32.mxu1 %v12603_v61 }
 0x1a4   : >> { %15431 = vmatprep.mubr.f32.mxu0 %v12695_v62  ;;  %15291 = vmatmul.mubr.f32.gmra.mrb[6].mxu1 %v12604_v63 }
 0x1a5   : >> { %17573 = vmatpush3.bf16.msra.mxu1 %v17570_v54  ;;  %15432 = vmatmul.mubr.f32.gmra.mrb[6].mxu0 %v12696_v2 }
 0x1a6   : >> { %17669 = vmatpush3.bf16.msra.mxu0 %v17666_v56  ;;  %17575 = vmatprep.subr.bf16.mxu1 %v17574_v0 }
 0x1a7   : >> { %17671 = vmatprep.subr.bf16.mxu0 %v17670_v7  ;;  %15293 = vmatprep.mubr.f32.mxu1 %v12605_v12 }
 0x1a8   : >> { %15434 = vmatprep.mubr.f32.mxu0 %v12697_v13  ;;  %15294 = vmatmul.mubr.f32.gmra.mrb[8].mxu1 %v12606_v14 }
 0x1a9   : >> { %17577 = vmatpush3.bf16.msra.mxu1 %v17574_v0  ;;  %15435 = vmatmul.mubr.f32.gmra.mrb[8].mxu0 %v12698_v16 }
 0x1aa   : >> { %17673 = vmatpush3.bf16.msra.mxu0 %v17670_v7  ;;  %17579 = vmatprep.subr.bf16.mxu1 %v17578_v15 }
 0x1ab   : >> { %17675 = vmatprep.subr.bf16.mxu0 %v17674_v17  ;;  %15328 = vmatprep.mubr.f32.mxu1 %v12635_v1 }
 0x1ac   : >> { %15469 = vmatprep.mubr.msk.f32.mxu0 %vm19690_vm4, %v12715_v23 }
 0x1ad   : >> { %17581 = vmatpush3.bf16.msra.mxu1 %v17578_v15 }
 0x1ae   : >> { %17677 = vmatpush3.bf16.msra.mxu0 %v17674_v17  ;;  %17583 = vmatprep.subr.bf16.mxu1 %v17582_v24 }
 0x1af   : >> { %17679 = vmatprep.subr.bf16.mxu0 %v17678_v25 }
 0x1b1   : >> { %17585 = vmatpush3.bf16.msra.mxu1 %v17582_v24 }
 0x1b2   : >> { %17681 = vmatpush3.bf16.msra.mxu0 %v17678_v25  ;;  %17587 = vmatprep.subr.bf16.mxu1 %v17586_v30 }
 0x1b3   : >> { %17683 = vmatprep.subr.bf16.mxu0 %v17682_v31 }
 0x1b5   : >> { %17589 = vmatpush3.bf16.msra.mxu1 %v17586_v30 }
 0x1b6   : >> { %17685 = vmatpush3.bf16.msra.mxu0 %v17682_v31 }
 0x1b8   : >> { %15329 = vmatmul.mubr.f32.vlgmr.msra.gmra.mrb[0].mxu1 %v12636_v32 }
 0x1b9   : >> { %15470 = vmatmul.mubr.f32.vlgmr.msra.gmra.mrb[0].mxu0 %v12716_v33  ;;  %15331 = vmatprep.mubr.f32.mxu1 %v12637_v34 }
 0x1ba   : >> { %15472 = vmatprep.mubr.f32.mxu0 %v12717_v35 }
 0x1bc   : >> { %15332 = vmatmul.mubr.f32.gmra.mrb[2].mxu1 %v12638_v36 }
 0x1bd   : >> { %15473 = vmatmul.mubr.f32.gmra.mrb[2].mxu0 %v12718_v37  ;;  %15334 = vmatprep.mubr.f32.mxu1 %v12639_v38 }
 0x1be   : >> { %15475 = vmatprep.mubr.f32.mxu0 %v12719_v39 }
 0x1c0   : >> { %15335 = vmatmul.mubr.f32.gmra.mrb[4].mxu1 %v12640_v40 }
 0x1c1   : >> { %15476 = vmatmul.mubr.f32.gmra.mrb[4].mxu0 %v12720_v41  ;;  %15337 = vmatprep.mubr.f32.mxu1 %v12641_v42  ;;  %v20017_v42 = vld [vmem:[%s22928_s6] ss:$0 sm:$0xff] (%p1646_p5) }
 0x1c2   : >> { %15478 = vmatprep.mubr.f32.mxu0 %v12721_v43 }
 0x1c4   : >> { %15338 = vmatmul.mubr.f32.gmra.mrb[6].mxu1 %v12642_v44 }
 0x1c5   : >> { %15479 = vmatmul.mubr.f32.gmra.mrb[6].mxu0 %v12722_v45  ;;  %15340 = vmatprep.mubr.f32.mxu1 %v12643_v46 }
 0x1c6   : >> { %15481 = vmatprep.mubr.f32.mxu0 %v12723_v47 }
 0x1c8   : >> { %15341 = vmatmul.mubr.f32.gmra.mrb[8].mxu1 %v12644_v48 }
 0x1c9   : >> { %15482 = vmatmul.mubr.f32.gmra.mrb[8].mxu0 %v12724_v50 }
 0x28b   : >> { %v15330_v51 = vpop.f32.mrb[0].mxu1 }
 0x28c   : >> { %v15471_v52 = vpop.f32.mrb[0].mxu0  ;;  %v2063_v53 = vpop.f32.mrb[1].mxu1 }
 0x28d   : >> { %v18732_v54 = vadd.f32 %v15471_v52, %v15330_v51  ;;  %v2545_v55 = vpop.f32.mrb[1].mxu0 }
 0x28e   : >> { %v18733_v56 = vadd.f32 %v2545_v55, %v2063_v53 }
 0x28f   : >> { %v2611_v57 = vadd.f32 %v18732_v54, %v19615_v20  ;;  %v15333_v58 = vpop.f32.mrb[2].mxu1 }
 0x290   : >> { %v2610_v59 = vadd.f32 %v18733_v56, %v19615_v20  ;;  %v15474_v60 = vpop.f32.mrb[2].mxu0  ;;  %v2073_v61 = vpop.f32.mrb[3].mxu1 }
 0x291   : >> { %v2621_v62 = vmax.f32 %v2611_v57, 0.0  ;;  %v18734_v63 = vadd.f32 %v15474_v60, %v15333_v58  ;;  %v2555_v0 = vpop.f32.mrb[3].mxu0 }
 0x292   : >> { %v2620_v2 = vmax.f32 %v2610_v59, 0.0  ;;  %v18735_v7 = vadd.f32 %v2555_v0, %v2073_v61 }
 0x293   : >> { %12745 = vst [vmem:[%s19991_s18 + $0x60] sm:$0xff] %v2621_v62  ;;  %v2613_v8 = vadd.f32 %v18734_v63, %v19615_v20  ;;  %v15336_v9 = vpop.f32.mrb[4].mxu1 }
 0x294   : >> { %12744 = vst [vmem:[%s19991_s18 + $0x58] sm:$0xff] %v2620_v2  ;;  %v2612_v10 = vadd.f32 %v18735_v7, %v19615_v20  ;;  %v15477_v11 = vpop.f32.mrb[4].mxu0  ;;  %v2083_v12 = vpop.f32.mrb[5].mxu1 }
 0x295   : >> { %v2623_v13 = vmax.f32 %v2613_v8, 0.0  ;;  %v18736_v14 = vadd.f32 %v15477_v11, %v15336_v9  ;;  %v2565_v15 = vpop.f32.mrb[5].mxu0 }
 0x296   : >> { %v2622_v16 = vmax.f32 %v2612_v10, 0.0  ;;  %v18737_v17 = vadd.f32 %v2565_v15, %v2083_v12 }
 0x297   : >> { %12747 = vst [vmem:[%s19991_s18 + $0x70] sm:$0xff] %v2623_v13  ;;  %v2615_v18 = vadd.f32 %v18736_v14, %v19615_v20  ;;  %v15339_v19 = vpop.f32.mrb[6].mxu1 }
 0x298   : >> { %12746 = vst [vmem:[%s19991_s18 + $0x68] sm:$0xff] %v2622_v16  ;;  %v2614_v21 = vadd.f32 %v18737_v17, %v19615_v20  ;;  %v15480_v22 = vpop.f32.mrb[6].mxu0  ;;  %v2093_v1 = vpop.f32.mrb[7].mxu1 }
 0x299   : >> { %v2625_v23 = vmax.f32 %v2615_v18, 0.0  ;;  %v18738_v24 = vadd.f32 %v15480_v22, %v15339_v19  ;;  %v2575_v25 = vpop.f32.mrb[7].mxu0 }
 0x29a   : >> { %v2624_v26 = vmax.f32 %v2614_v21, 0.0  ;;  %v18739_v27 = vadd.f32 %v2575_v25, %v2093_v1 }
 0x29b   : >> { %12749 = vst [vmem:[%s19991_s18 + $0x80] sm:$0xff] %v2625_v23  ;;  %v2617_v28 = vadd.f32 %v18738_v24, %v19615_v20  ;;  %v15342_v29 = vpop.f32.mrb[8].mxu1 }
 0x29c   : >> { %12748 = vst [vmem:[%s19991_s18 + $0x78] sm:$0xff] %v2624_v26  ;;  %v2616_v30 = vadd.f32 %v18739_v27, %v19615_v20  ;;  %v15483_v31 = vpop.f32.mrb[8].mxu0  ;;  %v2103_v32 = vpop.f32.mrb[9].mxu1 }
 0x29d   : >> { %v2627_v33 = vmax.f32 %v2617_v28, 0.0  ;;  %v18740_v34 = vadd.f32 %v15483_v31, %v15342_v29  ;;  %v2585_v35 = vpop.f32.mrb[9].mxu0 }
 0x29e   : >> { %v2626_v36 = vmax.f32 %v2616_v30, 0.0  ;;  %v18741_v37 = vadd.f32 %v2585_v35, %v2103_v32  ;;  %1648 = sbr.rel (!%p1646_p5) target bundleno = 341 (0x155), region = 295 }
 0x29f   : >> { %12751 = vst [vmem:[%s19991_s18 + $0x90] sm:$0xff] %v2627_v33  ;;  %v2619_v38 = vadd.f32 %v18740_v34, %v19615_v20 }
 0x2a0   : >> { %12750 = vst [vmem:[%s19991_s18 + $0x88] sm:$0xff] %v2626_v36  ;;  %v2618_v39 = vadd.f32 %v18741_v37, %v19615_v20 }
 0x2a1   : >> { %v2629_v40 = vmax.f32 %v2619_v38, 0.0 }
 0x2a2   : >> { %v2628_v41 = vmax.f32 %v2618_v39, 0.0 }
 0x2a3   : >> { %12753 = vst [vmem:[%s19991_s18 + $0xa0] sm:$0xff] %v2629_v40 }
 0x2a4   : >> { %12752 = vst [vmem:[%s19991_s18 + $0x98] sm:$0xff] %v2628_v41 }
 0x2a5 LB: >> { %v12774_v43 = vld [vmem:[%s22927_s5 + $0x80] sm:$0xff]  ;;  %v12775_v20 = vld [vmem:[%s22927_s5 + $0x88] sm:$0xff]  ;;  %v12776_v44 = vld [vmem:[%s22927_s5 + $0x90] sm:$0xff]  ;;  %s12153_s22 = smul.u32 160, %s19150_s19  ;;  %s19150_s19 = sphi %s20019_s19, %s2647_s19  }
 0x2a6   : >> { %v17686_v45 = vpack.c.bf16 %v12775_v20, %v12774_v43  ;;  %v12777_v46 = vld [vmem:[%s22927_s5 + $0x98] sm:$0xff]  ;;  %v12778_v48 = vld [vmem:[%s22927_s5 + $0xa0] sm:$0xff]  ;;  %v12779_v50 = vld [vmem:[%s22927_s5 + $0xa8] sm:$0xff]  ;;  %s12195_s18 = smul.u32 80, %s19150_s19  ;;  %s2647_s19 = sadd.s32 1, %s19150_s19  }
 0x2a7   : >> { %v17690_v47 = vpack.c.bf16 %v12777_v46, %v12776_v44  ;;  %v17694_v51 = vpack.c.bf16 %v12779_v50, %v12778_v48  ;;  %s20043_s23 = scalar_lea.vmem [#allocation3], %s12153_s22  ;;  %v12780_v53 = vld [vmem:[%s22927_s5 + $0xb0] sm:$0xff]  ;;  %v12781_v54 = vld [vmem:[%s22927_s5 + $0xb8] sm:$0xff]  ;;  %v12782_v57 = vld [vmem:[%s22927_s5 + $0xc0] sm:$0xff]  ;;  %p2644_p6 = scmp.ge.s32.totalorder %s2647_s19, 64  }
 0x2a8   : >> { %17687 = vmatprep.subr.bf16.mxu0 %v17686_v45  ;;  %17879 = vmatprep.subr.bf16.mxu1 %v17686_v45  ;;  %v17698_v56 = vpack.c.bf16 %v12781_v54, %v12780_v53  ;;  %v12783_v58 = vld [vmem:[%s22927_s5 + $0xc8] sm:$0xff]  ;;  %v12784_v60 = vld [vmem:[%s22927_s5 + $0xd0] sm:$0xff]  ;;  %v12785_v61 = vld [vmem:[%s22927_s5 + $0xd8] sm:$0xff]  ;;  %s12196_s22 = scalar_lea.vmem [#allocation4], %s12195_s18  ;;  %vm4565_vm5 = vcmp.eq.s32.totalorder (%p2644_p6), %v19399_v6, 79  ;;  %s20625_s28 = smov (%p2644_p6), 0  }
 0x2a9   : >> { %17689 = vmatpush3.bf16.msra.mxu0 %v17686_v45  ;;  %17881 = vmatpush3.bf16.msra.mxu1 %v17686_v45  ;;  %v17702_v59 = vpack.c.bf16 %v12783_v58, %v12782_v57  ;;  %v17706_v62 = vpack.c.bf16 %v12785_v61, %v12784_v60  ;;  %v12786_v63 = vld [vmem:[%s22927_s5 + $0xe0] sm:$0xff]  ;;  %v12787_v0 = vld [vmem:[%s22927_s5 + $0xe8] sm:$0xff]  ;;  %v12788_v7 = vld [vmem:[%s22927_s5 + $0xf0] sm:$0xff] }
 0x2aa   : >> { %17691 = vmatprep.subr.bf16.mxu0 %v17690_v47  ;;  %17883 = vmatprep.subr.bf16.mxu1 %v17690_v47  ;;  %v17710_v2 = vpack.c.bf16 %v12787_v0, %v12786_v63  ;;  %v12789_v8 = vld [vmem:[%s22927_s5 + $0xf8] sm:$0xff]  ;;  %v2661_v10 = vld [vmem:[%s22927_s5] sm:$0xff]  ;;  %v2662_v11 = vld [vmem:[%s22927_s5 + $0x8] sm:$0xff] }
 0x2ab   : >> { %v12764_v52 = vld [vmem:[%s20043_s23 + $0x7] sm:$0xff]  ;;  %v20055_v55 = vld [vmem:[%s20043_s23 + $0x57] sm:$0xff]  ;;  %v17714_v9 = vpack.c.bf16 %v12789_v8, %v12788_v7  ;;  %v17718_v12 = vpack.c.bf16 %v2662_v11, %v2661_v10  ;;  %v12765_v15 = vld [vmem:[%s20043_s23 + $0xf] sm:$0xff] }
 0x2ac   : >> { %15516 = vmatprep.mubr.msk.f32.mxu0 %vm19690_vm4, %v12764_v52  ;;  %15798 = vmatprep.mubr.msk.f32.mxu1 %vm19690_vm4, %v20055_v55  ;;  %v2663_v13 = vld [vmem:[%s22927_s5 + $0x10] sm:$0xff]  ;;  %v2664_v14 = vld [vmem:[%s22927_s5 + $0x18] sm:$0xff]  ;;  %v2665_v18 = vld [vmem:[%s22927_s5 + $0x20] sm:$0xff] }
 0x2ad   : >> { %17693 = vmatpush3.bf16.msra.mxu0 %v17690_v47  ;;  %17885 = vmatpush3.bf16.msra.mxu1 %v17690_v47  ;;  %v20098_v16 = vld [vmem:[%s20043_s23 + $0x5f] sm:$0xff]  ;;  %v17722_v17 = vpack.c.bf16 %v2664_v14, %v2663_v13  ;;  %v2666_v19 = vld [vmem:[%s22927_s5 + $0x28] sm:$0xff]  ;;  %v12766_v21 = vld [vmem:[%s20043_s23 + $0x17] sm:$0xff] }
 0x2ae   : >> { %17695 = vmatprep.subr.bf16.mxu0 %v17694_v51  ;;  %17887 = vmatprep.subr.bf16.mxu1 %v17694_v51  ;;  %v20109_v22 = vld [vmem:[%s20043_s23 + $0x67] sm:$0xff]  ;;  %v12767_v1 = vld [vmem:[%s20043_s23 + $0x1f] sm:$0xff]  ;;  %v20113_v23 = vld [vmem:[%s20043_s23 + $0x6f] sm:$0xff]  ;;  %v17726_v24 = vpack.c.bf16 %v2666_v19, %v2665_v18 }
 0x2af   : >> { %v2667_v25 = vld [vmem:[%s22927_s5 + $0x30] sm:$0xff]  ;;  %v2668_v26 = vld [vmem:[%s22927_s5 + $0x38] sm:$0xff]  ;;  %v12768_v27 = vld [vmem:[%s20043_s23 + $0x27] sm:$0xff] }
 0x2b0   : >> { %v20125_v28 = vld [vmem:[%s20043_s23 + $0x77] sm:$0xff]  ;;  %v12769_v29 = vld [vmem:[%s20043_s23 + $0x2f] sm:$0xff]  ;;  %v20129_v30 = vld [vmem:[%s20043_s23 + $0x7f] sm:$0xff]  ;;  %v17730_v31 = vpack.c.bf16 %v2668_v26, %v2667_v25 }
 0x2b1   : >> { %17697 = vmatpush3.bf16.msra.mxu0 %v17694_v51  ;;  %17889 = vmatpush3.bf16.msra.mxu1 %v17694_v51  ;;  %v2669_v32 = vld [vmem:[%s22927_s5 + $0x40] sm:$0xff]  ;;  %v2670_v33 = vld [vmem:[%s22927_s5 + $0x48] sm:$0xff]  ;;  %v12770_v34 = vld [vmem:[%s20043_s23 + $0x37] sm:$0xff] }
 0x2b2   : >> { %17699 = vmatprep.subr.bf16.mxu0 %v17698_v56  ;;  %17891 = vmatprep.subr.bf16.mxu1 %v17698_v56  ;;  %v20141_v35 = vld [vmem:[%s20043_s23 + $0x87] sm:$0xff]  ;;  %v12771_v36 = vld [vmem:[%s20043_s23 + $0x3f] sm:$0xff]  ;;  %v20145_v37 = vld [vmem:[%s20043_s23 + $0x8f] sm:$0xff]  ;;  %v17734_v38 = vpack.c.bf16 %v2670_v33, %v2669_v32 }
 0x2b3   : >> { %v2671_v39 = vld [vmem:[%s22927_s5 + $0x50] sm:$0xff]  ;;  %v2672_v40 = vld [vmem:[%s22927_s5 + $0x58] sm:$0xff]  ;;  %v12772_v41 = vld [vmem:[%s20043_s23 + $0x47] sm:$0xff] }
 0x2b4   : >> { %v20157_v43 = vld [vmem:[%s20043_s23 + $0x97] sm:$0xff]  ;;  %v12773_v20 = vld [vmem:[%s20043_s23 + $0x4f] sm:$0xff]  ;;  %v20161_v44 = vld [vmem:[%s20043_s23 + $0x9f] sm:$0xff]  ;;  %v17738_v45 = vpack.c.bf16 %v2672_v40, %v2671_v39 }
 0x2b5   : >> { %17701 = vmatpush3.bf16.msra.mxu0 %v17698_v56  ;;  %17893 = vmatpush3.bf16.msra.mxu1 %v17698_v56  ;;  %v2673_v46 = vld [vmem:[%s22927_s5 + $0x60] sm:$0xff]  ;;  %v2674_v47 = vld [vmem:[%s22927_s5 + $0x68] sm:$0xff]  ;;  %v20173_v50 = vld [vmem:[%s20043_s23 + $0x58] sm:$0xff] }
 0x2b6   : >> { %17703 = vmatprep.subr.bf16.mxu0 %v17702_v59  ;;  %17895 = vmatprep.subr.bf16.mxu1 %v17702_v59  ;;  %v12754_v48 = vld [vmem:[%s20043_s23 + $0x8] sm:$0xff]  ;;  %v17742_v51 = vpack.c.bf16 %v2674_v47, %v2673_v46  ;;  %v2675_v52 = vld [vmem:[%s22927_s5 + $0x70] sm:$0xff]  ;;  %v2676_v53 = vld [vmem:[%s22927_s5 + $0x78] sm:$0xff] }
 0x2b7   : >> { %v17746_v54 = vpack.c.bf16 %v2676_v53, %v2675_v52  ;;  %v12802_v56 = vld [vmem:[%s22927_s5 + $0x100] sm:$0xff]  ;;  %v12803_v57 = vld [vmem:[%s22927_s5 + $0x108] sm:$0xff]  ;;  %v12805_v60 = vld [vmem:[%s22927_s5 + $0x118] sm:$0xff] }
 0x2b8   : >> { %v17750_v58 = vpack.c.bf16 %v12803_v57, %v12802_v56  ;;  %v12755_v61 = vld [vmem:[%s20043_s23 + $0x10] sm:$0xff]  ;;  %v12806_v0 = vld [vmem:[%s22927_s5 + $0x120] sm:$0xff]  ;;  %v12756_v7 = vld [vmem:[%s20043_s23 + $0x18] sm:$0xff] }
 0x2b9   : >> { %17705 = vmatpush3.bf16.msra.mxu0 %v17702_v59  ;;  %17897 = vmatpush3.bf16.msra.mxu1 %v17702_v59  ;;  %v12804_v59 = vld [vmem:[%s22927_s5 + $0x110] sm:$0xff]  ;;  %v20207_v8 = vld [vmem:[%s20043_s23 + $0x68] sm:$0xff]  ;;  %v12809_v13 = vld [vmem:[%s22927_s5 + $0x138] sm:$0xff] }
 0x2ba   : >> { %17707 = vmatprep.subr.bf16.mxu0 %v17706_v62  ;;  %17899 = vmatprep.subr.bf16.mxu1 %v17706_v62  ;;  %v17754_v63 = vpack.c.bf16 %v12805_v60, %v12804_v59  ;;  %v20211_v10 = vld [vmem:[%s20043_s23 + $0x70] sm:$0xff]  ;;  %v12758_v14 = vld [vmem:[%s20043_s23 + $0x28] sm:$0xff]  ;;  %v20227_v18 = vld [vmem:[%s20043_s23 + $0x80] sm:$0xff] }
 0x2bb   : >> { %v20239_v25 = vld [vmem:[%s20043_s23 + $0x88] sm:$0xff]  ;;  %v12761_v26 = vld [vmem:[%s20043_s23 + $0x40] sm:$0xff]  ;;  %v12813_v32 = vld [vmem:[%s22927_s5 + $0x158] sm:$0xff] }
 0x2bc   : >> { %v12762_v33 = vld [vmem:[%s20043_s23 + $0x48] sm:$0xff]  ;;  %v12814_v40 = vld [vmem:[%s22927_s5 + $0x160] sm:$0xff]  ;;  %v12816_v46 = vld [vmem:[%s22927_s5 + $0x170] sm:$0xff] }
 0x2bd   : >> { %17709 = vmatpush3.bf16.msra.mxu0 %v17706_v62  ;;  %17901 = vmatpush3.bf16.msra.mxu1 %v17706_v62  ;;  %v20196_v62 = vld [vmem:[%s20043_s23 + $0x60] sm:$0xff]  ;;  %v12817_v47 = vld [vmem:[%s22927_s5 + $0x178] sm:$0xff]  ;;  %v12829_v52 = vld [vmem:[%s22927_s5 + $0x188] sm:$0xff] }
 0x2be   : >> { %17711 = vmatprep.subr.bf16.mxu0 %v17710_v2  ;;  %17903 = vmatprep.subr.bf16.mxu1 %v17710_v2  ;;  %v12830_v53 = vld [vmem:[%s22927_s5 + $0x190] sm:$0xff]  ;;  %v12833_v59 = vld [vmem:[%s22927_s5 + $0x1a8] sm:$0xff]  ;;  %v20304_v60 = vld [vmem:[%s20043_s23 + $0xb8] sm:$0xff] }
 0x2bf   : >> { %v20293_v56 = vld [vmem:[%s20043_s23 + $0xb0] sm:$0xff] }
 0x2c1   : >> { %17713 = vmatpush3.bf16.msra.mxu0 %v17710_v2  ;;  %17905 = vmatpush3.bf16.msra.mxu1 %v17710_v2  ;;  %v12807_v2 = vld [vmem:[%s22927_s5 + $0x128] sm:$0xff] }
 0x2c2   : >> { %17715 = vmatprep.subr.bf16.mxu0 %v17714_v9  ;;  %17907 = vmatprep.subr.bf16.mxu1 %v17714_v9  ;;  %v17758_v11 = vpack.c.bf16 %v12807_v2, %v12806_v0  ;;  %v12834_v0 = vld [vmem:[%s22927_s5 + $0x1b0] sm:$0xff]  ;;  %v20320_v2 = vld [vmem:[%s20043_s23 + $0xc8] sm:$0xff] }
 0x2c5   : >> { %17717 = vmatpush3.bf16.msra.mxu0 %v17714_v9  ;;  %17909 = vmatpush3.bf16.msra.mxu1 %v17714_v9  ;;  %v12757_v9 = vld [vmem:[%s20043_s23 + $0x20] sm:$0xff] }
 0x2c6   : >> { %17719 = vmatprep.subr.bf16.mxu0 %v17718_v12  ;;  %17911 = vmatprep.subr.bf16.mxu1 %v17718_v12 }
 0x2c8   : >> { %15517 = vmatmul.mubr.f32.vlgmr.msra.gmra.mrb[0].mxu0 %v12765_v15  ;;  %15799 = vmatmul.mubr.f32.vlgmr.msra.gmra.mrb[0].mxu1 %v20098_v16  ;;  %v20223_v15 = vld [vmem:[%s20043_s23 + $0x78] sm:$0xff] }
 0x2c9   : >> { %17721 = vmatpush3.bf16.msra.mxu0 %v17718_v12  ;;  %17913 = vmatpush3.bf16.msra.mxu1 %v17718_v12  ;;  %v12808_v12 = vld [vmem:[%s22927_s5 + $0x130] sm:$0xff] }
 0x2ca   : >> { %17723 = vmatprep.subr.bf16.mxu0 %v17722_v17  ;;  %17915 = vmatprep.subr.bf16.mxu1 %v17722_v17  ;;  %v17762_v19 = vpack.c.bf16 %v12809_v13, %v12808_v12  ;;  %v20339_v12 = vld [vmem:[%s20043_s23 + $0xe0] sm:$0xff] }
 0x2cb   : >> { %15519 = vmatprep.mubr.f32.mxu0 %v12766_v21  ;;  %15801 = vmatprep.mubr.f32.mxu1 %v20109_v22  ;;  %v12810_v21 = vld [vmem:[%s22927_s5 + $0x140] sm:$0xff] }
 0x2cc   : >> { %15520 = vmatmul.mubr.f32.gmra.mrb[2].mxu0 %v12767_v1  ;;  %15802 = vmatmul.mubr.f32.gmra.mrb[2].mxu1 %v20113_v23  ;;  %v12811_v1 = vld [vmem:[%s22927_s5 + $0x148] sm:$0xff] }
 0x2cd   : >> { %17725 = vmatpush3.bf16.msra.mxu0 %v17722_v17  ;;  %17917 = vmatpush3.bf16.msra.mxu1 %v17722_v17  ;;  %v12759_v17 = vld [vmem:[%s20043_s23 + $0x30] sm:$0xff] }
 0x2ce   : >> { %17727 = vmatprep.subr.bf16.mxu0 %v17726_v24  ;;  %17919 = vmatprep.subr.bf16.mxu1 %v17726_v24 }
 0x2cf   : >> { %15522 = vmatprep.mubr.f32.mxu0 %v12768_v27  ;;  %15804 = vmatprep.mubr.f32.mxu1 %v20125_v28  ;;  %v20243_v27 = vld [vmem:[%s20043_s23 + $0x90] sm:$0xff] }
 0x2d0   : >> { %15523 = vmatmul.mubr.f32.gmra.mrb[4].mxu0 %v12769_v29  ;;  %15805 = vmatmul.mubr.f32.gmra.mrb[4].mxu1 %v20129_v30  ;;  %v17766_v29 = vpack.c.bf16 %v12811_v1, %v12810_v21  ;;  %v12840_v21 = vld [vmem:[%s22927_s5 + $0x1e0] sm:$0xff]  ;;  %v12841_v1 = vld [vmem:[%s22927_s5 + $0x1e8] sm:$0xff] }
 0x2d1   : >> { %17729 = vmatpush3.bf16.msra.mxu0 %v17726_v24  ;;  %17921 = vmatpush3.bf16.msra.mxu1 %v17726_v24  ;;  %v12760_v24 = vld [vmem:[%s20043_s23 + $0x38] sm:$0xff] }
 0x2d2   : >> { %17731 = vmatprep.subr.bf16.mxu0 %v17730_v31  ;;  %17923 = vmatprep.subr.bf16.mxu1 %v17730_v31 }
 0x2d3   : >> { %15525 = vmatprep.mubr.f32.mxu0 %v12770_v34  ;;  %15807 = vmatprep.mubr.f32.mxu1 %v20141_v35  ;;  %v20255_v34 = vld [vmem:[%s20043_s23 + $0x98] sm:$0xff] }
 0x2d4   : >> { %15526 = vmatmul.mubr.f32.gmra.mrb[6].mxu0 %v12771_v36  ;;  %15808 = vmatmul.mubr.f32.gmra.mrb[6].mxu1 %v20145_v37  ;;  %v12763_v36 = vld [vmem:[%s20043_s23 + $0x50] sm:$0xff] }
 0x2d5   : >> { %17733 = vmatpush3.bf16.msra.mxu0 %v17730_v31  ;;  %17925 = vmatpush3.bf16.msra.mxu1 %v17730_v31  ;;  %v12812_v31 = vld [vmem:[%s22927_s5 + $0x150] sm:$0xff] }
 0x2d6   : >> { %17735 = vmatprep.subr.bf16.mxu0 %v17734_v38  ;;  %17927 = vmatprep.subr.bf16.mxu1 %v17734_v38  ;;  %v17770_v39 = vpack.c.bf16 %v12813_v32, %v12812_v31  ;;  %v12856_v31 = vld [vmem:[%s22927_s5 + $0x200] sm:$0xff]  ;;  %v12857_v32 = vld [vmem:[%s22927_s5 + $0x208] sm:$0xff] }
 0x2d7   : >> { %15528 = vmatprep.mubr.f32.mxu0 %v12772_v41  ;;  %15810 = vmatprep.mubr.f32.mxu1 %v20157_v43  ;;  %v12815_v41 = vld [vmem:[%s22927_s5 + $0x168] sm:$0xff] }
 0x2d8   : >> { %15529 = vmatmul.mubr.f32.gmra.mrb[8].mxu0 %v12773_v20  ;;  %15811 = vmatmul.mubr.f32.gmra.mrb[8].mxu1 %v20161_v44  ;;  %v20270_v20 = vld [vmem:[%s20043_s23 + $0xa8] sm:$0xff] }
 0x2d9   : >> { %17737 = vmatpush3.bf16.msra.mxu0 %v17734_v38  ;;  %17929 = vmatpush3.bf16.msra.mxu1 %v17734_v38  ;;  %v20259_v38 = vld [vmem:[%s20043_s23 + $0xa0] sm:$0xff] }
 0x2da   : >> { %17739 = vmatprep.subr.bf16.mxu0 %v17738_v45  ;;  %17931 = vmatprep.subr.bf16.mxu1 %v17738_v45 }
 0x2db   : >> { %15563 = vmatprep.mubr.f32.mxu0 %v12754_v48  ;;  %15845 = vmatprep.mubr.f32.mxu1 %v20173_v50  ;;  %v17778_v48 = vpack.c.bf16 %v12817_v47, %v12816_v46  ;;  %v12862_v47 = vld [vmem:[%s22927_s5 + $0x230] sm:$0xff] }
 0x2dd   : >> { %17741 = vmatpush3.bf16.msra.mxu0 %v17738_v45  ;;  %17933 = vmatpush3.bf16.msra.mxu1 %v17738_v45  ;;  %v17774_v45 = vpack.c.bf16 %v12815_v41, %v12814_v40  ;;  %v12861_v40 = vld [vmem:[%s22927_s5 + $0x228] sm:$0xff]  ;;  %v20406_v41 = vld [vmem:[%s20043_s23 + $0xb7] sm:$0xff] }
 0x2de   : >> { %17743 = vmatprep.subr.bf16.mxu0 %v17742_v51  ;;  %17935 = vmatprep.subr.bf16.mxu1 %v17742_v51 }
 0x2e1   : >> { %17745 = vmatpush3.bf16.msra.mxu0 %v17742_v51  ;;  %17937 = vmatpush3.bf16.msra.mxu1 %v17742_v51  ;;  %v12828_v51 = vld [vmem:[%s22927_s5 + $0x180] sm:$0xff] }
 0x2e2   : >> { %17747 = vmatprep.subr.bf16.mxu0 %v17746_v54  ;;  %17939 = vmatprep.subr.bf16.mxu1 %v17746_v54 }
 0x2e5   : >> { %17749 = vmatpush3.bf16.msra.mxu0 %v17746_v54  ;;  %17941 = vmatpush3.bf16.msra.mxu1 %v17746_v54  ;;  %v12831_v54 = vld [vmem:[%s22927_s5 + $0x198] sm:$0xff] }
 0x2e6   : >> { %17751 = vmatprep.subr.bf16.mxu0 %v17750_v58  ;;  %17943 = vmatprep.subr.bf16.mxu1 %v17750_v58  ;;  %v17786_v57 = vpack.c.bf16 %v12831_v54, %v12830_v53  ;;  %v20441_v53 = vld [vmem:[%s20043_s23 + $0xdf] sm:$0xff] }
 0x2e8   : >> { %15564 = vmatmul.mubr.f32.vlgmr.msra.gmra.mrb[0].mxu0 %v12755_v61  ;;  %15846 = vmatmul.mubr.f32.vlgmr.msra.gmra.mrb[0].mxu1 %v20196_v62  ;;  %v20307_v61 = vld [vmem:[%s20043_s23 + $0xc0] sm:$0xff] }
 0x2e9   : >> { %17753 = vmatpush3.bf16.msra.mxu0 %v17750_v58  ;;  %17945 = vmatpush3.bf16.msra.mxu1 %v17750_v58  ;;  %v12832_v58 = vld [vmem:[%s22927_s5 + $0x1a0] sm:$0xff] }
 0x2ea   : >> { %17755 = vmatprep.subr.bf16.mxu0 %v17754_v63  ;;  %17947 = vmatprep.subr.bf16.mxu1 %v17754_v63 }
 0x2eb   : >> { %15566 = vmatprep.mubr.f32.mxu0 %v12756_v7  ;;  %15848 = vmatprep.mubr.f32.mxu1 %v20207_v8  ;;  %v20323_v7 = vld [vmem:[%s20043_s23 + $0xd0] sm:$0xff] }
 0x2ec   : >> { %15567 = vmatmul.mubr.f32.gmra.mrb[2].mxu0 %v12757_v9  ;;  %15849 = vmatmul.mubr.f32.gmra.mrb[2].mxu1 %v20211_v10 }
 0x2ed   : >> { %17757 = vmatpush3.bf16.msra.mxu0 %v17754_v63  ;;  %17949 = vmatpush3.bf16.msra.mxu1 %v17754_v63  ;;  %v17790_v63 = vpack.c.bf16 %v12833_v59, %v12832_v58  ;;  %v20457_v58 = vld [vmem:[%s20043_s23 + $0xef] sm:$0xff] }
 0x2ee   : >> { %17759 = vmatprep.subr.bf16.mxu0 %v17758_v11  ;;  %17951 = vmatprep.subr.bf16.mxu1 %v17758_v11 }
 0x2ef   : >> { %15569 = vmatprep.mubr.f32.mxu0 %v12758_v14  ;;  %15851 = vmatprep.mubr.f32.mxu1 %v20223_v15  ;;  %v12838_v14 = vld [vmem:[%s22927_s5 + $0x1d0] sm:$0xff] }
 0x2f0   : >> { %15570 = vmatmul.mubr.f32.gmra.mrb[4].mxu0 %v12759_v17  ;;  %15852 = vmatmul.mubr.f32.gmra.mrb[4].mxu1 %v20227_v18  ;;  %v20352_v17 = vld [vmem:[%s20043_s23 + $0xe8] sm:$0xff] }
 0x2f1   : >> { %17761 = vmatpush3.bf16.msra.mxu0 %v17758_v11  ;;  %17953 = vmatpush3.bf16.msra.mxu1 %v17758_v11  ;;  %v20336_v11 = vld [vmem:[%s20043_s23 + $0xd8] sm:$0xff] }
 0x2f2   : >> { %17763 = vmatprep.subr.bf16.mxu0 %v17762_v19  ;;  %17955 = vmatprep.subr.bf16.mxu1 %v17762_v19 }
 0x2f3   : >> { %15572 = vmatprep.mubr.f32.mxu0 %v12760_v24  ;;  %15854 = vmatprep.mubr.f32.mxu1 %v20239_v25  ;;  %v20368_v24 = vld [vmem:[%s20043_s23 + $0xa7] sm:$0xff] }
 0x2f4   : >> { %15573 = vmatmul.mubr.f32.gmra.mrb[6].mxu0 %v12761_v26  ;;  %15855 = vmatmul.mubr.f32.gmra.mrb[6].mxu1 %v20243_v27  ;;  %v12842_v26 = vld [vmem:[%s22927_s5 + $0x1f0] sm:$0xff] }
 0x2f5   : >> { %17765 = vmatpush3.bf16.msra.mxu0 %v17762_v19  ;;  %17957 = vmatpush3.bf16.msra.mxu1 %v17762_v19 }
 0x2f6   : >> { %17767 = vmatprep.subr.bf16.mxu0 %v17766_v29  ;;  %17959 = vmatprep.subr.bf16.mxu1 %v17766_v29 }
 0x2f7   : >> { %15575 = vmatprep.mubr.f32.mxu0 %v12762_v33  ;;  %15857 = vmatprep.mubr.f32.mxu1 %v20255_v34  ;;  %v12858_v33 = vld [vmem:[%s22927_s5 + $0x210] sm:$0xff] }
 0x2f8   : >> { %15576 = vmatmul.mubr.f32.gmra.mrb[8].mxu0 %v12763_v36  ;;  %15858 = vmatmul.mubr.f32.gmra.mrb[8].mxu1 %v20259_v38  ;;  %v20395_v36 = vld [vmem:[%s20043_s23 + $0xaf] sm:$0xff] }
 0x2f9   : >> { %17769 = vmatpush3.bf16.msra.mxu0 %v17766_v29  ;;  %17961 = vmatpush3.bf16.msra.mxu1 %v17766_v29 }
 0x2fa   : >> { %17771 = vmatprep.subr.bf16.mxu0 %v17770_v39  ;;  %17963 = vmatprep.subr.bf16.mxu1 %v17770_v39 }
 0x2fb   : >> { %15610 = vmatprep.mubr.f32.mxu0 %v20173_v50  ;;  %15892 = vmatprep.mubr.f32.mxu1 %v20270_v20  ;;  %v17782_v50 = vpack.c.bf16 %v12829_v52, %v12828_v51  ;;  %v20425_v51 = vld [vmem:[%s20043_s23 + $0xcf] sm:$0xff] }
 0x2fd   : >> { %17773 = vmatpush3.bf16.msra.mxu0 %v17770_v39  ;;  %17965 = vmatpush3.bf16.msra.mxu1 %v17770_v39  ;;  %v12860_v39 = vld [vmem:[%s22927_s5 + $0x220] sm:$0xff] }
 0x2fe   : >> { %17775 = vmatprep.subr.bf16.mxu0 %v17774_v45  ;;  %17967 = vmatprep.subr.bf16.mxu1 %v17774_v45  ;;  %v17822_v46 = vpack.c.bf16 %v12861_v40, %v12860_v39  ;;  %v12964_v39 = vld [vmem:[%s20043_s23 + $0x140] sm:$0xff] }
 0x301   : >> { %17777 = vmatpush3.bf16.msra.mxu0 %v17774_v45  ;;  %17969 = vmatpush3.bf16.msra.mxu1 %v17774_v45  ;;  %v20409_v45 = vld [vmem:[%s20043_s23 + $0xbf] sm:$0xff] }
 0x302   : >> { %17779 = vmatprep.subr.bf16.mxu0 %v17778_v48  ;;  %17971 = vmatprep.subr.bf16.mxu1 %v17778_v48 }
 0x305   : >> { %17781 = vmatpush3.bf16.msra.mxu0 %v17778_v48  ;;  %17973 = vmatpush3.bf16.msra.mxu1 %v17778_v48  ;;  %v20422_v48 = vld [vmem:[%s20043_s23 + $0xc7] sm:$0xff] }
 0x306   : >> { %17783 = vmatprep.subr.bf16.mxu0 %v17782_v50  ;;  %17975 = vmatprep.subr.bf16.mxu1 %v17782_v50 }
 0x308   : >> { %15611 = vmatmul.mubr.f32.vlgmr.msra.gmra.mrb[0].mxu0 %v20196_v62  ;;  %15893 = vmatmul.mubr.f32.vlgmr.msra.gmra.mrb[0].mxu1 %v20293_v56  ;;  %v12835_v62 = vld [vmem:[%s22927_s5 + $0x1b8] sm:$0xff] }
 0x309   : >> { %17785 = vmatpush3.bf16.msra.mxu0 %v17782_v50  ;;  %17977 = vmatpush3.bf16.msra.mxu1 %v17782_v50  ;;  %v17794_v9 = vpack.c.bf16 %v12835_v62, %v12834_v0  ;;  %v20438_v50 = vld [vmem:[%s20043_s23 + $0xd7] sm:$0xff] }
 0x30a   : >> { %17787 = vmatprep.subr.bf16.mxu0 %v17786_v57  ;;  %17979 = vmatprep.subr.bf16.mxu1 %v17786_v57  ;;  %v12870_v62 = vld [vmem:[%s22927_s5 + $0x270] sm:$0xff] }
 0x30b   : >> { %15613 = vmatprep.mubr.f32.mxu0 %v20207_v8  ;;  %15895 = vmatprep.mubr.f32.mxu1 %v20304_v60  ;;  %v12836_v8 = vld [vmem:[%s22927_s5 + $0x1c0] sm:$0xff] }
 0x30c   : >> { %15614 = vmatmul.mubr.f32.gmra.mrb[2].mxu0 %v20211_v10  ;;  %15896 = vmatmul.mubr.f32.gmra.mrb[2].mxu1 %v20307_v61  ;;  %v12837_v10 = vld [vmem:[%s22927_s5 + $0x1c8] sm:$0xff] }
 0x30d   : >> { %17789 = vmatpush3.bf16.msra.mxu0 %v17786_v57  ;;  %17981 = vmatpush3.bf16.msra.mxu1 %v17786_v57  ;;  %v17798_v13 = vpack.c.bf16 %v12837_v10, %v12836_v8  ;;  %v20454_v57 = vld [vmem:[%s20043_s23 + $0xe7] sm:$0xff]  ;;  %v12884_v10 = vld [vmem:[%s22927_s5 + $0x290] sm:$0xff] }
 0x30e   : >> { %17791 = vmatprep.subr.bf16.mxu0 %v17790_v63  ;;  %17983 = vmatprep.subr.bf16.mxu1 %v17790_v63  ;;  %v12883_v8 = vld [vmem:[%s22927_s5 + $0x288] sm:$0xff] }
 0x30f   : >> { %15616 = vmatprep.mubr.f32.mxu0 %v20223_v15  ;;  %15898 = vmatprep.mubr.f32.mxu1 %v20320_v2  ;;  %v12839_v15 = vld [vmem:[%s22927_s5 + $0x1d8] sm:$0xff] }
 0x310   : >> { %15617 = vmatmul.mubr.f32.gmra.mrb[4].mxu0 %v20227_v18  ;;  %15899 = vmatmul.mubr.f32.gmra.mrb[4].mxu1 %v20323_v7  ;;  %v20355_v18 = vld [vmem:[%s20043_s23 + $0xf0] sm:$0xff]  ;;  %v17802_v19 = vpack.c.bf16 %v12839_v15, %v12838_v14  ;;  %v12956_v14 = vld [vmem:[%s20043_s23 + $0x100] sm:$0xff] }
 0x311   : >> { %17793 = vmatpush3.bf16.msra.mxu0 %v17790_v63  ;;  %17985 = vmatpush3.bf16.msra.mxu1 %v17790_v63  ;;  %v12869_v63 = vld [vmem:[%s22927_s5 + $0x268] sm:$0xff] }
 0x312   : >> { %17795 = vmatprep.subr.bf16.mxu0 %v17794_v9  ;;  %17987 = vmatprep.subr.bf16.mxu1 %v17794_v9 }
 0x313   : >> { %15619 = vmatprep.mubr.f32.mxu0 %v20239_v25  ;;  %15901 = vmatprep.mubr.f32.mxu1 %v20336_v11  ;;  %v17806_v25 = vpack.c.bf16 %v12841_v1, %v12840_v21  ;;  %v12887_v21 = vld [vmem:[%s22927_s5 + $0x2a8] sm:$0xff] }
 0x314   : >> { %15620 = vmatmul.mubr.f32.gmra.mrb[6].mxu0 %v20243_v27  ;;  %15902 = vmatmul.mubr.f32.gmra.mrb[6].mxu1 %v20339_v12  ;;  %v12843_v27 = vld [vmem:[%s22927_s5 + $0x1f8] sm:$0xff]  ;;  %v12957_v1 = vld [vmem:[%s20043_s23 + $0x108] sm:$0xff] }
 0x315   : >> { %17797 = vmatpush3.bf16.msra.mxu0 %v17794_v9  ;;  %17989 = vmatpush3.bf16.msra.mxu1 %v17794_v9  ;;  %v17810_v29 = vpack.c.bf16 %v12843_v27, %v12842_v26  ;;  %v12882_v9 = vld [vmem:[%s22927_s5 + $0x280] sm:$0xff]  ;;  %v12888_v27 = vld [vmem:[%s22927_s5 + $0x2b0] sm:$0xff] }
 0x316   : >> { %17799 = vmatprep.subr.bf16.mxu0 %v17798_v13  ;;  %17991 = vmatprep.subr.bf16.mxu1 %v17798_v13 }
 0x317   : >> { %15622 = vmatprep.mubr.f32.mxu0 %v20255_v34  ;;  %15904 = vmatprep.mubr.f32.mxu1 %v20352_v17  ;;  %v12859_v34 = vld [vmem:[%s22927_s5 + $0x218] sm:$0xff] }
 0x318   : >> { %15623 = vmatmul.mubr.f32.gmra.mrb[8].mxu0 %v20259_v38  ;;  %15905 = vmatmul.mubr.f32.gmra.mrb[8].mxu1 %v20355_v18  ;;  %v17818_v38 = vpack.c.bf16 %v12859_v34, %v12858_v33  ;;  %v12962_v33 = vld [vmem:[%s20043_s23 + $0x130] sm:$0xff] }
 0x319   : >> { %17801 = vmatpush3.bf16.msra.mxu0 %v17798_v13  ;;  %17993 = vmatpush3.bf16.msra.mxu1 %v17798_v13  ;;  %v12885_v13 = vld [vmem:[%s22927_s5 + $0x298] sm:$0xff] }
 0x31a   : >> { %17803 = vmatprep.subr.bf16.mxu0 %v17802_v19  ;;  %17995 = vmatprep.subr.bf16.mxu1 %v17802_v19  ;;  %v17850_v15 = vpack.c.bf16 %v12885_v13, %v12884_v10 }
 0x31b   : >> { %15657 = vmatprep.mubr.msk.f32.mxu0 %vm19690_vm4, %v20055_v55  ;;  %15939 = vmatprep.mubr.msk.f32.mxu1 %vm19690_vm4, %v20368_v24  ;;  %v17814_v55 = vpack.c.bf16 %v12857_v32, %v12856_v31  ;;  %v12960_v31 = vld [vmem:[%s20043_s23 + $0x120] sm:$0xff] }
 0x31d   : >> { %17805 = vmatpush3.bf16.msra.mxu0 %v17802_v19  ;;  %17997 = vmatpush3.bf16.msra.mxu1 %v17802_v19  ;;  %v12886_v19 = vld [vmem:[%s22927_s5 + $0x2a0] sm:$0xff] }
 0x31e   : >> { %17807 = vmatprep.subr.bf16.mxu0 %v17806_v25  ;;  %17999 = vmatprep.subr.bf16.mxu1 %v17806_v25  ;;  %v17854_v26 = vpack.c.bf16 %v12887_v21, %v12886_v19 }
 0x321   : >> { %17809 = vmatpush3.bf16.msra.mxu0 %v17806_v25  ;;  %18001 = vmatpush3.bf16.msra.mxu1 %v17806_v25  ;;  %v12958_v25 = vld [vmem:[%s20043_s23 + $0x110] sm:$0xff] }
 0x322   : >> { %17811 = vmatprep.subr.bf16.mxu0 %v17810_v29  ;;  %18003 = vmatprep.subr.bf16.mxu1 %v17810_v29 }
 0x325   : >> { %17813 = vmatpush3.bf16.msra.mxu0 %v17810_v29  ;;  %18005 = vmatpush3.bf16.msra.mxu1 %v17810_v29  ;;  %v12889_v29 = vld [vmem:[%s22927_s5 + $0x2b8] sm:$0xff] }
 0x326   : >> { %17815 = vmatprep.subr.bf16.mxu0 %v17814_v55  ;;  %18007 = vmatprep.subr.bf16.mxu1 %v17814_v55  ;;  %v17858_v32 = vpack.c.bf16 %v12889_v29, %v12888_v27 }
 0x328   : >> { %15658 = vmatmul.mubr.f32.vlgmr.msra.gmra.mrb[0].mxu0 %v20098_v16  ;;  %15940 = vmatmul.mubr.f32.vlgmr.msra.gmra.mrb[0].mxu1 %v20395_v36  ;;  %v12863_v16 = vld [vmem:[%s22927_s5 + $0x238] sm:$0xff] }
 0x329   : >> { %17817 = vmatpush3.bf16.msra.mxu0 %v17814_v55  ;;  %18009 = vmatpush3.bf16.msra.mxu1 %v17814_v55  ;;  %v17826_v52 = vpack.c.bf16 %v12863_v16, %v12862_v47  ;;  %v12890_v55 = vld [vmem:[%s22927_s5 + $0x2c0] sm:$0xff]  ;;  %v12896_v16 = vld [vmem:[%s22927_s5 + $0x2f0] sm:$0xff] }
 0x32a   : >> { %17819 = vmatprep.subr.bf16.mxu0 %v17818_v38  ;;  %18011 = vmatprep.subr.bf16.mxu1 %v17818_v38 }
 0x32b   : >> { %15660 = vmatprep.mubr.f32.mxu0 %v20109_v22  ;;  %15942 = vmatprep.mubr.f32.mxu1 %v20406_v41  ;;  %v12864_v22 = vld [vmem:[%s22927_s5 + $0x240] sm:$0xff] }
 0x32c   : >> { %15661 = vmatmul.mubr.f32.gmra.mrb[2].mxu0 %v20113_v23  ;;  %15943 = vmatmul.mubr.f32.gmra.mrb[2].mxu1 %v20409_v45  ;;  %v12865_v23 = vld [vmem:[%s22927_s5 + $0x248] sm:$0xff] }
 0x32d   : >> { %17821 = vmatpush3.bf16.msra.mxu0 %v17818_v38  ;;  %18013 = vmatpush3.bf16.msra.mxu1 %v17818_v38  ;;  %v17830_v54 = vpack.c.bf16 %v12865_v23, %v12864_v22  ;;  %v12892_v38 = vld [vmem:[%s22927_s5 + $0x2d0] sm:$0xff] }
 0x32e   : >> { %17823 = vmatprep.subr.bf16.mxu0 %v17822_v46  ;;  %18015 = vmatprep.subr.bf16.mxu1 %v17822_v46  ;;  %v12970_v22 = vld [vmem:[%s20043_s23 + $0x10f] sm:$0xff]  ;;  %v12971_v23 = vld [vmem:[%s20043_s23 + $0x117] sm:$0xff] }
 0x32f   : >> { %15663 = vmatprep.mubr.f32.mxu0 %v20125_v28  ;;  %15945 = vmatprep.mubr.f32.mxu1 %v20422_v48  ;;  %v12866_v28 = vld [vmem:[%s22927_s5 + $0x250] sm:$0xff] }
 0x330   : >> { %15664 = vmatmul.mubr.f32.gmra.mrb[4].mxu0 %v20129_v30  ;;  %15946 = vmatmul.mubr.f32.gmra.mrb[4].mxu1 %v20425_v51  ;;  %v12867_v30 = vld [vmem:[%s22927_s5 + $0x258] sm:$0xff] }
 0x331   : >> { %17825 = vmatpush3.bf16.msra.mxu0 %v17822_v46  ;;  %18017 = vmatpush3.bf16.msra.mxu1 %v17822_v46  ;;  %v17834_v59 = vpack.c.bf16 %v12867_v30, %v12866_v28  ;;  %v12894_v46 = vld [vmem:[%s22927_s5 + $0x2e0] sm:$0xff] }
 0x332   : >> { %17827 = vmatprep.subr.bf16.mxu0 %v17826_v52  ;;  %18019 = vmatprep.subr.bf16.mxu1 %v17826_v52  ;;  %v12973_v28 = vld [vmem:[%s20043_s23 + $0x127] sm:$0xff] }
 0x333   : >> { %15666 = vmatprep.mubr.f32.mxu0 %v20141_v35  ;;  %15948 = vmatprep.mubr.f32.mxu1 %v20438_v50  ;;  %v12868_v35 = vld [vmem:[%s22927_s5 + $0x260] sm:$0xff] }
 0x334   : >> { %15667 = vmatmul.mubr.f32.gmra.mrb[6].mxu0 %v20145_v37  ;;  %15949 = vmatmul.mubr.f32.gmra.mrb[6].mxu1 %v20441_v53  ;;  %v12955_v37 = vld [vmem:[%s20043_s23 + $0xf8] sm:$0xff]  ;;  %v17838_v0 = vpack.c.bf16 %v12869_v63, %v12868_v35 }
 0x335   : >> { %17829 = vmatpush3.bf16.msra.mxu0 %v17826_v52  ;;  %18021 = vmatpush3.bf16.msra.mxu1 %v17826_v52  ;;  %v12968_v52 = vld [vmem:[%s20043_s23 + $0xff] sm:$0xff] }
 0x336   : >> { %17831 = vmatprep.subr.bf16.mxu0 %v17830_v54  ;;  %18023 = vmatprep.subr.bf16.mxu1 %v17830_v54 }
 0x337   : >> { %15669 = vmatprep.mubr.f32.mxu0 %v20157_v43  ;;  %15951 = vmatprep.mubr.f32.mxu1 %v20454_v57  ;;  %v12871_v43 = vld [vmem:[%s22927_s5 + $0x278] sm:$0xff] }
 0x338   : >> { %15670 = vmatmul.mubr.f32.gmra.mrb[8].mxu0 %v20161_v44  ;;  %15952 = vmatmul.mubr.f32.gmra.mrb[8].mxu1 %v20457_v58  ;;  %v17842_v44 = vpack.c.bf16 %v12871_v43, %v12870_v62 }
 0x339   : >> { %17833 = vmatpush3.bf16.msra.mxu0 %v17830_v54  ;;  %18025 = vmatpush3.bf16.msra.mxu1 %v17830_v54  ;;  %v12972_v54 = vld [vmem:[%s20043_s23 + $0x11f] sm:$0xff] }
 0x33a   : >> { %17835 = vmatprep.subr.bf16.mxu0 %v17834_v59  ;;  %18027 = vmatprep.subr.bf16.mxu1 %v17834_v59 }
 0x33b   : >> { %15704 = vmatprep.mubr.f32.mxu0 %v20270_v20  ;;  %15986 = vmatprep.mubr.f32.mxu1 %v12955_v37  ;;  %v17846_v20 = vpack.c.bf16 %v12883_v8, %v12882_v9 }
 0x33d   : >> { %17837 = vmatpush3.bf16.msra.mxu0 %v17834_v59  ;;  %18029 = vmatpush3.bf16.msra.mxu1 %v17834_v59 }
 0x33e   : >> { %17839 = vmatprep.subr.bf16.mxu0 %v17838_v0  ;;  %18031 = vmatprep.subr.bf16.mxu1 %v17838_v0 }
 0x341   : >> { %17841 = vmatpush3.bf16.msra.mxu0 %v17838_v0  ;;  %18033 = vmatpush3.bf16.msra.mxu1 %v17838_v0 }
 0x342   : >> { %17843 = vmatprep.subr.bf16.mxu0 %v17842_v44  ;;  %18035 = vmatprep.subr.bf16.mxu1 %v17842_v44 }
 0x345   : >> { %17845 = vmatpush3.bf16.msra.mxu0 %v17842_v44  ;;  %18037 = vmatpush3.bf16.msra.mxu1 %v17842_v44 }
 0x346   : >> { %17847 = vmatprep.subr.bf16.mxu0 %v17846_v20  ;;  %18039 = vmatprep.subr.bf16.mxu1 %v17846_v20 }
 0x348   : >> { %15705 = vmatmul.mubr.f32.vlgmr.msra.gmra.mrb[0].mxu0 %v20293_v56  ;;  %15987 = vmatmul.mubr.f32.vlgmr.msra.gmra.mrb[0].mxu1 %v12956_v14  ;;  %v12959_v56 = vld [vmem:[%s20043_s23 + $0x118] sm:$0xff] }
 0x349   : >> { %17849 = vmatpush3.bf16.msra.mxu0 %v17846_v20  ;;  %18041 = vmatpush3.bf16.msra.mxu1 %v17846_v20 }
 0x34a   : >> { %17851 = vmatprep.subr.bf16.mxu0 %v17850_v15  ;;  %18043 = vmatprep.subr.bf16.mxu1 %v17850_v15 }
 0x34b   : >> { %15707 = vmatprep.mubr.f32.mxu0 %v20304_v60  ;;  %15989 = vmatprep.mubr.f32.mxu1 %v12957_v1  ;;  %v12891_v60 = vld [vmem:[%s22927_s5 + $0x2c8] sm:$0xff] }
 0x34c   : >> { %15708 = vmatmul.mubr.f32.gmra.mrb[2].mxu0 %v20307_v61  ;;  %15990 = vmatmul.mubr.f32.gmra.mrb[2].mxu1 %v12958_v25  ;;  %v12961_v61 = vld [vmem:[%s20043_s23 + $0x128] sm:$0xff]  ;;  %v17862_v34 = vpack.c.bf16 %v12891_v60, %v12890_v55 }
 0x34d   : >> { %17853 = vmatpush3.bf16.msra.mxu0 %v17850_v15  ;;  %18045 = vmatpush3.bf16.msra.mxu1 %v17850_v15 }
 0x34e   : >> { %17855 = vmatprep.subr.bf16.mxu0 %v17854_v26  ;;  %18047 = vmatprep.subr.bf16.mxu1 %v17854_v26 }
 0x34f   : >> { %15710 = vmatprep.mubr.f32.mxu0 %v20320_v2  ;;  %15992 = vmatprep.mubr.f32.mxu1 %v12959_v56  ;;  %v12893_v2 = vld [vmem:[%s22927_s5 + $0x2d8] sm:$0xff] }
 0x350   : >> { %15711 = vmatmul.mubr.f32.gmra.mrb[4].mxu0 %v20323_v7  ;;  %15993 = vmatmul.mubr.f32.gmra.mrb[4].mxu1 %v12960_v31  ;;  %v12963_v7 = vld [vmem:[%s20043_s23 + $0x138] sm:$0xff]  ;;  %v17866_v40 = vpack.c.bf16 %v12893_v2, %v12892_v38 }
 0x351   : >> { %17857 = vmatpush3.bf16.msra.mxu0 %v17854_v26  ;;  %18049 = vmatpush3.bf16.msra.mxu1 %v17854_v26 }
 0x352   : >> { %17859 = vmatprep.subr.bf16.mxu0 %v17858_v32  ;;  %18051 = vmatprep.subr.bf16.mxu1 %v17858_v32 }
 0x353   : >> { %15713 = vmatprep.mubr.f32.mxu0 %v20336_v11  ;;  %15995 = vmatprep.mubr.f32.mxu1 %v12961_v61  ;;  %v12895_v11 = vld [vmem:[%s22927_s5 + $0x2e8] sm:$0xff] }
 0x354   : >> { %15714 = vmatmul.mubr.f32.gmra.mrb[6].mxu0 %v20339_v12  ;;  %15996 = vmatmul.mubr.f32.gmra.mrb[6].mxu1 %v12962_v33  ;;  %v12967_v12 = vld [vmem:[%s20043_s23 + $0xf7] sm:$0xff]  ;;  %v17870_v47 = vpack.c.bf16 %v12895_v11, %v12894_v46 }
 0x355   : >> { %17861 = vmatpush3.bf16.msra.mxu0 %v17858_v32  ;;  %18053 = vmatpush3.bf16.msra.mxu1 %v17858_v32 }
 0x356   : >> { %17863 = vmatprep.subr.bf16.mxu0 %v17862_v34  ;;  %18055 = vmatprep.subr.bf16.mxu1 %v17862_v34 }
 0x357   : >> { %15716 = vmatprep.mubr.f32.mxu0 %v20352_v17  ;;  %15998 = vmatprep.mubr.f32.mxu1 %v12963_v7  ;;  %v12897_v17 = vld [vmem:[%s22927_s5 + $0x2f8] sm:$0xff] }
 0x358   : >> { %15717 = vmatmul.mubr.f32.gmra.mrb[8].mxu0 %v20355_v18  ;;  %15999 = vmatmul.mubr.f32.gmra.mrb[8].mxu1 %v12964_v39  ;;  %v17874_v18 = vpack.c.bf16 %v12897_v17, %v12896_v16 }
 0x359   : >> { %17865 = vmatpush3.bf16.msra.mxu0 %v17862_v34  ;;  %18057 = vmatpush3.bf16.msra.mxu1 %v17862_v34 }
 0x35a   : >> { %17867 = vmatprep.subr.bf16.mxu0 %v17866_v40  ;;  %18059 = vmatprep.subr.bf16.mxu1 %v17866_v40 }
 0x35b   : >> { %15751 = vmatprep.mubr.msk.f32.mxu0 %vm19690_vm4, %v20368_v24  ;;  %16033 = vmatprep.mubr.msk.f32.mxu1 %vm19690_vm4, %v12967_v12  ;;  %v12969_v24 = vld [vmem:[%s20043_s23 + $0x107] sm:$0xff] }
 0x35d   : >> { %17869 = vmatpush3.bf16.msra.mxu0 %v17866_v40  ;;  %18061 = vmatpush3.bf16.msra.mxu1 %v17866_v40 }
 0x35e   : >> { %17871 = vmatprep.subr.bf16.mxu0 %v17870_v47  ;;  %18063 = vmatprep.subr.bf16.mxu1 %v17870_v47 }
 0x361   : >> { %17873 = vmatpush3.bf16.msra.mxu0 %v17870_v47  ;;  %18065 = vmatpush3.bf16.msra.mxu1 %v17870_v47 }
 0x362   : >> { %17875 = vmatprep.subr.bf16.mxu0 %v17874_v18  ;;  %18067 = vmatprep.subr.bf16.mxu1 %v17874_v18 }
 0x365   : >> { %17877 = vmatpush3.bf16.msra.mxu0 %v17874_v18  ;;  %18069 = vmatpush3.bf16.msra.mxu1 %v17874_v18 }
 0x368   : >> { %15752 = vmatmul.mubr.f32.vlgmr.msra.gmra.mrb[0].mxu0 %v20395_v36  ;;  %16034 = vmatmul.mubr.f32.vlgmr.msra.gmra.mrb[0].mxu1 %v12968_v52  ;;  %v12974_v36 = vld [vmem:[%s20043_s23 + $0x12f] sm:$0xff] }
 0x369   : >> { %15754 = vmatprep.mubr.f32.mxu0 %v20406_v41  ;;  %16036 = vmatprep.mubr.f32.mxu1 %v12969_v24  ;;  %v12975_v41 = vld [vmem:[%s20043_s23 + $0x137] sm:$0xff] }
 0x36c   : >> { %15755 = vmatmul.mubr.f32.gmra.mrb[2].mxu0 %v20409_v45  ;;  %16037 = vmatmul.mubr.f32.gmra.mrb[2].mxu1 %v12970_v22  ;;  %v12976_v45 = vld [vmem:[%s20043_s23 + $0x13f] sm:$0xff]  ;;  %s19165_s23 = smov 64  }
 0x36d   : >> { %15757 = vmatprep.mubr.f32.mxu0 %v20422_v48  ;;  %16039 = vmatprep.mubr.f32.mxu1 %v12971_v23 }
 0x370   : >> { %15758 = vmatmul.mubr.f32.gmra.mrb[4].mxu0 %v20425_v51  ;;  %16040 = vmatmul.mubr.f32.gmra.mrb[4].mxu1 %v12972_v54 }
 0x371   : >> { %15760 = vmatprep.mubr.f32.mxu0 %v20438_v50  ;;  %16042 = vmatprep.mubr.f32.mxu1 %v12973_v28 }
 0x374   : >> { %15761 = vmatmul.mubr.f32.gmra.mrb[6].mxu0 %v20441_v53  ;;  %16043 = vmatmul.mubr.f32.gmra.mrb[6].mxu1 %v12974_v36 }
 0x375   : >> { %15763 = vmatprep.mubr.f32.mxu0 %v20454_v57  ;;  %16045 = vmatprep.mubr.f32.mxu1 %v12975_v41 }
 0x378   : >> { %15764 = vmatmul.mubr.f32.gmra.mrb[8].mxu0 %v20457_v58  ;;  %16046 = vmatmul.mubr.f32.gmra.mrb[8].mxu1 %v12976_v45 }
 0x43b   : >> { %v15753_v48 = vpop.f32.mrb[0].mxu0  ;;  %v16035_v30 = vpop.f32.mrb[0].mxu1 }
 0x43c   : >> { %v3609_v51 = vadd.f32 %v15753_v48, %v20017_v42  ;;  %v4464_v59 = vadd.f32 %v16035_v30, %v20017_v42  ;;  %v3543_v50 = vpop.f32.mrb[1].mxu0  ;;  %v4404_v35 = vpop.f32.mrb[1].mxu1 }
 0x43d   : >> { %v3608_v63 = vadd.f32 %v20017_v42, %v3543_v50  ;;  %v4463_v53 = vadd.f32 %v20017_v42, %v4404_v35 }
 0x43e   : >> { %v3619_v37 = vmax.f32 %v3609_v51, 0.0  ;;  %v4474_v0 = vmax.f32 %v4464_v59, 0.0 }
 0x43f   : >> { %v3618_v57 = vmax.f32 %v3608_v63, 0.0  ;;  %v4473_v62 = vmax.f32 %v4463_v53, 0.0  ;;  %v15756_v43 = vpop.f32.mrb[2].mxu0  ;;  %v16038_v44 = vpop.f32.mrb[2].mxu1 }
 0x440   : >> { %v3611_v58 = vadd.f32 %v15756_v43, %v20017_v42  ;;  %v4466_v9 = vadd.f32 %v16038_v44, %v20017_v42  ;;  %v3553_v8 = vpop.f32.mrb[3].mxu0  ;;  %v4414_v20 = vpop.f32.mrb[3].mxu1  ;;  %v20573_v10 = vmax.f32 %v3619_v37, %v4474_v0 }
 0x441   : >> { %v20575_v13 = vmax.f32 %v3618_v57, %v4473_v62  ;;  %v3610_v14 = vadd.f32 %v20017_v42, %v3553_v8  ;;  %v4465_v15 = vadd.f32 %v20017_v42, %v4414_v20 }
 0x442   : >> { %v3621_v19 = vmax.f32 %v3611_v58, 0.0  ;;  %v4476_v21 = vmax.f32 %v4466_v9, 0.0  ;;  %4507 = vrot.lane.b32.xlu0 %v20573_v10, %s19165_s23 }
 0x443   : >> { %v3620_v1 = vmax.f32 %v3610_v14, 0.0  ;;  %v4475_v25 = vmax.f32 %v4465_v15, 0.0  ;;  %v15759_v26 = vpop.f32.mrb[4].mxu0  ;;  %v16041_v27 = vpop.f32.mrb[4].mxu1 }
 0x444   : >> { %v3613_v29 = vadd.f32 %v15759_v26, %v20017_v42  ;;  %v4468_v56 = vadd.f32 %v16041_v27, %v20017_v42  ;;  %v3563_v31 = vpop.f32.mrb[5].mxu0  ;;  %v4424_v32 = vpop.f32.mrb[5].mxu1  ;;  %v4486_v55 = vmax.f32 %v3621_v19, %v4476_v21 }
 0x445   : >> { %v4485_v60 = vmax.f32 %v3620_v1, %v4475_v25  ;;  %v3612_v61 = vadd.f32 %v20017_v42, %v3563_v31  ;;  %v4467_v33 = vadd.f32 %v20017_v42, %v4424_v32 }
 0x446   : >> { %v3623_v34 = vmax.f32 %v3613_v29, 0.0  ;;  %v4478_v38 = vmax.f32 %v4468_v56, 0.0  ;;  %4505 = vrot.lane.b32.xlu0 %v20575_v13, %s19165_s23  ;;  %4511 = vrot.lane.b32.xlu1 %v4486_v55, %s19165_s23 }
 0x447   : >> { %v3622_v2 = vmax.f32 %v3612_v61, 0.0  ;;  %v4477_v7 = vmax.f32 %v4467_v33, 0.0  ;;  %v15762_v39 = vpop.f32.mrb[6].mxu0  ;;  %v16044_v40 = vpop.f32.mrb[6].mxu1 }
 0x448   : >> { %v4488_v46 = vmax.f32 %v3623_v34, %v4478_v38  ;;  %v3615_v11 = vadd.f32 %v15762_v39, %v20017_v42  ;;  %v4470_v12 = vadd.f32 %v16044_v40, %v20017_v42  ;;  %v3573_v47 = vpop.f32.mrb[7].mxu0  ;;  %v4434_v16 = vpop.f32.mrb[7].mxu1 }
 0x449   : >> { %v4487_v17 = vmax.f32 %v3622_v2, %v4477_v7  ;;  %v3614_v18 = vadd.f32 %v20017_v42, %v3573_v47  ;;  %v4469_v52 = vadd.f32 %v20017_v42, %v4434_v16 }
 0x44a   : >> { %v3625_v24 = vmax.f32 %v3615_v11, 0.0  ;;  %v4480_v22 = vmax.f32 %v4470_v12, 0.0  ;;  %4509 = vrot.lane.b32.xlu1 %v4485_v60, %s19165_s23 }
 0x44b   : >> { %v3624_v23 = vmax.f32 %v3614_v18, 0.0  ;;  %v4479_v54 = vmax.f32 %v4469_v52, 0.0  ;;  %v16047_v28 = vpop.f32.mrb[8].mxu1  ;;  %4513 = vrot.lane.b32.xlu0 %v4487_v17, %s19165_s23  ;;  %v15765_v36 = vpop.f32.mrb[8].mxu0 }
 0x44c   : >> { %v4490_v41 = vmax.f32 %v3625_v24, %v4480_v22  ;;  %v4472_v45 = vadd.f32 %v16047_v28, %v20017_v42  ;;  %v3617_v48 = vadd.f32 %v15765_v36, %v20017_v42  ;;  %v3583_v30 = vpop.f32.mrb[9].mxu0  ;;  %v4444_v51 = vpop.f32.mrb[9].mxu1 }
 0x44d   : >> { %v4489_v59 = vmax.f32 %v3624_v23, %v4479_v54  ;;  %v3616_v50 = vadd.f32 %v20017_v42, %v3583_v30  ;;  %v4471_v35 = vadd.f32 %v20017_v42, %v4444_v51 }
 0x44e   : >> { %v4482_v63 = vmax.f32 %v4472_v45, 0.0  ;;  %v3627_v53 = vmax.f32 %v3617_v48, 0.0  ;;  %4515 = vrot.lane.b32.xlu1 %v4488_v46, %s19165_s23 }
 0x44f   : >> { %v3626_v37 = vmax.f32 %v3616_v50, 0.0  ;;  %v4481_v0 = vmax.f32 %v4471_v35, 0.0  ;;  %4517 = vrot.lane.b32.xlu0 %v4489_v59, %s19165_s23 }
 0x450   : >> { %v4492_v57 = vmax.f32 %v3627_v53, %v4482_v63 }
 0x451   : >> { %v4491_v62 = vmax.f32 %v3626_v37, %v4481_v0 }
 0x452   : >> { %4519 = vrot.lane.b32.xlu1 %v4490_v41, %s19165_s23 }
 0x453   : >> { %4521 = vrot.lane.b32.xlu0 %v4491_v62, %s19165_s23 }
 0x456   : >> { %4523 = vrot.lane.b32.xlu1 %v4492_v57, %s19165_s23 }
 0x4b4   : >> { %v4508_v43 = vpop.permute.xlu0 %4507 }
 0x4b5   : >> { %v4536_v44 = vmax.f32 %v20573_v10, %v4508_v43 }
 0x4b7   : >> { %12980 = vst.msk [vmem:[%s12196_s22 + $0x60] sm:$0xff] %vm485_vm0, %v4536_v44 }
 0x4b8   : >> { %v4506_v58 = vpop.permute.xlu0 %4505  ;;  %v4512_v9 = vpop.permute.xlu1 %4511 }
 0x4b9   : >> { %v4535_v8 = vmax.f32 %v20575_v13, %v4506_v58  ;;  %v4538_v20 = vmax.f32 %v4486_v55, %v4512_v9  ;;  %v20623_v55 = vld [vmem:[%s22930_s8] ss:$0 sm:$0xff] (%p2644_p6) }
 0x4bb   : >> { %12979 = vst.msk [vmem:[%s12196_s22 + $0x58] sm:$0xff] %vm485_vm0, %v4535_v8  ;;  %12982 = vst.msk [vmem:[%s12196_s22 + $0x70] sm:$0xff] %vm485_vm0, %v4538_v20 }
 0x4bc   : >> { %v4510_v14 = vpop.permute.xlu1 %4509 }
 0x4bd   : >> { %v4537_v15 = vmax.f32 %v4485_v60, %v4510_v14  ;;  %v4514_v19 = vpop.permute.xlu0 %4513 }
 0x4be   : >> { %v4539_v21 = vmax.f32 %v4487_v17, %v4514_v19 }
 0x4bf   : >> { %12981 = vst.msk [vmem:[%s12196_s22 + $0x68] sm:$0xff] %vm485_vm0, %v4537_v15 }
 0x4c0   : >> { %12983 = vst.msk [vmem:[%s12196_s22 + $0x78] sm:$0xff] %vm485_vm0, %v4539_v21  ;;  %v4516_v10 = vpop.permute.xlu1 %4515 }
 0x4c1   : >> { %v4540_v1 = vmax.f32 %v4488_v46, %v4516_v10  ;;  %v4518_v25 = vpop.permute.xlu0 %4517 }
 0x4c2   : >> { %v4541_v26 = vmax.f32 %v4489_v59, %v4518_v25 }
 0x4c3   : >> { %12984 = vst.msk [vmem:[%s12196_s22 + $0x80] sm:$0xff] %vm485_vm0, %v4540_v1 }
 0x4c4   : >> { %12985 = vst.msk [vmem:[%s12196_s22 + $0x88] sm:$0xff] %vm485_vm0, %v4541_v26  ;;  %v4520_v13 = vpop.permute.xlu1 %4519 }
 0x4c5   : >> { %v4542_v27 = vmax.f32 %v4490_v41, %v4520_v13  ;;  %v4522_v29 = vpop.permute.xlu0 %4521  ;;  %2646 = sbr.rel (!%p2644_p6) target bundleno = 677 (0x2a5), region = 306 }
 0x4c6   : >> { %v4543_v56 = vmax.f32 %v4491_v62, %v4522_v29 }
 0x4c7   : >> { %12986 = vst.msk [vmem:[%s12196_s22 + $0x90] sm:$0xff] %vm485_vm0, %v4542_v27 }
 0x4c8   : >> { %12987 = vst.msk [vmem:[%s12196_s22 + $0x98] sm:$0xff] %vm485_vm0, %v4543_v56  ;;  %v4524_v31 = vpop.permute.xlu1 %4523 }
 0x4c9   : >> { %v4544_v32 = vmax.f32 %v4492_v57, %v4524_v31 }
 0x4cb   : >> { %12988 = vst.msk [vmem:[%s12196_s22 + $0xa0] sm:$0xff] %vm485_vm0, %v4544_v32 }
 0x4cc LB: >> { %v13009_v60 = vld [vmem:[%s22929_s7 + $0x40] sm:$0xff]  ;;  %v13010_v49 = vld [vmem:[%s22929_s7 + $0x48] sm:$0xff]  ;;  %v13011_v42 = vld [vmem:[%s22929_s7 + $0x50] sm:$0xff]  ;;  %s12198_s24 = smul.u32 160, %s19154_s28  ;;  %s19154_s28 = sphi %s20625_s28, %s4572_s28  }
 0x4cd   : >> { %v18070_v61 = vpack.c.bf16 %v13010_v49, %v13009_v60  ;;  %v13012_v33 = vld [vmem:[%s22929_s7 + $0x58] sm:$0xff]  ;;  %v13013_v38 = vld [vmem:[%s22929_s7 + $0x60] sm:$0xff]  ;;  %v13014_v2 = vld [vmem:[%s22929_s7 + $0x68] sm:$0xff] }
 0x4ce   : >> { %v18074_v34 = vpack.c.bf16 %v13012_v33, %v13011_v42  ;;  %v18078_v7 = vpack.c.bf16 %v13014_v2, %v13013_v38  ;;  %s20649_s27 = scalar_lea.vmem [#allocation4], %s12198_s24  ;;  %v13015_v46 = vld [vmem:[%s22929_s7 + $0x70] sm:$0xff]  ;;  %v13016_v11 = vld [vmem:[%s22929_s7 + $0x78] sm:$0xff]  ;;  %v4616_v47 = vld [vmem:[%s22929_s7] sm:$0xff] }
 0x4cf   : >> { %18071 = vmatprep.subr.bf16.mxu0 %v18070_v61  ;;  %18215 = vmatprep.subr.bf16.mxu1 %v18070_v61  ;;  %v18082_v12 = vpack.c.bf16 %v13016_v11, %v13015_v46  ;;  %v4617_v16 = vld [vmem:[%s22929_s7 + $0x8] sm:$0xff]  ;;  %v4618_v18 = vld [vmem:[%s22929_s7 + $0x10] sm:$0xff]  ;;  %v4619_v52 = vld [vmem:[%s22929_s7 + $0x18] sm:$0xff] }
 0x4d0   : >> { %18073 = vmatpush3.bf16.msra.mxu0 %v18070_v61  ;;  %18217 = vmatpush3.bf16.msra.mxu1 %v18070_v61  ;;  %v18086_v17 = vpack.c.bf16 %v4617_v16, %v4616_v47  ;;  %v18090_v28 = vpack.c.bf16 %v4619_v52, %v4618_v18  ;;  %v4620_v36 = vld [vmem:[%s22929_s7 + $0x20] sm:$0xff]  ;;  %v4621_v41 = vld [vmem:[%s22929_s7 + $0x28] sm:$0xff]  ;;  %v4622_v50 = vld [vmem:[%s22929_s7 + $0x30] sm:$0xff] }
 0x4d1   : >> { %18075 = vmatprep.subr.bf16.mxu0 %v18074_v34  ;;  %18219 = vmatprep.subr.bf16.mxu1 %v18074_v34  ;;  %v18094_v59 = vpack.c.bf16 %v4621_v41, %v4620_v36  ;;  %v4623_v35 = vld [vmem:[%s22929_s7 + $0x38] sm:$0xff]  ;;  %v13047_v62 = vld [vmem:[%s22929_s7 + $0x80] sm:$0xff]  ;;  %v13048_v43 = vld [vmem:[%s22929_s7 + $0x88] sm:$0xff] }
 0x4d2   : >> { %v12999_v39 = vld [vmem:[%s20649_s27 + $0x8] sm:$0xff]  ;;  %v20653_v40 = vld [vmem:[%s20649_s27 + $0x58] sm:$0xff]  ;;  %v13000_v24 = vld [vmem:[%s20649_s27 + $0x10] sm:$0xff]  ;;  %v18098_v57 = vpack.c.bf16 %v4623_v35, %v4622_v50  ;;  %v18102_v15 = vpack.c.bf16 %v13048_v43, %v13047_v62 }
 0x4d3   : >> { %16064 = vmatprep.mubr.msk.f32.mxu0 %vm485_vm0, %v12999_v39  ;;  %16343 = vmatprep.mubr.msk.f32.mxu1 %vm485_vm0, %v20653_v40  ;;  %v20678_v22 = vld [vmem:[%s20649_s27 + $0x60] sm:$0xff]  ;;  %v13001_v23 = vld [vmem:[%s20649_s27 + $0x18] sm:$0xff]  ;;  %v20682_v54 = vld [vmem:[%s20649_s27 + $0x68] sm:$0xff] }
 0x4d4   : >> { %18077 = vmatpush3.bf16.msra.mxu0 %v18074_v34  ;;  %18221 = vmatpush3.bf16.msra.mxu1 %v18074_v34  ;;  %v13002_v45 = vld [vmem:[%s20649_s27 + $0x20] sm:$0xff]  ;;  %v20695_v48 = vld [vmem:[%s20649_s27 + $0x70] sm:$0xff]  ;;  %v13003_v30 = vld [vmem:[%s20649_s27 + $0x28] sm:$0xff] }
 0x4d5   : >> { %18079 = vmatprep.subr.bf16.mxu0 %v18078_v7  ;;  %18223 = vmatprep.subr.bf16.mxu1 %v18078_v7  ;;  %v20702_v51 = vld [vmem:[%s20649_s27 + $0x78] sm:$0xff]  ;;  %v13004_v63 = vld [vmem:[%s20649_s27 + $0x30] sm:$0xff]  ;;  %v20715_v53 = vld [vmem:[%s20649_s27 + $0x80] sm:$0xff] }
 0x4d6   : >> { %v13005_v37 = vld [vmem:[%s20649_s27 + $0x38] sm:$0xff]  ;;  %v20722_v0 = vld [vmem:[%s20649_s27 + $0x88] sm:$0xff]  ;;  %v13006_v44 = vld [vmem:[%s20649_s27 + $0x40] sm:$0xff] }
 0x4d7   : >> { %v20736_v58 = vld [vmem:[%s20649_s27 + $0x90] sm:$0xff]  ;;  %v13007_v9 = vld [vmem:[%s20649_s27 + $0x48] sm:$0xff]  ;;  %v20742_v8 = vld [vmem:[%s20649_s27 + $0x98] sm:$0xff] }
 0x4d8   : >> { %18081 = vmatpush3.bf16.msra.mxu0 %v18078_v7  ;;  %18225 = vmatpush3.bf16.msra.mxu1 %v18078_v7  ;;  %v12989_v20 = vld [vmem:[%s20649_s27 + $0x7] sm:$0xff]  ;;  %v13236_v14 = vld [vmem:[%s20649_s27 + $0x57] sm:$0xff]  ;;  %v12990_v13 = vld [vmem:[%s20649_s27 + $0xf] sm:$0xff] }
 0x4d9   : >> { %18083 = vmatprep.subr.bf16.mxu0 %v18082_v12  ;;  %18227 = vmatprep.subr.bf16.mxu1 %v18082_v12  ;;  %v13008_v19 = vld [vmem:[%s20649_s27 + $0x50] sm:$0xff]  ;;  %v20754_v21 = vld [vmem:[%s20649_s27 + $0xa0] sm:$0xff]  ;;  %v4606_v10 = vsel %vm538_vm2, 0.0, %v12989_v20  ;;  %v20760_v1 = vsel %vm538_vm2, 0.0, %v13236_v14  ;;  %v13050_v26 = vld [vmem:[%s22929_s7 + $0x98] sm:$0xff] }
 0x4da   : >> { %v13049_v25 = vld [vmem:[%s22929_s7 + $0x90] sm:$0xff]  ;;  %v20776_v27 = vld [vmem:[%s20649_s27 + $0x5f] sm:$0xff]  ;;  %v20780_v56 = vld [vmem:[%s20649_s27 + $0x67] sm:$0xff] }
 0x4db   : >> { %v12991_v29 = vld [vmem:[%s20649_s27 + $0x17] sm:$0xff]  ;;  %v18106_v31 = vpack.c.bf16 %v13050_v26, %v13049_v25  ;;  %v13051_v32 = vld [vmem:[%s22929_s7 + $0xa0] sm:$0xff]  ;;  %v13052_v60 = vld [vmem:[%s22929_s7 + $0xa8] sm:$0xff] }
 0x4dc   : >> { %18085 = vmatpush3.bf16.msra.mxu0 %v18082_v12  ;;  %18229 = vmatpush3.bf16.msra.mxu1 %v18082_v12  ;;  %v12992_v49 = vld [vmem:[%s20649_s27 + $0x1f] sm:$0xff]  ;;  %v20793_v42 = vld [vmem:[%s20649_s27 + $0x6f] sm:$0xff]  ;;  %v12993_v61 = vld [vmem:[%s20649_s27 + $0x27] sm:$0xff]  ;;  %v18110_v34 = vpack.c.bf16 %v13052_v60, %v13051_v32 }
 0x4dd   : >> { %18087 = vmatprep.subr.bf16.mxu0 %v18086_v17  ;;  %18231 = vmatprep.subr.bf16.mxu1 %v18086_v17  ;;  %v20800_v33 = vld [vmem:[%s20649_s27 + $0x77] sm:$0xff]  ;;  %v12994_v7 = vld [vmem:[%s20649_s27 + $0x2f] sm:$0xff]  ;;  %v20813_v39 = vld [vmem:[%s20649_s27 + $0x7f] sm:$0xff] }
 0x4de   : >> { %v13053_v38 = vld [vmem:[%s22929_s7 + $0xb0] sm:$0xff]  ;;  %v13054_v2 = vld [vmem:[%s22929_s7 + $0xb8] sm:$0xff]  ;;  %v20820_v11 = vld [vmem:[%s20649_s27 + $0x87] sm:$0xff] }
 0x4df   : >> { %16065 = vmatmul.mubr.msk.f32.vlgmr.msra.gmra.mrb[0].mxu0 %vm485_vm0, %v13000_v24  ;;  %16344 = vmatmul.mubr.msk.f32.vlgmr.msra.gmra.mrb[0].mxu1 %vm485_vm0, %v20678_v22  ;;  %v12995_v46 = vld [vmem:[%s20649_s27 + $0x37] sm:$0xff]  ;;  %v18114_v12 = vpack.c.bf16 %v13054_v2, %v13053_v38  ;;  %v13075_v47 = vld [vmem:[%s22929_s7 + $0xc0] sm:$0xff]  ;;  %v13076_v16 = vld [vmem:[%s22929_s7 + $0xc8] sm:$0xff] }
 0x4e0   : >> { %18089 = vmatpush3.bf16.msra.mxu0 %v18086_v17  ;;  %18233 = vmatpush3.bf16.msra.mxu1 %v18086_v17  ;;  %v12996_v17 = vld [vmem:[%s20649_s27 + $0x3f] sm:$0xff]  ;;  %v20834_v18 = vld [vmem:[%s20649_s27 + $0x8f] sm:$0xff]  ;;  %v12997_v52 = vld [vmem:[%s20649_s27 + $0x47] sm:$0xff] }
 0x4e1   : >> { %16067 = vmatprep.mubr.msk.f32.mxu0 %vm485_vm0, %v13001_v23  ;;  %16346 = vmatprep.mubr.msk.f32.mxu1 %vm485_vm0, %v20682_v54  ;;  %v20840_v24 = vld [vmem:[%s20649_s27 + $0x97] sm:$0xff]  ;;  %v18118_v23 = vpack.c.bf16 %v13076_v16, %v13075_v47  ;;  %v20850_v36 = vld [vmem:[%s20649_s27 + $0x9f] sm:$0xff]  ;;  %v13037_v41 = vld [vmem:[%s20649_s27 + $0x9] sm:$0xff] }
 0x4e2   : >> { %18091 = vmatprep.subr.bf16.mxu0 %v18090_v28  ;;  %18235 = vmatprep.subr.bf16.mxu1 %v18090_v28  ;;  %v13038_v50 = vld [vmem:[%s20649_s27 + $0x11] sm:$0xff]  ;;  %v20870_v35 = vld [vmem:[%s20649_s27 + $0x61] sm:$0xff]  ;;  %v13041_v20 = vld [vmem:[%s20649_s27 + $0x29] sm:$0xff] }
 0x4e3   : >> { %16068 = vmatmul.mubr.msk.f32.gmra.mrb[2].mxu0 %vm485_vm0, %v13002_v45  ;;  %16347 = vmatmul.mubr.msk.f32.gmra.mrb[2].mxu1 %vm485_vm0, %v20695_v48  ;;  %v20854_v45 = vld [vmem:[%s20649_s27 + $0x59] sm:$0xff]  ;;  %v13080_v43 = vld [vmem:[%s22929_s7 + $0xe8] sm:$0xff]  ;;  %v13042_v25 = vld [vmem:[%s20649_s27 + $0x31] sm:$0xff] }
 0x4e4   : >> { %18093 = vmatpush3.bf16.msra.mxu0 %v18090_v28  ;;  %18237 = vmatpush3.bf16.msra.mxu1 %v18090_v28  ;;  %v12998_v28 = vld [vmem:[%s20649_s27 + $0x4f] sm:$0xff]  ;;  %v13079_v62 = vld [vmem:[%s22929_s7 + $0xe0] sm:$0xff] }
 0x4e5   : >> { %16070 = vmatprep.mubr.msk.f32.mxu0 %vm485_vm0, %v13003_v30  ;;  %16349 = vmatprep.mubr.msk.f32.mxu1 %vm485_vm0, %v20702_v51  ;;  %v13077_v30 = vld [vmem:[%s22929_s7 + $0xd0] sm:$0xff]  ;;  %v20894_v14 = vld [vmem:[%s20649_s27 + $0x79] sm:$0xff]  ;;  %v20907_v26 = vld [vmem:[%s20649_s27 + $0x81] sm:$0xff] }
 0x4e6   : >> { %18095 = vmatprep.subr.bf16.mxu0 %v18094_v59  ;;  %18239 = vmatprep.subr.bf16.mxu1 %v18094_v59  ;;  %v13103_v32 = vld [vmem:[%s22929_s7 + $0x100] sm:$0xff]  ;;  %v13104_v60 = vld [vmem:[%s22929_s7 + $0x108] sm:$0xff]  ;;  %v13046_v2 = vld [vmem:[%s20649_s27 + $0x51] sm:$0xff] }
 0x4e7   : >> { %16071 = vmatmul.mubr.msk.f32.gmra.mrb[4].mxu0 %vm485_vm0, %v13004_v63  ;;  %16350 = vmatmul.mubr.msk.f32.gmra.mrb[4].mxu1 %vm485_vm0, %v20715_v53  ;;  %v13039_v63 = vld [vmem:[%s20649_s27 + $0x19] sm:$0xff]  ;;  %v4976_v47 = vsel %vm4565_vm5, 0.0, %v13046_v2 }
 0x4e8   : >> { %16073 = vmatprep.mubr.msk.f32.mxu0 %vm485_vm0, %v13005_v37  ;;  %18097 = vmatpush3.bf16.msra.mxu0 %v18094_v59  ;;  %v20874_v37 = vld [vmem:[%s20649_s27 + $0x69] sm:$0xff]  ;;  %v20934_v38 = vld [vmem:[%s20649_s27 + $0x99] sm:$0xff] }
 0x4e9   : >> { %16352 = vmatprep.mubr.msk.f32.mxu1 %vm485_vm0, %v20722_v0  ;;  %18241 = vmatpush3.bf16.msra.mxu1 %v18094_v59  ;;  %v13078_v59 = vld [vmem:[%s22929_s7 + $0xd8] sm:$0xff]  ;;  %v13159_v2 = vld [vmem:[%s22929_s7 + $0x180] sm:$0xff] }
 0x4ea   : >> { %18099 = vmatprep.subr.bf16.mxu0 %v18098_v57  ;;  %18243 = vmatprep.subr.bf16.mxu1 %v18098_v57 }
 0x4eb   : >> { %16074 = vmatmul.mubr.msk.f32.gmra.mrb[6].mxu0 %vm485_vm0, %v13006_v44  ;;  %16353 = vmatmul.mubr.msk.f32.gmra.mrb[6].mxu1 %vm485_vm0, %v20736_v58  ;;  %v13040_v44 = vld [vmem:[%s20649_s27 + $0x21] sm:$0xff] }
 0x4ec   : >> { %16076 = vmatprep.mubr.msk.f32.mxu0 %vm485_vm0, %v13007_v9  ;;  %16355 = vmatprep.mubr.msk.f32.mxu1 %vm485_vm0, %v20742_v8  ;;  %v20887_v9 = vld [vmem:[%s20649_s27 + $0x71] sm:$0xff] }
 0x4ed   : >> { %18101 = vmatpush3.bf16.msra.mxu0 %v18098_v57  ;;  %18245 = vmatpush3.bf16.msra.mxu1 %v18098_v57  ;;  %v18122_v57 = vpack.c.bf16 %v13078_v59, %v13077_v30  ;;  %v13107_v59 = vld [vmem:[%s22929_s7 + $0x120] sm:$0xff] }
 0x4ee   : >> { %18103 = vmatprep.subr.bf16.mxu0 %v18102_v15  ;;  %18247 = vmatprep.subr.bf16.mxu1 %v18102_v15 }
 0x4ef   : >> { %16077 = vmatmul.mubr.msk.f32.gmra.mrb[8].mxu0 %vm485_vm0, %v13008_v19  ;;  %16356 = vmatmul.mubr.msk.f32.gmra.mrb[8].mxu1 %vm485_vm0, %v20754_v21  ;;  %v13081_v19 = vld [vmem:[%s22929_s7 + $0xf0] sm:$0xff] }
 0x4f0   : >> { %16095 = vmatprep.mubr.msk.f32.mxu0 %vm485_vm0, %v4606_v10  ;;  %16374 = vmatprep.mubr.msk.f32.mxu1 %vm485_vm0, %v20760_v1  ;;  %v13082_v10 = vld [vmem:[%s22929_s7 + $0xf8] sm:$0xff] }
 0x4f3   : >> { %16096 = vmatmul.mubr.msk.f32.vlgmr.msra.gmra.mrb[0].mxu0 %vm485_vm0, %v12990_v13  ;;  %16375 = vmatmul.mubr.msk.f32.vlgmr.msra.gmra.mrb[0].mxu1 %vm485_vm0, %v20776_v27  ;;  %v13043_v13 = vld [vmem:[%s20649_s27 + $0x39] sm:$0xff] }
 0x4f4   : >> { %18105 = vmatpush3.bf16.msra.mxu0 %v18102_v15  ;;  %18249 = vmatpush3.bf16.msra.mxu1 %v18102_v15  ;;  %v18126_v15 = vpack.c.bf16 %v13080_v43, %v13079_v62  ;;  %v21005_v62 = vld [vmem:[%s20649_s27 + $0xcf] sm:$0xff] }
 0x4f5   : >> { %16098 = vmatprep.mubr.msk.f32.mxu0 %vm485_vm0, %v12991_v29  ;;  %16377 = vmatprep.mubr.msk.f32.mxu1 %vm485_vm0, %v20780_v56  ;;  %v20914_v29 = vld [vmem:[%s20649_s27 + $0x89] sm:$0xff] }
 0x4f6   : >> { %18107 = vmatprep.subr.bf16.mxu0 %v18106_v31  ;;  %18251 = vmatprep.subr.bf16.mxu1 %v18106_v31 }
 0x4f7   : >> { %16099 = vmatmul.mubr.msk.f32.gmra.mrb[2].mxu0 %vm485_vm0, %v12992_v49  ;;  %16378 = vmatmul.mubr.msk.f32.gmra.mrb[2].mxu1 %vm485_vm0, %v20793_v42  ;;  %v13044_v49 = vld [vmem:[%s20649_s27 + $0x41] sm:$0xff] }
 0x4f8   : >> { %18109 = vmatpush3.bf16.msra.mxu0 %v18106_v31  ;;  %18253 = vmatpush3.bf16.msra.mxu1 %v18106_v31  ;;  %v18130_v31 = vpack.c.bf16 %v13082_v10, %v13081_v19  ;;  %v21046_v19 = vld [vmem:[%s20649_s27 + $0xa8] sm:$0xff]  ;;  %v21063_v10 = vld [vmem:[%s20649_s27 + $0xb0] sm:$0xff] }
 0x4f9   : >> { %16101 = vmatprep.mubr.msk.f32.mxu0 %vm485_vm0, %v12993_v61  ;;  %16380 = vmatprep.mubr.msk.f32.mxu1 %vm485_vm0, %v20800_v33  ;;  %v20928_v61 = vld [vmem:[%s20649_s27 + $0x91] sm:$0xff] }
 0x4fa   : >> { %18111 = vmatprep.subr.bf16.mxu0 %v18110_v34  ;;  %18255 = vmatprep.subr.bf16.mxu1 %v18110_v34 }
 0x4fb   : >> { %16102 = vmatmul.mubr.msk.f32.gmra.mrb[4].mxu0 %vm485_vm0, %v12994_v7  ;;  %16381 = vmatmul.mubr.msk.f32.gmra.mrb[4].mxu1 %vm485_vm0, %v20813_v39  ;;  %v13289_v7 = vld [vmem:[%s20649_s27 + $0xa1] sm:$0xff] }
 0x4fc   : >> { %16104 = vmatprep.mubr.msk.f32.mxu0 %vm485_vm0, %v12995_v46  ;;  %18113 = vmatpush3.bf16.msra.mxu0 %v18110_v34  ;;  %v13302_v46 = vld [vmem:[%s20649_s27 + $0xa7] sm:$0xff]  ;;  %v20949_v16 = vsel %vm4565_vm5, 0.0, %v13289_v7 }
 0x4fd   : >> { %16383 = vmatprep.mubr.msk.f32.mxu1 %vm485_vm0, %v20820_v11  ;;  %18257 = vmatpush3.bf16.msra.mxu1 %v18110_v34  ;;  %v13045_v34 = vld [vmem:[%s20649_s27 + $0x49] sm:$0xff]  ;;  %v21121_v7 = vld [vmem:[%s20649_s27 + $0xe0] sm:$0xff] }
 0x4fe   : >> { %18115 = vmatprep.subr.bf16.mxu0 %v18114_v12  ;;  %18259 = vmatprep.subr.bf16.mxu1 %v18114_v12 }
 0x4ff   : >> { %16105 = vmatmul.mubr.msk.f32.gmra.mrb[6].mxu0 %vm485_vm0, %v12996_v17  ;;  %16384 = vmatmul.mubr.msk.f32.gmra.mrb[6].mxu1 %vm485_vm0, %v20834_v18  ;;  %v20953_v17 = vsel %vm538_vm2, 0.0, %v13302_v46 }
 0x500   : >> { %16107 = vmatprep.mubr.msk.f32.mxu0 %vm485_vm0, %v12997_v52  ;;  %16386 = vmatprep.mubr.msk.f32.mxu1 %vm485_vm0, %v20840_v24  ;;  %v13105_v52 = vld [vmem:[%s22929_s7 + $0x110] sm:$0xff] }
 0x501   : >> { %18117 = vmatpush3.bf16.msra.mxu0 %v18114_v12  ;;  %18261 = vmatpush3.bf16.msra.mxu1 %v18114_v12  ;;  %v18134_v12 = vpack.c.bf16 %v13104_v60, %v13103_v32  ;;  %v13137_v60 = vld [vmem:[%s22929_s7 + $0x170] sm:$0xff] }
 0x502   : >> { %18119 = vmatprep.subr.bf16.mxu0 %v18118_v23  ;;  %18263 = vmatprep.subr.bf16.mxu1 %v18118_v23 }
 0x503   : >> { %16108 = vmatmul.mubr.msk.f32.gmra.mrb[8].mxu0 %vm485_vm0, %v12998_v28  ;;  %16387 = vmatmul.mubr.msk.f32.gmra.mrb[8].mxu1 %vm485_vm0, %v20850_v36  ;;  %v20969_v28 = vld [vmem:[%s20649_s27 + $0xaf] sm:$0xff] }
 0x504   : >> { %16126 = vmatprep.mubr.msk.f32.mxu0 %vm485_vm0, %v13037_v41  ;;  %16405 = vmatprep.mubr.msk.f32.mxu1 %vm485_vm0, %v20854_v45  ;;  %v20972_v41 = vld [vmem:[%s20649_s27 + $0xb7] sm:$0xff] }
 0x507   : >> { %16127 = vmatmul.mubr.msk.f32.vlgmr.msra.gmra.mrb[0].mxu0 %vm485_vm0, %v13038_v50  ;;  %16406 = vmatmul.mubr.msk.f32.vlgmr.msra.gmra.mrb[0].mxu1 %vm485_vm0, %v20870_v35  ;;  %v20985_v50 = vld [vmem:[%s20649_s27 + $0xbf] sm:$0xff] }
 0x508   : >> { %18121 = vmatpush3.bf16.msra.mxu0 %v18118_v23  ;;  %18265 = vmatpush3.bf16.msra.mxu1 %v18118_v23  ;;  %v13106_v23 = vld [vmem:[%s22929_s7 + $0x118] sm:$0xff] }
 0x509   : >> { %16129 = vmatprep.mubr.msk.f32.mxu0 %vm485_vm0, %v13039_v63  ;;  %16408 = vmatprep.mubr.msk.f32.mxu1 %vm485_vm0, %v20874_v37  ;;  %v18138_v30 = vpack.c.bf16 %v13106_v23, %v13105_v52  ;;  %v13163_v23 = vld [vmem:[%s22929_s7 + $0x1a0] sm:$0xff] }
 0x50a   : >> { %18123 = vmatprep.subr.bf16.mxu0 %v18122_v57  ;;  %18267 = vmatprep.subr.bf16.mxu1 %v18122_v57 }
 0x50b   : >> { %16130 = vmatmul.mubr.msk.f32.gmra.mrb[2].mxu0 %vm485_vm0, %v13040_v44  ;;  %16409 = vmatmul.mubr.msk.f32.gmra.mrb[2].mxu1 %vm485_vm0, %v20887_v9  ;;  %v13131_v44 = vld [vmem:[%s22929_s7 + $0x140] sm:$0xff] }
 0x50c   : >> { %18125 = vmatpush3.bf16.msra.mxu0 %v18122_v57  ;;  %18269 = vmatpush3.bf16.msra.mxu1 %v18122_v57  ;;  %v13109_v57 = vld [vmem:[%s22929_s7 + $0x130] sm:$0xff] }
 0x50d   : >> { %16132 = vmatprep.mubr.msk.f32.mxu0 %vm485_vm0, %v13041_v20  ;;  %16411 = vmatprep.mubr.msk.f32.mxu1 %vm485_vm0, %v20894_v14  ;;  %v21027_v20 = vld [vmem:[%s20649_s27 + $0xdf] sm:$0xff] }
 0x50e   : >> { %18127 = vmatprep.subr.bf16.mxu0 %v18126_v15  ;;  %18271 = vmatprep.subr.bf16.mxu1 %v18126_v15 }
 0x50f   : >> { %16133 = vmatmul.mubr.msk.f32.gmra.mrb[4].mxu0 %vm485_vm0, %v13042_v25  ;;  %16412 = vmatmul.mubr.msk.f32.gmra.mrb[4].mxu1 %vm485_vm0, %v20907_v26 }
 0x510   : >> { %16135 = vmatprep.mubr.msk.f32.mxu0 %vm485_vm0, %v13043_v13  ;;  %18129 = vmatpush3.bf16.msra.mxu0 %v18126_v15  ;;  %v13135_v13 = vld [vmem:[%s22929_s7 + $0x160] sm:$0xff] }
 0x511   : >> { %16414 = vmatprep.mubr.msk.f32.mxu1 %vm485_vm0, %v20914_v29  ;;  %18273 = vmatpush3.bf16.msra.mxu1 %v18126_v15 }
 0x512   : >> { %18131 = vmatprep.subr.bf16.mxu0 %v18130_v31  ;;  %18275 = vmatprep.subr.bf16.mxu1 %v18130_v31 }
 0x513   : >> { %16136 = vmatmul.mubr.msk.f32.gmra.mrb[6].mxu0 %vm485_vm0, %v13044_v49  ;;  %16415 = vmatmul.mubr.msk.f32.gmra.mrb[6].mxu1 %vm485_vm0, %v20928_v61  ;;  %v21099_v49 = vld [vmem:[%s20649_s27 + $0xd0] sm:$0xff] }
 0x514   : >> { %16138 = vmatprep.mubr.msk.f32.mxu0 %vm485_vm0, %v13045_v34  ;;  %16417 = vmatprep.mubr.msk.f32.mxu1 %vm485_vm0, %v20934_v38 }
 0x515   : >> { %18133 = vmatpush3.bf16.msra.mxu0 %v18130_v31  ;;  %18277 = vmatpush3.bf16.msra.mxu1 %v18130_v31  ;;  %v21079_v31 = vld [vmem:[%s20649_s27 + $0xc0] sm:$0xff] }
 0x516   : >> { %18135 = vmatprep.subr.bf16.mxu0 %v18134_v12  ;;  %18279 = vmatprep.subr.bf16.mxu1 %v18134_v12 }
 0x517   : >> { %16139 = vmatmul.mubr.msk.f32.gmra.mrb[8].mxu0 %vm485_vm0, %v4976_v47  ;;  %16418 = vmatmul.mubr.msk.f32.gmra.mrb[8].mxu1 %vm485_vm0, %v20949_v16  ;;  %v21157_v47 = vld [vmem:[%s20649_s27 + $0xb1] sm:$0xff] }
 0x518   : >> { %16157 = vmatprep.mubr.msk.f32.mxu0 %vm485_vm0, %v20760_v1  ;;  %16436 = vmatprep.mubr.msk.f32.mxu1 %vm485_vm0, %v20953_v17  ;;  %v13108_v1 = vld [vmem:[%s22929_s7 + $0x128] sm:$0xff] }
 0x519   : >> { %v18142_v63 = vpack.c.bf16 %v13108_v1, %v13107_v59  ;;  %v13165_v1 = vld [vmem:[%s22929_s7 + $0x1b0] sm:$0xff] }
 0x51b   : >> { %16158 = vmatmul.mubr.msk.f32.vlgmr.msra.gmra.mrb[0].mxu0 %vm485_vm0, %v20776_v27  ;;  %16437 = vmatmul.mubr.msk.f32.vlgmr.msra.gmra.mrb[0].mxu1 %vm485_vm0, %v20969_v28  ;;  %v20992_v27 = vld [vmem:[%s20649_s27 + $0xc7] sm:$0xff] }
 0x51c   : >> { %18137 = vmatpush3.bf16.msra.mxu0 %v18134_v12  ;;  %18281 = vmatpush3.bf16.msra.mxu1 %v18134_v12  ;;  %v21140_v12 = vld [vmem:[%s20649_s27 + $0xa9] sm:$0xff] }
 0x51d   : >> { %16160 = vmatprep.mubr.msk.f32.mxu0 %vm485_vm0, %v20780_v56  ;;  %16439 = vmatprep.mubr.msk.f32.mxu1 %vm485_vm0, %v20972_v41  ;;  %v13110_v56 = vld [vmem:[%s22929_s7 + $0x138] sm:$0xff] }
 0x51e   : >> { %18139 = vmatprep.subr.bf16.mxu0 %v18138_v30  ;;  %18283 = vmatprep.subr.bf16.mxu1 %v18138_v30  ;;  %v18146_v43 = vpack.c.bf16 %v13110_v56, %v13109_v57  ;;  %v13188_v56 = vld [vmem:[%s22929_s7 + $0x1c8] sm:$0xff] }
 0x51f   : >> { %16161 = vmatmul.mubr.msk.f32.gmra.mrb[2].mxu0 %vm485_vm0, %v20793_v42  ;;  %16440 = vmatmul.mubr.msk.f32.gmra.mrb[2].mxu1 %vm485_vm0, %v20985_v50  ;;  %v21012_v42 = vld [vmem:[%s20649_s27 + $0xd7] sm:$0xff] }
 0x520   : >> { %18141 = vmatpush3.bf16.msra.mxu0 %v18138_v30  ;;  %18285 = vmatpush3.bf16.msra.mxu1 %v18138_v30  ;;  %v21173_v30 = vld [vmem:[%s20649_s27 + $0xc1] sm:$0xff] }
 0x521   : >> { %16163 = vmatprep.mubr.msk.f32.mxu0 %vm485_vm0, %v20800_v33  ;;  %16442 = vmatprep.mubr.msk.f32.mxu1 %vm485_vm0, %v20992_v27  ;;  %v13132_v33 = vld [vmem:[%s22929_s7 + $0x148] sm:$0xff] }
 0x522   : >> { %18143 = vmatprep.subr.bf16.mxu0 %v18142_v63  ;;  %18287 = vmatprep.subr.bf16.mxu1 %v18142_v63  ;;  %v18150_v15 = vpack.c.bf16 %v13132_v33, %v13131_v44  ;;  %v13355_v44 = vld [vmem:[%s20649_s27 + $0xf1] sm:$0xff] }
 0x523   : >> { %16164 = vmatmul.mubr.msk.f32.gmra.mrb[4].mxu0 %vm485_vm0, %v20813_v39  ;;  %16443 = vmatmul.mubr.msk.f32.gmra.mrb[4].mxu1 %vm485_vm0, %v21005_v62  ;;  %v21032_v39 = vld [vmem:[%s20649_s27 + $0xe7] sm:$0xff]  ;;  %v13368_v33 = vld [vmem:[%s20649_s27 + $0xf7] sm:$0xff] }
 0x524   : >> { %16166 = vmatprep.mubr.msk.f32.mxu0 %vm485_vm0, %v20820_v11  ;;  %18145 = vmatpush3.bf16.msra.mxu0 %v18142_v63  ;;  %v21043_v11 = vld [vmem:[%s20649_s27 + $0xef] sm:$0xff] }
 0x525   : >> { %16445 = vmatprep.mubr.msk.f32.mxu1 %vm485_vm0, %v21012_v42  ;;  %18289 = vmatpush3.bf16.msra.mxu1 %v18142_v63  ;;  %v21193_v63 = vld [vmem:[%s20649_s27 + $0xd1] sm:$0xff] }
 0x526   : >> { %18147 = vmatprep.subr.bf16.mxu0 %v18146_v43  ;;  %18291 = vmatprep.subr.bf16.mxu1 %v18146_v43 }
 0x527   : >> { %16167 = vmatmul.mubr.msk.f32.gmra.mrb[6].mxu0 %vm485_vm0, %v20834_v18  ;;  %16446 = vmatmul.mubr.msk.f32.gmra.mrb[6].mxu1 %vm485_vm0, %v21027_v20  ;;  %v13133_v18 = vld [vmem:[%s22929_s7 + $0x150] sm:$0xff] }
 0x528   : >> { %16169 = vmatprep.mubr.msk.f32.mxu0 %vm485_vm0, %v20840_v24  ;;  %16448 = vmatprep.mubr.msk.f32.mxu1 %vm485_vm0, %v21032_v39  ;;  %v13134_v24 = vld [vmem:[%s22929_s7 + $0x158] sm:$0xff] }
 0x529   : >> { %18149 = vmatpush3.bf16.msra.mxu0 %v18146_v43  ;;  %18293 = vmatpush3.bf16.msra.mxu1 %v18146_v43  ;;  %v18154_v25 = vpack.c.bf16 %v13134_v24, %v13133_v18  ;;  %v21215_v43 = vld [vmem:[%s20649_s27 + $0xe1] sm:$0xff]  ;;  %v13190_v18 = vld [vmem:[%s22929_s7 + $0x1d8] sm:$0xff] }
 0x52a   : >> { %18151 = vmatprep.subr.bf16.mxu0 %v18150_v15  ;;  %18295 = vmatprep.subr.bf16.mxu1 %v18150_v15  ;;  %v13369_v24 = vld [vmem:[%s20649_s27 + $0xff] sm:$0xff] }
 0x52b   : >> { %16170 = vmatmul.mubr.msk.f32.gmra.mrb[8].mxu0 %vm485_vm0, %v20850_v36  ;;  %16449 = vmatmul.mubr.msk.f32.gmra.mrb[8].mxu1 %vm485_vm0, %v21043_v11  ;;  %v21066_v36 = vld [vmem:[%s20649_s27 + $0xb8] sm:$0xff] }
 0x52c   : >> { %16188 = vmatprep.mubr.msk.f32.mxu0 %vm485_vm0, %v20653_v40  ;;  %16467 = vmatprep.mubr.msk.f32.mxu1 %vm485_vm0, %v21046_v19  ;;  %v13136_v40 = vld [vmem:[%s22929_s7 + $0x168] sm:$0xff] }
 0x52d   : >> { %v18158_v32 = vpack.c.bf16 %v13136_v40, %v13135_v13  ;;  %v13191_v13 = vld [vmem:[%s22929_s7 + $0x1e0] sm:$0xff]  ;;  %v13192_v40 = vld [vmem:[%s22929_s7 + $0x1e8] sm:$0xff] }
 0x52f   : >> { %16189 = vmatmul.mubr.msk.f32.vlgmr.msra.gmra.mrb[0].mxu0 %vm485_vm0, %v20678_v22  ;;  %16468 = vmatmul.mubr.msk.f32.vlgmr.msra.gmra.mrb[0].mxu1 %vm485_vm0, %v21063_v10  ;;  %v21086_v22 = vld [vmem:[%s20649_s27 + $0xc8] sm:$0xff] }
 0x530   : >> { %18153 = vmatpush3.bf16.msra.mxu0 %v18150_v15  ;;  %18297 = vmatpush3.bf16.msra.mxu1 %v18150_v15 }
 0x531   : >> { %16191 = vmatprep.mubr.msk.f32.mxu0 %vm485_vm0, %v20682_v54  ;;  %16470 = vmatprep.mubr.msk.f32.mxu1 %vm485_vm0, %v21066_v36  ;;  %v13138_v54 = vld [vmem:[%s22929_s7 + $0x178] sm:$0xff] }
 0x532   : >> { %18155 = vmatprep.subr.bf16.mxu0 %v18154_v25  ;;  %18299 = vmatprep.subr.bf16.mxu1 %v18154_v25  ;;  %v18162_v34 = vpack.c.bf16 %v13138_v54, %v13137_v60  ;;  %v13193_v60 = vld [vmem:[%s22929_s7 + $0x1f0] sm:$0xff]  ;;  %v13373_v54 = vld [vmem:[%s20649_s27 + $0x11f] sm:$0xff] }
 0x533   : >> { %16192 = vmatmul.mubr.msk.f32.gmra.mrb[2].mxu0 %vm485_vm0, %v20695_v48  ;;  %16471 = vmatmul.mubr.msk.f32.gmra.mrb[2].mxu1 %vm485_vm0, %v21079_v31  ;;  %v21106_v48 = vld [vmem:[%s20649_s27 + $0xd8] sm:$0xff] }
 0x534   : >> { %18157 = vmatpush3.bf16.msra.mxu0 %v18154_v25  ;;  %18301 = vmatpush3.bf16.msra.mxu1 %v18154_v25  ;;  %v13370_v25 = vld [vmem:[%s20649_s27 + $0x107] sm:$0xff] }
 0x535   : >> { %16194 = vmatprep.mubr.msk.f32.mxu0 %vm485_vm0, %v20702_v51  ;;  %16473 = vmatprep.mubr.msk.f32.mxu1 %vm485_vm0, %v21086_v22  ;;  %v13160_v51 = vld [vmem:[%s22929_s7 + $0x188] sm:$0xff] }
 0x536   : >> { %18159 = vmatprep.subr.bf16.mxu0 %v18158_v32  ;;  %18303 = vmatprep.subr.bf16.mxu1 %v18158_v32  ;;  %v18166_v46 = vpack.c.bf16 %v13160_v51, %v13159_v2  ;;  %v13215_v2 = vld [vmem:[%s22929_s7 + $0x200] sm:$0xff]  ;;  %v13375_v51 = vld [vmem:[%s20649_s27 + $0x12f] sm:$0xff] }
 0x537   : >> { %16195 = vmatmul.mubr.msk.f32.gmra.mrb[4].mxu0 %vm485_vm0, %v20715_v53  ;;  %16474 = vmatmul.mubr.msk.f32.gmra.mrb[4].mxu1 %vm485_vm0, %v21099_v49  ;;  %v21126_v53 = vld [vmem:[%s20649_s27 + $0xe8] sm:$0xff] }
 0x538   : >> { %16197 = vmatprep.mubr.msk.f32.mxu0 %vm485_vm0, %v20722_v0  ;;  %18161 = vmatpush3.bf16.msra.mxu0 %v18158_v32  ;;  %v21137_v0 = vld [vmem:[%s20649_s27 + $0xf0] sm:$0xff] }
 0x539   : >> { %16476 = vmatprep.mubr.msk.f32.mxu1 %vm485_vm0, %v21106_v48  ;;  %18305 = vmatpush3.bf16.msra.mxu1 %v18158_v32  ;;  %v18190_v32 = vpack.c.bf16 %v13192_v40, %v13191_v13 }
 0x53a   : >> { %18163 = vmatprep.subr.bf16.mxu0 %v18162_v34  ;;  %18307 = vmatprep.subr.bf16.mxu1 %v18162_v34 }
 0x53b   : >> { %16198 = vmatmul.mubr.msk.f32.gmra.mrb[6].mxu0 %vm485_vm0, %v20736_v58  ;;  %16477 = vmatmul.mubr.msk.f32.gmra.mrb[6].mxu1 %vm485_vm0, %v21121_v7  ;;  %v13161_v58 = vld [vmem:[%s22929_s7 + $0x190] sm:$0xff] }
 0x53c   : >> { %16200 = vmatprep.mubr.msk.f32.mxu0 %vm485_vm0, %v20742_v8  ;;  %16479 = vmatprep.mubr.msk.f32.mxu1 %vm485_vm0, %v21126_v53  ;;  %v13162_v8 = vld [vmem:[%s22929_s7 + $0x198] sm:$0xff] }
 0x53d   : >> { %18165 = vmatpush3.bf16.msra.mxu0 %v18162_v34  ;;  %18309 = vmatpush3.bf16.msra.mxu1 %v18162_v34  ;;  %v18170_v52 = vpack.c.bf16 %v13162_v8, %v13161_v58  ;;  %v13390_v58 = vld [vmem:[%s20649_s27 + $0xf8] sm:$0xff]  ;;  %v13391_v8 = vld [vmem:[%s20649_s27 + $0x100] sm:$0xff] }
 0x53e   : >> { %18167 = vmatprep.subr.bf16.mxu0 %v18166_v46  ;;  %18311 = vmatprep.subr.bf16.mxu1 %v18166_v46 }
 0x53f   : >> { %16201 = vmatmul.mubr.msk.f32.gmra.mrb[8].mxu0 %vm485_vm0, %v20754_v21  ;;  %16480 = vmatmul.mubr.msk.f32.gmra.mrb[8].mxu1 %vm485_vm0, %v21137_v0  ;;  %v21160_v21 = vld [vmem:[%s20649_s27 + $0xb9] sm:$0xff] }
 0x540   : >> { %16219 = vmatprep.mubr.msk.f32.mxu0 %vm485_vm0, %v20854_v45  ;;  %16498 = vmatprep.mubr.msk.f32.mxu1 %vm485_vm0, %v21140_v12  ;;  %v13164_v45 = vld [vmem:[%s22929_s7 + $0x1a8] sm:$0xff] }
 0x541   : >> { %v18174_v59 = vpack.c.bf16 %v13164_v45, %v13163_v23  ;;  %v13220_v45 = vld [vmem:[%s22929_s7 + $0x228] sm:$0xff] }
 0x543   : >> { %16220 = vmatmul.mubr.msk.f32.vlgmr.msra.gmra.mrb[0].mxu0 %vm485_vm0, %v20870_v35  ;;  %16499 = vmatmul.mubr.msk.f32.vlgmr.msra.gmra.mrb[0].mxu1 %vm485_vm0, %v21157_v47  ;;  %v21180_v35 = vld [vmem:[%s20649_s27 + $0xc9] sm:$0xff] }
 0x544   : >> { %18169 = vmatpush3.bf16.msra.mxu0 %v18166_v46  ;;  %18313 = vmatpush3.bf16.msra.mxu1 %v18166_v46 }
 0x545   : >> { %16222 = vmatprep.mubr.msk.f32.mxu0 %vm485_vm0, %v20874_v37  ;;  %16501 = vmatprep.mubr.msk.f32.mxu1 %vm485_vm0, %v21160_v21  ;;  %v13166_v37 = vld [vmem:[%s22929_s7 + $0x1b8] sm:$0xff] }
 0x546   : >> { %18171 = vmatprep.subr.bf16.mxu0 %v18170_v52  ;;  %18315 = vmatprep.subr.bf16.mxu1 %v18170_v52  ;;  %v18178_v57 = vpack.c.bf16 %v13166_v37, %v13165_v1  ;;  %v13221_v1 = vld [vmem:[%s22929_s7 + $0x230] sm:$0xff]  ;;  %v13395_v37 = vld [vmem:[%s20649_s27 + $0x120] sm:$0xff] }
 0x547   : >> { %16223 = vmatmul.mubr.msk.f32.gmra.mrb[2].mxu0 %vm485_vm0, %v20887_v9  ;;  %16502 = vmatmul.mubr.msk.f32.gmra.mrb[2].mxu1 %vm485_vm0, %v21173_v30  ;;  %v21200_v9 = vld [vmem:[%s20649_s27 + $0xd9] sm:$0xff] }
 0x548   : >> { %18173 = vmatpush3.bf16.msra.mxu0 %v18170_v52  ;;  %18317 = vmatpush3.bf16.msra.mxu1 %v18170_v52  ;;  %v13392_v52 = vld [vmem:[%s20649_s27 + $0x108] sm:$0xff] }
 0x549   : >> { %16225 = vmatprep.mubr.msk.f32.mxu0 %vm485_vm0, %v20894_v14  ;;  %16504 = vmatprep.mubr.msk.f32.mxu1 %vm485_vm0, %v21180_v35  ;;  %v13187_v14 = vld [vmem:[%s22929_s7 + $0x1c0] sm:$0xff] }
 0x54a   : >> { %18175 = vmatprep.subr.bf16.mxu0 %v18174_v59  ;;  %18319 = vmatprep.subr.bf16.mxu1 %v18174_v59  ;;  %v18182_v15 = vpack.c.bf16 %v13188_v56, %v13187_v14  ;;  %v13397_v14 = vld [vmem:[%s20649_s27 + $0x130] sm:$0xff]  ;;  %v13416_v56 = vld [vmem:[%s20649_s27 + $0x119] sm:$0xff] }
 0x54b   : >> { %16226 = vmatmul.mubr.msk.f32.gmra.mrb[4].mxu0 %vm485_vm0, %v20907_v26  ;;  %16505 = vmatmul.mubr.msk.f32.gmra.mrb[4].mxu1 %vm485_vm0, %v21193_v63  ;;  %v21220_v26 = vld [vmem:[%s20649_s27 + $0xe9] sm:$0xff] }
 0x54c   : >> { %16228 = vmatprep.mubr.msk.f32.mxu0 %vm485_vm0, %v20914_v29  ;;  %18177 = vmatpush3.bf16.msra.mxu0 %v18174_v59  ;;  %v21234_v29 = vsel %vm4565_vm5, 0.0, %v13355_v44  ;;  %v13421_v44 = vld [vmem:[%s20649_s27 + $0x141] sm:$0xff] }
 0x54d   : >> { %16507 = vmatprep.mubr.msk.f32.mxu1 %vm485_vm0, %v21200_v9  ;;  %18321 = vmatpush3.bf16.msra.mxu1 %v18174_v59 }
 0x54e   : >> { %18179 = vmatprep.subr.bf16.mxu0 %v18178_v57  ;;  %18323 = vmatprep.subr.bf16.mxu1 %v18178_v57 }
 0x54f   : >> { %16229 = vmatmul.mubr.msk.f32.gmra.mrb[6].mxu0 %vm485_vm0, %v20928_v61  ;;  %16508 = vmatmul.mubr.msk.f32.gmra.mrb[6].mxu1 %vm485_vm0, %v21215_v43  ;;  %v7300_v61 = vsel %vm538_vm2, 0.0, %v13368_v33 }
 0x550   : >> { %16231 = vmatprep.mubr.msk.f32.mxu0 %vm485_vm0, %v20934_v38  ;;  %16510 = vmatprep.mubr.msk.f32.mxu1 %vm485_vm0, %v21220_v26  ;;  %v13189_v38 = vld [vmem:[%s22929_s7 + $0x1d0] sm:$0xff] }
 0x551   : >> { %18181 = vmatpush3.bf16.msra.mxu0 %v18178_v57  ;;  %18325 = vmatpush3.bf16.msra.mxu1 %v18178_v57 }
 0x552   : >> { %18183 = vmatprep.subr.bf16.mxu0 %v18182_v15  ;;  %18327 = vmatprep.subr.bf16.mxu1 %v18182_v15 }
 0x553   : >> { %16232 = vmatmul.mubr.msk.f32.gmra.mrb[8].mxu0 %vm485_vm0, %v20949_v16  ;;  %16511 = vmatmul.mubr.msk.f32.gmra.mrb[8].mxu1 %vm485_vm0, %v21234_v29  ;;  %v18186_v16 = vpack.c.bf16 %v13190_v18, %v13189_v38 }
 0x554   : >> { %16250 = vmatprep.mubr.msk.f32.mxu0 %vm485_vm0, %v20953_v17  ;;  %16529 = vmatprep.mubr.msk.f32.mxu1 %vm485_vm0, %v7300_v61  ;;  %v13371_v17 = vld [vmem:[%s20649_s27 + $0x10f] sm:$0xff] }
 0x557   : >> { %16251 = vmatmul.mubr.msk.f32.vlgmr.msra.gmra.mrb[0].mxu0 %vm485_vm0, %v20969_v28  ;;  %16530 = vmatmul.mubr.msk.f32.vlgmr.msra.gmra.mrb[0].mxu1 %vm485_vm0, %v13369_v24  ;;  %v13372_v28 = vld [vmem:[%s20649_s27 + $0x117] sm:$0xff] }
 0x558   : >> { %18185 = vmatpush3.bf16.msra.mxu0 %v18182_v15  ;;  %18329 = vmatpush3.bf16.msra.mxu1 %v18182_v15 }
 0x559   : >> { %16253 = vmatprep.mubr.msk.f32.mxu0 %vm485_vm0, %v20972_v41  ;;  %16532 = vmatprep.mubr.msk.f32.mxu1 %vm485_vm0, %v13370_v25  ;;  %v13194_v41 = vld [vmem:[%s22929_s7 + $0x1f8] sm:$0xff] }
 0x55a   : >> { %18187 = vmatprep.subr.bf16.mxu0 %v18186_v16  ;;  %18331 = vmatprep.subr.bf16.mxu1 %v18186_v16  ;;  %v18194_v34 = vpack.c.bf16 %v13194_v41, %v13193_v60 }
 0x55b   : >> { %16254 = vmatmul.mubr.msk.f32.gmra.mrb[2].mxu0 %vm485_vm0, %v20985_v50  ;;  %16533 = vmatmul.mubr.msk.f32.gmra.mrb[2].mxu1 %vm485_vm0, %v13371_v17  ;;  %v13374_v50 = vld [vmem:[%s20649_s27 + $0x127] sm:$0xff] }
 0x55c   : >> { %18189 = vmatpush3.bf16.msra.mxu0 %v18186_v16  ;;  %18333 = vmatpush3.bf16.msra.mxu1 %v18186_v16 }
 0x55d   : >> { %16256 = vmatprep.mubr.msk.f32.mxu0 %vm485_vm0, %v20992_v27  ;;  %16535 = vmatprep.mubr.msk.f32.mxu1 %vm485_vm0, %v13372_v28  ;;  %v13216_v27 = vld [vmem:[%s22929_s7 + $0x208] sm:$0xff] }
 0x55e   : >> { %18191 = vmatprep.subr.bf16.mxu0 %v18190_v32  ;;  %18335 = vmatprep.subr.bf16.mxu1 %v18190_v32  ;;  %v18198_v46 = vpack.c.bf16 %v13216_v27, %v13215_v2 }
 0x55f   : >> { %16257 = vmatmul.mubr.msk.f32.gmra.mrb[4].mxu0 %vm485_vm0, %v21005_v62  ;;  %16536 = vmatmul.mubr.msk.f32.gmra.mrb[4].mxu1 %vm485_vm0, %v13373_v54  ;;  %v13376_v62 = vld [vmem:[%s20649_s27 + $0x137] sm:$0xff] }
 0x560   : >> { %16259 = vmatprep.mubr.msk.f32.mxu0 %vm485_vm0, %v21012_v42  ;;  %18193 = vmatpush3.bf16.msra.mxu0 %v18190_v32  ;;  %v13377_v42 = vld [vmem:[%s20649_s27 + $0x13f] sm:$0xff] }
 0x561   : >> { %16538 = vmatprep.mubr.msk.f32.mxu1 %vm485_vm0, %v13374_v50  ;;  %18337 = vmatpush3.bf16.msra.mxu1 %v18190_v32 }
 0x562   : >> { %18195 = vmatprep.subr.bf16.mxu0 %v18194_v34  ;;  %18339 = vmatprep.subr.bf16.mxu1 %v18194_v34 }
 0x563   : >> { %16260 = vmatmul.mubr.msk.f32.gmra.mrb[6].mxu0 %vm485_vm0, %v21027_v20  ;;  %16539 = vmatmul.mubr.msk.f32.gmra.mrb[6].mxu1 %vm485_vm0, %v13375_v51  ;;  %v13217_v20 = vld [vmem:[%s22929_s7 + $0x210] sm:$0xff] }
 0x564   : >> { %16262 = vmatprep.mubr.msk.f32.mxu0 %vm485_vm0, %v21032_v39  ;;  %16541 = vmatprep.mubr.msk.f32.mxu1 %vm485_vm0, %v13376_v62  ;;  %v13218_v39 = vld [vmem:[%s22929_s7 + $0x218] sm:$0xff] }
 0x565   : >> { %18197 = vmatpush3.bf16.msra.mxu0 %v18194_v34  ;;  %18341 = vmatpush3.bf16.msra.mxu1 %v18194_v34  ;;  %v18202_v23 = vpack.c.bf16 %v13218_v39, %v13217_v20 }
 0x566   : >> { %18199 = vmatprep.subr.bf16.mxu0 %v18198_v46  ;;  %18343 = vmatprep.subr.bf16.mxu1 %v18198_v46 }
 0x567   : >> { %16263 = vmatmul.mubr.msk.f32.gmra.mrb[8].mxu0 %vm485_vm0, %v21043_v11  ;;  %16542 = vmatmul.mubr.msk.f32.gmra.mrb[8].mxu1 %vm485_vm0, %v13377_v42  ;;  %v13219_v11 = vld [vmem:[%s22929_s7 + $0x220] sm:$0xff] }
 0x568   : >> { %16281 = vmatprep.mubr.msk.f32.mxu0 %vm485_vm0, %v21046_v19  ;;  %16560 = vmatprep.mubr.msk.f32.mxu1 %vm485_vm0, %v13390_v58  ;;  %v13393_v19 = vld [vmem:[%s20649_s27 + $0x110] sm:$0xff]  ;;  %v18206_v59 = vpack.c.bf16 %v13220_v45, %v13219_v11 }
 0x56b   : >> { %16282 = vmatmul.mubr.msk.f32.vlgmr.msra.gmra.mrb[0].mxu0 %vm485_vm0, %v21063_v10  ;;  %16561 = vmatmul.mubr.msk.f32.vlgmr.msra.gmra.mrb[0].mxu1 %vm485_vm0, %v13391_v8  ;;  %v13394_v10 = vld [vmem:[%s20649_s27 + $0x118] sm:$0xff] }
 0x56c   : >> { %18201 = vmatpush3.bf16.msra.mxu0 %v18198_v46  ;;  %18345 = vmatpush3.bf16.msra.mxu1 %v18198_v46 }
 0x56d   : >> { %16284 = vmatprep.mubr.msk.f32.mxu0 %vm485_vm0, %v21066_v36  ;;  %16563 = vmatprep.mubr.msk.f32.mxu1 %vm485_vm0, %v13392_v52  ;;  %v13222_v36 = vld [vmem:[%s22929_s7 + $0x238] sm:$0xff] }
 0x56e   : >> { %18203 = vmatprep.subr.bf16.mxu0 %v18202_v23  ;;  %18347 = vmatprep.subr.bf16.mxu1 %v18202_v23  ;;  %v18210_v57 = vpack.c.bf16 %v13222_v36, %v13221_v1 }
 0x56f   : >> { %16285 = vmatmul.mubr.msk.f32.gmra.mrb[2].mxu0 %vm485_vm0, %v21079_v31  ;;  %16564 = vmatmul.mubr.msk.f32.gmra.mrb[2].mxu1 %vm485_vm0, %v13393_v19  ;;  %v13396_v31 = vld [vmem:[%s20649_s27 + $0x128] sm:$0xff] }
 0x570   : >> { %18205 = vmatpush3.bf16.msra.mxu0 %v18202_v23  ;;  %18349 = vmatpush3.bf16.msra.mxu1 %v18202_v23 }
 0x571   : >> { %16287 = vmatprep.mubr.msk.f32.mxu0 %vm485_vm0, %v21086_v22  ;;  %16566 = vmatprep.mubr.msk.f32.mxu1 %vm485_vm0, %v13394_v10  ;;  %v13398_v22 = vld [vmem:[%s20649_s27 + $0x138] sm:$0xff] }
 0x572   : >> { %18207 = vmatprep.subr.bf16.mxu0 %v18206_v59  ;;  %18351 = vmatprep.subr.bf16.mxu1 %v18206_v59 }
 0x573   : >> { %16288 = vmatmul.mubr.msk.f32.gmra.mrb[4].mxu0 %vm485_vm0, %v21099_v49  ;;  %16567 = vmatmul.mubr.msk.f32.gmra.mrb[4].mxu1 %vm485_vm0, %v13395_v37  ;;  %v13399_v49 = vld [vmem:[%s20649_s27 + $0x140] sm:$0xff] }
 0x574   : >> { %16290 = vmatprep.mubr.msk.f32.mxu0 %vm485_vm0, %v21106_v48  ;;  %18209 = vmatpush3.bf16.msra.mxu0 %v18206_v59  ;;  %v13412_v48 = vld [vmem:[%s20649_s27 + $0xf9] sm:$0xff] }
 0x575   : >> { %16569 = vmatprep.mubr.msk.f32.mxu1 %vm485_vm0, %v13396_v31  ;;  %18353 = vmatpush3.bf16.msra.mxu1 %v18206_v59 }
 0x576   : >> { %18211 = vmatprep.subr.bf16.mxu0 %v18210_v57  ;;  %18355 = vmatprep.subr.bf16.mxu1 %v18210_v57 }
 0x577   : >> { %16291 = vmatmul.mubr.msk.f32.gmra.mrb[6].mxu0 %vm485_vm0, %v21121_v7  ;;  %16570 = vmatmul.mubr.msk.f32.gmra.mrb[6].mxu1 %vm485_vm0, %v13397_v14  ;;  %v13413_v7 = vld [vmem:[%s20649_s27 + $0x101] sm:$0xff] }
 0x578   : >> { %16293 = vmatprep.mubr.msk.f32.mxu0 %vm485_vm0, %v21126_v53  ;;  %16572 = vmatprep.mubr.msk.f32.mxu1 %vm485_vm0, %v13398_v22  ;;  %v13414_v53 = vld [vmem:[%s20649_s27 + $0x109] sm:$0xff] }
 0x579   : >> { %18213 = vmatpush3.bf16.msra.mxu0 %v18210_v57  ;;  %18357 = vmatpush3.bf16.msra.mxu1 %v18210_v57 }
 0x57b   : >> { %16294 = vmatmul.mubr.msk.f32.gmra.mrb[8].mxu0 %vm485_vm0, %v21137_v0  ;;  %16573 = vmatmul.mubr.msk.f32.gmra.mrb[8].mxu1 %vm485_vm0, %v13399_v49  ;;  %v13415_v0 = vld [vmem:[%s20649_s27 + $0x111] sm:$0xff] }
 0x57c   : >> { %16312 = vmatprep.mubr.msk.f32.mxu0 %vm485_vm0, %v21140_v12  ;;  %16591 = vmatprep.mubr.msk.f32.mxu1 %vm485_vm0, %v13412_v48  ;;  %v13417_v12 = vld [vmem:[%s20649_s27 + $0x121] sm:$0xff] }
 0x57f   : >> { %16313 = vmatmul.mubr.msk.f32.vlgmr.msra.gmra.mrb[0].mxu0 %vm485_vm0, %v21157_v47  ;;  %16592 = vmatmul.mubr.msk.f32.vlgmr.msra.gmra.mrb[0].mxu1 %vm485_vm0, %v13413_v7  ;;  %v13418_v47 = vld [vmem:[%s20649_s27 + $0x129] sm:$0xff] }
 0x580   : >> { %16315 = vmatprep.mubr.msk.f32.mxu0 %vm485_vm0, %v21160_v21  ;;  %16594 = vmatprep.mubr.msk.f32.mxu1 %vm485_vm0, %v13414_v53  ;;  %v13419_v21 = vld [vmem:[%s20649_s27 + $0x131] sm:$0xff] }
 0x583   : >> { %16316 = vmatmul.mubr.msk.f32.gmra.mrb[2].mxu0 %vm485_vm0, %v21173_v30  ;;  %16595 = vmatmul.mubr.msk.f32.gmra.mrb[2].mxu1 %vm485_vm0, %v13415_v0  ;;  %v13420_v30 = vld [vmem:[%s20649_s27 + $0x139] sm:$0xff]  ;;  %s12261_s27 = smul.u32 40, %s19154_s28  ;;  %s4572_s28 = sadd.s32 1, %s19154_s28  }
 0x584   : >> { %16318 = vmatprep.mubr.msk.f32.mxu0 %vm485_vm0, %v21180_v35  ;;  %16597 = vmatprep.mubr.msk.f32.mxu1 %vm485_vm0, %v13416_v56  ;;  %v7653_v35 = vsel %vm4565_vm5, 0.0, %v13421_v44  ;;  %p4569_p7 = scmp.ge.s32.totalorder %s4572_s28, 32  }
 0x585   : >> { %s12262_s19 = scalar_lea.vmem [#allocation5], %s12261_s27  ;;  %vm7885_vm6 = vcmp.eq.s32.totalorder (%p4569_p7), %v19396_v5, 39  ;;  %s21452_s21 = smov (%p4569_p7), 0  }
 0x587   : >> { %16319 = vmatmul.mubr.msk.f32.gmra.mrb[4].mxu0 %vm485_vm0, %v21193_v63  ;;  %16598 = vmatmul.mubr.msk.f32.gmra.mrb[4].mxu1 %vm485_vm0, %v13417_v12 }
 0x588   : >> { %16321 = vmatprep.mubr.msk.f32.mxu0 %vm485_vm0, %v21200_v9  ;;  %16600 = vmatprep.mubr.msk.f32.mxu1 %vm485_vm0, %v13418_v47 }
 0x58b   : >> { %16322 = vmatmul.mubr.msk.f32.gmra.mrb[6].mxu0 %vm485_vm0, %v21215_v43  ;;  %16601 = vmatmul.mubr.msk.f32.gmra.mrb[6].mxu1 %vm485_vm0, %v13419_v21 }
 0x58c   : >> { %16324 = vmatprep.mubr.msk.f32.mxu0 %vm485_vm0, %v21220_v26  ;;  %16603 = vmatprep.mubr.msk.f32.mxu1 %vm485_vm0, %v13420_v30 }
 0x58f   : >> { %16325 = vmatmul.mubr.msk.f32.gmra.mrb[8].mxu0 %vm485_vm0, %v21234_v29  ;;  %16604 = vmatmul.mubr.msk.f32.gmra.mrb[8].mxu1 %vm485_vm0, %v7653_v35 }
 0x652   : >> { %v16314_v63 = vpop.f32.mrb[0].mxu0  ;;  %v16593_v9 = vpop.f32.mrb[0].mxu1 }
 0x653   : >> { %v6244_v33 = vadd.f32 %v16314_v63, %v20623_v55  ;;  %v7810_v43 = vadd.f32 %v16593_v9, %v20623_v55  ;;  %v6178_v15 = vpop.f32.mrb[1].mxu0  ;;  %v7750_v61 = vpop.f32.mrb[1].mxu1 }
 0x654   : >> { %v6243_v26 = vadd.f32 %v20623_v55, %v6178_v15  ;;  %v7809_v38 = vadd.f32 %v20623_v55, %v7750_v61 }
 0x655   : >> { %v6254_v18 = vmax.f32 %v6244_v33, 0.0  ;;  %v7820_v24 = vmax.f32 %v7810_v43, 0.0 }
 0x656   : >> { %v6253_v25 = vmax.f32 %v6243_v26, 0.0  ;;  %v7819_v16 = vmax.f32 %v7809_v38, 0.0  ;;  %v16317_v13 = vpop.f32.mrb[2].mxu0  ;;  %v16596_v29 = vpop.f32.mrb[2].mxu1 }
 0x657   : >> { %v7830_v40 = vmax.f32 %v6254_v18, %v7820_v24  ;;  %v6246_v17 = vadd.f32 %v16317_v13, %v20623_v55  ;;  %v7812_v28 = vadd.f32 %v16596_v29, %v20623_v55  ;;  %v6188_v32 = vpop.f32.mrb[3].mxu0  ;;  %v7760_v60 = vpop.f32.mrb[3].mxu1 }
 0x658   : >> { %v7829_v41 = vmax.f32 %v6253_v25, %v7819_v16  ;;  %v6245_v54 = vadd.f32 %v20623_v55, %v6188_v32  ;;  %v7811_v50 = vadd.f32 %v20623_v55, %v7760_v60 }
 0x659   : >> { %7840 = vst.msk [vmem:[#allocation7 + $0x8] sm:$0xff] %vm485_vm0, %v7830_v40  ;;  %v6256_v34 = vmax.f32 %v6246_v17, 0.0  ;;  %v7822_v2 = vmax.f32 %v7812_v28, 0.0 }
 0x65a   : >> { %7839 = vst.msk [vmem:[#allocation7] sm:$0xff] %vm485_vm0, %v7829_v41  ;;  %v6255_v27 = vmax.f32 %v6245_v54, 0.0  ;;  %v7821_v51 = vmax.f32 %v7811_v50, 0.0  ;;  %v16320_v62 = vpop.f32.mrb[4].mxu0  ;;  %v16599_v46 = vpop.f32.mrb[4].mxu1 }
 0x65b   : >> { %v7832_v42 = vmax.f32 %v6256_v34, %v7822_v2  ;;  %v6248_v58 = vadd.f32 %v16320_v62, %v20623_v55  ;;  %v7814_v20 = vadd.f32 %v16599_v46, %v20623_v55  ;;  %v6198_v39 = vpop.f32.mrb[5].mxu0  ;;  %v7770_v8 = vpop.f32.mrb[5].mxu1  ;;  %v21450_v62 = vld [vmem:[%s22932_s10] ss:$0 sm:$0xff] (%p4569_p7) }
 0x65c   : >> { %v7831_v52 = vmax.f32 %v6255_v27, %v7821_v51  ;;  %v6247_v23 = vadd.f32 %v20623_v55, %v6198_v39  ;;  %v7813_v11 = vadd.f32 %v20623_v55, %v7770_v8  ;;  %22942 = vst [vmem:[#allocation11_spill] sm:$0xff] (%p4569_p7), %v21450_v62 }
 0x65d   : >> { %7842 = vst.msk [vmem:[#allocation7 + $0x18] sm:$0xff] %vm485_vm0, %v7832_v42  ;;  %v6258_v45 = vmax.f32 %v6248_v58, 0.0  ;;  %v7824_v19 = vmax.f32 %v7814_v20, 0.0 }
 0x65e   : >> { %7841 = vst.msk [vmem:[#allocation7 + $0x10] sm:$0xff] %vm485_vm0, %v7831_v52  ;;  %v6257_v10 = vmax.f32 %v6247_v23, 0.0  ;;  %v7823_v59 = vmax.f32 %v7813_v11, 0.0  ;;  %v16323_v1 = vpop.f32.mrb[6].mxu0  ;;  %v16602_v36 = vpop.f32.mrb[6].mxu1 }
 0x65f   : >> { %v7834_v37 = vmax.f32 %v6258_v45, %v7824_v19  ;;  %v6250_v31 = vadd.f32 %v16323_v1, %v20623_v55  ;;  %v7816_v57 = vadd.f32 %v16602_v36, %v20623_v55  ;;  %v6208_v14 = vpop.f32.mrb[7].mxu0  ;;  %v7780_v22 = vpop.f32.mrb[7].mxu1 }
 0x660   : >> { %v7833_v49 = vmax.f32 %v6257_v10, %v7823_v59  ;;  %v6249_v48 = vadd.f32 %v20623_v55, %v6208_v14  ;;  %v7815_v7 = vadd.f32 %v20623_v55, %v7780_v22 }
 0x661   : >> { %v7849_v53 = vld [vmem:[#allocation7] ss:$2 sm:$0xff]  ;;  %v7859_v0 = vld [vmem:[#allocation7 + $0x1] ss:$2 sm:$0xff]  ;;  %7844 = vst.msk [vmem:[#allocation7 + $0x28] sm:$0xff] %vm485_vm0, %v7834_v37  ;;  %v6260_v56 = vmax.f32 %v6250_v31, 0.0 }
 0x662   : >> { %v7826_v12 = vmax.f32 %v7816_v57, 0.0  ;;  %v7870_v47 = vmax.f32 %v7849_v53, %v7859_v0  ;;  %7843 = vst.msk [vmem:[#allocation7 + $0x20] sm:$0xff] %vm485_vm0, %v7833_v49  ;;  %v6259_v21 = vmax.f32 %v6249_v48, 0.0  ;;  %v7825_v30 = vmax.f32 %v7815_v7, 0.0  ;;  %v16326_v44 = vpop.f32.mrb[8].mxu0  ;;  %v16605_v35 = vpop.f32.mrb[8].mxu1 }
 0x663   : >> { %v6252_v9 = vadd.f32 %v16326_v44, %v20623_v55  ;;  %v7818_v33 = vadd.f32 %v16605_v35, %v20623_v55  ;;  %v6218_v43 = vpop.f32.mrb[9].mxu0  ;;  %v7790_v15 = vpop.f32.mrb[9].mxu1 }
 0x664   : >> { %v7836_v63 = vmax.f32 %v6260_v56, %v7826_v12  ;;  %13432 = vst.msk [vmem:[%s12262_s19 + $0x30] sm:$0xff] %vm485_vm0, %v7870_v47  ;;  %v7835_v61 = vmax.f32 %v6259_v21, %v7825_v30  ;;  %v6251_v26 = vadd.f32 %v20623_v55, %v6218_v43  ;;  %v7817_v38 = vadd.f32 %v20623_v55, %v7790_v15 }
 0x665   : >> { %v7851_v18 = vld [vmem:[#allocation7 + $0x10] ss:$2 sm:$0xff]  ;;  %v7861_v24 = vld [vmem:[#allocation7 + $0x11] ss:$2 sm:$0xff]  ;;  %v6262_v25 = vmax.f32 %v6252_v9, 0.0  ;;  %v7828_v16 = vmax.f32 %v7818_v33, 0.0 }
 0x666   : >> { %7846 = vst.msk [vmem:[#allocation7 + $0x38] sm:$0xff] %vm485_vm0, %v7836_v63  ;;  %v7871_v13 = vmax.f32 %v7851_v18, %v7861_v24  ;;  %7845 = vst.msk [vmem:[#allocation7 + $0x30] sm:$0xff] %vm485_vm0, %v7835_v61  ;;  %v6261_v29 = vmax.f32 %v6251_v26, 0.0  ;;  %v7827_v40 = vmax.f32 %v7817_v38, 0.0 }
 0x667   : >> { %v7838_v17 = vmax.f32 %v6262_v25, %v7828_v16 }
 0x668   : >> { %13433 = vst.msk [vmem:[%s12262_s19 + $0x38] sm:$0xff] %vm485_vm0, %v7871_v13  ;;  %v7837_v28 = vmax.f32 %v6261_v29, %v7827_v40 }
 0x669   : >> { %v7853_v32 = vld [vmem:[#allocation7 + $0x20] ss:$2 sm:$0xff]  ;;  %v7863_v60 = vld [vmem:[#allocation7 + $0x21] ss:$2 sm:$0xff]  ;;  %7848 = vst.msk [vmem:[#allocation7 + $0x48] sm:$0xff] %vm485_vm0, %v7838_v17 }
 0x66a   : >> { %v7872_v41 = vmax.f32 %v7853_v32, %v7863_v60  ;;  %7847 = vst.msk [vmem:[#allocation7 + $0x40] sm:$0xff] %vm485_vm0, %v7837_v28 }
 0x66c   : >> { %13434 = vst.msk [vmem:[%s12262_s19 + $0x40] sm:$0xff] %vm485_vm0, %v7872_v41 }
 0x66d   : >> { %v7855_v54 = vld [vmem:[#allocation7 + $0x30] ss:$2 sm:$0xff]  ;;  %v7865_v50 = vld [vmem:[#allocation7 + $0x31] ss:$2 sm:$0xff] }
 0x66e   : >> { %v7873_v34 = vmax.f32 %v7855_v54, %v7865_v50  ;;  %4571 = sbr.rel (!%p4569_p7) target bundleno = 1228 (0x4cc), region = 317 }
 0x670   : >> { %13435 = vst.msk [vmem:[%s12262_s19 + $0x48] sm:$0xff] %vm485_vm0, %v7873_v34 }
 0x671   : >> { %v7857_v2 = vld [vmem:[#allocation7 + $0x40] ss:$2 sm:$0xff]  ;;  %v7867_v27 = vld [vmem:[#allocation7 + $0x41] ss:$2 sm:$0xff] }
 0x672   : >> { %v7874_v51 = vmax.f32 %v7857_v2, %v7867_v27 }
 0x674   : >> { %13436 = vst.msk [vmem:[%s12262_s19 + $0x50] sm:$0xff] %vm485_vm0, %v7874_v51 }
 0x675 LB: >> { %v13447_v46 = vld [vmem:[%s22931_s9 + $0x40] sm:$0xff]  ;;  %v13448_v6 = vld [vmem:[%s22931_s9 + $0x48] sm:$0xff]  ;;  %v19166_v42 = vmov 0.0|0.0   ;;  %v13449_v39 = vld [vmem:[%s22931_s9 + $0x50] sm:$0xff]  ;;  %vm19167_vm7 = vmmov 0   ;;  %v19168_v45 = vmov 0.0   ;;  %s19158_s21 = sphi %s21452_s21, %s7892_s21  }
 0x676   : >> { %v7916_v55 = vld [vmem:[%s22931_s9] sm:$0xff]  ;;  %18358 = vmatprep.subr.bf16.mxu0 %v19166_v42  ;;  %v21467_v58 = vpack.c.bf16 %v13448_v6, %v13447_v46  ;;  %18370 = vmatprep.subr.bf16.mxu1 %v19166_v42  ;;  %v7917_v20 = vld [vmem:[%s22931_s9 + $0x8] sm:$0xff]  ;;  %v13450_v8 = vld [vmem:[%s22931_s9 + $0x58] sm:$0xff]  ;;  %s12264_s27 = smul.u32 80, %s19158_s21  ;;  %vm10198_vm8 = vcmask 257024  }
 0x677   : >> { %v21479_v52 = vpack.c.bf16 %v7917_v20, %v7916_v55  ;;  %v7918_v23 = vld [vmem:[%s22931_s9 + $0x10] sm:$0xff]  ;;  %v7919_v11 = vld [vmem:[%s22931_s9 + $0x18] sm:$0xff]  ;;  %16622 = vmatprep.mubr.msk.f32.mxu0 %vm19167_vm7, %v19168_v45  ;;  %16653 = vmatprep.mubr.msk.f32.mxu1 %vm19167_vm7, %v19168_v45  ;;  %v21492_v19 = vpack.c.bf16 %v13450_v8, %v13449_v39  ;;  %v13451_v59 = vld [vmem:[%s22931_s9 + $0x60] sm:$0xff] }
 0x678   : >> { %18360 = vmatpush3.bf16.msra.mxu0 %v21467_v58  ;;  %v21496_v10 = vpack.c.bf16 %v7919_v11, %v7918_v23  ;;  %v13452_v1 = vld [vmem:[%s22931_s9 + $0x68] sm:$0xff]  ;;  %v7920_v36 = vld [vmem:[%s22931_s9 + $0x20] sm:$0xff]  ;;  %v13453_v14 = vld [vmem:[%s22931_s9 + $0x70] sm:$0xff]  ;;  %s21546_s29 = scalar_lea.vmem [#allocation5], %s12264_s27 }
 0x679   : >> { %18372 = vmatpush3.bf16.msra.mxu1 %v21479_v52  ;;  %18361 = vmatprep.subr.bf16.mxu0 %v19166_v42  ;;  %v7921_v37 = vld [vmem:[%s22931_s9 + $0x28] sm:$0xff]  ;;  %v21513_v31 = vpack.c.bf16 %v13452_v1, %v13451_v59  ;;  %v13454_v22 = vld [vmem:[%s22931_s9 + $0x78] sm:$0xff]  ;;  %v7922_v49 = vld [vmem:[%s22931_s9 + $0x30] sm:$0xff] }
 0x67a   : >> { %18373 = vmatprep.subr.bf16.mxu1 %v19166_v42  ;;  %v21517_v57 = vpack.c.bf16 %v7921_v37, %v7920_v36  ;;  %v7923_v48 = vld [vmem:[%s22931_s9 + $0x38] sm:$0xff]  ;;  %v21533_v7 = vpack.c.bf16 %v13454_v22, %v13453_v14  ;;  %v13470_v0 = vld [vmem:[%s22931_s9 + $0x80] sm:$0xff]  ;;  %v13471_v56 = vld [vmem:[%s22931_s9 + $0x88] sm:$0xff] }
 0x67b   : >> { %v21537_v53 = vpack.c.bf16 %v7923_v48, %v7922_v49  ;;  %v13437_v12 = vld [vmem:[%s21546_s29 + $0x7] sm:$0xff]  ;;  %v21557_v44 = vpack.c.bf16 %v13471_v56, %v13470_v0  ;;  %v13472_v9 = vld [vmem:[%s22931_s9 + $0x90] sm:$0xff]  ;;  %v13473_v33 = vld [vmem:[%s22931_s9 + $0x98] sm:$0xff] }
 0x67c   : >> { %18363 = vmatpush3.bf16.msra.mxu0 %v21492_v19  ;;  %v13488_v47 = vld [vmem:[%s22931_s9 + $0xc0] sm:$0xff]  ;;  %v13489_v21 = vld [vmem:[%s22931_s9 + $0xc8] sm:$0xff]  ;;  %v7911_v35 = vsel %vm538_vm2, 0.0, %v13437_v12  ;;  %v13490_v43 = vld [vmem:[%s22931_s9 + $0xd0] sm:$0xff]  ;;  %v21582_v26 = vpack.c.bf16 %v13473_v33, %v13472_v9 }
 0x67d   : >> { %18375 = vmatpush3.bf16.msra.mxu1 %v21496_v10  ;;  %18364 = vmatprep.subr.bf16.mxu0 %v19166_v42  ;;  %v13442_v30 = vld [vmem:[%s21546_s29 + $0x8] sm:$0xff]  ;;  %v21563_v63 = vpack.c.bf16 %v13489_v21, %v13488_v47  ;;  %v13491_v15 = vld [vmem:[%s22931_s9 + $0xd8] sm:$0xff]  ;;  %v13443_v61 = vld [vmem:[%s21546_s29 + $0x10] sm:$0xff] }
 0x67e   : >> { %18376 = vmatprep.subr.bf16.mxu1 %v19166_v42  ;;  %v13438_v38 = vld [vmem:[%s21546_s29 + $0xf] sm:$0xff]  ;;  %v21591_v18 = vpack.c.bf16 %v13491_v15, %v13490_v43  ;;  %v13474_v24 = vld [vmem:[%s22931_s9 + $0xa0] sm:$0xff]  ;;  %v13444_v29 = vld [vmem:[%s21546_s29 + $0x18] sm:$0xff] }
 0x67f   : >> { %v13475_v25 = vld [vmem:[%s22931_s9 + $0xa8] sm:$0xff]  ;;  %v13492_v16 = vld [vmem:[%s22931_s9 + $0xe0] sm:$0xff]  ;;  %v13439_v40 = vld [vmem:[%s21546_s29 + $0x17] sm:$0xff] }
 0x680   : >> { %18366 = vmatpush3.bf16.msra.mxu0 %v21513_v31  ;;  %v13493_v13 = vld [vmem:[%s22931_s9 + $0xe8] sm:$0xff]  ;;  %v21615_v17 = vpack.c.bf16 %v13475_v25, %v13474_v24  ;;  %v13476_v32 = vld [vmem:[%s22931_s9 + $0xb0] sm:$0xff]  ;;  %v13477_v60 = vld [vmem:[%s22931_s9 + $0xb8] sm:$0xff] }
 0x681   : >> { %18378 = vmatpush3.bf16.msra.mxu1 %v21517_v57  ;;  %18367 = vmatprep.subr.bf16.mxu0 %v19166_v42  ;;  %v21619_v28 = vpack.c.bf16 %v13493_v13, %v13492_v16  ;;  %v13494_v41 = vld [vmem:[%s22931_s9 + $0xf0] sm:$0xff]  ;;  %v13495_v54 = vld [vmem:[%s22931_s9 + $0xf8] sm:$0xff]  ;;  %v13445_v50 = vld [vmem:[%s21546_s29 + $0x20] sm:$0xff]  ;;  %v21643_v2 = vpack.c.bf16 %v13477_v60, %v13476_v32 }
 0x682   : >> { %18379 = vmatprep.subr.bf16.mxu1 %v19166_v42  ;;  %v13440_v34 = vld [vmem:[%s21546_s29 + $0x1f] sm:$0xff]  ;;  %v21647_v27 = vpack.c.bf16 %v13495_v54, %v13494_v41  ;;  %v13446_v51 = vld [vmem:[%s21546_s29 + $0x28] sm:$0xff]  ;;  %v13508_v36 = vld [vmem:[%s22931_s9 + $0x110] sm:$0xff] }
 0x683   : >> { %v13441_v46 = vld [vmem:[%s21546_s29 + $0x27] sm:$0xff]  ;;  %v13483_v20 = vld [vmem:[%s21546_s29 + $0x2f] sm:$0xff]  ;;  %v13509_v37 = vld [vmem:[%s22931_s9 + $0x118] sm:$0xff] }
 0x684   : >> { %18369 = vmatpush3.bf16.msra.mxu0 %v21533_v7  ;;  %v13506_v6 = vld [vmem:[%s22931_s9 + $0x100] sm:$0xff]  ;;  %v13507_v55 = vld [vmem:[%s22931_s9 + $0x108] sm:$0xff]  ;;  %v21686_v59 = vsel %vm538_vm2, 0.0, %v13483_v20  ;;  %v13526_v14 = vld [vmem:[%s22931_s9 + $0x150] sm:$0xff]  ;;  %v21707_v48 = vpack.c.bf16 %v13509_v37, %v13508_v36 }
 0x685   : >> { %18381 = vmatpush3.bf16.msra.mxu1 %v21537_v53  ;;  %18382 = vmatprep.subr.bf16.mxu0 %v19166_v42  ;;  %v13524_v39 = vld [vmem:[%s22931_s9 + $0x140] sm:$0xff]  ;;  %v13525_v8 = vld [vmem:[%s22931_s9 + $0x148] sm:$0xff]  ;;  %v21680_v11 = vpack.c.bf16 %v13507_v55, %v13506_v6  ;;  %v13527_v22 = vld [vmem:[%s22931_s9 + $0x158] sm:$0xff] }
 0x686   : >> { %18394 = vmatprep.subr.bf16.mxu1 %v19166_v42  ;;  %v13465_v23 = vld [vmem:[%s21546_s29 + $0x9] sm:$0xff]  ;;  %v21688_v1 = vpack.c.bf16 %v13525_v8, %v13524_v39  ;;  %v13466_v49 = vld [vmem:[%s21546_s29 + $0x11] sm:$0xff]  ;;  %v21715_v56 = vpack.c.bf16 %v13527_v22, %v13526_v14  ;;  %v13510_v12 = vld [vmem:[%s22931_s9 + $0x120] sm:$0xff] }
 0x687   : >> { %16623 = vmatmul.mubr.msk.f32.vlgmr.msra.gmra.mrb[0].mxu0 %vm485_vm0, %v13442_v30  ;;  %v21713_v0 = vld [vmem:[%s21546_s29 + $0x37] sm:$0xff]  ;;  %v13511_v47 = vld [vmem:[%s22931_s9 + $0x128] sm:$0xff]  ;;  %v13528_v21 = vld [vmem:[%s22931_s9 + $0x160] sm:$0xff] }
 0x688   : >> { %16654 = vmatmul.mubr.msk.f32.vlgmr.msra.gmra.mrb[0].mxu1 %vm485_vm0, %v7911_v35  ;;  %18384 = vmatpush3.bf16.msra.mxu0 %v21557_v44  ;;  %v13529_v30 = vld [vmem:[%s22931_s9 + $0x168] sm:$0xff]  ;;  %v13467_v35 = vld [vmem:[%s21546_s29 + $0x19] sm:$0xff]  ;;  %v21744_v33 = vpack.c.bf16 %v13511_v47, %v13510_v12  ;;  %v13512_v15 = vld [vmem:[%s22931_s9 + $0x130] sm:$0xff] }
 0x689   : >> { %16625 = vmatprep.mubr.msk.f32.mxu0 %vm19167_vm7, %v19168_v45  ;;  %18396 = vmatpush3.bf16.msra.mxu1 %v21563_v63  ;;  %v21742_v9 = vld [vmem:[%s21546_s29 + $0x3f] sm:$0xff]  ;;  %v21749_v43 = vpack.c.bf16 %v13529_v30, %v13528_v21  ;;  %v21774_v16 = vld [vmem:[%s21546_s29 + $0x47] sm:$0xff]  ;;  %v21795_v60 = vld [vmem:[%s21546_s29 + $0x4f] sm:$0xff] }
 0x68a   : >> { %16656 = vmatprep.mubr.msk.f32.mxu1 %vm19167_vm7, %v19168_v45  ;;  %18385 = vmatprep.subr.bf16.mxu0 %v19166_v42  ;;  %v13531_v24 = vld [vmem:[%s22931_s9 + $0x178] sm:$0xff]  ;;  %v13468_v25 = vld [vmem:[%s21546_s29 + $0x21] sm:$0xff]  ;;  %v13469_v13 = vld [vmem:[%s21546_s29 + $0x29] sm:$0xff] }
 0x68b   : >> { %16626 = vmatmul.mubr.msk.f32.gmra.mrb[2].mxu0 %vm485_vm0, %v13443_v61  ;;  %18397 = vmatprep.subr.bf16.mxu1 %v19166_v42  ;;  %v13513_v61 = vld [vmem:[%s22931_s9 + $0x138] sm:$0xff]  ;;  %v8171_v32 = vsel %vm7885_vm6, 0.0, %v13469_v13  ;;  %v13542_v41 = vld [vmem:[%s22931_s9 + $0x180] sm:$0xff]  ;;  %v13543_v54 = vld [vmem:[%s22931_s9 + $0x188] sm:$0xff] }
 0x68c   : >> { %16657 = vmatmul.mubr.msk.f32.gmra.mrb[2].mxu1 %vm485_vm0, %v13438_v38  ;;  %18387 = vmatpush3.bf16.msra.mxu0 %v21582_v26  ;;  %v13530_v38 = vld [vmem:[%s22931_s9 + $0x170] sm:$0xff]  ;;  %v13545_v39 = vld [vmem:[%s22931_s9 + $0x198] sm:$0xff]  ;;  %v13547_v12 = vld [vmem:[%s22931_s9 + $0x1a8] sm:$0xff] }
 0x68d   : >> { %16628 = vmatprep.mubr.msk.f32.mxu0 %vm19167_vm7, %v19168_v45  ;;  %16659 = vmatprep.mubr.msk.f32.mxu1 %vm19167_vm7, %v19168_v45  ;;  %v21825_v6 = vld [vmem:[%s21546_s29 + $0x31] sm:$0xff]  ;;  %v21855_v14 = vld [vmem:[%s21546_s29 + $0x39] sm:$0xff]  ;;  %v13565_v21 = vld [vmem:[%s22931_s9 + $0x1e8] sm:$0xff] }
 0x68e   : >> { %18399 = vmatpush3.bf16.msra.mxu1 %v21591_v18  ;;  %18388 = vmatprep.subr.bf16.mxu0 %v19166_v42  ;;  %v13544_v20 = vld [vmem:[%s22931_s9 + $0x190] sm:$0xff]  ;;  %v21847_v36 = vld [vmem:[%s21546_s29 + $0x38] sm:$0xff]  ;;  %v13564_v47 = vld [vmem:[%s22931_s9 + $0x1e0] sm:$0xff] }
 0x68f   : >> { %16629 = vmatmul.mubr.msk.f32.gmra.mrb[4].mxu0 %vm485_vm0, %v13444_v29  ;;  %18400 = vmatprep.subr.bf16.mxu1 %v19166_v42  ;;  %v21777_v29 = vpack.c.bf16 %v13513_v61, %v13512_v15  ;;  %v13562_v8 = vld [vmem:[%s22931_s9 + $0x1d0] sm:$0xff]  ;;  %v21849_v37 = vpack.c.bf16 %v13545_v39, %v13544_v20  ;;  %v21881_v30 = vld [vmem:[%s21546_s29 + $0x40] sm:$0xff]  ;;  %v21894_v61 = vpack.c.bf16 %v13565_v21, %v13564_v47  ;;  %v13567_v13 = vld [vmem:[%s22931_s9 + $0x1f8] sm:$0xff] }
 0x690   : >> { %16660 = vmatmul.mubr.msk.f32.gmra.mrb[4].mxu1 %vm485_vm0, %v13439_v40  ;;  %16631 = vmatprep.mubr.msk.f32.mxu0 %vm19167_vm7, %v19168_v45  ;;  %v21781_v40 = vpack.c.bf16 %v13531_v24, %v13530_v38  ;;  %v13548_v38 = vld [vmem:[%s22931_s9 + $0x1b0] sm:$0xff]  ;;  %v13549_v24 = vld [vmem:[%s22931_s9 + $0x1b8] sm:$0xff] }
 0x691   : >> { %18390 = vmatpush3.bf16.msra.mxu0 %v21615_v17  ;;  %16662 = vmatprep.mubr.msk.f32.mxu1 %vm19167_vm7, %v19168_v45  ;;  %v21939_v20 = vld [vmem:[%s21546_s29 + $0x50] sm:$0xff]  ;;  %v21973_v21 = vld [vmem:[%s21546_s29 + $0x58] sm:$0xff] }
 0x692   : >> { %18402 = vmatpush3.bf16.msra.mxu1 %v21619_v28  ;;  %18391 = vmatprep.subr.bf16.mxu0 %v19166_v42  ;;  %v13585_v4 = vld [vmem:[%s22931_s9 + $0x238] sm:$0xff] }
 0x693   : >> { %16632 = vmatmul.mubr.msk.f32.gmra.mrb[6].mxu0 %vm485_vm0, %v13445_v50  ;;  %18403 = vmatprep.subr.bf16.mxu1 %v19166_v42  ;;  %v13560_v50 = vld [vmem:[%s22931_s9 + $0x1c0] sm:$0xff]  ;;  %v22060_v62 = vld [vmem:[%s21546_s29 + $0x77] sm:$0xff] }
 0x694   : >> { %16663 = vmatmul.mubr.msk.f32.gmra.mrb[6].mxu1 %vm485_vm0, %v13440_v34  ;;  %16634 = vmatprep.mubr.msk.f32.mxu0 %vm19167_vm7, %v19168_v45  ;;  %v13561_v34 = vld [vmem:[%s22931_s9 + $0x1c8] sm:$0xff] }
 0x695   : >> { %16665 = vmatprep.mubr.msk.f32.mxu1 %vm19167_vm7, %v19168_v45  ;;  %18393 = vmatpush3.bf16.msra.mxu0 %v21643_v2  ;;  %v21827_v55 = vpack.c.bf16 %v13561_v34, %v13560_v50  ;;  %v13523_v50 = vld [vmem:[%s21546_s29 + $0x51] sm:$0xff] }
 0x696   : >> { %18405 = vmatpush3.bf16.msra.mxu1 %v21647_v27  ;;  %18406 = vmatprep.subr.bf16.mxu0 %v19166_v42  ;;  %v21946_v39 = vsel %vm7885_vm6, 0.0, %v13523_v50  ;;  %v21995_v50 = vld [vmem:[%s21546_s29 + $0x60] sm:$0xff] }
 0x697   : >> { %16635 = vmatmul.mubr.msk.f32.gmra.mrb[8].mxu0 %vm485_vm0, %v13446_v51  ;;  %18418 = vmatprep.subr.bf16.mxu1 %v19166_v42  ;;  %v21818_v51 = vld [vmem:[%s21546_s29 + $0x30] sm:$0xff] }
 0x698   : >> { %16666 = vmatmul.mubr.msk.f32.gmra.mrb[8].mxu1 %vm485_vm0, %v13441_v46  ;;  %16684 = vmatprep.mubr.msk.f32.mxu0 %vm19167_vm7, %v19168_v45  ;;  %v21820_v46 = vpack.c.bf16 %v13543_v54, %v13542_v41  ;;  %v21922_v41 = vld [vmem:[%s21546_s29 + $0x49] sm:$0xff]  ;;  %v21924_v54 = vpack.c.bf16 %v13549_v24, %v13548_v38  ;;  %v13581_v24 = vld [vmem:[%s22931_s9 + $0x218] sm:$0xff] }
 0x699   : >> { %16715 = vmatprep.mubr.msk.f32.mxu1 %vm19167_vm7, %v19168_v45  ;;  %v13580_v38 = vld [vmem:[%s22931_s9 + $0x210] sm:$0xff] }
 0x69b   : >> { %16685 = vmatmul.mubr.msk.f32.vlgmr.msra.gmra.mrb[10].mxu0 %vm485_vm0, %v13465_v23  ;;  %v13563_v23 = vld [vmem:[%s22931_s9 + $0x1d8] sm:$0xff] }
 0x69c   : >> { %18408 = vmatpush3.bf16.msra.mxu0 %v21680_v11  ;;  %16716 = vmatmul.mubr.msk.f32.vlgmr.msra.gmra.mrb[10].mxu1 %vm485_vm0, %v21686_v59  ;;  %v21857_v22 = vpack.c.bf16 %v13563_v23, %v13562_v8  ;;  %v13537_v8 = vld [vmem:[%s21546_s29 + $0x57] sm:$0xff]  ;;  %v13578_v23 = vld [vmem:[%s22931_s9 + $0x200] sm:$0xff] }
 0x69d   : >> { %16687 = vmatprep.mubr.msk.f32.mxu0 %vm19167_vm7, %v19168_v45  ;;  %18420 = vmatpush3.bf16.msra.mxu1 %v21688_v1 }
 0x69e   : >> { %16718 = vmatprep.mubr.msk.f32.mxu1 %vm19167_vm7, %v19168_v45  ;;  %18409 = vmatprep.subr.bf16.mxu0 %v19166_v42 }
 0x69f   : >> { %16688 = vmatmul.mubr.msk.f32.gmra.mrb[12].mxu0 %vm485_vm0, %v13466_v49  ;;  %18421 = vmatprep.subr.bf16.mxu1 %v19166_v42  ;;  %v13546_v49 = vld [vmem:[%s22931_s9 + $0x1a0] sm:$0xff] }
 0x6a0   : >> { %16719 = vmatmul.mubr.msk.f32.gmra.mrb[12].mxu1 %vm485_vm0, %v21713_v0  ;;  %18411 = vmatpush3.bf16.msra.mxu0 %v21707_v48  ;;  %v21889_v15 = vpack.c.bf16 %v13547_v12, %v13546_v49  ;;  %v13579_v49 = vld [vmem:[%s22931_s9 + $0x208] sm:$0xff]  ;;  %v21966_v12 = vsel %vm538_vm2, 0.0, %v13537_v8  ;;  %v13582_v8 = vld [vmem:[%s22931_s9 + $0x220] sm:$0xff] }
 0x6a1   : >> { %16690 = vmatprep.mubr.msk.f32.mxu0 %vm19167_vm7, %v19168_v45  ;;  %18423 = vmatpush3.bf16.msra.mxu1 %v21715_v56  ;;  %v21968_v47 = vpack.c.bf16 %v13579_v49, %v13578_v23  ;;  %v13583_v23 = vld [vmem:[%s22931_s9 + $0x228] sm:$0xff] }
 0x6a2   : >> { %16721 = vmatprep.mubr.msk.f32.mxu1 %vm19167_vm7, %v19168_v45  ;;  %18412 = vmatprep.subr.bf16.mxu0 %v19166_v42  ;;  %v22019_v49 = vld [vmem:[%s21546_s29 + $0x68] sm:$0xff] }
 0x6a3   : >> { %16691 = vmatmul.mubr.msk.f32.gmra.mrb[14].mxu0 %vm485_vm0, %v13467_v35  ;;  %18424 = vmatprep.subr.bf16.mxu1 %v19166_v42  ;;  %v21887_v35 = vld [vmem:[%s21546_s29 + $0x41] sm:$0xff] }
 0x6a4   : >> { %16722 = vmatmul.mubr.msk.f32.gmra.mrb[14].mxu1 %vm485_vm0, %v21742_v9  ;;  %16693 = vmatprep.mubr.msk.f32.mxu0 %vm19167_vm7, %v19168_v45 }
 0x6a5   : >> { %18414 = vmatpush3.bf16.msra.mxu0 %v21744_v33  ;;  %16724 = vmatprep.mubr.msk.f32.mxu1 %vm19167_vm7, %v19168_v45 }
 0x6a6   : >> { %18426 = vmatpush3.bf16.msra.mxu1 %v21749_v43  ;;  %18415 = vmatprep.subr.bf16.mxu0 %v19166_v42 }
 0x6a7   : >> { %16694 = vmatmul.mubr.msk.f32.gmra.mrb[16].mxu0 %vm485_vm0, %v13468_v25  ;;  %18427 = vmatprep.subr.bf16.mxu1 %v19166_v42  ;;  %v13566_v25 = vld [vmem:[%s22931_s9 + $0x1f0] sm:$0xff] }
 0x6a8   : >> { %16725 = vmatmul.mubr.msk.f32.gmra.mrb[16].mxu1 %vm485_vm0, %v21774_v16  ;;  %16696 = vmatprep.mubr.msk.f32.mxu0 %vm19167_vm7, %v19168_v45  ;;  %v21929_v34 = vpack.c.bf16 %v13567_v13, %v13566_v25  ;;  %v21987_v25 = vld [vmem:[%s21546_s29 + $0x5f] sm:$0xff]  ;;  %v21989_v13 = vpack.c.bf16 %v13581_v24, %v13580_v38  ;;  %v22021_v38 = vpack.c.bf16 %v13583_v23, %v13582_v8  ;;  %v13584_v24 = vld [vmem:[%s22931_s9 + $0x230] sm:$0xff] }
 0x6a9   : >> { %18417 = vmatpush3.bf16.msra.mxu0 %v21777_v29  ;;  %16727 = vmatprep.mubr.msk.f32.mxu1 %vm19167_vm7, %v19168_v45  ;;  %v22046_v8 = vld [vmem:[%s21546_s29 + $0x70] sm:$0xff]  ;;  %v22048_v23 = vpack.c.bf16 %v13585_v4, %v13584_v24  ;;  %v22066_v4 = vld [vmem:[%s21546_s29 + $0x78] sm:$0xff] }
 0x6aa   : >> { %18429 = vmatpush3.bf16.msra.mxu1 %v21781_v40  ;;  %18430 = vmatprep.subr.bf16.mxu0 %v19166_v42 }
 0x6ab   : >> { %16697 = vmatmul.mubr.msk.f32.gmra.mrb[18].mxu0 %vm485_vm0, %v8171_v32  ;;  %18442 = vmatprep.subr.bf16.mxu1 %v19166_v42  ;;  %v21916_v32 = vld [vmem:[%s21546_s29 + $0x48] sm:$0xff] }
 0x6ac   : >> { %16728 = vmatmul.mubr.msk.f32.gmra.mrb[18].mxu1 %vm485_vm0, %v21795_v60  ;;  %16746 = vmatprep.mubr.msk.f32.mxu0 %vm19167_vm7, %v19168_v45 }
 0x6ad   : >> { %16777 = vmatprep.mubr.msk.f32.mxu1 %vm19167_vm7, %v19168_v45 }
 0x6af   : >> { %16747 = vmatmul.mubr.msk.f32.vlgmr.msra.gmra.mrb[20].mxu0 %vm485_vm0, %v21818_v51 }
 0x6b0   : >> { %18432 = vmatpush3.bf16.msra.mxu0 %v21820_v46  ;;  %16778 = vmatmul.mubr.msk.f32.vlgmr.msra.gmra.mrb[20].mxu1 %vm485_vm0, %v21825_v6 }
 0x6b1   : >> { %16749 = vmatprep.mubr.msk.f32.mxu0 %vm19167_vm7, %v19168_v45  ;;  %18444 = vmatpush3.bf16.msra.mxu1 %v21827_v55 }
 0x6b2   : >> { %16780 = vmatprep.mubr.msk.f32.mxu1 %vm19167_vm7, %v19168_v45  ;;  %18433 = vmatprep.subr.bf16.mxu0 %v19166_v42 }
 0x6b3   : >> { %16750 = vmatmul.mubr.msk.f32.gmra.mrb[22].mxu0 %vm485_vm0, %v21847_v36  ;;  %18445 = vmatprep.subr.bf16.mxu1 %v19166_v42 }
 0x6b4   : >> { %16781 = vmatmul.mubr.msk.f32.gmra.mrb[22].mxu1 %vm485_vm0, %v21855_v14  ;;  %18435 = vmatpush3.bf16.msra.mxu0 %v21849_v37 }
 0x6b5   : >> { %16752 = vmatprep.mubr.msk.f32.mxu0 %vm19167_vm7, %v19168_v45  ;;  %18447 = vmatpush3.bf16.msra.mxu1 %v21857_v22 }
 0x6b6   : >> { %16783 = vmatprep.mubr.msk.f32.mxu1 %vm19167_vm7, %v19168_v45  ;;  %18436 = vmatprep.subr.bf16.mxu0 %v19166_v42 }
 0x6b7   : >> { %16753 = vmatmul.mubr.msk.f32.gmra.mrb[24].mxu0 %vm485_vm0, %v21881_v30  ;;  %18448 = vmatprep.subr.bf16.mxu1 %v19166_v42 }
 0x6b8   : >> { %16784 = vmatmul.mubr.msk.f32.gmra.mrb[24].mxu1 %vm485_vm0, %v21887_v35  ;;  %16755 = vmatprep.mubr.msk.f32.mxu0 %vm19167_vm7, %v19168_v45 }
 0x6b9   : >> { %18438 = vmatpush3.bf16.msra.mxu0 %v21889_v15  ;;  %16786 = vmatprep.mubr.msk.f32.mxu1 %vm19167_vm7, %v19168_v45 }
 0x6ba   : >> { %18450 = vmatpush3.bf16.msra.mxu1 %v21894_v61  ;;  %18439 = vmatprep.subr.bf16.mxu0 %v19166_v42 }
 0x6bb   : >> { %16756 = vmatmul.mubr.msk.f32.gmra.mrb[26].mxu0 %vm485_vm0, %v21916_v32  ;;  %18451 = vmatprep.subr.bf16.mxu1 %v19166_v42 }
 0x6bc   : >> { %16787 = vmatmul.mubr.msk.f32.gmra.mrb[26].mxu1 %vm485_vm0, %v21922_v41  ;;  %16758 = vmatprep.mubr.msk.f32.mxu0 %vm19167_vm7, %v19168_v45 }
 0x6bd   : >> { %18441 = vmatpush3.bf16.msra.mxu0 %v21924_v54  ;;  %16789 = vmatprep.mubr.msk.f32.mxu1 %vm19167_vm7, %v19168_v45 }
 0x6be   : >> { %18453 = vmatpush3.bf16.msra.mxu1 %v21929_v34  ;;  %18454 = vmatprep.subr.bf16.mxu0 %v19166_v42 }
 0x6bf   : >> { %16759 = vmatmul.mubr.msk.f32.gmra.mrb[28].mxu0 %vm485_vm0, %v21939_v20  ;;  %18466 = vmatprep.subr.bf16.mxu1 %v19166_v42 }
 0x6c0   : >> { %16790 = vmatmul.mubr.msk.f32.gmra.mrb[28].mxu1 %vm485_vm0, %v21946_v39  ;;  %16808 = vmatprep.mubr.msk.f32.mxu0 %vm19167_vm7, %v19168_v45 }
 0x6c1   : >> { %16839 = vmatprep.mubr.msk.f32.mxu1 %vm19167_vm7, %v19168_v45 }
 0x6c3   : >> { %16809 = vmatmul.mubr.msk.f32.vlgmr.msra.gmra.mrb[30].mxu0 %vm485_vm0, %v21966_v12 }
 0x6c4   : >> { %18456 = vmatpush3.bf16.msra.mxu0 %v21968_v47  ;;  %16840 = vmatmul.mubr.msk.f32.vlgmr.msra.gmra.mrb[30].mxu1 %vm485_vm0, %v21973_v21 }
 0x6c5   : >> { %16811 = vmatprep.mubr.msk.f32.mxu0 %vm19167_vm7, %v19168_v45  ;;  %18468 = vmatpush3.bf16.msra.mxu1 %v21467_v58  ;;  %v22013_v58 = vld [vmem:[%s21546_s29 + $0x67] sm:$0xff] }
 0x6c6   : >> { %16842 = vmatprep.mubr.msk.f32.mxu1 %vm19167_vm7, %v19168_v45  ;;  %18457 = vmatprep.subr.bf16.mxu0 %v19166_v42 }
 0x6c7   : >> { %16812 = vmatmul.mubr.msk.f32.gmra.mrb[32].mxu0 %vm485_vm0, %v21987_v25  ;;  %18469 = vmatprep.subr.bf16.mxu1 %v19166_v42 }
 0x6c8   : >> { %16843 = vmatmul.mubr.msk.f32.gmra.mrb[32].mxu1 %vm485_vm0, %v21995_v50  ;;  %18459 = vmatpush3.bf16.msra.mxu0 %v21989_v13 }
 0x6c9   : >> { %16814 = vmatprep.mubr.msk.f32.mxu0 %vm19167_vm7, %v19168_v45  ;;  %18471 = vmatpush3.bf16.msra.mxu1 %v21492_v19  ;;  %v22040_v19 = vld [vmem:[%s21546_s29 + $0x6f] sm:$0xff] }
 0x6ca   : >> { %16845 = vmatprep.mubr.msk.f32.mxu1 %vm19167_vm7, %v19168_v45  ;;  %18460 = vmatprep.subr.bf16.mxu0 %v19166_v42 }
 0x6cb   : >> { %16815 = vmatmul.mubr.msk.f32.gmra.mrb[34].mxu0 %vm485_vm0, %v22013_v58  ;;  %18472 = vmatprep.subr.bf16.mxu1 %v19166_v42 }
 0x6cc   : >> { %16846 = vmatmul.mubr.msk.f32.gmra.mrb[34].mxu1 %vm485_vm0, %v22019_v49  ;;  %16817 = vmatprep.mubr.msk.f32.mxu0 %vm19167_vm7, %v19168_v45 }
 0x6cd   : >> { %18462 = vmatpush3.bf16.msra.mxu0 %v22021_v38  ;;  %16848 = vmatprep.mubr.msk.f32.mxu1 %vm19167_vm7, %v19168_v45 }
 0x6ce   : >> { %18474 = vmatpush3.bf16.msra.mxu1 %v21513_v31  ;;  %18463 = vmatprep.subr.bf16.mxu0 %v19166_v42  ;;  %v22078_v31 = vld [vmem:[%s21546_s29 + $0x59] sm:$0xff] }
 0x6cf   : >> { %16818 = vmatmul.mubr.msk.f32.gmra.mrb[36].mxu0 %vm485_vm0, %v22040_v19  ;;  %18475 = vmatprep.subr.bf16.mxu1 %v19166_v42 }
 0x6d0   : >> { %16849 = vmatmul.mubr.msk.f32.gmra.mrb[36].mxu1 %vm485_vm0, %v22046_v8  ;;  %16820 = vmatprep.mubr.msk.f32.mxu0 %vm19167_vm7, %v19168_v45 }
 0x6d1   : >> { %18465 = vmatpush3.bf16.msra.mxu0 %v22048_v23  ;;  %16851 = vmatprep.mubr.msk.f32.mxu1 %vm19167_vm7, %v19168_v45 }
 0x6d2   : >> { %18477 = vmatpush3.bf16.msra.mxu1 %v21533_v7  ;;  %18478 = vmatprep.subr.bf16.mxu0 %v19166_v42  ;;  %v22088_v7 = vld [vmem:[%s21546_s29 + $0x61] sm:$0xff] }
 0x6d3   : >> { %16821 = vmatmul.mubr.msk.f32.gmra.mrb[38].mxu0 %vm485_vm0, %v22060_v62  ;;  %18490 = vmatprep.subr.bf16.mxu1 %v19166_v42 }
 0x6d4   : >> { %16852 = vmatmul.mubr.msk.f32.gmra.mrb[38].mxu1 %vm485_vm0, %v22066_v4  ;;  %16870 = vmatprep.mubr.msk.f32.mxu0 %vm19167_vm7, %v19168_v45 }
 0x6d5   : >> { %16901 = vmatprep.mubr.msk.f32.mxu1 %vm19167_vm7, %v19168_v45 }
 0x6d7   : >> { %16871 = vmatmul.mubr.msk.f32.vlgmr.msra.gmra.mrb[40].mxu0 %vm485_vm0, %v22078_v31 }
 0x6d8   : >> { %18480 = vmatpush3.bf16.msra.mxu0 %v21479_v52  ;;  %16902 = vmatmul.mubr.msk.f32.vlgmr.msra.gmra.mrb[40].mxu1 %vm485_vm0, %v21818_v51  ;;  %v22103_v52 = vld [vmem:[%s21546_s29 + $0x69] sm:$0xff] }
 0x6d9   : >> { %16873 = vmatprep.mubr.msk.f32.mxu0 %vm19167_vm7, %v19168_v45  ;;  %18492 = vmatpush3.bf16.msra.mxu1 %v21557_v44  ;;  %v13577_v44 = vld [vmem:[%s21546_s29 + $0x79] sm:$0xff] }
 0x6da   : >> { %16904 = vmatprep.mubr.msk.f32.mxu1 %vm19167_vm7, %v19168_v45  ;;  %18481 = vmatprep.subr.bf16.mxu0 %v19166_v42 }
 0x6db   : >> { %16874 = vmatmul.mubr.msk.f32.gmra.mrb[42].mxu0 %vm485_vm0, %v22088_v7  ;;  %18493 = vmatprep.subr.bf16.mxu1 %v19166_v42 }
 0x6dc   : >> { %16905 = vmatmul.mubr.msk.f32.gmra.mrb[42].mxu1 %vm485_vm0, %v21847_v36  ;;  %18483 = vmatpush3.bf16.msra.mxu0 %v21496_v10  ;;  %v22119_v10 = vld [vmem:[%s21546_s29 + $0x71] sm:$0xff] }
 0x6dd   : >> { %16876 = vmatprep.mubr.msk.f32.mxu0 %vm19167_vm7, %v19168_v45  ;;  %18495 = vmatpush3.bf16.msra.mxu1 %v21582_v26  ;;  %v13668_v26 = vld [vmem:[%s21546_s29 + $0x8f] sm:$0xff] }
 0x6de   : >> { %16907 = vmatprep.mubr.msk.f32.mxu1 %vm19167_vm7, %v19168_v45  ;;  %18484 = vmatprep.subr.bf16.mxu0 %v19166_v42 }
 0x6df   : >> { %16877 = vmatmul.mubr.msk.f32.gmra.mrb[44].mxu0 %vm485_vm0, %v22103_v52  ;;  %18496 = vmatprep.subr.bf16.mxu1 %v19166_v42 }
 0x6e0   : >> { %16908 = vmatmul.mubr.msk.f32.gmra.mrb[44].mxu1 %vm485_vm0, %v21881_v30  ;;  %16879 = vmatprep.mubr.msk.f32.mxu0 %vm19167_vm7, %v19168_v45 }
 0x6e1   : >> { %18486 = vmatpush3.bf16.msra.mxu0 %v21517_v57  ;;  %16910 = vmatprep.mubr.msk.f32.mxu1 %vm19167_vm7, %v19168_v45  ;;  %v22136_v57 = vsel %vm7885_vm6, 0.0, %v13577_v44 }
 0x6e2   : >> { %18498 = vmatpush3.bf16.msra.mxu1 %v21615_v17  ;;  %18487 = vmatprep.subr.bf16.mxu0 %v19166_v42  ;;  %v13670_v17 = vld [vmem:[%s21546_s29 + $0x9f] sm:$0xff] }
 0x6e3   : >> { %16880 = vmatmul.mubr.msk.f32.gmra.mrb[46].mxu0 %vm485_vm0, %v22119_v10  ;;  %18499 = vmatprep.subr.bf16.mxu1 %v19166_v42 }
 0x6e4   : >> { %16911 = vmatmul.mubr.msk.f32.gmra.mrb[46].mxu1 %vm485_vm0, %v21916_v32  ;;  %16882 = vmatprep.mubr.msk.f32.mxu0 %vm19167_vm7, %v19168_v45 }
 0x6e5   : >> { %18489 = vmatpush3.bf16.msra.mxu0 %v21537_v53  ;;  %16913 = vmatprep.mubr.msk.f32.mxu1 %vm19167_vm7, %v19168_v45  ;;  %v13666_v53 = vld [vmem:[%s21546_s29 + $0x7f] sm:$0xff] }
 0x6e6   : >> { %18501 = vmatpush3.bf16.msra.mxu1 %v21643_v2  ;;  %18502 = vmatprep.subr.bf16.mxu0 %v19166_v42  ;;  %v13679_v2 = vld [vmem:[%s21546_s29 + $0x88] sm:$0xff] }
 0x6e7   : >> { %16883 = vmatmul.mubr.msk.f32.gmra.mrb[48].mxu0 %vm485_vm0, %v22136_v57  ;;  %18514 = vmatprep.subr.bf16.mxu1 %v19166_v42 }
 0x6e8   : >> { %16914 = vmatmul.mubr.msk.f32.gmra.mrb[48].mxu1 %vm485_vm0, %v21939_v20  ;;  %16932 = vmatprep.mubr.msk.f32.mxu0 %vm19167_vm7, %v19168_v45 }
 0x6e9   : >> { %16963 = vmatprep.mubr.msk.f32.mxu1 %vm19167_vm7, %v19168_v45 }
 0x6eb   : >> { %16933 = vmatmul.mubr.msk.f32.vlgmr.msra.gmra.mrb[50].mxu0 %vm485_vm0, %v21686_v59  ;;  %v13692_v59 = vld [vmem:[%s21546_s29 + $0x91] sm:$0xff] }
 0x6ec   : >> { %18504 = vmatpush3.bf16.msra.mxu0 %v21563_v63  ;;  %16964 = vmatmul.mubr.msk.f32.vlgmr.msra.gmra.mrb[50].mxu1 %vm485_vm0, %v21825_v6  ;;  %v9805_v63 = vsel %vm538_vm2, 0.0, %v13666_v53 }
 0x6ed   : >> { %16935 = vmatprep.mubr.msk.f32.mxu0 %vm19167_vm7, %v19168_v45  ;;  %18516 = vmatpush3.bf16.msra.mxu1 %v21680_v11  ;;  %v13680_v11 = vld [vmem:[%s21546_s29 + $0x90] sm:$0xff] }
 0x6ee   : >> { %16966 = vmatprep.mubr.msk.f32.mxu1 %vm19167_vm7, %v19168_v45  ;;  %18505 = vmatprep.subr.bf16.mxu0 %v19166_v42 }
 0x6ef   : >> { %16936 = vmatmul.mubr.msk.f32.gmra.mrb[52].mxu0 %vm485_vm0, %v21713_v0  ;;  %18517 = vmatprep.subr.bf16.mxu1 %v19166_v42  ;;  %v13694_v0 = vld [vmem:[%s21546_s29 + $0xa1] sm:$0xff] }
 0x6f0   : >> { %16967 = vmatmul.mubr.msk.f32.gmra.mrb[52].mxu1 %vm485_vm0, %v21855_v14  ;;  %18507 = vmatpush3.bf16.msra.mxu0 %v21591_v18  ;;  %v13669_v18 = vld [vmem:[%s21546_s29 + $0x97] sm:$0xff] }
 0x6f1   : >> { %16938 = vmatprep.mubr.msk.f32.mxu0 %vm19167_vm7, %v19168_v45  ;;  %18519 = vmatpush3.bf16.msra.mxu1 %v21707_v48  ;;  %v13693_v48 = vld [vmem:[%s21546_s29 + $0x99] sm:$0xff] }
 0x6f2   : >> { %16969 = vmatprep.mubr.msk.f32.mxu1 %vm19167_vm7, %v19168_v45  ;;  %18508 = vmatprep.subr.bf16.mxu0 %v19166_v42 }
 0x6f3   : >> { %16939 = vmatmul.mubr.msk.f32.gmra.mrb[54].mxu0 %vm485_vm0, %v21742_v9  ;;  %18520 = vmatprep.subr.bf16.mxu1 %v19166_v42  ;;  %v10048_v9 = vsel %vm7885_vm6, 0.0, %v13694_v0 }
 0x6f4   : >> { %16970 = vmatmul.mubr.msk.f32.gmra.mrb[54].mxu1 %vm485_vm0, %v21887_v35  ;;  %16941 = vmatprep.mubr.msk.f32.mxu0 %vm19167_vm7, %v19168_v45 }
 0x6f5   : >> { %18510 = vmatpush3.bf16.msra.mxu0 %v21619_v28  ;;  %16972 = vmatprep.mubr.msk.f32.mxu1 %vm19167_vm7, %v19168_v45  ;;  %v13690_v28 = vld [vmem:[%s21546_s29 + $0x81] sm:$0xff] }
 0x6f6   : >> { %18522 = vmatpush3.bf16.msra.mxu1 %v21744_v33  ;;  %18511 = vmatprep.subr.bf16.mxu0 %v19166_v42 }
 0x6f7   : >> { %16942 = vmatmul.mubr.msk.f32.gmra.mrb[56].mxu0 %vm485_vm0, %v21774_v16  ;;  %18523 = vmatprep.subr.bf16.mxu1 %v19166_v42 }
 0x6f8   : >> { %16973 = vmatmul.mubr.msk.f32.gmra.mrb[56].mxu1 %vm485_vm0, %v21922_v41  ;;  %16944 = vmatprep.mubr.msk.f32.mxu0 %vm19167_vm7, %v19168_v45 }
 0x6f9   : >> { %18513 = vmatpush3.bf16.msra.mxu0 %v21647_v27  ;;  %16975 = vmatprep.mubr.msk.f32.mxu1 %vm19167_vm7, %v19168_v45  ;;  %v13691_v27 = vld [vmem:[%s21546_s29 + $0x89] sm:$0xff] }
 0x6fa   : >> { %18525 = vmatpush3.bf16.msra.mxu1 %v21777_v29  ;;  %18526 = vmatprep.subr.bf16.mxu0 %v19166_v42 }
 0x6fb   : >> { %16945 = vmatmul.mubr.msk.f32.gmra.mrb[58].mxu0 %vm485_vm0, %v21795_v60  ;;  %18538 = vmatprep.subr.bf16.mxu1 %v19166_v42 }
 0x6fc   : >> { %16976 = vmatmul.mubr.msk.f32.gmra.mrb[58].mxu1 %vm485_vm0, %v21946_v39  ;;  %16994 = vmatprep.mubr.msk.f32.mxu0 %vm19167_vm7, %v19168_v45 }
 0x6fd   : >> { %17025 = vmatprep.mubr.msk.f32.mxu1 %vm19167_vm7, %v19168_v45 }
 0x6ff   : >> { %16995 = vmatmul.mubr.msk.f32.vlgmr.msra.gmra.mrb[60].mxu0 %vm485_vm0, %v21966_v12 }
 0x700   : >> { %18528 = vmatpush3.bf16.msra.mxu0 %v21688_v1  ;;  %17026 = vmatmul.mubr.msk.f32.vlgmr.msra.gmra.mrb[60].mxu1 %vm485_vm0, %v21973_v21  ;;  %v13681_v1 = vld [vmem:[%s21546_s29 + $0x98] sm:$0xff] }
 0x701   : >> { %16997 = vmatprep.mubr.msk.f32.mxu0 %vm19167_vm7, %v19168_v45  ;;  %18540 = vmatpush3.bf16.msra.mxu1 %v21820_v46 }
 0x702   : >> { %17028 = vmatprep.mubr.msk.f32.mxu1 %vm19167_vm7, %v19168_v45  ;;  %18529 = vmatprep.subr.bf16.mxu0 %v19166_v42 }
 0x703   : >> { %16998 = vmatmul.mubr.msk.f32.gmra.mrb[62].mxu0 %vm485_vm0, %v21987_v25  ;;  %18541 = vmatprep.subr.bf16.mxu1 %v19166_v42 }
 0x704   : >> { %17029 = vmatmul.mubr.msk.f32.gmra.mrb[62].mxu1 %vm485_vm0, %v21995_v50  ;;  %18531 = vmatpush3.bf16.msra.mxu0 %v21715_v56  ;;  %v13682_v56 = vld [vmem:[%s21546_s29 + $0xa0] sm:$0xff] }
 0x705   : >> { %17000 = vmatprep.mubr.msk.f32.mxu0 %vm19167_vm7, %v19168_v45  ;;  %18543 = vmatpush3.bf16.msra.mxu1 %v21849_v37 }
 0x706   : >> { %17031 = vmatprep.mubr.msk.f32.mxu1 %vm19167_vm7, %v19168_v45  ;;  %18532 = vmatprep.subr.bf16.mxu0 %v19166_v42 }
 0x707   : >> { %17001 = vmatmul.mubr.msk.f32.gmra.mrb[64].mxu0 %vm485_vm0, %v22013_v58  ;;  %18544 = vmatprep.subr.bf16.mxu1 %v19166_v42 }
 0x708   : >> { %17032 = vmatmul.mubr.msk.f32.gmra.mrb[64].mxu1 %vm485_vm0, %v22019_v49  ;;  %17003 = vmatprep.mubr.msk.f32.mxu0 %vm19167_vm7, %v19168_v45 }
 0x709   : >> { %18534 = vmatpush3.bf16.msra.mxu0 %v21749_v43  ;;  %17034 = vmatprep.mubr.msk.f32.mxu1 %vm19167_vm7, %v19168_v45 }
 0x70a   : >> { %18546 = vmatpush3.bf16.msra.mxu1 %v21889_v15  ;;  %18535 = vmatprep.subr.bf16.mxu0 %v19166_v42 }
 0x70b   : >> { %17004 = vmatmul.mubr.msk.f32.gmra.mrb[66].mxu0 %vm485_vm0, %v22040_v19  ;;  %18547 = vmatprep.subr.bf16.mxu1 %v19166_v42 }
 0x70c   : >> { %17035 = vmatmul.mubr.msk.f32.gmra.mrb[66].mxu1 %vm485_vm0, %v22046_v8  ;;  %17006 = vmatprep.mubr.msk.f32.mxu0 %vm19167_vm7, %v19168_v45 }
 0x70d   : >> { %18537 = vmatpush3.bf16.msra.mxu0 %v21781_v40  ;;  %17037 = vmatprep.mubr.msk.f32.mxu1 %vm19167_vm7, %v19168_v45 }
 0x70e   : >> { %18549 = vmatpush3.bf16.msra.mxu1 %v21924_v54  ;;  %18550 = vmatprep.subr.bf16.mxu0 %v19166_v42 }
 0x70f   : >> { %17007 = vmatmul.mubr.msk.f32.gmra.mrb[68].mxu0 %vm485_vm0, %v22060_v62  ;;  %18562 = vmatprep.subr.bf16.mxu1 %v19166_v42  ;;  %v13667_v62 = vld [vmem:[%s21546_s29 + $0x87] sm:$0xff] }
 0x710   : >> { %17038 = vmatmul.mubr.msk.f32.gmra.mrb[68].mxu1 %vm485_vm0, %v22066_v4  ;;  %17056 = vmatprep.mubr.msk.f32.mxu0 %vm19167_vm7, %v19168_v45 }
 0x711   : >> { %17087 = vmatprep.mubr.msk.f32.mxu1 %vm19167_vm7, %v19168_v45 }
 0x713   : >> { %17057 = vmatmul.mubr.msk.f32.vlgmr.msra.gmra.mrb[70].mxu0 %vm485_vm0, %v22078_v31 }
 0x714   : >> { %18552 = vmatpush3.bf16.msra.mxu0 %v21827_v55  ;;  %17088 = vmatmul.mubr.msk.f32.vlgmr.msra.gmra.mrb[70].mxu1 %vm485_vm0, %v9805_v63 }
 0x715   : >> { %17059 = vmatprep.mubr.msk.f32.mxu0 %vm19167_vm7, %v19168_v45  ;;  %18564 = vmatpush3.bf16.msra.mxu1 %v21968_v47 }
 0x716   : >> { %17090 = vmatprep.mubr.msk.f32.mxu1 %vm19167_vm7, %v19168_v45  ;;  %18553 = vmatprep.subr.bf16.mxu0 %v19166_v42 }
 0x717   : >> { %17060 = vmatmul.mubr.msk.f32.gmra.mrb[72].mxu0 %vm485_vm0, %v22088_v7  ;;  %18565 = vmatprep.subr.bf16.mxu1 %v19166_v42 }
 0x718   : >> { %17091 = vmatmul.mubr.msk.f32.gmra.mrb[72].mxu1 %vm485_vm0, %v13667_v62  ;;  %18555 = vmatpush3.bf16.msra.mxu0 %v21857_v22 }
 0x719   : >> { %17062 = vmatprep.mubr.msk.f32.mxu0 %vm19167_vm7, %v19168_v45  ;;  %18567 = vmatpush3.bf16.msra.mxu1 %v21989_v13 }
 0x71a   : >> { %17093 = vmatprep.mubr.msk.f32.mxu1 %vm19167_vm7, %v19168_v45  ;;  %18556 = vmatprep.subr.bf16.mxu0 %v19166_v42 }
 0x71b   : >> { %17063 = vmatmul.mubr.msk.f32.gmra.mrb[74].mxu0 %vm485_vm0, %v22103_v52  ;;  %18568 = vmatprep.subr.bf16.mxu1 %v19166_v42 }
 0x71c   : >> { %17094 = vmatmul.mubr.msk.f32.gmra.mrb[74].mxu1 %vm485_vm0, %v13668_v26  ;;  %17065 = vmatprep.mubr.msk.f32.mxu0 %vm19167_vm7, %v19168_v45 }
 0x71d   : >> { %18558 = vmatpush3.bf16.msra.mxu0 %v21894_v61  ;;  %17096 = vmatprep.mubr.msk.f32.mxu1 %vm19167_vm7, %v19168_v45 }
 0x71e   : >> { %18570 = vmatpush3.bf16.msra.mxu1 %v22021_v38  ;;  %18559 = vmatprep.subr.bf16.mxu0 %v19166_v42 }
 0x71f   : >> { %17066 = vmatmul.mubr.msk.f32.gmra.mrb[76].mxu0 %vm485_vm0, %v22119_v10  ;;  %18571 = vmatprep.subr.bf16.mxu1 %v19166_v42  ;;  %v13678_v42 = vld [vmem:[%s21546_s29 + $0x80] sm:$0xff]  ;;  %s12327_s29 = smul.u32 20, %s19158_s21  ;;  %s7892_s21 = sadd.s32 1, %s19158_s21  }
 0x720   : >> { %17097 = vmatmul.mubr.msk.f32.gmra.mrb[76].mxu1 %vm485_vm0, %v13669_v18  ;;  %17068 = vmatprep.mubr.msk.f32.mxu0 %vm19167_vm7, %v19168_v45  ;;  %p7889_p8 = scmp.ge.s32.totalorder %s7892_s21, 16  }
 0x721   : >> { %18561 = vmatpush3.bf16.msra.mxu0 %v21929_v34  ;;  %17099 = vmatprep.mubr.msk.f32.mxu1 %vm19167_vm7, %v19168_v45  ;;  %s12328_s27 = scalar_lea.vmem [#allocation6], %s12327_s29  ;;  %s22400_s16 = smov (%p7889_p8), 0  }
 0x722   : >> { %18573 = vmatpush3.bf16.msra.mxu1 %v22048_v23 }
 0x723   : >> { %17069 = vmatmul.mubr.msk.f32.gmra.mrb[78].mxu0 %vm485_vm0, %v22136_v57 }
 0x724   : >> { %17100 = vmatmul.mubr.msk.f32.gmra.mrb[78].mxu1 %vm485_vm0, %v13670_v17  ;;  %17118 = vmatprep.mubr.msk.f32.mxu0 %vm19167_vm7, %v19168_v45 }
 0x725   : >> { %17149 = vmatprep.mubr.msk.f32.mxu1 %vm19167_vm7, %v19168_v45 }
 0x727   : >> { %17119 = vmatmul.mubr.msk.f32.vlgmr.msra.gmra.mrb[80].mxu0 %vm485_vm0, %v13678_v42 }
 0x728   : >> { %17150 = vmatmul.mubr.msk.f32.vlgmr.msra.gmra.mrb[80].mxu1 %vm485_vm0, %v13690_v28  ;;  %17121 = vmatprep.mubr.msk.f32.mxu0 %vm19167_vm7, %v19168_v45 }
 0x729   : >> { %17152 = vmatprep.mubr.msk.f32.mxu1 %vm19167_vm7, %v19168_v45 }
 0x72b   : >> { %17122 = vmatmul.mubr.msk.f32.gmra.mrb[82].mxu0 %vm485_vm0, %v13679_v2 }
 0x72c   : >> { %17153 = vmatmul.mubr.msk.f32.gmra.mrb[82].mxu1 %vm485_vm0, %v13691_v27  ;;  %17124 = vmatprep.mubr.msk.f32.mxu0 %vm19167_vm7, %v19168_v45 }
 0x72d   : >> { %17155 = vmatprep.mubr.msk.f32.mxu1 %vm19167_vm7, %v19168_v45 }
 0x72f   : >> { %17125 = vmatmul.mubr.msk.f32.gmra.mrb[84].mxu0 %vm485_vm0, %v13680_v11 }
 0x730   : >> { %17156 = vmatmul.mubr.msk.f32.gmra.mrb[84].mxu1 %vm485_vm0, %v13692_v59  ;;  %17127 = vmatprep.mubr.msk.f32.mxu0 %vm19167_vm7, %v19168_v45 }
 0x731   : >> { %17158 = vmatprep.mubr.msk.f32.mxu1 %vm19167_vm7, %v19168_v45 }
 0x733   : >> { %17128 = vmatmul.mubr.msk.f32.gmra.mrb[86].mxu0 %vm485_vm0, %v13681_v1 }
 0x734   : >> { %17159 = vmatmul.mubr.msk.f32.gmra.mrb[86].mxu1 %vm485_vm0, %v13693_v48  ;;  %17130 = vmatprep.mubr.msk.f32.mxu0 %vm19167_vm7, %v19168_v45 }
 0x735   : >> { %17161 = vmatprep.mubr.msk.f32.mxu1 %vm19167_vm7, %v19168_v45 }
 0x737   : >> { %17131 = vmatmul.mubr.msk.f32.gmra.mrb[88].mxu0 %vm485_vm0, %v13682_v56 }
 0x738   : >> { %17162 = vmatmul.mubr.msk.f32.gmra.mrb[88].mxu1 %vm485_vm0, %v10048_v9 }
 0x75a   : >> { %v8021_v33 = vpop.f32.mrb[0].mxu0 }
 0x75b   : >> { %v16624_v43 = vpop.f32.mrb[1].mxu0  ;;  %v8126_v16 = vpop.f32.mrb[0].mxu1 }
 0x75c   : >> { %v8127_v29 = vadd.f32 %v8126_v16, %v8021_v33  ;;  %v16655_v40 = vpop.f32.mrb[1].mxu1 }
 0x75e   : >> { %v8026_v60 = vpop.f32.mrb[2].mxu0 }
 0x75f   : >> { %v16627_v51 = vpop.f32.mrb[3].mxu0  ;;  %v8131_v46 = vpop.f32.mrb[2].mxu1 }
 0x760   : >> { %v8132_v6 = vadd.f32 %v8131_v46, %v8026_v60  ;;  %v16658_v55 = vpop.f32.mrb[3].mxu1 }
 0x762   : >> { %v8031_v36 = vpop.f32.mrb[4].mxu0 }
 0x763   : >> { %v16630_v37 = vpop.f32.mrb[5].mxu0  ;;  %v8136_v45 = vpop.f32.mrb[4].mxu1 }
 0x764   : >> { %v8137_v14 = vadd.f32 %v8136_v45, %v8031_v36  ;;  %v16661_v22 = vpop.f32.mrb[5].mxu1 }
 0x766   : >> { %v8036_v30 = vpop.f32.mrb[6].mxu0 }
 0x767   : >> { %v16633_v35 = vpop.f32.mrb[7].mxu0  ;;  %v8141_v15 = vpop.f32.mrb[6].mxu1 }
 0x768   : >> { %v8142_v61 = vadd.f32 %v8141_v15, %v8036_v30  ;;  %v16664_v32 = vpop.f32.mrb[7].mxu1 }
 0x76a   : >> { %v8041_v41 = vpop.f32.mrb[8].mxu0 }
 0x76b   : >> { %v16636_v54 = vpop.f32.mrb[9].mxu0  ;;  %v8146_v34 = vpop.f32.mrb[8].mxu1 }
 0x76c   : >> { %v8147_v20 = vadd.f32 %v8146_v34, %v8041_v41  ;;  %v16667_v39 = vpop.f32.mrb[9].mxu1 }
 0x76e   : >> { %v8262_v12 = vpop.f32.mrb[10].mxu0 }
 0x76f   : >> { %v8286_v47 = vadd.f32 %v8262_v12, %v8127_v29  ;;  %v16686_v21 = vpop.f32.mrb[11].mxu0  ;;  %v8393_v25 = vpop.f32.mrb[10].mxu1 }
 0x770   : >> { %v16717_v13 = vpop.f32.mrb[11].mxu1 }
 0x771   : >> { %v8417_v50 = vadd.f32 %v8393_v25, %v8286_v47 }
 0x772   : >> { %v8267_v58 = vpop.f32.mrb[12].mxu0 }
 0x773   : >> { %v8287_v49 = vadd.f32 %v8267_v58, %v8132_v6  ;;  %v16689_v38 = vpop.f32.mrb[13].mxu0  ;;  %v8398_v24 = vpop.f32.mrb[12].mxu1 }
 0x774   : >> { %v16720_v19 = vpop.f32.mrb[13].mxu1 }
 0x775   : >> { %v8418_v8 = vadd.f32 %v8398_v24, %v8287_v49 }
 0x776   : >> { %v8272_v23 = vpop.f32.mrb[14].mxu0 }
 0x777   : >> { %v8288_v4 = vadd.f32 %v8272_v23, %v8137_v14  ;;  %v16692_v31 = vpop.f32.mrb[15].mxu0  ;;  %v8403_v7 = vpop.f32.mrb[14].mxu1 }
 0x778   : >> { %v16723_v52 = vpop.f32.mrb[15].mxu1 }
 0x779   : >> { %v8419_v10 = vadd.f32 %v8403_v7, %v8288_v4 }
 0x77a   : >> { %v8277_v44 = vpop.f32.mrb[16].mxu0 }
 0x77b   : >> { %v8289_v57 = vadd.f32 %v8277_v44, %v8142_v61  ;;  %v16695_v53 = vpop.f32.mrb[17].mxu0  ;;  %v8408_v63 = vpop.f32.mrb[16].mxu1 }
 0x77c   : >> { %v16726_v62 = vpop.f32.mrb[17].mxu1 }
 0x77d   : >> { %v8420_v26 = vadd.f32 %v8408_v63, %v8289_v57 }
 0x77e   : >> { %v8282_v18 = vpop.f32.mrb[18].mxu0 }
 0x77f   : >> { %v8290_v17 = vadd.f32 %v8282_v18, %v8147_v20  ;;  %v16698_v42 = vpop.f32.mrb[19].mxu0  ;;  %v8413_v28 = vpop.f32.mrb[18].mxu1 }
 0x780   : >> { %v16729_v2 = vpop.f32.mrb[19].mxu1 }
 0x781   : >> { %v8421_v27 = vadd.f32 %v8413_v28, %v8290_v17 }
 0x782   : >> { %v8519_v11 = vpop.f32.mrb[20].mxu0 }
 0x783   : >> { %v8543_v59 = vadd.f32 %v8519_v11, %v8417_v50  ;;  %v16748_v1 = vpop.f32.mrb[21].mxu0  ;;  %v8650_v48 = vpop.f32.mrb[20].mxu1 }
 0x784   : >> { %v16779_v0 = vpop.f32.mrb[21].mxu1 }
 0x785   : >> { %v8674_v56 = vadd.f32 %v8650_v48, %v8543_v59 }
 0x786   : >> { %v8524_v9 = vpop.f32.mrb[22].mxu0 }
 0x787   : >> { %v8544_v33 = vadd.f32 %v8524_v9, %v8418_v8  ;;  %v16751_v43 = vpop.f32.mrb[23].mxu0  ;;  %v8655_v16 = vpop.f32.mrb[22].mxu1 }
 0x788   : >> { %v16782_v29 = vpop.f32.mrb[23].mxu1 }
 0x789   : >> { %v8675_v40 = vadd.f32 %v8655_v16, %v8544_v33 }
 0x78a   : >> { %v8529_v60 = vpop.f32.mrb[24].mxu0 }
 0x78b   : >> { %v8545_v51 = vadd.f32 %v8529_v60, %v8419_v10  ;;  %v16754_v46 = vpop.f32.mrb[25].mxu0  ;;  %v8660_v6 = vpop.f32.mrb[24].mxu1 }
 0x78c   : >> { %v16785_v55 = vpop.f32.mrb[25].mxu1 }
 0x78d   : >> { %v8676_v36 = vadd.f32 %v8660_v6, %v8545_v51 }
 0x78e   : >> { %v8534_v37 = vpop.f32.mrb[26].mxu0 }
 0x78f   : >> { %v8546_v45 = vadd.f32 %v8534_v37, %v8420_v26  ;;  %v16757_v14 = vpop.f32.mrb[27].mxu0  ;;  %v8665_v22 = vpop.f32.mrb[26].mxu1 }
 0x790   : >> { %v16788_v30 = vpop.f32.mrb[27].mxu1 }
 0x791   : >> { %v8677_v35 = vadd.f32 %v8665_v22, %v8546_v45 }
 0x792   : >> { %v8539_v15 = vpop.f32.mrb[28].mxu0 }
 0x793   : >> { %v8547_v61 = vadd.f32 %v8539_v15, %v8421_v27  ;;  %v16760_v32 = vpop.f32.mrb[29].mxu0  ;;  %v8670_v41 = vpop.f32.mrb[28].mxu1 }
 0x794   : >> { %v16791_v54 = vpop.f32.mrb[29].mxu1 }
 0x795   : >> { %v8678_v34 = vadd.f32 %v8670_v41, %v8547_v61 }
 0x796   : >> { %v8781_v20 = vpop.f32.mrb[30].mxu0 }
 0x797   : >> { %v8805_v39 = vadd.f32 %v8781_v20, %v8674_v56  ;;  %v16810_v12 = vpop.f32.mrb[31].mxu0  ;;  %v8907_v47 = vpop.f32.mrb[30].mxu1 }
 0x798   : >> { %v16841_v21 = vpop.f32.mrb[31].mxu1 }
 0x799   : >> { %v8931_v25 = vadd.f32 %v8907_v47, %v8805_v39 }
 0x79a   : >> { %v8786_v13 = vpop.f32.mrb[32].mxu0 }
 0x79b   : >> { %v8806_v50 = vadd.f32 %v8786_v13, %v8675_v40  ;;  %v16813_v58 = vpop.f32.mrb[33].mxu0  ;;  %v8912_v49 = vpop.f32.mrb[32].mxu1 }
 0x79c   : >> { %v16844_v38 = vpop.f32.mrb[33].mxu1 }
 0x79d   : >> { %v8932_v24 = vadd.f32 %v8912_v49, %v8806_v50 }
 0x79e   : >> { %v8791_v19 = vpop.f32.mrb[34].mxu0 }
 0x79f   : >> { %v8807_v8 = vadd.f32 %v8791_v19, %v8676_v36  ;;  %v16816_v23 = vpop.f32.mrb[35].mxu0  ;;  %v8917_v4 = vpop.f32.mrb[34].mxu1 }
 0x7a0   : >> { %v16847_v31 = vpop.f32.mrb[35].mxu1 }
 0x7a1   : >> { %v8933_v7 = vadd.f32 %v8917_v4, %v8807_v8 }
 0x7a2   : >> { %v8796_v52 = vpop.f32.mrb[36].mxu0 }
 0x7a3   : >> { %v8808_v10 = vadd.f32 %v8796_v52, %v8677_v35  ;;  %v16819_v44 = vpop.f32.mrb[37].mxu0  ;;  %v8922_v57 = vpop.f32.mrb[36].mxu1 }
 0x7a4   : >> { %v16850_v53 = vpop.f32.mrb[37].mxu1 }
 0x7a5   : >> { %v8934_v63 = vadd.f32 %v8922_v57, %v8808_v10 }
 0x7a6   : >> { %v8801_v62 = vpop.f32.mrb[38].mxu0 }
 0x7a7   : >> { %v8809_v26 = vadd.f32 %v8801_v62, %v8678_v34  ;;  %v16822_v18 = vpop.f32.mrb[39].mxu0  ;;  %v8927_v17 = vpop.f32.mrb[38].mxu1 }
 0x7a8   : >> { %v16853_v42 = vpop.f32.mrb[39].mxu1 }
 0x7a9   : >> { %v8935_v28 = vadd.f32 %v8927_v17, %v8809_v26 }
 0x7aa   : >> { %v9038_v2 = vpop.f32.mrb[40].mxu0 }
 0x7ab   : >> { %v22358_v27 = vadd.f32 %v9038_v2, %v8931_v25  ;;  %v16872_v11 = vpop.f32.mrb[41].mxu0  ;;  %v9186_v59 = vpop.f32.mrb[40].mxu1 }
 0x7ac   : >> { %v16903_v1 = vpop.f32.mrb[41].mxu1 }
 0x7ae   : >> { %v9043_v48 = vpop.f32.mrb[42].mxu0 }
 0x7af   : >> { %v22360_v0 = vadd.f32 %v9043_v48, %v8932_v24  ;;  %v16875_v56 = vpop.f32.mrb[43].mxu0  ;;  %v9191_v9 = vpop.f32.mrb[42].mxu1 }
 0x7b0   : >> { %v16906_v33 = vpop.f32.mrb[43].mxu1 }
 0x7b2   : >> { %v9048_v43 = vpop.f32.mrb[44].mxu0 }
 0x7b3   : >> { %v22362_v16 = vadd.f32 %v9048_v43, %v8933_v7  ;;  %v16878_v29 = vpop.f32.mrb[45].mxu0  ;;  %v9196_v40 = vpop.f32.mrb[44].mxu1 }
 0x7b4   : >> { %v16909_v60 = vpop.f32.mrb[45].mxu1 }
 0x7b6   : >> { %v9053_v51 = vpop.f32.mrb[46].mxu0 }
 0x7b7   : >> { %v22364_v46 = vadd.f32 %v9053_v51, %v8934_v63  ;;  %v16881_v6 = vpop.f32.mrb[47].mxu0  ;;  %v9201_v55 = vpop.f32.mrb[46].mxu1 }
 0x7b8   : >> { %v16912_v36 = vpop.f32.mrb[47].mxu1 }
 0x7ba   : >> { %v9058_v37 = vpop.f32.mrb[48].mxu0 }
 0x7bb   : >> { %v22366_v45 = vadd.f32 %v9058_v37, %v8935_v28  ;;  %v16884_v14 = vpop.f32.mrb[49].mxu0  ;;  %v9206_v22 = vpop.f32.mrb[48].mxu1 }
 0x7bc   : >> { %v16915_v30 = vpop.f32.mrb[49].mxu1 }
 0x7be   : >> { %v9291_v35 = vpop.f32.mrb[50].mxu0 }
 0x7bf   : >> { %v9292_v15 = vadd.f32 %v9291_v35, %v9186_v59  ;;  %v16934_v61 = vpop.f32.mrb[51].mxu0  ;;  %v9408_v32 = vpop.f32.mrb[50].mxu1 }
 0x7c0   : >> { %v16965_v41 = vpop.f32.mrb[51].mxu1 }
 0x7c1   : >> { %v9432_v54 = vadd.f32 %v9408_v32, %v9292_v15 }
 0x7c2   : >> { %v9296_v34 = vpop.f32.mrb[52].mxu0 }
 0x7c3   : >> { %v9297_v20 = vadd.f32 %v9296_v34, %v9191_v9  ;;  %v16937_v39 = vpop.f32.mrb[53].mxu0  ;;  %v9413_v12 = vpop.f32.mrb[52].mxu1 }
 0x7c4   : >> { %v16968_v47 = vpop.f32.mrb[53].mxu1 }
 0x7c5   : >> { %v9433_v21 = vadd.f32 %v9413_v12, %v9297_v20 }
 0x7c6   : >> { %v9301_v25 = vpop.f32.mrb[54].mxu0 }
 0x7c7   : >> { %v9302_v13 = vadd.f32 %v9301_v25, %v9196_v40  ;;  %v16940_v50 = vpop.f32.mrb[55].mxu0  ;;  %v9418_v58 = vpop.f32.mrb[54].mxu1 }
 0x7c8   : >> { %v16971_v49 = vpop.f32.mrb[55].mxu1 }
 0x7c9   : >> { %v9434_v38 = vadd.f32 %v9418_v58, %v9302_v13 }
 0x7ca   : >> { %v9306_v24 = vpop.f32.mrb[56].mxu0 }
 0x7cb   : >> { %v9307_v19 = vadd.f32 %v9306_v24, %v9201_v55  ;;  %v16943_v8 = vpop.f32.mrb[57].mxu0  ;;  %v9423_v23 = vpop.f32.mrb[56].mxu1 }
 0x7cc   : >> { %v16974_v4 = vpop.f32.mrb[57].mxu1 }
 0x7cd   : >> { %v9435_v31 = vadd.f32 %v9423_v23, %v9307_v19 }
 0x7ce   : >> { %v9311_v7 = vpop.f32.mrb[58].mxu0 }
 0x7cf   : >> { %v9312_v52 = vadd.f32 %v9311_v7, %v9206_v22  ;;  %v16946_v10 = vpop.f32.mrb[59].mxu0  ;;  %v9428_v44 = vpop.f32.mrb[58].mxu1 }
 0x7d0   : >> { %v16977_v57 = vpop.f32.mrb[59].mxu1 }
 0x7d1   : >> { %v9436_v53 = vadd.f32 %v9428_v44, %v9312_v52 }
 0x7d2   : >> { %v9530_v63 = vpop.f32.mrb[60].mxu0 }
 0x7d3   : >> { %v9554_v62 = vadd.f32 %v9530_v63, %v9432_v54  ;;  %v16996_v26 = vpop.f32.mrb[61].mxu0  ;;  %v9647_v18 = vpop.f32.mrb[60].mxu1 }
 0x7d4   : >> { %v17027_v17 = vpop.f32.mrb[61].mxu1 }
 0x7d5   : >> { %v9671_v42 = vadd.f32 %v9647_v18, %v9554_v62 }
 0x7d6   : >> { %v9535_v28 = vpop.f32.mrb[62].mxu0 }
 0x7d7   : >> { %v9555_v2 = vadd.f32 %v9535_v28, %v9433_v21  ;;  %v16999_v11 = vpop.f32.mrb[63].mxu0  ;;  %v9652_v59 = vpop.f32.mrb[62].mxu1 }
 0x7d8   : >> { %v17030_v1 = vpop.f32.mrb[63].mxu1  ;;  %v22943_v11 = vld [vmem:[#allocation11_spill] sm:$0xff] }
 0x7d9   : >> { %v9672_v48 = vadd.f32 %v9652_v59, %v9555_v2  ;;  %v9073_v59 = vadd.f32 %v22943_v11, %v22358_v27 }
 0x7da   : >> { %v9540_v56 = vpop.f32.mrb[64].mxu0 }
 0x7db   : >> { %v9556_v9 = vadd.f32 %v9540_v56, %v9434_v38  ;;  %v17002_v33 = vpop.f32.mrb[65].mxu0  ;;  %v9657_v43 = vpop.f32.mrb[64].mxu1 }
 0x7dc   : >> { %v17033_v29 = vpop.f32.mrb[65].mxu1 }
 0x7dd   : >> { %v9673_v40 = vadd.f32 %v9657_v43, %v9556_v9 }
 0x7de   : >> { %v9545_v60 = vpop.f32.mrb[66].mxu0 }
 0x7df   : >> { %v9557_v51 = vadd.f32 %v9545_v60, %v9435_v31  ;;  %v17005_v6 = vpop.f32.mrb[67].mxu0  ;;  %v9662_v55 = vpop.f32.mrb[66].mxu1  ;;  %v9074_v60 = vadd.f32 %v22943_v11, %v22360_v0 }
 0x7e0   : >> { %v17036_v36 = vpop.f32.mrb[67].mxu1 }
 0x7e1   : >> { %v9674_v37 = vadd.f32 %v9662_v55, %v9557_v51 }
 0x7e2   : >> { %v9550_v14 = vpop.f32.mrb[68].mxu0 }
 0x7e3   : >> { %v9558_v22 = vadd.f32 %v9550_v14, %v9436_v53  ;;  %v17008_v30 = vpop.f32.mrb[69].mxu0  ;;  %v9667_v35 = vpop.f32.mrb[68].mxu1 }
 0x7e4   : >> { %v17039_v15 = vpop.f32.mrb[69].mxu1 }
 0x7e5   : >> { %v9675_v61 = vadd.f32 %v9667_v35, %v9558_v22  ;;  %v9079_v35 = vmax.f32 %v9074_v60, 0.0  ;;  %v9075_v15 = vadd.f32 %v22943_v11, %v22362_v16 }
 0x7e6   : >> { %v9769_v32 = vpop.f32.mrb[70].mxu0 }
 0x7e7   : >> { %v9793_v41 = vadd.f32 %v9769_v32, %v9671_v42  ;;  %v17058_v54 = vpop.f32.mrb[71].mxu0  ;;  %v9891_v34 = vpop.f32.mrb[70].mxu1 }
 0x7e8   : >> { %v17089_v20 = vpop.f32.mrb[71].mxu1 }
 0x7e9   : >> { %v9915_v39 = vadd.f32 %v9891_v34, %v9793_v41 }
 0x7ea   : >> { %v9774_v12 = vpop.f32.mrb[72].mxu0 }
 0x7eb   : >> { %v9794_v47 = vadd.f32 %v9774_v12, %v9672_v48  ;;  %v17061_v21 = vpop.f32.mrb[73].mxu0  ;;  %v9896_v25 = vpop.f32.mrb[72].mxu1 }
 0x7ec   : >> { %v17092_v13 = vpop.f32.mrb[73].mxu1  ;;  %v9076_v21 = vadd.f32 %v22943_v11, %v22364_v46 }
 0x7ed   : >> { %v9916_v50 = vadd.f32 %v9896_v25, %v9794_v47  ;;  %v9080_v47 = vmax.f32 %v9075_v15, 0.0 }
 0x7ee   : >> { %v9779_v58 = vpop.f32.mrb[74].mxu0 }
 0x7ef   : >> { %v9795_v49 = vadd.f32 %v9779_v58, %v9673_v40  ;;  %v17064_v38 = vpop.f32.mrb[75].mxu0  ;;  %v9901_v24 = vpop.f32.mrb[74].mxu1  ;;  %v9078_v40 = vmax.f32 %v9073_v59, 0.0 }
 0x7f0   : >> { %v17095_v19 = vpop.f32.mrb[75].mxu1 }
 0x7f1   : >> { %v9917_v8 = vadd.f32 %v9901_v24, %v9795_v49 }
 0x7f2   : >> { %v9784_v23 = vpop.f32.mrb[76].mxu0 }
 0x7f3   : >> { %v9796_v4 = vadd.f32 %v9784_v23, %v9674_v37  ;;  %v17067_v31 = vpop.f32.mrb[77].mxu0  ;;  %v9906_v7 = vpop.f32.mrb[76].mxu1  ;;  %v9077_v23 = vadd.f32 %v22943_v11, %v22366_v45 }
 0x7f4   : >> { %v17098_v52 = vpop.f32.mrb[77].mxu1 }
 0x7f5   : >> { %v9918_v10 = vadd.f32 %v9906_v7, %v9796_v4 }
 0x7f6   : >> { %v9789_v44 = vpop.f32.mrb[78].mxu0 }
 0x7f7   : >> { %v9797_v57 = vadd.f32 %v9789_v44, %v9675_v61  ;;  %v17070_v53 = vpop.f32.mrb[79].mxu0  ;;  %v9911_v63 = vpop.f32.mrb[78].mxu1  ;;  %v9082_v44 = vmax.f32 %v9077_v23, 0.0 }
 0x7f8   : >> { %v17101_v62 = vpop.f32.mrb[79].mxu1 }
 0x7f9   : >> { %v9919_v26 = vadd.f32 %v9911_v63, %v9797_v57 }
 0x7fa   : >> { %v10008_v18 = vpop.f32.mrb[80].mxu0 }
 0x7fb   : >> { %v10032_v17 = vadd.f32 %v10008_v18, %v9915_v39  ;;  %v17120_v42 = vpop.f32.mrb[81].mxu0  ;;  %v10130_v28 = vpop.f32.mrb[80].mxu1 }
 0x7fc   : >> { %v17151_v2 = vpop.f32.mrb[81].mxu1 }
 0x7fd   : >> { %v10154_v1 = vadd.f32 %v10130_v28, %v10032_v17  ;;  %v22944_v28 = vld [vmem:[#allocation10_spill] sm:$0xff] (%p7889_p8)  ;;  %v22398_v2 = vld [vmem:[%s22934_s12] ss:$0 sm:$0xff] (%p7889_p8) }
 0x7fe   : >> { %v10013_v48 = vpop.f32.mrb[82].mxu0  ;;  %vm10202_vm9 = vcmp.eq.s32.totalorder (%p7889_p8), %v22944_v28, 19 }
 0x7ff   : >> { %v10159_v56 = vadd.f32 %v22943_v11, %v10154_v1  ;;  %v10033_v9 = vadd.f32 %v10013_v48, %v9916_v50  ;;  %v17123_v33 = vpop.f32.mrb[83].mxu0  ;;  %v10135_v43 = vpop.f32.mrb[82].mxu1 }
 0x800   : >> { %v17154_v29 = vpop.f32.mrb[83].mxu1 }
 0x801   : >> { %v10164_v51 = vmax.f32 %v10159_v56, 0.0  ;;  %v10155_v6 = vadd.f32 %v10135_v43, %v10033_v9 }
 0x802   : >> { %v10018_v55 = vpop.f32.mrb[84].mxu0 }
 0x803   : >> { %v10169_v36 = vmax.f32 %v9078_v40, %v10164_v51  ;;  %v10160_v37 = vadd.f32 %v22943_v11, %v10155_v6  ;;  %v10034_v14 = vadd.f32 %v10018_v55, %v9917_v8  ;;  %v17126_v27 = vpop.f32.mrb[85].mxu0  ;;  %v10140_v22 = vpop.f32.mrb[84].mxu1  ;;  %v9081_v8 = vmax.f32 %v9076_v21, 0.0 }
 0x804   : >> { %v17157_v30 = vpop.f32.mrb[85].mxu1 }
 0x805   : >> { %10174 = vst.msk [vmem:[#allocation8] sm:$0xff] %vm520_vm1, %v10169_v36  ;;  %v10165_v61 = vmax.f32 %v10160_v37, 0.0  ;;  %v10156_v32 = vadd.f32 %v10140_v22, %v10034_v14 }
 0x806   : >> { %v10023_v41 = vpop.f32.mrb[86].mxu0 }
 0x807   : >> { %v10170_v0 = vmax.f32 %v9079_v35, %v10165_v61  ;;  %v10161_v54 = vadd.f32 %v22943_v11, %v10156_v32  ;;  %v10035_v34 = vadd.f32 %v10023_v41, %v9918_v10  ;;  %v17129_v20 = vpop.f32.mrb[87].mxu0  ;;  %v10145_v39 = vpop.f32.mrb[86].mxu1 }
 0x808   : >> { %v17160_v12 = vpop.f32.mrb[87].mxu1 }
 0x809   : >> { %10175 = vst.msk [vmem:[#allocation8 + $0x8] sm:$0xff] %vm520_vm1, %v10170_v0  ;;  %v10166_v16 = vmax.f32 %v10161_v54, 0.0  ;;  %v10157_v25 = vadd.f32 %v10145_v39, %v10035_v34 }
 0x80a   : >> { %v10028_v13 = vpop.f32.mrb[88].mxu0 }
 0x80b   : >> { %v10171_v50 = vmax.f32 %v9080_v47, %v10166_v16  ;;  %v10162_v58 = vadd.f32 %v22943_v11, %v10157_v25  ;;  %v10036_v49 = vadd.f32 %v10028_v13, %v9919_v26  ;;  %v17132_v38 = vpop.f32.mrb[89].mxu0  ;;  %v10150_v24 = vpop.f32.mrb[88].mxu1 }
 0x80c   : >> { %v17163_v19 = vpop.f32.mrb[89].mxu1 }
 0x80d   : >> { %10176 = vst.msk [vmem:[#allocation8 + $0x10] sm:$0xff] %vm520_vm1, %v10171_v50  ;;  %v10167_v46 = vmax.f32 %v10162_v58, 0.0  ;;  %v10158_v4 = vadd.f32 %v10150_v24, %v10036_v49 }
 0x80f   : >> { %v10172_v31 = vmax.f32 %v9081_v8, %v10167_v46  ;;  %v10163_v7 = vadd.f32 %v22943_v11, %v10158_v4 }
 0x810   : >> { %v10179_v52 = vld [vmem:[#allocation8] ss:$2 sm:$0xff]  ;;  %v10185_v10 = vld [vmem:[#allocation8 + $0x1] ss:$2 sm:$0xff] }
 0x811   : >> { %v10192_v57 = vmax.f32 %v10179_v52, %v10185_v10  ;;  %10177 = vst.msk [vmem:[#allocation8 + $0x18] sm:$0xff] %vm520_vm1, %v10172_v31  ;;  %v10168_v53 = vmax.f32 %v10163_v7, 0.0 }
 0x813   : >> { %13700 = vst.msk [vmem:[%s12328_s27 + $0x18] sm:$0xff] %vm520_vm1, %v10192_v57  ;;  %v10173_v63 = vmax.f32 %v9082_v44, %v10168_v53 }
 0x815   : >> { %10178 = vst.msk [vmem:[#allocation8 + $0x20] sm:$0xff] %vm520_vm1, %v10173_v63 }
 0x818   : >> { %v10181_v45 = vld [vmem:[#allocation8 + $0x10] ss:$2 sm:$0xff]  ;;  %v10187_v62 = vld [vmem:[#allocation8 + $0x11] ss:$2 sm:$0xff] }
 0x819   : >> { %v10193_v26 = vmax.f32 %v10181_v45, %v10187_v62  ;;  %7891 = sbr.rel (!%p7889_p8) target bundleno = 1653 (0x675), region = 328 }
 0x81b   : >> { %13701 = vst.msk [vmem:[%s12328_s27 + $0x20] sm:$0xff] %vm520_vm1, %v10193_v26 }
 0x81c   : >> { %v10183_v18 = vld [vmem:[#allocation8 + $0x20] ss:$2 sm:$0xf]  ;;  %v10189_v17 = vld [vmem:[#allocation8 + $0x21] ss:$2 sm:$0xf] }
 0x81d   : >> { %v10194_v42 = vmax.f32 %v10183_v18, %v10189_v17 }
 0x81f   : >> { %13702 = vst.msk [vmem:[%s12328_s27 + $0x28] sm:$0xf] %vm10198_vm8, %v10194_v42 }
 0x820 LB: >> { %v13709_v59 = vld [vmem:[%s22933_s11 + $0x20] sm:$0xff]  ;;  %v13710_v5 = vld [vmem:[%s22933_s11 + $0x28] sm:$0xff]  ;;  %v19169_v1 = vmov 0.0|0.0   ;;  %v13711_v9 = vld [vmem:[%s22933_s11 + $0x30] sm:$0xff]  ;;  %vm19170_vm10 = vmmov 0   ;;  %v19171_v60 = vmov 0.0   ;;  %s19162_s16 = sphi %s22400_s16, %s10209_s16  }
 0x821   : >> { %v10225_v11 = vld [vmem:[%s22933_s11] sm:$0xff]  ;;  %18574 = vmatprep.subr.bf16.mxu0 %v19169_v1  ;;  %v22415_v48 = vpack.c.bf16 %v13710_v5, %v13709_v59  ;;  %18580 = vmatprep.subr.bf16.mxu1 %v19169_v1  ;;  %v10226_v56 = vld [vmem:[%s22933_s11 + $0x8] sm:$0xff]  ;;  %v13712_v33 = vld [vmem:[%s22933_s11 + $0x38] sm:$0xff]  ;;  %s12330_s21 = smul.u32 40, %s19162_s16  ;;  %vm12064_vm11 = vcmask 125952   ;;  %vm12078_vm12 = vcmask 123904  }
 0x822   : >> { %v22427_v43 = vpack.c.bf16 %v10226_v56, %v10225_v11  ;;  %v10227_v29 = vld [vmem:[%s22933_s11 + $0x10] sm:$0xff]  ;;  %v10228_v40 = vld [vmem:[%s22933_s11 + $0x18] sm:$0xff]  ;;  %17172 = vmatprep.mubr.msk.f32.mxu0 %vm19170_vm10, %v19171_v60  ;;  %17189 = vmatprep.mubr.msk.f32.mxu1 %vm19170_vm10, %v19171_v60  ;;  %v22441_v51 = vpack.c.bf16 %v13712_v33, %v13711_v9  ;;  %v13722_v55 = vld [vmem:[%s22933_s11 + $0x40] sm:$0xff] }
 0x823   : >> { %18576 = vmatpush3.bf16.msra.mxu0 %v22415_v48  ;;  %v22445_v6 = vpack.c.bf16 %v10228_v40, %v10227_v29  ;;  %v13723_v36 = vld [vmem:[%s22933_s11 + $0x48] sm:$0xff]  ;;  %s22454_s30 = scalar_lea.vmem [#allocation6], %s12330_s21  ;;  %v13732_v14 = vld [vmem:[%s22933_s11 + $0x60] sm:$0xff]  ;;  %v13724_v61 = vld [vmem:[%s22933_s11 + $0x50] sm:$0xff] }
 0x824   : >> { %18582 = vmatpush3.bf16.msra.mxu1 %v22427_v43  ;;  %18577 = vmatprep.subr.bf16.mxu0 %v19169_v1  ;;  %v13733_v27 = vld [vmem:[%s22933_s11 + $0x68] sm:$0xff]  ;;  %v22465_v30 = vpack.c.bf16 %v13723_v36, %v13722_v55  ;;  %v13725_v32 = vld [vmem:[%s22933_s11 + $0x58] sm:$0xff]  ;;  %v13734_v41 = vld [vmem:[%s22933_s11 + $0x70] sm:$0xff] }
 0x825   : >> { %18583 = vmatprep.subr.bf16.mxu1 %v19169_v1  ;;  %v22471_v15 = vpack.c.bf16 %v13733_v27, %v13732_v14  ;;  %v13735_v0 = vld [vmem:[%s22933_s11 + $0x78] sm:$0xff]  ;;  %v22494_v20 = vpack.c.bf16 %v13725_v32, %v13724_v61  ;;  %v13742_v21 = vld [vmem:[%s22933_s11 + $0x80] sm:$0xff]  ;;  %v13743_v16 = vld [vmem:[%s22933_s11 + $0x88] sm:$0xff] }
 0x826   : >> { %v13703_v37 = vld [vmem:[%s22454_s30 + $0x3] sm:$0xff]  ;;  %v13707_v54 = vld [vmem:[%s22454_s30 + $0xc] sm:$0xff]  ;;  %v22499_v39 = vpack.c.bf16 %v13735_v0, %v13734_v41  ;;  %v13708_v12 = vld [vmem:[%s22454_s30 + $0x14] sm:$0xf]  ;;  %v22532_v49 = vpack.c.bf16 %v13743_v16, %v13742_v21 }
 0x827   : >> { %18579 = vmatpush3.bf16.msra.mxu0 %v22441_v51  ;;  %v13706_v22 = vld [vmem:[%s22454_s30 + $0x4] sm:$0xff]  ;;  %v10222_v35 = vsel %vm538_vm2, 0.0, %v13703_v37  ;;  %v13705_v47 = vld [vmem:[%s22454_s30 + $0x13] sm:$0xf]  ;;  %v13729_v25 = vld [vmem:[%s22454_s30 + $0x17] sm:$0xff] }
 0x828   : >> { %18585 = vmatpush3.bf16.msra.mxu1 %v22445_v6  ;;  %18586 = vmatprep.subr.bf16.mxu0 %v19169_v1  ;;  %v13704_v34 = vld [vmem:[%s22454_s30 + $0xb] sm:$0xff]  ;;  %v13752_v13 = vld [vmem:[%s22933_s11 + $0xa0] sm:$0xff]  ;;  %v22538_v38 = vsel %vm538_vm2, 0.0, %v13729_v25  ;;  %v13745_v8 = vld [vmem:[%s22933_s11 + $0x98] sm:$0xff] }
 0x829   : >> { %18592 = vmatprep.subr.bf16.mxu1 %v19169_v1  ;;  %v13753_v50 = vld [vmem:[%s22933_s11 + $0xa8] sm:$0xff]  ;;  %v13744_v19 = vld [vmem:[%s22933_s11 + $0x90] sm:$0xff]  ;;  %v13755_v46 = vld [vmem:[%s22933_s11 + $0xb8] sm:$0xff] }
 0x82a   : >> { %17173 = vmatmul.mubr.msk.f32.vlgmr.msra.gmra.mrb[0].mxu0 %vm520_vm1, %v13706_v22  ;;  %v13719_v58 = vld [vmem:[%s22454_s30 + $0x5] sm:$0xff]  ;;  %v22540_v24 = vpack.c.bf16 %v13753_v50, %v13752_v13  ;;  %v13754_v23 = vld [vmem:[%s22933_s11 + $0xb0] sm:$0xff]  ;;  %v22565_v7 = vpack.c.bf16 %v13745_v8, %v13744_v19  ;;  %v22605_v18 = vld [vmem:[%s22454_s30 + $0x18] sm:$0xff] }
 0x82b   : >> { %17190 = vmatmul.mubr.msk.f32.vlgmr.msra.gmra.mrb[0].mxu1 %vm520_vm1, %v10222_v35  ;;  %18588 = vmatpush3.bf16.msra.mxu0 %v22465_v30  ;;  %v13720_v4 = vld [vmem:[%s22454_s30 + $0xd] sm:$0xff]  ;;  %v22563_v31 = vld [vmem:[%s22454_s30 + $0x1f] sm:$0xff]  ;;  %v13721_v52 = vld [vmem:[%s22454_s30 + $0x15] sm:$0xf]  ;;  %v22571_v10 = vpack.c.bf16 %v13755_v46, %v13754_v23 }
 0x82c   : >> { %17175 = vmatprep.mubr.msk.f32.mxu0 %vm19170_vm10, %v19171_v60  ;;  %18594 = vmatpush3.bf16.msra.mxu1 %v22471_v15  ;;  %v10430_v57 = vsel %vm10202_vm9, 0.0, %v13721_v52  ;;  %v13731_v53 = vld [vmem:[%s22454_s30 + $0x27] sm:$0xf]  ;;  %v22612_v42 = vld [vmem:[%s22454_s30 + $0x19] sm:$0xff]  ;;  %v13764_v59 = vld [vmem:[%s22933_s11 + $0xd0] sm:$0xff] }
 0x82d   : >> { %17192 = vmatprep.mubr.msk.f32.mxu1 %vm19170_vm10, %v19171_v60  ;;  %18589 = vmatprep.subr.bf16.mxu0 %v19169_v1  ;;  %v13762_v63 = vld [vmem:[%s22933_s11 + $0xc0] sm:$0xff]  ;;  %v13763_v45 = vld [vmem:[%s22933_s11 + $0xc8] sm:$0xff]  ;;  %v13765_v5 = vld [vmem:[%s22933_s11 + $0xd8] sm:$0xff] }
 0x82e   : >> { %17176 = vmatmul.mubr.msk.f32.gmra.mrb[2].mxu0 %vm520_vm1, %v13707_v54  ;;  %18595 = vmatprep.subr.bf16.mxu1 %v19169_v1  ;;  %v13772_v62 = vld [vmem:[%s22933_s11 + $0xe0] sm:$0xff]  ;;  %v13773_v26 = vld [vmem:[%s22933_s11 + $0xe8] sm:$0xff]  ;;  %v22607_v17 = vpack.c.bf16 %v13763_v45, %v13762_v63  ;;  %v13774_v11 = vld [vmem:[%s22933_s11 + $0xf0] sm:$0xff]  ;;  %v22642_v29 = vpack.c.bf16 %v13765_v5, %v13764_v59 }
 0x82f   : >> { %17193 = vmatmul.mubr.msk.f32.gmra.mrb[2].mxu1 %vm520_vm1, %v13704_v34  ;;  %17178 = vmatprep.mubr.msk.f32.mxu0 %vm19170_vm10, %v19171_v60  ;;  %v22614_v28 = vpack.c.bf16 %v13773_v26, %v13772_v62  ;;  %v13775_v56 = vld [vmem:[%s22933_s11 + $0xf8] sm:$0xff]  ;;  %v22634_v9 = vld [vmem:[%s22454_s30 + $0x20] sm:$0xff]  ;;  %v13751_v55 = vld [vmem:[%s22454_s30 + $0x29] sm:$0xf] }
 0x830   : >> { %18591 = vmatpush3.bf16.msra.mxu0 %v22494_v20  ;;  %17195 = vmatprep.mubr.msk.f32.mxu1 %vm19170_vm10, %v19171_v60  ;;  %v22640_v33 = vld [vmem:[%s22454_s30 + $0x21] sm:$0xff]  ;;  %v22647_v40 = vpack.c.bf16 %v13775_v56, %v13774_v11  ;;  %v10742_v37 = vsel %vm10202_vm9, 0.0, %v13751_v55  ;;  %v13759_v14 = vld [vmem:[%s22454_s30 + $0x2b] sm:$0xff]  ;;  %v13785_v0 = vld [vmem:[%s22933_s11 + $0x118] sm:$0xff] }
 0x831   : >> { %18597 = vmatpush3.bf16.msra.mxu1 %v22499_v39  ;;  %18598 = vmatprep.subr.bf16.mxu0 %v19169_v1  ;;  %v13741_v36 = vld [vmem:[%s22454_s30 + $0x28] sm:$0xf]  ;;  %v13782_v27 = vld [vmem:[%s22933_s11 + $0x100] sm:$0xff]  ;;  %v22679_v35 = vsel %vm538_vm2, 0.0, %v13759_v14  ;;  %v22686_v32 = vld [vmem:[%s22454_s30 + $0x2c] sm:$0xff] }
 0x832   : >> { %17179 = vmatmul.mubr.msk.f32.gmra.mrb[4].mxu0 %vm520_vm1, %v13708_v12  ;;  %18604 = vmatprep.subr.bf16.mxu1 %v19169_v1  ;;  %v13783_v22 = vld [vmem:[%s22933_s11 + $0x108] sm:$0xff]  ;;  %v13784_v41 = vld [vmem:[%s22933_s11 + $0x110] sm:$0xff]  ;;  %v13781_v16 = vld [vmem:[%s22454_s30 + $0x3d] sm:$0xf] }
 0x833   : >> { %17196 = vmatmul.mubr.msk.f32.gmra.mrb[4].mxu1 %vm520_vm1, %v13705_v47  ;;  %17206 = vmatprep.mubr.msk.f32.mxu0 %vm19170_vm10, %v19171_v60  ;;  %v22681_v61 = vpack.c.bf16 %v13783_v22, %v13782_v27  ;;  %v22700_v54 = vld [vmem:[%s22454_s30 + $0x33] sm:$0xff]  ;;  %v22708_v12 = vpack.c.bf16 %v13785_v0, %v13784_v41  ;;  %v13771_v47 = vld [vmem:[%s22454_s30 + $0x3c] sm:$0xf]  ;;  %v13856_v19 = vld [vmem:[%s22454_s30 + $0x41] sm:$0xff] }
 0x834   : >> { %17223 = vmatprep.mubr.msk.f32.mxu1 %vm19170_vm10, %v19171_v60  ;;  %v22706_v34 = vld [vmem:[%s22454_s30 + $0x34] sm:$0xff]  ;;  %v13826_v25 = vld [vmem:[%s22454_s30 + $0x3c] sm:$0xf]  ;;  %v13849_v8 = vld [vmem:[%s22454_s30 + $0x48] sm:$0xff] }
 0x835   : >> { %v22733_v21 = vld [vmem:[%s22454_s30 + $0x2d] sm:$0xff]  ;;  %v13840_v13 = vld [vmem:[%s22454_s30 + $0x3f] sm:$0xff] }
 0x836   : >> { %17207 = vmatmul.mubr.msk.f32.vlgmr.msra.gmra.mrb[6].mxu0 %vm520_vm1, %v13719_v58  ;;  %v11760_v50 = vsel %vm538_vm2, 0.0, %v13840_v13  ;;  %v13841_v58 = vld [vmem:[%s22454_s30 + $0x47] sm:$0xff]  ;;  %v13858_v46 = vld [vmem:[%s22454_s30 + $0x51] sm:$0xf] }
 0x837   : >> { %18600 = vmatpush3.bf16.msra.mxu0 %v22532_v49  ;;  %17224 = vmatmul.mubr.msk.f32.vlgmr.msra.gmra.mrb[6].mxu1 %vm520_vm1, %v22538_v38  ;;  %v13857_v23 = vld [vmem:[%s22454_s30 + $0x49] sm:$0xff] }
 0x838   : >> { %17209 = vmatprep.mubr.msk.f32.mxu0 %vm19170_vm10, %v19171_v60  ;;  %18606 = vmatpush3.bf16.msra.mxu1 %v22540_v24 }
 0x839   : >> { %17226 = vmatprep.mubr.msk.f32.mxu1 %vm19170_vm10, %v19171_v60  ;;  %18601 = vmatprep.subr.bf16.mxu0 %v19169_v1 }
 0x83a   : >> { %17210 = vmatmul.mubr.msk.f32.gmra.mrb[8].mxu0 %vm520_vm1, %v13720_v4  ;;  %18607 = vmatprep.subr.bf16.mxu1 %v19169_v1  ;;  %v13850_v4 = vld [vmem:[%s22454_s30 + $0x50] sm:$0xf] }
 0x83b   : >> { %17227 = vmatmul.mubr.msk.f32.gmra.mrb[8].mxu1 %vm520_vm1, %v22563_v31  ;;  %17212 = vmatprep.mubr.msk.f32.mxu0 %vm19170_vm10, %v19171_v60 }
 0x83c   : >> { %18603 = vmatpush3.bf16.msra.mxu0 %v22565_v7  ;;  %17229 = vmatprep.mubr.msk.f32.mxu1 %vm19170_vm10, %v19171_v60 }
 0x83d   : >> { %18609 = vmatpush3.bf16.msra.mxu1 %v22571_v10  ;;  %18610 = vmatprep.subr.bf16.mxu0 %v19169_v1 }
 0x83e   : >> { %17213 = vmatmul.mubr.msk.f32.gmra.mrb[10].mxu0 %vm520_vm1, %v10430_v57  ;;  %18616 = vmatprep.subr.bf16.mxu1 %v19169_v1 }
 0x83f   : >> { %17230 = vmatmul.mubr.msk.f32.gmra.mrb[10].mxu1 %vm520_vm1, %v13731_v53  ;;  %17240 = vmatprep.mubr.msk.f32.mxu0 %vm19170_vm10, %v19171_v60 }
 0x840   : >> { %17257 = vmatprep.mubr.msk.f32.mxu1 %vm19170_vm10, %v19171_v60 }
 0x842   : >> { %17241 = vmatmul.mubr.msk.f32.vlgmr.msra.gmra.mrb[12].mxu0 %vm520_vm1, %v22605_v18 }
 0x843   : >> { %18612 = vmatpush3.bf16.msra.mxu0 %v22607_v17  ;;  %17258 = vmatmul.mubr.msk.f32.vlgmr.msra.gmra.mrb[12].mxu1 %vm520_vm1, %v22612_v42 }
 0x844   : >> { %17243 = vmatprep.mubr.msk.f32.mxu0 %vm19170_vm10, %v19171_v60  ;;  %18618 = vmatpush3.bf16.msra.mxu1 %v22614_v28 }
 0x845   : >> { %17260 = vmatprep.mubr.msk.f32.mxu1 %vm19170_vm10, %v19171_v60  ;;  %18613 = vmatprep.subr.bf16.mxu0 %v19169_v1 }
 0x846   : >> { %17244 = vmatmul.mubr.msk.f32.gmra.mrb[14].mxu0 %vm520_vm1, %v22634_v9  ;;  %18619 = vmatprep.subr.bf16.mxu1 %v19169_v1 }
 0x847   : >> { %17261 = vmatmul.mubr.msk.f32.gmra.mrb[14].mxu1 %vm520_vm1, %v22640_v33  ;;  %17246 = vmatprep.mubr.msk.f32.mxu0 %vm19170_vm10, %v19171_v60 }
 0x848   : >> { %18615 = vmatpush3.bf16.msra.mxu0 %v22642_v29  ;;  %17263 = vmatprep.mubr.msk.f32.mxu1 %vm19170_vm10, %v19171_v60 }
 0x849   : >> { %18621 = vmatpush3.bf16.msra.mxu1 %v22647_v40  ;;  %18622 = vmatprep.subr.bf16.mxu0 %v19169_v1 }
 0x84a   : >> { %17247 = vmatmul.mubr.msk.f32.gmra.mrb[16].mxu0 %vm520_vm1, %v13741_v36  ;;  %18628 = vmatprep.subr.bf16.mxu1 %v19169_v1 }
 0x84b   : >> { %17264 = vmatmul.mubr.msk.f32.gmra.mrb[16].mxu1 %vm520_vm1, %v10742_v37  ;;  %17274 = vmatprep.mubr.msk.f32.mxu0 %vm19170_vm10, %v19171_v60 }
 0x84c   : >> { %17291 = vmatprep.mubr.msk.f32.mxu1 %vm19170_vm10, %v19171_v60 }
 0x84e   : >> { %17275 = vmatmul.mubr.msk.f32.vlgmr.msra.gmra.mrb[18].mxu0 %vm520_vm1, %v22679_v35 }
 0x84f   : >> { %18624 = vmatpush3.bf16.msra.mxu0 %v22681_v61  ;;  %17292 = vmatmul.mubr.msk.f32.vlgmr.msra.gmra.mrb[18].mxu1 %vm520_vm1, %v22686_v32 }
 0x850   : >> { %17277 = vmatprep.mubr.msk.f32.mxu0 %vm19170_vm10, %v19171_v60  ;;  %18630 = vmatpush3.bf16.msra.mxu1 %v22415_v48  ;;  %v13761_v48 = vld [vmem:[%s22454_s30 + $0x3b] sm:$0xf] }
 0x851   : >> { %17294 = vmatprep.mubr.msk.f32.mxu1 %vm19170_vm10, %v19171_v60  ;;  %18625 = vmatprep.subr.bf16.mxu0 %v19169_v1 }
 0x852   : >> { %17278 = vmatmul.mubr.msk.f32.gmra.mrb[20].mxu0 %vm520_vm1, %v22700_v54  ;;  %18631 = vmatprep.subr.bf16.mxu1 %v19169_v1 }
 0x853   : >> { %17295 = vmatmul.mubr.msk.f32.gmra.mrb[20].mxu1 %vm520_vm1, %v22706_v34  ;;  %17280 = vmatprep.mubr.msk.f32.mxu0 %vm19170_vm10, %v19171_v60 }
 0x854   : >> { %18627 = vmatpush3.bf16.msra.mxu0 %v22708_v12  ;;  %17297 = vmatprep.mubr.msk.f32.mxu1 %vm19170_vm10, %v19171_v60 }
 0x855   : >> { %18633 = vmatpush3.bf16.msra.mxu1 %v22441_v51  ;;  %18634 = vmatprep.subr.bf16.mxu0 %v19169_v1  ;;  %v22743_v51 = vld [vmem:[%s22454_s30 + $0x35] sm:$0xff] }
 0x856   : >> { %17281 = vmatmul.mubr.msk.f32.gmra.mrb[22].mxu0 %vm520_vm1, %v13761_v48  ;;  %18640 = vmatprep.subr.bf16.mxu1 %v19169_v1 }
 0x857   : >> { %17298 = vmatmul.mubr.msk.f32.gmra.mrb[22].mxu1 %vm520_vm1, %v13771_v47  ;;  %17308 = vmatprep.mubr.msk.f32.mxu0 %vm19170_vm10, %v19171_v60 }
 0x858   : >> { %17325 = vmatprep.mubr.msk.f32.mxu1 %vm19170_vm10, %v19171_v60 }
 0x85a   : >> { %17309 = vmatmul.mubr.msk.f32.vlgmr.msra.gmra.mrb[24].mxu0 %vm520_vm1, %v22733_v21 }
 0x85b   : >> { %18636 = vmatpush3.bf16.msra.mxu0 %v22427_v43  ;;  %17326 = vmatmul.mubr.msk.f32.vlgmr.msra.gmra.mrb[24].mxu1 %vm520_vm1, %v22605_v18  ;;  %v11054_v43 = vsel %vm10202_vm9, 0.0, %v13781_v16 }
 0x85c   : >> { %17311 = vmatprep.mubr.msk.f32.mxu0 %vm19170_vm10, %v19171_v60  ;;  %18642 = vmatpush3.bf16.msra.mxu1 %v22465_v30  ;;  %v13799_v30 = vld [vmem:[%s22454_s30 + $0x28] sm:$0xf] }
 0x85d   : >> { %17328 = vmatprep.mubr.msk.f32.mxu1 %vm19170_vm10, %v19171_v60  ;;  %18637 = vmatprep.subr.bf16.mxu0 %v19169_v1 }
 0x85e   : >> { %17312 = vmatmul.mubr.msk.f32.gmra.mrb[26].mxu0 %vm520_vm1, %v22743_v51  ;;  %18643 = vmatprep.subr.bf16.mxu1 %v19169_v1 }
 0x85f   : >> { %17329 = vmatmul.mubr.msk.f32.gmra.mrb[26].mxu1 %vm520_vm1, %v22634_v9  ;;  %17314 = vmatprep.mubr.msk.f32.mxu0 %vm19170_vm10, %v19171_v60 }
 0x860   : >> { %18639 = vmatpush3.bf16.msra.mxu0 %v22445_v6  ;;  %17331 = vmatprep.mubr.msk.f32.mxu1 %vm19170_vm10, %v19171_v60  ;;  %v13810_v6 = vld [vmem:[%s22454_s30 + $0x29] sm:$0xf] }
 0x861   : >> { %18645 = vmatpush3.bf16.msra.mxu1 %v22494_v20  ;;  %18646 = vmatprep.subr.bf16.mxu0 %v19169_v1  ;;  %v11365_v20 = vsel %vm10202_vm9, 0.0, %v13810_v6 }
 0x862   : >> { %17315 = vmatmul.mubr.msk.f32.gmra.mrb[28].mxu0 %vm520_vm1, %v11054_v43  ;;  %18652 = vmatprep.subr.bf16.mxu1 %v19169_v1 }
 0x863   : >> { %17332 = vmatmul.mubr.msk.f32.gmra.mrb[28].mxu1 %vm520_vm1, %v13799_v30  ;;  %17342 = vmatprep.mubr.msk.f32.mxu0 %vm19170_vm10, %v19171_v60 }
 0x864   : >> { %17359 = vmatprep.mubr.msk.f32.mxu1 %vm19170_vm10, %v19171_v60 }
 0x866   : >> { %17343 = vmatmul.mubr.msk.f32.vlgmr.msra.gmra.mrb[30].mxu0 %vm520_vm1, %v22538_v38 }
 0x867   : >> { %18648 = vmatpush3.bf16.msra.mxu0 %v22471_v15  ;;  %17360 = vmatmul.mubr.msk.f32.vlgmr.msra.gmra.mrb[30].mxu1 %vm520_vm1, %v22612_v42  ;;  %v13794_v15 = vld [vmem:[%s22454_s30 + $0x27] sm:$0xf] }
 0x868   : >> { %17345 = vmatprep.mubr.msk.f32.mxu0 %vm19170_vm10, %v19171_v60  ;;  %18654 = vmatpush3.bf16.msra.mxu1 %v22532_v49  ;;  %v13834_v49 = vld [vmem:[%s22454_s30 + $0x3d] sm:$0xf] }
 0x869   : >> { %17362 = vmatprep.mubr.msk.f32.mxu1 %vm19170_vm10, %v19171_v60  ;;  %18649 = vmatprep.subr.bf16.mxu0 %v19169_v1  ;;  %v11662_v38 = vsel %vm10202_vm9, 0.0, %v13834_v49 }
 0x86a   : >> { %17346 = vmatmul.mubr.msk.f32.gmra.mrb[32].mxu0 %vm520_vm1, %v22563_v31  ;;  %18655 = vmatprep.subr.bf16.mxu1 %v19169_v1  ;;  %v11959_v31 = vsel %vm10202_vm9, 0.0, %v13858_v46 }
 0x86b   : >> { %17363 = vmatmul.mubr.msk.f32.gmra.mrb[32].mxu1 %vm520_vm1, %v22640_v33  ;;  %17348 = vmatprep.mubr.msk.f32.mxu0 %vm19170_vm10, %v19171_v60 }
 0x86c   : >> { %18651 = vmatpush3.bf16.msra.mxu0 %v22499_v39  ;;  %17365 = vmatprep.mubr.msk.f32.mxu1 %vm19170_vm10, %v19171_v60  ;;  %v13818_v39 = vld [vmem:[%s22454_s30 + $0x3b] sm:$0xf] }
 0x86d   : >> { %18657 = vmatpush3.bf16.msra.mxu1 %v22565_v7  ;;  %18658 = vmatprep.subr.bf16.mxu0 %v19169_v1 }
 0x86e   : >> { %17349 = vmatmul.mubr.msk.f32.gmra.mrb[34].mxu0 %vm520_vm1, %v13794_v15  ;;  %18664 = vmatprep.subr.bf16.mxu1 %v19169_v1 }
 0x86f   : >> { %17366 = vmatmul.mubr.msk.f32.gmra.mrb[34].mxu1 %vm520_vm1, %v11365_v20  ;;  %17376 = vmatprep.mubr.msk.f32.mxu0 %vm19170_vm10, %v19171_v60 }
 0x870   : >> { %17393 = vmatprep.mubr.msk.f32.mxu1 %vm19170_vm10, %v19171_v60 }
 0x872   : >> { %17377 = vmatmul.mubr.msk.f32.vlgmr.msra.gmra.mrb[36].mxu0 %vm520_vm1, %v22679_v35 }
 0x873   : >> { %18660 = vmatpush3.bf16.msra.mxu0 %v22540_v24  ;;  %17394 = vmatmul.mubr.msk.f32.vlgmr.msra.gmra.mrb[36].mxu1 %vm520_vm1, %v22686_v32  ;;  %v13842_v24 = vld [vmem:[%s22454_s30 + $0x4f] sm:$0xf] }
 0x874   : >> { %17379 = vmatprep.mubr.msk.f32.mxu0 %vm19170_vm10, %v19171_v60  ;;  %18666 = vmatpush3.bf16.msra.mxu1 %v22607_v17 }
 0x875   : >> { %17396 = vmatprep.mubr.msk.f32.mxu1 %vm19170_vm10, %v19171_v60  ;;  %18661 = vmatprep.subr.bf16.mxu0 %v19169_v1 }
 0x876   : >> { %17380 = vmatmul.mubr.msk.f32.gmra.mrb[38].mxu0 %vm520_vm1, %v22700_v54  ;;  %18667 = vmatprep.subr.bf16.mxu1 %v19169_v1 }
 0x877   : >> { %17397 = vmatmul.mubr.msk.f32.gmra.mrb[38].mxu1 %vm520_vm1, %v22706_v34  ;;  %17382 = vmatprep.mubr.msk.f32.mxu0 %vm19170_vm10, %v19171_v60 }
 0x878   : >> { %18663 = vmatpush3.bf16.msra.mxu0 %v22571_v10  ;;  %17399 = vmatprep.mubr.msk.f32.mxu1 %vm19170_vm10, %v19171_v60 }
 0x879   : >> { %18669 = vmatpush3.bf16.msra.mxu1 %v22642_v29  ;;  %18670 = vmatprep.subr.bf16.mxu0 %v19169_v1 }
 0x87a   : >> { %17383 = vmatmul.mubr.msk.f32.gmra.mrb[40].mxu0 %vm520_vm1, %v13818_v39  ;;  %18676 = vmatprep.subr.bf16.mxu1 %v19169_v1 }
 0x87b   : >> { %17400 = vmatmul.mubr.msk.f32.gmra.mrb[40].mxu1 %vm520_vm1, %v13826_v25  ;;  %17410 = vmatprep.mubr.msk.f32.mxu0 %vm19170_vm10, %v19171_v60 }
 0x87c   : >> { %17427 = vmatprep.mubr.msk.f32.mxu1 %vm19170_vm10, %v19171_v60 }
 0x87e   : >> { %17411 = vmatmul.mubr.msk.f32.vlgmr.msra.gmra.mrb[42].mxu0 %vm520_vm1, %v22733_v21 }
 0x87f   : >> { %18672 = vmatpush3.bf16.msra.mxu0 %v22614_v28  ;;  %17428 = vmatmul.mubr.msk.f32.vlgmr.msra.gmra.mrb[42].mxu1 %vm520_vm1, %v11760_v50 }
 0x880   : >> { %17413 = vmatprep.mubr.msk.f32.mxu0 %vm19170_vm10, %v19171_v60  ;;  %18678 = vmatpush3.bf16.msra.mxu1 %v22681_v61 }
 0x881   : >> { %17430 = vmatprep.mubr.msk.f32.mxu1 %vm19170_vm10, %v19171_v60  ;;  %18673 = vmatprep.subr.bf16.mxu0 %v19169_v1 }
 0x882   : >> { %17414 = vmatmul.mubr.msk.f32.gmra.mrb[44].mxu0 %vm520_vm1, %v22743_v51  ;;  %18679 = vmatprep.subr.bf16.mxu1 %v19169_v1  ;;  %v13848_v1 = vld [vmem:[%s22454_s30 + $0x40] sm:$0xff]  ;;  %s12073_s30 = smul.u32 10, %s19162_s16  ;;  %s10209_s16 = sadd.s32 1, %s19162_s16  }
 0x883   : >> { %17431 = vmatmul.mubr.msk.f32.gmra.mrb[44].mxu1 %vm520_vm1, %v13841_v58  ;;  %17416 = vmatprep.mubr.msk.f32.mxu0 %vm19170_vm10, %v19171_v60  ;;  %p10206_p9 = scmp.ge.s32.totalorder %s10209_s16, 8  }
 0x884   : >> { %18675 = vmatpush3.bf16.msra.mxu0 %v22647_v40  ;;  %17433 = vmatprep.mubr.msk.f32.mxu1 %vm19170_vm10, %v19171_v60  ;;  %s12076_s17 = scalar_lea.vmem %s19410_s20, %s12073_s30 }
 0x885   : >> { %18681 = vmatpush3.bf16.msra.mxu1 %v22708_v12 }
 0x886   : >> { %17417 = vmatmul.mubr.msk.f32.gmra.mrb[46].mxu0 %vm520_vm1, %v11662_v38 }
 0x887   : >> { %17434 = vmatmul.mubr.msk.f32.gmra.mrb[46].mxu1 %vm520_vm1, %v13842_v24  ;;  %17444 = vmatprep.mubr.msk.f32.mxu0 %vm19170_vm10, %v19171_v60 }
 0x888   : >> { %17461 = vmatprep.mubr.msk.f32.mxu1 %vm19170_vm10, %v19171_v60 }
 0x88a   : >> { %17445 = vmatmul.mubr.msk.f32.vlgmr.msra.gmra.mrb[48].mxu0 %vm520_vm1, %v13848_v1 }
 0x88b   : >> { %17462 = vmatmul.mubr.msk.f32.vlgmr.msra.gmra.mrb[48].mxu1 %vm520_vm1, %v13856_v19  ;;  %17447 = vmatprep.mubr.msk.f32.mxu0 %vm19170_vm10, %v19171_v60 }
 0x88c   : >> { %17464 = vmatprep.mubr.msk.f32.mxu1 %vm19170_vm10, %v19171_v60 }
 0x88e   : >> { %17448 = vmatmul.mubr.msk.f32.gmra.mrb[50].mxu0 %vm520_vm1, %v13849_v8 }
 0x88f   : >> { %17465 = vmatmul.mubr.msk.f32.gmra.mrb[50].mxu1 %vm520_vm1, %v13857_v23  ;;  %17450 = vmatprep.mubr.msk.f32.mxu0 %vm19170_vm10, %v19171_v60 }
 0x890   : >> { %17467 = vmatprep.mubr.msk.f32.mxu1 %vm19170_vm10, %v19171_v60 }
 0x892   : >> { %17451 = vmatmul.mubr.msk.f32.gmra.mrb[52].mxu0 %vm520_vm1, %v13850_v4 }
 0x893   : >> { %17468 = vmatmul.mubr.msk.f32.gmra.mrb[52].mxu1 %vm520_vm1, %v11959_v31 }
 0x8fd   : >> { %v10314_v7 = vpop.f32.mrb[0].mxu0 }
 0x8fe   : >> { %v17174_v52 = vpop.f32.mrb[1].mxu0  ;;  %v10403_v10 = vpop.f32.mrb[0].mxu1 }
 0x8ff   : >> { %v10404_v57 = vadd.f32 %v10403_v10, %v10314_v7  ;;  %v17191_v53 = vpop.f32.mrb[1].mxu1 }
 0x901   : >> { %v10319_v63 = vpop.f32.mrb[2].mxu0 }
 0x902   : >> { %v17177_v45 = vpop.f32.mrb[3].mxu0  ;;  %v10408_v62 = vpop.f32.mrb[2].mxu1 }
 0x903   : >> { %v10409_v26 = vadd.f32 %v10408_v62, %v10319_v63  ;;  %v17194_v18 = vpop.f32.mrb[3].mxu1 }
 0x905   : >> { %v10324_v17 = vpop.f32.mrb[4].mxu0 }
 0x906   : >> { %v17180_v42 = vpop.f32.mrb[5].mxu0  ;;  %v10413_v60 = vpop.f32.mrb[4].mxu1 }
 0x907   : >> { %v10414_v28 = vadd.f32 %v10413_v60, %v10324_v17  ;;  %v17197_v44 = vpop.f32.mrb[5].mxu1 }
 0x909   : >> { %v10511_v59 = vpop.f32.mrb[6].mxu0 }
 0x90a   : >> { %v10525_v5 = vadd.f32 %v10511_v59, %v10404_v57  ;;  %v17208_v11 = vpop.f32.mrb[7].mxu0  ;;  %v10616_v56 = vpop.f32.mrb[6].mxu1 }
 0x90b   : >> { %v17225_v9 = vpop.f32.mrb[7].mxu1 }
 0x90c   : >> { %v10630_v33 = vadd.f32 %v10616_v56, %v10525_v5 }
 0x90d   : >> { %v10516_v29 = vpop.f32.mrb[8].mxu0 }
 0x90e   : >> { %v10526_v40 = vadd.f32 %v10516_v29, %v10409_v26  ;;  %v17211_v55 = vpop.f32.mrb[9].mxu0  ;;  %v10621_v36 = vpop.f32.mrb[8].mxu1 }
 0x90f   : >> { %v17228_v37 = vpop.f32.mrb[9].mxu1 }
 0x910   : >> { %v10631_v14 = vadd.f32 %v10621_v36, %v10526_v40 }
 0x911   : >> { %v10521_v27 = vpop.f32.mrb[10].mxu0 }
 0x912   : >> { %v10527_v22 = vadd.f32 %v10521_v27, %v10414_v28  ;;  %v17214_v35 = vpop.f32.mrb[11].mxu0  ;;  %v10626_v61 = vpop.f32.mrb[10].mxu1 }
 0x913   : >> { %v17231_v32 = vpop.f32.mrb[11].mxu1 }
 0x914   : >> { %v10632_v41 = vadd.f32 %v10626_v61, %v10527_v22 }
 0x915   : >> { %v10718_v0 = vpop.f32.mrb[12].mxu0 }
 0x916   : >> { %v10732_v54 = vadd.f32 %v10718_v0, %v10630_v33  ;;  %v17242_v34 = vpop.f32.mrb[13].mxu0  ;;  %v10823_v12 = vpop.f32.mrb[12].mxu1 }
 0x917   : >> { %v17259_v48 = vpop.f32.mrb[13].mxu1 }
 0x918   : >> { %v10837_v47 = vadd.f32 %v10823_v12, %v10732_v54 }
 0x919   : >> { %v10723_v21 = vpop.f32.mrb[14].mxu0 }
 0x91a   : >> { %v10733_v51 = vadd.f32 %v10723_v21, %v10631_v14  ;;  %v17245_v16 = vpop.f32.mrb[15].mxu0  ;;  %v10828_v43 = vpop.f32.mrb[14].mxu1 }
 0x91b   : >> { %v17262_v30 = vpop.f32.mrb[15].mxu1 }
 0x91c   : >> { %v10838_v6 = vadd.f32 %v10828_v43, %v10733_v51 }
 0x91d   : >> { %v10728_v15 = vpop.f32.mrb[16].mxu0 }
 0x91e   : >> { %v10734_v20 = vadd.f32 %v10728_v15, %v10632_v41  ;;  %v17248_v39 = vpop.f32.mrb[17].mxu0  ;;  %v10833_v25 = vpop.f32.mrb[16].mxu1 }
 0x91f   : >> { %v17265_v13 = vpop.f32.mrb[17].mxu1 }
 0x920   : >> { %v10839_v50 = vadd.f32 %v10833_v25, %v10734_v20 }
 0x921   : >> { %v10928_v58 = vpop.f32.mrb[18].mxu0 }
 0x922   : >> { %v10942_v49 = vadd.f32 %v10928_v58, %v10837_v47  ;;  %v17276_v38 = vpop.f32.mrb[19].mxu0  ;;  %v11030_v24 = vpop.f32.mrb[18].mxu1 }
 0x923   : >> { %v17293_v1 = vpop.f32.mrb[19].mxu1 }
 0x924   : >> { %v11044_v19 = vadd.f32 %v11030_v24, %v10942_v49 }
 0x925   : >> { %v10933_v8 = vpop.f32.mrb[20].mxu0 }
 0x926   : >> { %v10943_v23 = vadd.f32 %v10933_v8, %v10838_v6  ;;  %v17279_v46 = vpop.f32.mrb[21].mxu0  ;;  %v11035_v4 = vpop.f32.mrb[20].mxu1 }
 0x927   : >> { %v17296_v31 = vpop.f32.mrb[21].mxu1 }
 0x928   : >> { %v11045_v7 = vadd.f32 %v11035_v4, %v10943_v23 }
 0x929   : >> { %v10938_v52 = vpop.f32.mrb[22].mxu0 }
 0x92a   : >> { %v10944_v10 = vadd.f32 %v10938_v52, %v10839_v50  ;;  %v17282_v57 = vpop.f32.mrb[23].mxu0  ;;  %v11040_v53 = vpop.f32.mrb[22].mxu1 }
 0x92b   : >> { %v17299_v63 = vpop.f32.mrb[23].mxu1 }
 0x92c   : >> { %v11046_v45 = vadd.f32 %v11040_v53, %v10944_v10 }
 0x92d   : >> { %v11135_v62 = vpop.f32.mrb[24].mxu0 }
 0x92e   : >> { %v22896_v26 = vadd.f32 %v11135_v62, %v11044_v19  ;;  %v17310_v18 = vpop.f32.mrb[25].mxu0  ;;  %v11255_v17 = vpop.f32.mrb[24].mxu1 }
 0x92f   : >> { %v17327_v42 = vpop.f32.mrb[25].mxu1 }
 0x931   : >> { %v11140_v60 = vpop.f32.mrb[26].mxu0 }
 0x932   : >> { %v22898_v28 = vadd.f32 %v11140_v60, %v11045_v7  ;;  %v17313_v44 = vpop.f32.mrb[27].mxu0  ;;  %v11260_v59 = vpop.f32.mrb[26].mxu1 }
 0x933   : >> { %v17330_v5 = vpop.f32.mrb[27].mxu1 }
 0x935   : >> { %v11145_v11 = vpop.f32.mrb[28].mxu0 }
 0x936   : >> { %v22900_v56 = vadd.f32 %v11145_v11, %v11046_v45  ;;  %v17316_v9 = vpop.f32.mrb[29].mxu0  ;;  %v11265_v33 = vpop.f32.mrb[28].mxu1 }
 0x937   : >> { %v17333_v29 = vpop.f32.mrb[29].mxu1 }
 0x939   : >> { %v11344_v40 = vpop.f32.mrb[30].mxu0 }
 0x93a   : >> { %v11345_v55 = vadd.f32 %v11344_v40, %v11255_v17  ;;  %v17344_v36 = vpop.f32.mrb[31].mxu0  ;;  %v11441_v37 = vpop.f32.mrb[30].mxu1  ;;  %v11158_v40 = vadd.f32 %v22398_v2, %v22896_v26 }
 0x93b   : >> { %v17361_v14 = vpop.f32.mrb[31].mxu1 }
 0x93c   : >> { %v11455_v27 = vadd.f32 %v11441_v37, %v11345_v55 }
 0x93d   : >> { %v11349_v22 = vpop.f32.mrb[32].mxu0 }
 0x93e   : >> { %v11350_v35 = vadd.f32 %v11349_v22, %v11260_v59  ;;  %v17347_v61 = vpop.f32.mrb[33].mxu0  ;;  %v11446_v32 = vpop.f32.mrb[32].mxu1 }
 0x93f   : >> { %v17364_v41 = vpop.f32.mrb[33].mxu1  ;;  %v11161_v61 = vmax.f32 %v11158_v40, 0.0 }
 0x940   : >> { %v11456_v0 = vadd.f32 %v11446_v32, %v11350_v35  ;;  %v11159_v32 = vadd.f32 %v22398_v2, %v22898_v28 }
 0x941   : >> { %v11354_v54 = vpop.f32.mrb[34].mxu0 }
 0x942   : >> { %v11355_v34 = vadd.f32 %v11354_v54, %v11265_v33  ;;  %v17350_v12 = vpop.f32.mrb[35].mxu0  ;;  %v11451_v48 = vpop.f32.mrb[34].mxu1 }
 0x943   : >> { %v17367_v47 = vpop.f32.mrb[35].mxu1 }
 0x944   : >> { %v11457_v21 = vadd.f32 %v11451_v48, %v11355_v34 }
 0x945   : >> { %v11541_v51 = vpop.f32.mrb[36].mxu0 }
 0x946   : >> { %v11555_v16 = vadd.f32 %v11541_v51, %v11455_v27  ;;  %v17378_v43 = vpop.f32.mrb[37].mxu0  ;;  %v11638_v30 = vpop.f32.mrb[36].mxu1  ;;  %v11162_v51 = vmax.f32 %v11159_v32, 0.0 }
 0x947   : >> { %v17395_v6 = vpop.f32.mrb[37].mxu1 }
 0x948   : >> { %v11652_v15 = vadd.f32 %v11638_v30, %v11555_v16  ;;  %v11160_v16 = vadd.f32 %v22398_v2, %v22900_v56 }
 0x949   : >> { %v11546_v20 = vpop.f32.mrb[38].mxu0 }
 0x94a   : >> { %v11556_v39 = vadd.f32 %v11546_v20, %v11456_v0  ;;  %v17381_v25 = vpop.f32.mrb[39].mxu0  ;;  %v11643_v13 = vpop.f32.mrb[38].mxu1 }
 0x94b   : >> { %v17398_v50 = vpop.f32.mrb[39].mxu1 }
 0x94c   : >> { %v11653_v58 = vadd.f32 %v11643_v13, %v11556_v39 }
 0x94d   : >> { %v11551_v49 = vpop.f32.mrb[40].mxu0 }
 0x94e   : >> { %v11557_v38 = vadd.f32 %v11551_v49, %v11457_v21  ;;  %v17384_v24 = vpop.f32.mrb[41].mxu0  ;;  %v11648_v1 = vpop.f32.mrb[40].mxu1 }
 0x94f   : >> { %v17401_v19 = vpop.f32.mrb[41].mxu1 }
 0x950   : >> { %v11654_v8 = vadd.f32 %v11648_v1, %v11557_v38 }
 0x951   : >> { %v11738_v23 = vpop.f32.mrb[42].mxu0 }
 0x952   : >> { %v11752_v46 = vadd.f32 %v11738_v23, %v11652_v15  ;;  %v17412_v4 = vpop.f32.mrb[43].mxu0  ;;  %v11838_v31 = vpop.f32.mrb[42].mxu1  ;;  %v11163_v15 = vmax.f32 %v11160_v16, 0.0 }
 0x953   : >> { %v17429_v7 = vpop.f32.mrb[43].mxu1 }
 0x954   : >> { %v11852_v52 = vadd.f32 %v11838_v31, %v11752_v46 }
 0x955   : >> { %v11743_v10 = vpop.f32.mrb[44].mxu0 }
 0x956   : >> { %v11753_v57 = vadd.f32 %v11743_v10, %v11653_v58  ;;  %v17415_v53 = vpop.f32.mrb[45].mxu0  ;;  %v11843_v63 = vpop.f32.mrb[44].mxu1 }
 0x957   : >> { %v17432_v45 = vpop.f32.mrb[45].mxu1 }
 0x958   : >> { %v11853_v62 = vadd.f32 %v11843_v63, %v11753_v57 }
 0x959   : >> { %v11748_v18 = vpop.f32.mrb[46].mxu0 }
 0x95a   : >> { %v11754_v17 = vadd.f32 %v11748_v18, %v11654_v8  ;;  %v17418_v42 = vpop.f32.mrb[47].mxu0  ;;  %v11848_v60 = vpop.f32.mrb[46].mxu1 }
 0x95b   : >> { %v17435_v44 = vpop.f32.mrb[47].mxu1 }
 0x95c   : >> { %v11854_v59 = vadd.f32 %v11848_v60, %v11754_v17 }
 0x95d   : >> { %v11935_v5 = vpop.f32.mrb[48].mxu0 }
 0x95e   : >> { %v11949_v11 = vadd.f32 %v11935_v5, %v11852_v52  ;;  %v17446_v9 = vpop.f32.mrb[49].mxu0  ;;  %v12035_v33 = vpop.f32.mrb[48].mxu1 }
 0x95f   : >> { %v17463_v29 = vpop.f32.mrb[49].mxu1 }
 0x960   : >> { %v12049_v55 = vadd.f32 %v12035_v33, %v11949_v11 }
 0x961   : >> { %v11940_v36 = vpop.f32.mrb[50].mxu0 }
 0x962   : >> { %v12052_v37 = vadd.f32 %v22398_v2, %v12049_v55  ;;  %v11950_v14 = vadd.f32 %v11940_v36, %v11853_v62  ;;  %v17449_v27 = vpop.f32.mrb[51].mxu0  ;;  %v12040_v22 = vpop.f32.mrb[50].mxu1 }
 0x963   : >> { %v17466_v35 = vpop.f32.mrb[51].mxu1 }
 0x964   : >> { %v12055_v41 = vmax.f32 %v12052_v37, 0.0  ;;  %v12050_v0 = vadd.f32 %v12040_v22, %v11950_v14 }
 0x965   : >> { %v11945_v54 = vpop.f32.mrb[52].mxu0 }
 0x966   : >> { %v12058_v34 = vmax.f32 %v11161_v61, %v12055_v41  ;;  %v12053_v12 = vadd.f32 %v22398_v2, %v12050_v0  ;;  %v11951_v48 = vadd.f32 %v11945_v54, %v11854_v59  ;;  %v17452_v26 = vpop.f32.mrb[53].mxu0  ;;  %v12045_v47 = vpop.f32.mrb[52].mxu1 }
 0x967   : >> { %v17469_v21 = vpop.f32.mrb[53].mxu1 }
 0x968   : >> { %12062 = vst.msk [vmem:[#allocation9] sm:$0xff] %vm616_vm3, %v12058_v34  ;;  %v12056_v43 = vmax.f32 %v12053_v12, 0.0  ;;  %v12051_v28 = vadd.f32 %v12045_v47, %v11951_v48 }
 0x96a   : >> { %v12059_v30 = vmax.f32 %v11162_v51, %v12056_v43  ;;  %v12054_v6 = vadd.f32 %v22398_v2, %v12051_v28 }
 0x96c   : >> { %12063 = vst.msk [vmem:[#allocation9 + $0x8] sm:$0xff] %vm616_vm3, %v12059_v30  ;;  %v12057_v20 = vmax.f32 %v12054_v6, 0.0 }
 0x96e   : >> { %v12060_v39 = vmax.f32 %v11163_v15, %v12057_v20 }
 0x970   : >> { %12065 = vst.msk [vmem:[#allocation9 + $0x10] sm:$0xf] %vm12064_vm11, %v12060_v39 }
 0x973   : >> { %v12066_v25 = vld [vmem:[#allocation9] ss:$2 sm:$0xff]  ;;  %v12070_v13 = vld [vmem:[#allocation9 + $0x1] ss:$2 sm:$0xff] }
 0x974   : >> { %v12074_v50 = vmax.f32 %v12066_v25, %v12070_v13  ;;  %10208 = sbr.rel (!%p10206_p9) target bundleno = 2080 (0x820), region = 339 }
 0x976   : >> { %12077 = vst.msk [vmem:[%s12076_s17] sm:$0xff] %vm616_vm3, %v12074_v50 }
 0x977   : >> { %v12068_v56 = vld [vmem:[#allocation9 + $0x10] ss:$2 sm:$0x3]  ;;  %v12072_v58 = vld [vmem:[#allocation9 + $0x11] ss:$2 sm:$0x3] }
 0x978   : >> { %v12075_v49 = vmax.f32 %v12068_v56, %v12072_v58 }
 0x97a   : >> { %12079 = vst.msk [vmem:[%s12076_s17 + $0x8] sm:$0x3] %vm12078_vm12, %v12075_v49 }
 0x97b PF: > { %s23_s25 = sadd.s32 1, %s19138_s25  }
 0x97c   : > { %p20_p10 = scmp.ge.s32.totalorder %s23_s25, 4  }
 0x97e   :  { %22 = sbr.rel (!%p20_p10) target bundleno = 1 (0x1), region = 350 }

</bundles_post_ra>
